<compile_context>
chip_gen: v5e
topology: v5e:2x2
jax: 0.10.0
libtpu: 0.0.40
codegen_flags: <defaults>
</compile_context>

<pallas_src>
import jax
import jax.numpy as jnp
from jax.experimental import pallas as pl
from jax.experimental.pallas import tpu as pltpu


# ----------------------------------------------------------------------------
# in-kernel helpers (operate on traced values)
# ----------------------------------------------------------------------------
def _relu(x):
    return jnp.maximum(x, 0.0)


def _leaky(x, alpha):
    return jnp.where(x > 0, x, alpha * x)


def _shift_right(x, shift):
    """Causal shift along axis=1: y[:, t] = x[:, t - shift] (zeros for t<shift)."""
    if shift == 0:
        return x
    b, length, c = x.shape
    return jnp.concatenate(
        [jnp.zeros((b, shift, c), x.dtype), x[:, :length - shift, :]], axis=1)


def _tcn_same(x, conv_w, conv_b, fin_w, fin_b):
    """Residual TCN: two same-width blocks (dil 1, 2) + final linear projection.

    x:(b,L,c)  conv_w:(4,ks,c,c)  conv_b:(4,c)  fin_w:(c,c)  fin_b:(1,c)
    Conv matmuls are done on the (b*L, c) flattened form (batch folded into M).
    """
    bsz, length, c = x.shape
    ks = conv_w.shape[1]

    def conv(inp, idx, dil):
        acc = None
        for q in range(ks):
            xq = _shift_right(inp, (ks - 1 - q) * dil).reshape(bsz * length, c)
            t = jnp.dot(xq, conv_w[idx, q], preferred_element_type=jnp.float32)
            acc = t if acc is None else acc + t
        return (acc + conv_b[idx:idx + 1]).reshape(bsz, length, c)

    h = x
    for blk, dil in enumerate((1, 2)):
        out = _relu(conv(h, 2 * blk, dil))
        out = _relu(conv(out, 2 * blk + 1, dil))
        h = _relu(out + h)                               # cin == cout: identity residual
    y = jnp.dot(h.reshape(bsz * length, c), fin_w,
                preferred_element_type=jnp.float32) + fin_b
    return y.reshape(bsz, length, c)


def _gat_attention(node_x, wmat, ab, bias, alpha):
    """GATv2-style attention. node_x:(b,N,F) wmat:(F,2E) ab:(2,E)=[b_lin;a] bias:(N,N)."""
    bsz, nn_, nf = node_x.shape
    e = ab.shape[1]
    flat = node_x.reshape(bsz * nn_, nf)                 # fold batch into M
    li = (jnp.dot(flat, wmat[:, :e], preferred_element_type=jnp.float32)
          + ab[0:1, :]).reshape(bsz, nn_, e)
    lj = jnp.dot(flat, wmat[:, e:],
                 preferred_element_type=jnp.float32).reshape(bsz, nn_, e)
    s = li[:, :, None, :] + lj[:, None, :, :]            # (b,N,N,E)
    s = jnp.where(s > 0, s, alpha * s)                   # LeakyReLU(alpha)
    sc = jnp.sum(s * ab[1:2, :], axis=-1) + bias         # VPU mul + lane reduce (no N=1 matmul)
    sc = sc - jnp.max(sc, axis=-1, keepdims=True)
    pe = jnp.exp(sc)
    return pe / jnp.sum(pe, axis=-1, keepdims=True)      # dropout = identity (eval)


# ----------------------------------------------------------------------------
# the single fused kernel
# ----------------------------------------------------------------------------
def _make_fused_kernel(treedef, alpha):
    n_leaves = treedef.num_leaves

    def kernel(*refs):
        x_ref, eps_ref = refs[0], refs[1]
        p = jax.tree_util.tree_unflatten(treedef, refs[2:2 + n_leaves])
        pred_ref, rec_ref = refs[2 + n_leaves], refs[3 + n_leaves]

        f32 = jnp.float32
        bsz, w, n_feat = x_ref.shape
        k = p["dimred_w"].shape[1]
        hid = p["gru_whh"].shape[0]
        fc_hid = p["fc1_w"].shape[1]
        out_dim = p["fc2_w"].shape[1]

        misc_b = p["misc_b"][...]                        # (4, >=32) packed biases

        # ---------------- dim_red: Linear(n->k) + LeakyReLU(0.01) ----------------
        x = x_ref[...]
        h = jnp.dot(x.reshape(bsz * w, n_feat), p["dimred_w"][...],
                    preferred_element_type=f32) + misc_b[3:4, :k]
        h = _leaky(h, 0.01).reshape(bsz, w, k)

        # ---------------- tcn1 ----------------
        tcn13_w = p["tcn13_w"][...]
        tcn13_cb = p["tcn13_cb"][...]
        tcn13_fw = p["tcn13_fw"][...]
        tcn13_fb = p["tcn13_fb"][...]
        x_enc = _tcn_same(h, tcn13_w[0:4], tcn13_cb[0:4],
                          tcn13_fw[0], tcn13_fb[0:1])    # (b, w, k)
        x_t = jnp.swapaxes(x_enc, 1, 2)                  # (b, k, w) in-kernel transpose

        # ---------------- feature / temporal GAT ----------------
        attn_f = _gat_attention(x_t, p["fgat_w"][...], p["fgat_ab"][...],
                                p["fgat_bias"][...], alpha)      # (b,k,k)
        attn_t = _gat_attention(x_enc, p["tgat_w"][...], p["tgat_ab"][...],
                                p["tgat_bias"][...], alpha)      # (b,w,w)
        # aggregation on the VPU (tiny K contraction -> broadcast mul + lane reduce)
        h_feat = jax.nn.sigmoid(
            jnp.sum(x_enc[:, :, None, :] * attn_f[:, None, :, :], axis=-1))  # (b,w,k)
        h_temp = jax.nn.sigmoid(
            jnp.sum(attn_t[:, :, None, :] * x_t[:, None, :, :], axis=-1))    # (b,w,k)

        # ---------------- GRU (1 layer, gate order r|z|n, all gates fused) -------
        gru_b = p["gru_b"][...]                          # (2, 3*hid) = [bih; bhh]
        gcat = jnp.concatenate([x_enc, h_feat, h_temp], axis=-1)   # (b, w, 3k)
        gi = (jnp.dot(gcat.reshape(bsz * w, 3 * k), p["gru_wih"][...],
                      preferred_element_type=f32)
              + gru_b[0:1, :]).reshape(bsz, w, 3 * hid)
        whh = p["gru_whh"][...]
        bhh = gru_b[1:2, :]
        hcur = jnp.zeros((bsz, hid), f32)
        for t in range(w):   # w is small & static; TODO(synk): fori_loop for w~100
            hh = jnp.dot(hcur, whh, preferred_element_type=f32) + bhh    # (b, 3*hid)
            gt = gi[:, t, :]
            rz = jax.nn.sigmoid(gt[:, :2 * hid] + hh[:, :2 * hid])       # fused r|z
            r, z = rz[:, :hid], rz[:, hid:]
            cand = jnp.tanh(gt[:, 2 * hid:] + r * hh[:, 2 * hid:])
            hcur = (1.0 - z) * cand + z * hcur                           # (b, hid)

        # ---------------- tcn2 over the GRU hidden state (cin = 1, VPU) ----------
        ts = p["tcn2_small"][...]                        # (10, ch2) packed small tensors
        t2w = p["tcn2_w"][...]                           # (3, ks, ch2, ch2)
        ch2 = ts.shape[1]
        h3 = jnp.swapaxes(hcur.reshape(bsz, 1, hid), 1, 2)   # (b, hid, 1)

        def conv1ch(inp, taps, bias, dil):               # cin=1: VPU broadcast taps
            acc = None
            for q in range(2):
                xq = _shift_right(inp, (1 - q) * dil)
                term = xq * taps[q:q + 1]                # (b,L,1)*(1,ch2)
                acc = term if acc is None else acc + term
            return acc + bias

        def convN(inp, wconv, bias, dil):                # ch2 -> ch2 channel mix
            acc = None
            for q in range(2):
                xq = _shift_right(inp, (1 - q) * dil).reshape(bsz * hid, ch2)
                term = jnp.dot(xq, wconv[q], preferred_element_type=f32)
                acc = term if acc is None else acc + term
            return (acc + bias).reshape(bsz, hid, ch2)

        o = _relu(conv1ch(h3, ts[0:2], ts[2:3], 1))
        o = _relu(convN(o, t2w[0], ts[3:4], 1))
        res = h3 * ts[6:7] + ts[7:8]                     # downsample 1->ch2 (VPU)
        h2 = _relu(o + res)
        o = _relu(convN(h2, t2w[1], ts[4:5], 2))
        o = _relu(convN(o, t2w[2], ts[5:6], 2))
        h2 = _relu(o + h2)
        # final ch2 -> 1: VPU multiply + lane reduce (no N=1 MXU matmul)
        h_for = jnp.sum(h2 * ts[8:9], axis=-1) + ts[9:10, 0:1]   # (b, hid)

        # ---------------- forecasting head (fc1 -> relu -> fc2) ----------------
        f1 = _relu(jnp.dot(h_for, p["fc1_w"][...], preferred_element_type=f32)
                   + misc_b[0:1, :fc_hid])
        pred = (jnp.dot(f1, p["fc2_w"][...], preferred_element_type=f32)
                + misc_b[1:2, :out_dim])
        pred_ref[...] = pred.astype(pred_ref.dtype)

        # ---------------- VAE reconstruction on x^T (flattened to 2D) ----------
        vb = p["vae_b"][...]                             # (4, vae_hid) packed biases
        he = _relu(jnp.dot(x_t.reshape(bsz * k, w), p["vae_enc_w"][...],
                           preferred_element_type=f32) + vb[0:1, :])
        ml = (jnp.dot(he, p["vae_ml_w"][...], preferred_element_type=f32)
              + vb[1:2, :2 * hid])                        # [mean | logvar]
        mean, logv = ml[:, :hid], ml[:, hid:]
        z_lat = mean + eps_ref[...].reshape(bsz * k, hid) * jnp.exp(0.5 * logv)
        hd = _relu(jnp.dot(z_lat, p["vae_dec1_w"][...],
                           preferred_element_type=f32) + vb[2:3, :])
        rec = jax.nn.sigmoid(jnp.dot(hd, p["vae_dec2_w"][...],
                                     preferred_element_type=f32) + vb[3:4, :w])
        rec = jnp.swapaxes(rec.reshape(bsz, k, w), 1, 2)  # (b, w, k)

        # ---------------- tcn3 + dim_up (reconstruction tail) ----------------
        rec = _tcn_same(rec, tcn13_w[4:8], tcn13_cb[4:8],
                        tcn13_fw[1], tcn13_fb[1:2])
        rec = (jnp.dot(rec.reshape(bsz * w, k), p["dimup_w"][...],
                       preferred_element_type=f32) + misc_b[2:3, :n_feat])
        rec = _leaky(rec, 0.01).reshape(bsz, w, n_feat)

        # lane-dense output: (b, w*n) so the HBM writeback is one dense store/row
        for t in range(w):
            rec_ref[:, t * n_feat:(t + 1) * n_feat] = rec[:, t, :].astype(rec_ref.dtype)

    return kernel


# ----------------------------------------------------------------------------
# host-side wrapper: ONE pallas_call, no grid, everything in VMEM
# ----------------------------------------------------------------------------
def mtad_gat_forward(params, x, eps, alpha=0.2):
    b, w, n = x.shape
    out_dim = params["fc2_w"].shape[1]
    leaves, treedef = jax.tree_util.tree_flatten(params)
    kernel = _make_fused_kernel(treedef, alpha)

    vmem = pl.BlockSpec(memory_space=pltpu.MemorySpace.VMEM)
    pred, rec_flat = pl.pallas_call(
        kernel,
        out_shape=(jax.ShapeDtypeStruct((b, out_dim), jnp.float32),
                   jax.ShapeDtypeStruct((b, w * n), jnp.float32)),
        in_specs=[vmem] * (2 + len(leaves)),
        out_specs=(vmem, vmem),
    )(x, eps, *leaves)

    recons = rec_flat.reshape(b, w, n)                   # free host-side relabel
    # use_KLD=False -> the reference forward zeroes mean / log_var
    return pred, recons, 0.0, 0.0


# ----------------------------------------------------------------------------
# deterministic synthetic parameters, packed for few DMA descriptors
# ----------------------------------------------------------------------------
def init_params(key, cfg):
    n, w, k = cfg["n_features"], cfg["window"], cfg["n_reduced"]
    hid, fc_hid = cfg["gru_hid"], cfg["fc_hid"]
    out_dim, vh = cfg["out_dim"], cfg["vae_hid"]
    ch2, ks = 10, 2
    e_f, e_t = 2 * w, 2 * k          # GATv2 embed dims (2 x node-feature dim)

    keys = jax.random.split(key, 40)
    it = iter(keys)

    def rnd(shape, scale=0.1):
        return scale * jax.random.normal(next(it), shape, jnp.float32)

    # packed bias rows: 0=fc1_b, 1=fc2_b, 2=dim_up_b, 3=dim_red_b
    mwidth = max(fc_hid, out_dim, n, k)
    misc_b = jnp.zeros((4, mwidth), jnp.float32)
    misc_b = misc_b.at[0, :fc_hid].set(rnd((fc_hid,)))
    misc_b = misc_b.at[1, :out_dim].set(rnd((out_dim,)))
    misc_b = misc_b.at[2, :n].set(rnd((n,)))
    misc_b = misc_b.at[3, :k].set(rnd((k,)))

    # packed VAE bias rows: 0=enc_b, 1=[mean|logvar]_b, 2=dec1_b, 3=dec2_b
    vae_b = jnp.zeros((4, vh), jnp.float32)
    vae_b = vae_b.at[0, :].set(rnd((vh,)))
    vae_b = vae_b.at[1, :2 * hid].set(rnd((2 * hid,)))
    vae_b = vae_b.at[2, :].set(rnd((vh,)))
    vae_b = vae_b.at[3, :w].set(rnd((w,)))

    # tcn2 small tensors: rows 0-1 cin=1 taps, 2-5 conv biases,
    # 6 downsample weight, 7 downsample bias, 8 final(10->1) weight, 9[0] final bias
    tcn2_small = jnp.zeros((10, ch2), jnp.float32)
    tcn2_small = tcn2_small.at[0:2, :].set(rnd((ks, ch2)))
    tcn2_small = tcn2_small.at[2:6, :].set(rnd((4, ch2)))
    tcn2_small = tcn2_small.at[6, :].set(rnd((ch2,)))
    tcn2_small = tcn2_small.at[7, :].set(rnd((ch2,)))
    tcn2_small = tcn2_small.at[8, :].set(rnd((ch2,)))
    tcn2_small = tcn2_small.at[9, 0:1].set(rnd((1,)))

    return {
        "dimred_w": rnd((n, k)),
        "misc_b": misc_b,
        # tcn1 (convs 0-3) and tcn3 (convs 4-7) stacked: [b0.c1, b0.c2, b1.c1, b1.c2]
        "tcn13_w": rnd((8, ks, k, k)),
        "tcn13_cb": rnd((8, k)),
        "tcn13_fw": rnd((2, k, k)),
        "tcn13_fb": rnd((2, k)),
        # feature-GAT (nodes=features, node-feat dim = window)
        "fgat_w": rnd((w, 2 * e_f)),        # [w1 | w2]
        "fgat_ab": rnd((2, e_f)),           # [b_lin ; a]
        "fgat_bias": rnd((k, k)),
        # temporal-GAT (nodes=time steps, node-feat dim = k)
        "tgat_w": rnd((k, 2 * e_t)),
        "tgat_ab": rnd((2, e_t)),
        "tgat_bias": rnd((w, w)),
        # GRU: gates packed r|z|n along columns
        "gru_wih": rnd((3 * k, 3 * hid)),
        "gru_whh": rnd((hid, 3 * hid)),
        "gru_b": rnd((2, 3 * hid)),         # [bih ; bhh]
        # VAE (input_dim = window, hidden = vh, latent = gru_hid)
        "vae_enc_w": rnd((w, vh)),
        "vae_ml_w": rnd((vh, 2 * hid)),     # [mean | logvar]
        "vae_dec1_w": rnd((hid, vh)),
        "vae_dec2_w": rnd((vh, w)),
        "vae_b": vae_b,
        # tcn2 channel-mixing convs: [b0.c2, b1.c1, b1.c2]
        "tcn2_w": rnd((3, ks, ch2, ch2)),
        "tcn2_small": tcn2_small,
        # heads
        "fc1_w": rnd((hid, fc_hid)),
        "fc2_w": rnd((fc_hid, out_dim)),
        "dimup_w": rnd((k, n)),
    }


# ----------------------------------------------------------------------------
if __name__ == "__main__":
    cfg = dict(n_features=16, window=8, n_reduced=4, out_dim=16,
               gru_hid=32, fc_hid=32, vae_hid=200)

    key = jax.random.PRNGKey(0)
    pkey, xkey, ekey = jax.random.split(key, 3)

    params = init_params(pkey, cfg)
    x = jax.random.normal(xkey, (2, cfg["window"], cfg["n_features"]), jnp.float32)
    # deterministic VAE reparameterization noise (replaces torch.randn_like)
    eps = jax.random.normal(ekey, (2, cfg["n_reduced"], cfg["gru_hid"]), jnp.float32)

    fwd = jax.jit(mtad_gat_forward)
    predictions, recons, mean, log_var = fwd(params, x, eps)
    jax.block_until_ready((predictions, recons))

    assert predictions.shape == (2, cfg["out_dim"])
    assert recons.shape == (2, cfg["window"], cfg["n_features"])
    assert bool(jnp.all(jnp.isfinite(predictions)))
    assert bool(jnp.all(jnp.isfinite(recons)))
    print("KERNEL_OK")
</pallas_src>

<mosaic_0001>
module attributes {stable_mosaic.version = 11 : i64} {
  func.func @kernel(%arg0: memref<2x8x16xf32, #tpu.memory_space<vmem>>, %arg1: memref<2x4x32xf32, #tpu.memory_space<vmem>>, %arg2: memref<16x4xf32, #tpu.memory_space<vmem>>, %arg3: memref<4x16xf32, #tpu.memory_space<vmem>>, %arg4: memref<32x32xf32, #tpu.memory_space<vmem>>, %arg5: memref<32x16xf32, #tpu.memory_space<vmem>>, %arg6: memref<2x16xf32, #tpu.memory_space<vmem>>, %arg7: memref<4x4xf32, #tpu.memory_space<vmem>>, %arg8: memref<8x32xf32, #tpu.memory_space<vmem>>, %arg9: memref<2x96xf32, #tpu.memory_space<vmem>>, %arg10: memref<32x96xf32, #tpu.memory_space<vmem>>, %arg11: memref<12x96xf32, #tpu.memory_space<vmem>>, %arg12: memref<4x32xf32, #tpu.memory_space<vmem>>, %arg13: memref<8x4xf32, #tpu.memory_space<vmem>>, %arg14: memref<2x4xf32, #tpu.memory_space<vmem>>, %arg15: memref<2x4x4xf32, #tpu.memory_space<vmem>>, %arg16: memref<8x2x4x4xf32, #tpu.memory_space<vmem>>, %arg17: memref<10x10xf32, #tpu.memory_space<vmem>>, %arg18: memref<3x2x10x10xf32, #tpu.memory_space<vmem>>, %arg19: memref<2x8xf32, #tpu.memory_space<vmem>>, %arg20: memref<8x8xf32, #tpu.memory_space<vmem>>, %arg21: memref<4x16xf32, #tpu.memory_space<vmem>>, %arg22: memref<4x200xf32, #tpu.memory_space<vmem>>, %arg23: memref<32x200xf32, #tpu.memory_space<vmem>>, %arg24: memref<200x8xf32, #tpu.memory_space<vmem>>, %arg25: memref<8x200xf32, #tpu.memory_space<vmem>>, %arg26: memref<200x64xf32, #tpu.memory_space<vmem>>, %arg27: memref<2x16xf32, #tpu.memory_space<vmem>>, %arg28: memref<2x128xf32, #tpu.memory_space<vmem>>) attributes {dimension_semantics = [], scalar_prefetch = 0 : i64, scratch_operands = 0 : i64, tpu.core_type = #tpu.core_type<tc>} {
    %c0 = arith.constant 0 : index
    %c0_0 = arith.constant 0 : index
    %0 = vector.load %arg12[%c0, %c0_0] : memref<4x32xf32, #tpu.memory_space<vmem>>, vector<4x32xf32>
    %c0_1 = arith.constant 0 : index
    %c0_2 = arith.constant 0 : index
    %c0_3 = arith.constant 0 : index
    %1 = vector.load %arg0[%c0_1, %c0_2, %c0_3] : memref<2x8x16xf32, #tpu.memory_space<vmem>>, vector<2x8x16xf32>
    %2 = vector.shape_cast %1 : vector<2x8x16xf32> to vector<16x16xf32>
    %c0_4 = arith.constant 0 : index
    %c0_5 = arith.constant 0 : index
    %3 = vector.load %arg2[%c0_4, %c0_5] : memref<16x4xf32, #tpu.memory_space<vmem>>, vector<16x4xf32>
    %cst = arith.constant dense<0.000000e+00> : vector<16x4xf32>
    %4 = tpu.matmul %2, %3, %cst {dimension_numbers = #tpu.dot_dimension_numbers<[1], [0], [0], [1], [0, 0, 1, 1], [], []>} : vector<16x16xf32>, vector<16x4xf32>, vector<16x4xf32> -> vector<16x4xf32>
    %5 = vector.extract_strided_slice %0 {offsets = [3, 0], sizes = [1, 4], strides = [1, 1]} : vector<4x32xf32> to vector<1x4xf32>
    %6 = vector.broadcast %5 : vector<1x4xf32> to vector<16x4xf32>
    %7 = arith.addf %4, %6 : vector<16x4xf32>
    %cst_6 = arith.constant 0.000000e+00 : f32
    %8 = vector.broadcast %cst_6 : f32 to vector<16x4xf32>
    %9 = arith.cmpf ogt, %7, %8 : vector<16x4xf32>
    %cst_7 = arith.constant 0.00999999977 : f32
    %10 = vector.broadcast %cst_7 : f32 to vector<16x4xf32>
    %11 = arith.mulf %10, %7 : vector<16x4xf32>
    %12 = arith.select %9, %7, %11 : vector<16x4xi1>, vector<16x4xf32>
    %13 = vector.shape_cast %12 : vector<16x4xf32> to vector<2x8x4xf32>
    %c0_8 = arith.constant 0 : index
    %c0_9 = arith.constant 0 : index
    %c0_10 = arith.constant 0 : index
    %c0_11 = arith.constant 0 : index
    %14 = vector.load %arg16[%c0_8, %c0_9, %c0_10, %c0_11] : memref<8x2x4x4xf32, #tpu.memory_space<vmem>>, vector<8x2x4x4xf32>
    %c0_12 = arith.constant 0 : index
    %c0_13 = arith.constant 0 : index
    %15 = vector.load %arg13[%c0_12, %c0_13] : memref<8x4xf32, #tpu.memory_space<vmem>>, vector<8x4xf32>
    %c0_14 = arith.constant 0 : index
    %c0_15 = arith.constant 0 : index
    %c0_16 = arith.constant 0 : index
    %16 = vector.load %arg15[%c0_14, %c0_15, %c0_16] : memref<2x4x4xf32, #tpu.memory_space<vmem>>, vector<2x4x4xf32>
    %c0_17 = arith.constant 0 : index
    %c0_18 = arith.constant 0 : index
    %17 = vector.load %arg14[%c0_17, %c0_18] : memref<2x4xf32, #tpu.memory_space<vmem>>, vector<2x4xf32>
    %18 = vector.extract_strided_slice %14 {offsets = [0, 0, 0, 0], sizes = [4, 2, 4, 4], strides = [1, 1, 1, 1]} : vector<8x2x4x4xf32> to vector<4x2x4x4xf32>
    %19 = vector.extract_strided_slice %15 {offsets = [0, 0], sizes = [4, 4], strides = [1, 1]} : vector<8x4xf32> to vector<4x4xf32>
    %20 = vector.extract_strided_slice %16 {offsets = [0, 0, 0], sizes = [1, 4, 4], strides = [1, 1, 1]} : vector<2x4x4xf32> to vector<1x4x4xf32>
    %21 = vector.shape_cast %20 : vector<1x4x4xf32> to vector<4x4xf32>
    %22 = vector.extract_strided_slice %17 {offsets = [0, 0], sizes = [1, 4], strides = [1, 1]} : vector<2x4xf32> to vector<1x4xf32>
    %cst_19 = arith.constant 0.000000e+00 : f32
    %23 = vector.broadcast %cst_19 : f32 to vector<2x1x4xf32>
    %24 = vector.extract_strided_slice %13 {offsets = [0, 0, 0], sizes = [2, 7, 4], strides = [1, 1, 1]} : vector<2x8x4xf32> to vector<2x7x4xf32>
    %25 = tpu.concatenate %23, %24 in 1 : vector<2x1x4xf32>, vector<2x7x4xf32> -> vector<2x8x4xf32>
    %26 = vector.shape_cast %25 : vector<2x8x4xf32> to vector<16x4xf32>
    %27 = vector.extract_strided_slice %18 {offsets = [0, 0, 0, 0], sizes = [1, 1, 4, 4], strides = [1, 1, 1, 1]} : vector<4x2x4x4xf32> to vector<1x1x4x4xf32>
    %28 = vector.shape_cast %27 : vector<1x1x4x4xf32> to vector<4x4xf32>
    %cst_20 = arith.constant dense<0.000000e+00> : vector<16x4xf32>
    %29 = tpu.matmul %26, %28, %cst_20 {dimension_numbers = #tpu.dot_dimension_numbers<[1], [0], [0], [1], [0, 0, 1, 1], [], []>} : vector<16x4xf32>, vector<4x4xf32>, vector<16x4xf32> -> vector<16x4xf32>
    %30 = vector.shape_cast %13 : vector<2x8x4xf32> to vector<16x4xf32>
    %31 = vector.extract_strided_slice %18 {offsets = [0, 1, 0, 0], sizes = [1, 1, 4, 4], strides = [1, 1, 1, 1]} : vector<4x2x4x4xf32> to vector<1x1x4x4xf32>
    %32 = vector.shape_cast %31 : vector<1x1x4x4xf32> to vector<4x4xf32>
    %cst_21 = arith.constant dense<0.000000e+00> : vector<16x4xf32>
    %33 = tpu.matmul %30, %32, %cst_21 {dimension_numbers = #tpu.dot_dimension_numbers<[1], [0], [0], [1], [0, 0, 1, 1], [], []>} : vector<16x4xf32>, vector<4x4xf32>, vector<16x4xf32> -> vector<16x4xf32>
    %34 = arith.addf %29, %33 : vector<16x4xf32>
    %35 = vector.extract_strided_slice %19 {offsets = [0, 0], sizes = [1, 4], strides = [1, 1]} : vector<4x4xf32> to vector<1x4xf32>
    %36 = vector.broadcast %35 : vector<1x4xf32> to vector<16x4xf32>
    %37 = arith.addf %34, %36 : vector<16x4xf32>
    %38 = vector.shape_cast %37 : vector<16x4xf32> to vector<2x8x4xf32>
    %cst_22 = arith.constant 0.000000e+00 : f32
    %39 = vector.broadcast %cst_22 : f32 to vector<2x8x4xf32>
    %40 = arith.maximumf %38, %39 : vector<2x8x4xf32>
    %cst_23 = arith.constant 0.000000e+00 : f32
    %41 = vector.broadcast %cst_23 : f32 to vector<2x1x4xf32>
    %42 = vector.extract_strided_slice %40 {offsets = [0, 0, 0], sizes = [2, 7, 4], strides = [1, 1, 1]} : vector<2x8x4xf32> to vector<2x7x4xf32>
    %43 = tpu.concatenate %41, %42 in 1 : vector<2x1x4xf32>, vector<2x7x4xf32> -> vector<2x8x4xf32>
    %44 = vector.shape_cast %43 : vector<2x8x4xf32> to vector<16x4xf32>
    %45 = vector.extract_strided_slice %18 {offsets = [1, 0, 0, 0], sizes = [1, 1, 4, 4], strides = [1, 1, 1, 1]} : vector<4x2x4x4xf32> to vector<1x1x4x4xf32>
    %46 = vector.shape_cast %45 : vector<1x1x4x4xf32> to vector<4x4xf32>
    %cst_24 = arith.constant dense<0.000000e+00> : vector<16x4xf32>
    %47 = tpu.matmul %44, %46, %cst_24 {dimension_numbers = #tpu.dot_dimension_numbers<[1], [0], [0], [1], [0, 0, 1, 1], [], []>} : vector<16x4xf32>, vector<4x4xf32>, vector<16x4xf32> -> vector<16x4xf32>
    %48 = vector.shape_cast %40 : vector<2x8x4xf32> to vector<16x4xf32>
    %49 = vector.extract_strided_slice %18 {offsets = [1, 1, 0, 0], sizes = [1, 1, 4, 4], strides = [1, 1, 1, 1]} : vector<4x2x4x4xf32> to vector<1x1x4x4xf32>
    %50 = vector.shape_cast %49 : vector<1x1x4x4xf32> to vector<4x4xf32>
    %cst_25 = arith.constant dense<0.000000e+00> : vector<16x4xf32>
    %51 = tpu.matmul %48, %50, %cst_25 {dimension_numbers = #tpu.dot_dimension_numbers<[1], [0], [0], [1], [0, 0, 1, 1], [], []>} : vector<16x4xf32>, vector<4x4xf32>, vector<16x4xf32> -> vector<16x4xf32>
    %52 = arith.addf %47, %51 : vector<16x4xf32>
    %53 = vector.extract_strided_slice %19 {offsets = [1, 0], sizes = [1, 4], strides = [1, 1]} : vector<4x4xf32> to vector<1x4xf32>
    %54 = vector.broadcast %53 : vector<1x4xf32> to vector<16x4xf32>
    %55 = arith.addf %52, %54 : vector<16x4xf32>
    %56 = vector.shape_cast %55 : vector<16x4xf32> to vector<2x8x4xf32>
    %cst_26 = arith.constant 0.000000e+00 : f32
    %57 = vector.broadcast %cst_26 : f32 to vector<2x8x4xf32>
    %58 = arith.maximumf %56, %57 : vector<2x8x4xf32>
    %59 = arith.addf %58, %13 : vector<2x8x4xf32>
    %cst_27 = arith.constant 0.000000e+00 : f32
    %60 = vector.broadcast %cst_27 : f32 to vector<2x8x4xf32>
    %61 = arith.maximumf %59, %60 : vector<2x8x4xf32>
    %cst_28 = arith.constant 0.000000e+00 : f32
    %62 = vector.broadcast %cst_28 : f32 to vector<2x2x4xf32>
    %63 = vector.extract_strided_slice %61 {offsets = [0, 0, 0], sizes = [2, 6, 4], strides = [1, 1, 1]} : vector<2x8x4xf32> to vector<2x6x4xf32>
    %64 = tpu.concatenate %62, %63 in 1 : vector<2x2x4xf32>, vector<2x6x4xf32> -> vector<2x8x4xf32>
    %65 = vector.shape_cast %64 : vector<2x8x4xf32> to vector<16x4xf32>
    %66 = vector.extract_strided_slice %18 {offsets = [2, 0, 0, 0], sizes = [1, 1, 4, 4], strides = [1, 1, 1, 1]} : vector<4x2x4x4xf32> to vector<1x1x4x4xf32>
    %67 = vector.shape_cast %66 : vector<1x1x4x4xf32> to vector<4x4xf32>
    %cst_29 = arith.constant dense<0.000000e+00> : vector<16x4xf32>
    %68 = tpu.matmul %65, %67, %cst_29 {dimension_numbers = #tpu.dot_dimension_numbers<[1], [0], [0], [1], [0, 0, 1, 1], [], []>} : vector<16x4xf32>, vector<4x4xf32>, vector<16x4xf32> -> vector<16x4xf32>
    %69 = vector.shape_cast %61 : vector<2x8x4xf32> to vector<16x4xf32>
    %70 = vector.extract_strided_slice %18 {offsets = [2, 1, 0, 0], sizes = [1, 1, 4, 4], strides = [1, 1, 1, 1]} : vector<4x2x4x4xf32> to vector<1x1x4x4xf32>
    %71 = vector.shape_cast %70 : vector<1x1x4x4xf32> to vector<4x4xf32>
    %cst_30 = arith.constant dense<0.000000e+00> : vector<16x4xf32>
    %72 = tpu.matmul %69, %71, %cst_30 {dimension_numbers = #tpu.dot_dimension_numbers<[1], [0], [0], [1], [0, 0, 1, 1], [], []>} : vector<16x4xf32>, vector<4x4xf32>, vector<16x4xf32> -> vector<16x4xf32>
    %73 = arith.addf %68, %72 : vector<16x4xf32>
    %74 = vector.extract_strided_slice %19 {offsets = [2, 0], sizes = [1, 4], strides = [1, 1]} : vector<4x4xf32> to vector<1x4xf32>
    %75 = vector.broadcast %74 : vector<1x4xf32> to vector<16x4xf32>
    %76 = arith.addf %73, %75 : vector<16x4xf32>
    %77 = vector.shape_cast %76 : vector<16x4xf32> to vector<2x8x4xf32>
    %cst_31 = arith.constant 0.000000e+00 : f32
    %78 = vector.broadcast %cst_31 : f32 to vector<2x8x4xf32>
    %79 = arith.maximumf %77, %78 : vector<2x8x4xf32>
    %cst_32 = arith.constant 0.000000e+00 : f32
    %80 = vector.broadcast %cst_32 : f32 to vector<2x2x4xf32>
    %81 = vector.extract_strided_slice %79 {offsets = [0, 0, 0], sizes = [2, 6, 4], strides = [1, 1, 1]} : vector<2x8x4xf32> to vector<2x6x4xf32>
    %82 = tpu.concatenate %80, %81 in 1 : vector<2x2x4xf32>, vector<2x6x4xf32> -> vector<2x8x4xf32>
    %83 = vector.shape_cast %82 : vector<2x8x4xf32> to vector<16x4xf32>
    %84 = vector.extract_strided_slice %18 {offsets = [3, 0, 0, 0], sizes = [1, 1, 4, 4], strides = [1, 1, 1, 1]} : vector<4x2x4x4xf32> to vector<1x1x4x4xf32>
    %85 = vector.shape_cast %84 : vector<1x1x4x4xf32> to vector<4x4xf32>
    %cst_33 = arith.constant dense<0.000000e+00> : vector<16x4xf32>
    %86 = tpu.matmul %83, %85, %cst_33 {dimension_numbers = #tpu.dot_dimension_numbers<[1], [0], [0], [1], [0, 0, 1, 1], [], []>} : vector<16x4xf32>, vector<4x4xf32>, vector<16x4xf32> -> vector<16x4xf32>
    %87 = vector.shape_cast %79 : vector<2x8x4xf32> to vector<16x4xf32>
    %88 = vector.extract_strided_slice %18 {offsets = [3, 1, 0, 0], sizes = [1, 1, 4, 4], strides = [1, 1, 1, 1]} : vector<4x2x4x4xf32> to vector<1x1x4x4xf32>
    %89 = vector.shape_cast %88 : vector<1x1x4x4xf32> to vector<4x4xf32>
    %cst_34 = arith.constant dense<0.000000e+00> : vector<16x4xf32>
    %90 = tpu.matmul %87, %89, %cst_34 {dimension_numbers = #tpu.dot_dimension_numbers<[1], [0], [0], [1], [0, 0, 1, 1], [], []>} : vector<16x4xf32>, vector<4x4xf32>, vector<16x4xf32> -> vector<16x4xf32>
    %91 = arith.addf %86, %90 : vector<16x4xf32>
    %92 = vector.extract_strided_slice %19 {offsets = [3, 0], sizes = [1, 4], strides = [1, 1]} : vector<4x4xf32> to vector<1x4xf32>
    %93 = vector.broadcast %92 : vector<1x4xf32> to vector<16x4xf32>
    %94 = arith.addf %91, %93 : vector<16x4xf32>
    %95 = vector.shape_cast %94 : vector<16x4xf32> to vector<2x8x4xf32>
    %cst_35 = arith.constant 0.000000e+00 : f32
    %96 = vector.broadcast %cst_35 : f32 to vector<2x8x4xf32>
    %97 = arith.maximumf %95, %96 : vector<2x8x4xf32>
    %98 = arith.addf %97, %61 : vector<2x8x4xf32>
    %cst_36 = arith.constant 0.000000e+00 : f32
    %99 = vector.broadcast %cst_36 : f32 to vector<2x8x4xf32>
    %100 = arith.maximumf %98, %99 : vector<2x8x4xf32>
    %101 = vector.shape_cast %100 : vector<2x8x4xf32> to vector<16x4xf32>
    %cst_37 = arith.constant dense<0.000000e+00> : vector<16x4xf32>
    %102 = tpu.matmul %101, %21, %cst_37 {dimension_numbers = #tpu.dot_dimension_numbers<[1], [0], [0], [1], [0, 0, 1, 1], [], []>} : vector<16x4xf32>, vector<4x4xf32>, vector<16x4xf32> -> vector<16x4xf32>
    %103 = vector.broadcast %22 : vector<1x4xf32> to vector<16x4xf32>
    %104 = arith.addf %102, %103 : vector<16x4xf32>
    %105 = vector.shape_cast %104 : vector<16x4xf32> to vector<2x8x4xf32>
    %106 = tpu.transpose %105, [0, 2, 1] : vector<2x8x4xf32> -> vector<2x4x8xf32>
    %c0_38 = arith.constant 0 : index
    %c0_39 = arith.constant 0 : index
    %107 = vector.load %arg8[%c0_38, %c0_39] : memref<8x32xf32, #tpu.memory_space<vmem>>, vector<8x32xf32>
    %c0_40 = arith.constant 0 : index
    %c0_41 = arith.constant 0 : index
    %108 = vector.load %arg6[%c0_40, %c0_41] : memref<2x16xf32, #tpu.memory_space<vmem>>, vector<2x16xf32>
    %c0_42 = arith.constant 0 : index
    %c0_43 = arith.constant 0 : index
    %109 = vector.load %arg7[%c0_42, %c0_43] : memref<4x4xf32, #tpu.memory_space<vmem>>, vector<4x4xf32>
    %110 = vector.shape_cast %106 : vector<2x4x8xf32> to vector<8x8xf32>
    %111 = vector.extract_strided_slice %107 {offsets = [0, 0], sizes = [8, 16], strides = [1, 1]} : vector<8x32xf32> to vector<8x16xf32>
    %cst_44 = arith.constant dense<0.000000e+00> : vector<8x16xf32>
    %112 = tpu.matmul %110, %111, %cst_44 {dimension_numbers = #tpu.dot_dimension_numbers<[1], [0], [0], [1], [0, 0, 1, 1], [], []>} : vector<8x8xf32>, vector<8x16xf32>, vector<8x16xf32> -> vector<8x16xf32>
    %113 = vector.extract_strided_slice %108 {offsets = [0, 0], sizes = [1, 16], strides = [1, 1]} : vector<2x16xf32> to vector<1x16xf32>
    %114 = vector.broadcast %113 : vector<1x16xf32> to vector<8x16xf32>
    %115 = arith.addf %112, %114 : vector<8x16xf32>
    %116 = vector.shape_cast %115 : vector<8x16xf32> to vector<2x4x16xf32>
    %117 = vector.extract_strided_slice %107 {offsets = [0, 16], sizes = [8, 16], strides = [1, 1]} : vector<8x32xf32> to vector<8x16xf32>
    %cst_45 = arith.constant dense<0.000000e+00> : vector<8x16xf32>
    %118 = tpu.matmul %110, %117, %cst_45 {dimension_numbers = #tpu.dot_dimension_numbers<[1], [0], [0], [1], [0, 0, 1, 1], [], []>} : vector<8x8xf32>, vector<8x16xf32>, vector<8x16xf32> -> vector<8x16xf32>
    %119 = vector.shape_cast %118 : vector<8x16xf32> to vector<2x4x16xf32>
    %120 = vector.shape_cast %116 : vector<2x4x16xf32> to vector<2x4x1x16xf32>
    %121 = vector.shape_cast %119 : vector<2x4x16xf32> to vector<2x1x4x16xf32>
    %122 = vector.broadcast %120 : vector<2x4x1x16xf32> to vector<2x4x4x16xf32>
    %123 = vector.broadcast %121 : vector<2x1x4x16xf32> to vector<2x4x4x16xf32>
    %124 = arith.addf %122, %123 : vector<2x4x4x16xf32>
    %cst_46 = arith.constant 0.000000e+00 : f32
    %125 = vector.broadcast %cst_46 : f32 to vector<2x4x4x16xf32>
    %126 = arith.cmpf ogt, %124, %125 : vector<2x4x4x16xf32>
    %cst_47 = arith.constant 2.000000e-01 : f32
    %127 = vector.broadcast %cst_47 : f32 to vector<2x4x4x16xf32>
    %128 = arith.mulf %127, %124 : vector<2x4x4x16xf32>
    %129 = arith.select %126, %124, %128 : vector<2x4x4x16xi1>, vector<2x4x4x16xf32>
    %130 = vector.extract_strided_slice %108 {offsets = [1, 0], sizes = [1, 16], strides = [1, 1]} : vector<2x16xf32> to vector<1x16xf32>
    %131 = vector.shape_cast %130 : vector<1x16xf32> to vector<1x1x1x16xf32>
    %132 = vector.broadcast %131 : vector<1x1x1x16xf32> to vector<2x4x4x16xf32>
    %133 = arith.mulf %129, %132 : vector<2x4x4x16xf32>
    %cst_48 = arith.constant dense<0.000000e+00> : vector<2x4x4xf32>
    %134 = vector.multi_reduction <add>, %133, %cst_48 [3] : vector<2x4x4x16xf32> to vector<2x4x4xf32>
    %135 = vector.shape_cast %109 : vector<4x4xf32> to vector<1x4x4xf32>
    %136 = vector.broadcast %135 : vector<1x4x4xf32> to vector<2x4x4xf32>
    %137 = arith.addf %134, %136 : vector<2x4x4xf32>
    %cst_49 = arith.constant dense<0xFF800000> : vector<2x4xf32>
    %138 = vector.multi_reduction <maximumf>, %137, %cst_49 [2] : vector<2x4x4xf32> to vector<2x4xf32>
    %139 = vector.shape_cast %138 : vector<2x4xf32> to vector<2x4x1xf32>
    %140 = vector.broadcast %139 : vector<2x4x1xf32> to vector<2x4x4xf32>
    %141 = arith.subf %137, %140 : vector<2x4x4xf32>
    %142 = math.exp %141 : vector<2x4x4xf32>
    %cst_50 = arith.constant dense<0.000000e+00> : vector<2x4xf32>
    %143 = vector.multi_reduction <add>, %142, %cst_50 [2] : vector<2x4x4xf32> to vector<2x4xf32>
    %144 = vector.shape_cast %143 : vector<2x4xf32> to vector<2x4x1xf32>
    %145 = vector.broadcast %144 : vector<2x4x1xf32> to vector<2x4x4xf32>
    %146 = arith.divf %142, %145 : vector<2x4x4xf32>
    %c0_51 = arith.constant 0 : index
    %c0_52 = arith.constant 0 : index
    %147 = vector.load %arg21[%c0_51, %c0_52] : memref<4x16xf32, #tpu.memory_space<vmem>>, vector<4x16xf32>
    %c0_53 = arith.constant 0 : index
    %c0_54 = arith.constant 0 : index
    %148 = vector.load %arg19[%c0_53, %c0_54] : memref<2x8xf32, #tpu.memory_space<vmem>>, vector<2x8xf32>
    %c0_55 = arith.constant 0 : index
    %c0_56 = arith.constant 0 : index
    %149 = vector.load %arg20[%c0_55, %c0_56] : memref<8x8xf32, #tpu.memory_space<vmem>>, vector<8x8xf32>
    %150 = vector.shape_cast %105 : vector<2x8x4xf32> to vector<16x4xf32>
    %151 = vector.extract_strided_slice %147 {offsets = [0, 0], sizes = [4, 8], strides = [1, 1]} : vector<4x16xf32> to vector<4x8xf32>
    %cst_57 = arith.constant dense<0.000000e+00> : vector<16x8xf32>
    %152 = tpu.matmul %150, %151, %cst_57 {dimension_numbers = #tpu.dot_dimension_numbers<[1], [0], [0], [1], [0, 0, 1, 1], [], []>} : vector<16x4xf32>, vector<4x8xf32>, vector<16x8xf32> -> vector<16x8xf32>
    %153 = vector.extract_strided_slice %148 {offsets = [0, 0], sizes = [1, 8], strides = [1, 1]} : vector<2x8xf32> to vector<1x8xf32>
    %154 = vector.broadcast %153 : vector<1x8xf32> to vector<16x8xf32>
    %155 = arith.addf %152, %154 : vector<16x8xf32>
    %156 = vector.shape_cast %155 : vector<16x8xf32> to vector<2x8x8xf32>
    %157 = vector.extract_strided_slice %147 {offsets = [0, 8], sizes = [4, 8], strides = [1, 1]} : vector<4x16xf32> to vector<4x8xf32>
    %cst_58 = arith.constant dense<0.000000e+00> : vector<16x8xf32>
    %158 = tpu.matmul %150, %157, %cst_58 {dimension_numbers = #tpu.dot_dimension_numbers<[1], [0], [0], [1], [0, 0, 1, 1], [], []>} : vector<16x4xf32>, vector<4x8xf32>, vector<16x8xf32> -> vector<16x8xf32>
    %159 = vector.shape_cast %158 : vector<16x8xf32> to vector<2x8x8xf32>
    %160 = vector.shape_cast %156 : vector<2x8x8xf32> to vector<2x8x1x8xf32>
    %161 = vector.shape_cast %159 : vector<2x8x8xf32> to vector<2x1x8x8xf32>
    %162 = vector.broadcast %160 : vector<2x8x1x8xf32> to vector<2x8x8x8xf32>
    %163 = vector.broadcast %161 : vector<2x1x8x8xf32> to vector<2x8x8x8xf32>
    %164 = arith.addf %162, %163 : vector<2x8x8x8xf32>
    %cst_59 = arith.constant 0.000000e+00 : f32
    %165 = vector.broadcast %cst_59 : f32 to vector<2x8x8x8xf32>
    %166 = arith.cmpf ogt, %164, %165 : vector<2x8x8x8xf32>
    %cst_60 = arith.constant 2.000000e-01 : f32
    %167 = vector.broadcast %cst_60 : f32 to vector<2x8x8x8xf32>
    %168 = arith.mulf %167, %164 : vector<2x8x8x8xf32>
    %169 = arith.select %166, %164, %168 : vector<2x8x8x8xi1>, vector<2x8x8x8xf32>
    %170 = vector.extract_strided_slice %148 {offsets = [1, 0], sizes = [1, 8], strides = [1, 1]} : vector<2x8xf32> to vector<1x8xf32>
    %171 = vector.shape_cast %170 : vector<1x8xf32> to vector<1x1x1x8xf32>
    %172 = vector.broadcast %171 : vector<1x1x1x8xf32> to vector<2x8x8x8xf32>
    %173 = arith.mulf %169, %172 : vector<2x8x8x8xf32>
    %cst_61 = arith.constant dense<0.000000e+00> : vector<2x8x8xf32>
    %174 = vector.multi_reduction <add>, %173, %cst_61 [3] : vector<2x8x8x8xf32> to vector<2x8x8xf32>
    %175 = vector.shape_cast %149 : vector<8x8xf32> to vector<1x8x8xf32>
    %176 = vector.broadcast %175 : vector<1x8x8xf32> to vector<2x8x8xf32>
    %177 = arith.addf %174, %176 : vector<2x8x8xf32>
    %cst_62 = arith.constant dense<0xFF800000> : vector<2x8xf32>
    %178 = vector.multi_reduction <maximumf>, %177, %cst_62 [2] : vector<2x8x8xf32> to vector<2x8xf32>
    %179 = vector.shape_cast %178 : vector<2x8xf32> to vector<2x8x1xf32>
    %180 = vector.broadcast %179 : vector<2x8x1xf32> to vector<2x8x8xf32>
    %181 = arith.subf %177, %180 : vector<2x8x8xf32>
    %182 = math.exp %181 : vector<2x8x8xf32>
    %cst_63 = arith.constant dense<0.000000e+00> : vector<2x8xf32>
    %183 = vector.multi_reduction <add>, %182, %cst_63 [2] : vector<2x8x8xf32> to vector<2x8xf32>
    %184 = vector.shape_cast %183 : vector<2x8xf32> to vector<2x8x1xf32>
    %185 = vector.broadcast %184 : vector<2x8x1xf32> to vector<2x8x8xf32>
    %186 = arith.divf %182, %185 : vector<2x8x8xf32>
    %187 = vector.shape_cast %105 : vector<2x8x4xf32> to vector<2x8x1x4xf32>
    %188 = vector.shape_cast %146 : vector<2x4x4xf32> to vector<2x1x4x4xf32>
    %189 = vector.broadcast %187 : vector<2x8x1x4xf32> to vector<2x8x4x4xf32>
    %190 = vector.broadcast %188 : vector<2x1x4x4xf32> to vector<2x8x4x4xf32>
    %191 = arith.mulf %189, %190 : vector<2x8x4x4xf32>
    %cst_64 = arith.constant dense<0.000000e+00> : vector<2x8x4xf32>
    %192 = vector.multi_reduction <add>, %191, %cst_64 [3] : vector<2x8x4x4xf32> to vector<2x8x4xf32>
    %193 = arith.negf %192 : vector<2x8x4xf32>
    %194 = math.exp %193 : vector<2x8x4xf32>
    %cst_65 = arith.constant 1.000000e+00 : f32
    %195 = vector.broadcast %cst_65 : f32 to vector<2x8x4xf32>
    %196 = arith.addf %195, %194 : vector<2x8x4xf32>
    %197 = arith.divf %195, %196 : vector<2x8x4xf32>
    %198 = vector.shape_cast %186 : vector<2x8x8xf32> to vector<2x8x1x8xf32>
    %199 = vector.shape_cast %106 : vector<2x4x8xf32> to vector<2x1x4x8xf32>
    %200 = vector.broadcast %198 : vector<2x8x1x8xf32> to vector<2x8x4x8xf32>
    %201 = vector.broadcast %199 : vector<2x1x4x8xf32> to vector<2x8x4x8xf32>
    %202 = arith.mulf %200, %201 : vector<2x8x4x8xf32>
    %cst_66 = arith.constant dense<0.000000e+00> : vector<2x8x4xf32>
    %203 = vector.multi_reduction <add>, %202, %cst_66 [3] : vector<2x8x4x8xf32> to vector<2x8x4xf32>
    %204 = arith.negf %203 : vector<2x8x4xf32>
    %205 = math.exp %204 : vector<2x8x4xf32>
    %cst_67 = arith.constant 1.000000e+00 : f32
    %206 = vector.broadcast %cst_67 : f32 to vector<2x8x4xf32>
    %207 = arith.addf %206, %205 : vector<2x8x4xf32>
    %208 = arith.divf %206, %207 : vector<2x8x4xf32>
    %c0_68 = arith.constant 0 : index
    %c0_69 = arith.constant 0 : index
    %209 = vector.load %arg9[%c0_68, %c0_69] : memref<2x96xf32, #tpu.memory_space<vmem>>, vector<2x96xf32>
    %210 = tpu.concatenate %105, %197, %208 in 2 : vector<2x8x4xf32>, vector<2x8x4xf32>, vector<2x8x4xf32> -> vector<2x8x12xf32>
    %211 = vector.shape_cast %210 : vector<2x8x12xf32> to vector<16x12xf32>
    %c0_70 = arith.constant 0 : index
    %c0_71 = arith.constant 0 : index
    %212 = vector.load %arg11[%c0_70, %c0_71] : memref<12x96xf32, #tpu.memory_space<vmem>>, vector<12x96xf32>
    %cst_72 = arith.constant dense<0.000000e+00> : vector<16x96xf32>
    %213 = tpu.matmul %211, %212, %cst_72 {dimension_numbers = #tpu.dot_dimension_numbers<[1], [0], [0], [1], [0, 0, 1, 1], [], []>} : vector<16x12xf32>, vector<12x96xf32>, vector<16x96xf32> -> vector<16x96xf32>
    %214 = vector.extract_strided_slice %209 {offsets = [0, 0], sizes = [1, 96], strides = [1, 1]} : vector<2x96xf32> to vector<1x96xf32>
    %215 = vector.broadcast %214 : vector<1x96xf32> to vector<16x96xf32>
    %216 = arith.addf %213, %215 : vector<16x96xf32>
    %217 = vector.shape_cast %216 : vector<16x96xf32> to vector<2x8x96xf32>
    %c0_73 = arith.constant 0 : index
    %c0_74 = arith.constant 0 : index
    %218 = vector.load %arg10[%c0_73, %c0_74] : memref<32x96xf32, #tpu.memory_space<vmem>>, vector<32x96xf32>
    %219 = vector.extract_strided_slice %209 {offsets = [1, 0], sizes = [1, 96], strides = [1, 1]} : vector<2x96xf32> to vector<1x96xf32>
    %cst_75 = arith.constant 0.000000e+00 : f32
    %220 = vector.broadcast %cst_75 : f32 to vector<2x32xf32>
    %cst_76 = arith.constant dense<0.000000e+00> : vector<2x96xf32>
    %221 = tpu.matmul %220, %218, %cst_76 {dimension_numbers = #tpu.dot_dimension_numbers<[1], [0], [0], [1], [0, 0, 1, 1], [], []>} : vector<2x32xf32>, vector<32x96xf32>, vector<2x96xf32> -> vector<2x96xf32>
    %222 = vector.broadcast %219 : vector<1x96xf32> to vector<2x96xf32>
    %223 = arith.addf %221, %222 : vector<2x96xf32>
    %224 = vector.extract_strided_slice %217 {offsets = [0, 0, 0], sizes = [2, 1, 96], strides = [1, 1, 1]} : vector<2x8x96xf32> to vector<2x1x96xf32>
    %225 = vector.shape_cast %224 : vector<2x1x96xf32> to vector<2x96xf32>
    %226 = vector.extract_strided_slice %225 {offsets = [0, 0], sizes = [2, 64], strides = [1, 1]} : vector<2x96xf32> to vector<2x64xf32>
    %227 = vector.extract_strided_slice %223 {offsets = [0, 0], sizes = [2, 64], strides = [1, 1]} : vector<2x96xf32> to vector<2x64xf32>
    %228 = arith.addf %226, %227 : vector<2x64xf32>
    %229 = arith.negf %228 : vector<2x64xf32>
    %230 = math.exp %229 : vector<2x64xf32>
    %cst_77 = arith.constant 1.000000e+00 : f32
    %231 = vector.broadcast %cst_77 : f32 to vector<2x64xf32>
    %232 = arith.addf %231, %230 : vector<2x64xf32>
    %233 = arith.divf %231, %232 : vector<2x64xf32>
    %234 = vector.extract_strided_slice %233 {offsets = [0, 0], sizes = [2, 32], strides = [1, 1]} : vector<2x64xf32> to vector<2x32xf32>
    %235 = vector.extract_strided_slice %233 {offsets = [0, 32], sizes = [2, 32], strides = [1, 1]} : vector<2x64xf32> to vector<2x32xf32>
    %236 = vector.extract_strided_slice %225 {offsets = [0, 64], sizes = [2, 32], strides = [1, 1]} : vector<2x96xf32> to vector<2x32xf32>
    %237 = vector.extract_strided_slice %223 {offsets = [0, 64], sizes = [2, 32], strides = [1, 1]} : vector<2x96xf32> to vector<2x32xf32>
    %238 = arith.mulf %234, %237 : vector<2x32xf32>
    %239 = arith.addf %236, %238 : vector<2x32xf32>
    %240 = math.tanh %239 : vector<2x32xf32>
    %cst_78 = arith.constant 1.000000e+00 : f32
    %241 = vector.broadcast %cst_78 : f32 to vector<2x32xf32>
    %242 = arith.subf %241, %235 : vector<2x32xf32>
    %243 = arith.mulf %242, %240 : vector<2x32xf32>
    %244 = arith.mulf %235, %220 : vector<2x32xf32>
    %245 = arith.addf %243, %244 : vector<2x32xf32>
    %cst_79 = arith.constant dense<0.000000e+00> : vector<2x96xf32>
    %246 = tpu.matmul %245, %218, %cst_79 {dimension_numbers = #tpu.dot_dimension_numbers<[1], [0], [0], [1], [0, 0, 1, 1], [], []>} : vector<2x32xf32>, vector<32x96xf32>, vector<2x96xf32> -> vector<2x96xf32>
    %247 = vector.broadcast %219 : vector<1x96xf32> to vector<2x96xf32>
    %248 = arith.addf %246, %247 : vector<2x96xf32>
    %249 = vector.extract_strided_slice %217 {offsets = [0, 1, 0], sizes = [2, 1, 96], strides = [1, 1, 1]} : vector<2x8x96xf32> to vector<2x1x96xf32>
    %250 = vector.shape_cast %249 : vector<2x1x96xf32> to vector<2x96xf32>
    %251 = vector.extract_strided_slice %250 {offsets = [0, 0], sizes = [2, 64], strides = [1, 1]} : vector<2x96xf32> to vector<2x64xf32>
    %252 = vector.extract_strided_slice %248 {offsets = [0, 0], sizes = [2, 64], strides = [1, 1]} : vector<2x96xf32> to vector<2x64xf32>
    %253 = arith.addf %251, %252 : vector<2x64xf32>
    %254 = arith.negf %253 : vector<2x64xf32>
    %255 = math.exp %254 : vector<2x64xf32>
    %cst_80 = arith.constant 1.000000e+00 : f32
    %256 = vector.broadcast %cst_80 : f32 to vector<2x64xf32>
    %257 = arith.addf %256, %255 : vector<2x64xf32>
    %258 = arith.divf %256, %257 : vector<2x64xf32>
    %259 = vector.extract_strided_slice %258 {offsets = [0, 0], sizes = [2, 32], strides = [1, 1]} : vector<2x64xf32> to vector<2x32xf32>
    %260 = vector.extract_strided_slice %258 {offsets = [0, 32], sizes = [2, 32], strides = [1, 1]} : vector<2x64xf32> to vector<2x32xf32>
    %261 = vector.extract_strided_slice %250 {offsets = [0, 64], sizes = [2, 32], strides = [1, 1]} : vector<2x96xf32> to vector<2x32xf32>
    %262 = vector.extract_strided_slice %248 {offsets = [0, 64], sizes = [2, 32], strides = [1, 1]} : vector<2x96xf32> to vector<2x32xf32>
    %263 = arith.mulf %259, %262 : vector<2x32xf32>
    %264 = arith.addf %261, %263 : vector<2x32xf32>
    %265 = math.tanh %264 : vector<2x32xf32>
    %cst_81 = arith.constant 1.000000e+00 : f32
    %266 = vector.broadcast %cst_81 : f32 to vector<2x32xf32>
    %267 = arith.subf %266, %260 : vector<2x32xf32>
    %268 = arith.mulf %267, %265 : vector<2x32xf32>
    %269 = arith.mulf %260, %245 : vector<2x32xf32>
    %270 = arith.addf %268, %269 : vector<2x32xf32>
    %cst_82 = arith.constant dense<0.000000e+00> : vector<2x96xf32>
    %271 = tpu.matmul %270, %218, %cst_82 {dimension_numbers = #tpu.dot_dimension_numbers<[1], [0], [0], [1], [0, 0, 1, 1], [], []>} : vector<2x32xf32>, vector<32x96xf32>, vector<2x96xf32> -> vector<2x96xf32>
    %272 = vector.broadcast %219 : vector<1x96xf32> to vector<2x96xf32>
    %273 = arith.addf %271, %272 : vector<2x96xf32>
    %274 = vector.extract_strided_slice %217 {offsets = [0, 2, 0], sizes = [2, 1, 96], strides = [1, 1, 1]} : vector<2x8x96xf32> to vector<2x1x96xf32>
    %275 = vector.shape_cast %274 : vector<2x1x96xf32> to vector<2x96xf32>
    %276 = vector.extract_strided_slice %275 {offsets = [0, 0], sizes = [2, 64], strides = [1, 1]} : vector<2x96xf32> to vector<2x64xf32>
    %277 = vector.extract_strided_slice %273 {offsets = [0, 0], sizes = [2, 64], strides = [1, 1]} : vector<2x96xf32> to vector<2x64xf32>
    %278 = arith.addf %276, %277 : vector<2x64xf32>
    %279 = arith.negf %278 : vector<2x64xf32>
    %280 = math.exp %279 : vector<2x64xf32>
    %cst_83 = arith.constant 1.000000e+00 : f32
    %281 = vector.broadcast %cst_83 : f32 to vector<2x64xf32>
    %282 = arith.addf %281, %280 : vector<2x64xf32>
    %283 = arith.divf %281, %282 : vector<2x64xf32>
    %284 = vector.extract_strided_slice %283 {offsets = [0, 0], sizes = [2, 32], strides = [1, 1]} : vector<2x64xf32> to vector<2x32xf32>
    %285 = vector.extract_strided_slice %283 {offsets = [0, 32], sizes = [2, 32], strides = [1, 1]} : vector<2x64xf32> to vector<2x32xf32>
    %286 = vector.extract_strided_slice %275 {offsets = [0, 64], sizes = [2, 32], strides = [1, 1]} : vector<2x96xf32> to vector<2x32xf32>
    %287 = vector.extract_strided_slice %273 {offsets = [0, 64], sizes = [2, 32], strides = [1, 1]} : vector<2x96xf32> to vector<2x32xf32>
    %288 = arith.mulf %284, %287 : vector<2x32xf32>
    %289 = arith.addf %286, %288 : vector<2x32xf32>
    %290 = math.tanh %289 : vector<2x32xf32>
    %cst_84 = arith.constant 1.000000e+00 : f32
    %291 = vector.broadcast %cst_84 : f32 to vector<2x32xf32>
    %292 = arith.subf %291, %285 : vector<2x32xf32>
    %293 = arith.mulf %292, %290 : vector<2x32xf32>
    %294 = arith.mulf %285, %270 : vector<2x32xf32>
    %295 = arith.addf %293, %294 : vector<2x32xf32>
    %cst_85 = arith.constant dense<0.000000e+00> : vector<2x96xf32>
    %296 = tpu.matmul %295, %218, %cst_85 {dimension_numbers = #tpu.dot_dimension_numbers<[1], [0], [0], [1], [0, 0, 1, 1], [], []>} : vector<2x32xf32>, vector<32x96xf32>, vector<2x96xf32> -> vector<2x96xf32>
    %297 = vector.broadcast %219 : vector<1x96xf32> to vector<2x96xf32>
    %298 = arith.addf %296, %297 : vector<2x96xf32>
    %299 = vector.extract_strided_slice %217 {offsets = [0, 3, 0], sizes = [2, 1, 96], strides = [1, 1, 1]} : vector<2x8x96xf32> to vector<2x1x96xf32>
    %300 = vector.shape_cast %299 : vector<2x1x96xf32> to vector<2x96xf32>
    %301 = vector.extract_strided_slice %300 {offsets = [0, 0], sizes = [2, 64], strides = [1, 1]} : vector<2x96xf32> to vector<2x64xf32>
    %302 = vector.extract_strided_slice %298 {offsets = [0, 0], sizes = [2, 64], strides = [1, 1]} : vector<2x96xf32> to vector<2x64xf32>
    %303 = arith.addf %301, %302 : vector<2x64xf32>
    %304 = arith.negf %303 : vector<2x64xf32>
    %305 = math.exp %304 : vector<2x64xf32>
    %cst_86 = arith.constant 1.000000e+00 : f32
    %306 = vector.broadcast %cst_86 : f32 to vector<2x64xf32>
    %307 = arith.addf %306, %305 : vector<2x64xf32>
    %308 = arith.divf %306, %307 : vector<2x64xf32>
    %309 = vector.extract_strided_slice %308 {offsets = [0, 0], sizes = [2, 32], strides = [1, 1]} : vector<2x64xf32> to vector<2x32xf32>
    %310 = vector.extract_strided_slice %308 {offsets = [0, 32], sizes = [2, 32], strides = [1, 1]} : vector<2x64xf32> to vector<2x32xf32>
    %311 = vector.extract_strided_slice %300 {offsets = [0, 64], sizes = [2, 32], strides = [1, 1]} : vector<2x96xf32> to vector<2x32xf32>
    %312 = vector.extract_strided_slice %298 {offsets = [0, 64], sizes = [2, 32], strides = [1, 1]} : vector<2x96xf32> to vector<2x32xf32>
    %313 = arith.mulf %309, %312 : vector<2x32xf32>
    %314 = arith.addf %311, %313 : vector<2x32xf32>
    %315 = math.tanh %314 : vector<2x32xf32>
    %cst_87 = arith.constant 1.000000e+00 : f32
    %316 = vector.broadcast %cst_87 : f32 to vector<2x32xf32>
    %317 = arith.subf %316, %310 : vector<2x32xf32>
    %318 = arith.mulf %317, %315 : vector<2x32xf32>
    %319 = arith.mulf %310, %295 : vector<2x32xf32>
    %320 = arith.addf %318, %319 : vector<2x32xf32>
    %cst_88 = arith.constant dense<0.000000e+00> : vector<2x96xf32>
    %321 = tpu.matmul %320, %218, %cst_88 {dimension_numbers = #tpu.dot_dimension_numbers<[1], [0], [0], [1], [0, 0, 1, 1], [], []>} : vector<2x32xf32>, vector<32x96xf32>, vector<2x96xf32> -> vector<2x96xf32>
    %322 = vector.broadcast %219 : vector<1x96xf32> to vector<2x96xf32>
    %323 = arith.addf %321, %322 : vector<2x96xf32>
    %324 = vector.extract_strided_slice %217 {offsets = [0, 4, 0], sizes = [2, 1, 96], strides = [1, 1, 1]} : vector<2x8x96xf32> to vector<2x1x96xf32>
    %325 = vector.shape_cast %324 : vector<2x1x96xf32> to vector<2x96xf32>
    %326 = vector.extract_strided_slice %325 {offsets = [0, 0], sizes = [2, 64], strides = [1, 1]} : vector<2x96xf32> to vector<2x64xf32>
    %327 = vector.extract_strided_slice %323 {offsets = [0, 0], sizes = [2, 64], strides = [1, 1]} : vector<2x96xf32> to vector<2x64xf32>
    %328 = arith.addf %326, %327 : vector<2x64xf32>
    %329 = arith.negf %328 : vector<2x64xf32>
    %330 = math.exp %329 : vector<2x64xf32>
    %cst_89 = arith.constant 1.000000e+00 : f32
    %331 = vector.broadcast %cst_89 : f32 to vector<2x64xf32>
    %332 = arith.addf %331, %330 : vector<2x64xf32>
    %333 = arith.divf %331, %332 : vector<2x64xf32>
    %334 = vector.extract_strided_slice %333 {offsets = [0, 0], sizes = [2, 32], strides = [1, 1]} : vector<2x64xf32> to vector<2x32xf32>
    %335 = vector.extract_strided_slice %333 {offsets = [0, 32], sizes = [2, 32], strides = [1, 1]} : vector<2x64xf32> to vector<2x32xf32>
    %336 = vector.extract_strided_slice %325 {offsets = [0, 64], sizes = [2, 32], strides = [1, 1]} : vector<2x96xf32> to vector<2x32xf32>
    %337 = vector.extract_strided_slice %323 {offsets = [0, 64], sizes = [2, 32], strides = [1, 1]} : vector<2x96xf32> to vector<2x32xf32>
    %338 = arith.mulf %334, %337 : vector<2x32xf32>
    %339 = arith.addf %336, %338 : vector<2x32xf32>
    %340 = math.tanh %339 : vector<2x32xf32>
    %cst_90 = arith.constant 1.000000e+00 : f32
    %341 = vector.broadcast %cst_90 : f32 to vector<2x32xf32>
    %342 = arith.subf %341, %335 : vector<2x32xf32>
    %343 = arith.mulf %342, %340 : vector<2x32xf32>
    %344 = arith.mulf %335, %320 : vector<2x32xf32>
    %345 = arith.addf %343, %344 : vector<2x32xf32>
    %cst_91 = arith.constant dense<0.000000e+00> : vector<2x96xf32>
    %346 = tpu.matmul %345, %218, %cst_91 {dimension_numbers = #tpu.dot_dimension_numbers<[1], [0], [0], [1], [0, 0, 1, 1], [], []>} : vector<2x32xf32>, vector<32x96xf32>, vector<2x96xf32> -> vector<2x96xf32>
    %347 = vector.broadcast %219 : vector<1x96xf32> to vector<2x96xf32>
    %348 = arith.addf %346, %347 : vector<2x96xf32>
    %349 = vector.extract_strided_slice %217 {offsets = [0, 5, 0], sizes = [2, 1, 96], strides = [1, 1, 1]} : vector<2x8x96xf32> to vector<2x1x96xf32>
    %350 = vector.shape_cast %349 : vector<2x1x96xf32> to vector<2x96xf32>
    %351 = vector.extract_strided_slice %350 {offsets = [0, 0], sizes = [2, 64], strides = [1, 1]} : vector<2x96xf32> to vector<2x64xf32>
    %352 = vector.extract_strided_slice %348 {offsets = [0, 0], sizes = [2, 64], strides = [1, 1]} : vector<2x96xf32> to vector<2x64xf32>
    %353 = arith.addf %351, %352 : vector<2x64xf32>
    %354 = arith.negf %353 : vector<2x64xf32>
    %355 = math.exp %354 : vector<2x64xf32>
    %cst_92 = arith.constant 1.000000e+00 : f32
    %356 = vector.broadcast %cst_92 : f32 to vector<2x64xf32>
    %357 = arith.addf %356, %355 : vector<2x64xf32>
    %358 = arith.divf %356, %357 : vector<2x64xf32>
    %359 = vector.extract_strided_slice %358 {offsets = [0, 0], sizes = [2, 32], strides = [1, 1]} : vector<2x64xf32> to vector<2x32xf32>
    %360 = vector.extract_strided_slice %358 {offsets = [0, 32], sizes = [2, 32], strides = [1, 1]} : vector<2x64xf32> to vector<2x32xf32>
    %361 = vector.extract_strided_slice %350 {offsets = [0, 64], sizes = [2, 32], strides = [1, 1]} : vector<2x96xf32> to vector<2x32xf32>
    %362 = vector.extract_strided_slice %348 {offsets = [0, 64], sizes = [2, 32], strides = [1, 1]} : vector<2x96xf32> to vector<2x32xf32>
    %363 = arith.mulf %359, %362 : vector<2x32xf32>
    %364 = arith.addf %361, %363 : vector<2x32xf32>
    %365 = math.tanh %364 : vector<2x32xf32>
    %cst_93 = arith.constant 1.000000e+00 : f32
    %366 = vector.broadcast %cst_93 : f32 to vector<2x32xf32>
    %367 = arith.subf %366, %360 : vector<2x32xf32>
    %368 = arith.mulf %367, %365 : vector<2x32xf32>
    %369 = arith.mulf %360, %345 : vector<2x32xf32>
    %370 = arith.addf %368, %369 : vector<2x32xf32>
    %cst_94 = arith.constant dense<0.000000e+00> : vector<2x96xf32>
    %371 = tpu.matmul %370, %218, %cst_94 {dimension_numbers = #tpu.dot_dimension_numbers<[1], [0], [0], [1], [0, 0, 1, 1], [], []>} : vector<2x32xf32>, vector<32x96xf32>, vector<2x96xf32> -> vector<2x96xf32>
    %372 = vector.broadcast %219 : vector<1x96xf32> to vector<2x96xf32>
    %373 = arith.addf %371, %372 : vector<2x96xf32>
    %374 = vector.extract_strided_slice %217 {offsets = [0, 6, 0], sizes = [2, 1, 96], strides = [1, 1, 1]} : vector<2x8x96xf32> to vector<2x1x96xf32>
    %375 = vector.shape_cast %374 : vector<2x1x96xf32> to vector<2x96xf32>
    %376 = vector.extract_strided_slice %375 {offsets = [0, 0], sizes = [2, 64], strides = [1, 1]} : vector<2x96xf32> to vector<2x64xf32>
    %377 = vector.extract_strided_slice %373 {offsets = [0, 0], sizes = [2, 64], strides = [1, 1]} : vector<2x96xf32> to vector<2x64xf32>
    %378 = arith.addf %376, %377 : vector<2x64xf32>
    %379 = arith.negf %378 : vector<2x64xf32>
    %380 = math.exp %379 : vector<2x64xf32>
    %cst_95 = arith.constant 1.000000e+00 : f32
    %381 = vector.broadcast %cst_95 : f32 to vector<2x64xf32>
    %382 = arith.addf %381, %380 : vector<2x64xf32>
    %383 = arith.divf %381, %382 : vector<2x64xf32>
    %384 = vector.extract_strided_slice %383 {offsets = [0, 0], sizes = [2, 32], strides = [1, 1]} : vector<2x64xf32> to vector<2x32xf32>
    %385 = vector.extract_strided_slice %383 {offsets = [0, 32], sizes = [2, 32], strides = [1, 1]} : vector<2x64xf32> to vector<2x32xf32>
    %386 = vector.extract_strided_slice %375 {offsets = [0, 64], sizes = [2, 32], strides = [1, 1]} : vector<2x96xf32> to vector<2x32xf32>
    %387 = vector.extract_strided_slice %373 {offsets = [0, 64], sizes = [2, 32], strides = [1, 1]} : vector<2x96xf32> to vector<2x32xf32>
    %388 = arith.mulf %384, %387 : vector<2x32xf32>
    %389 = arith.addf %386, %388 : vector<2x32xf32>
    %390 = math.tanh %389 : vector<2x32xf32>
    %cst_96 = arith.constant 1.000000e+00 : f32
    %391 = vector.broadcast %cst_96 : f32 to vector<2x32xf32>
    %392 = arith.subf %391, %385 : vector<2x32xf32>
    %393 = arith.mulf %392, %390 : vector<2x32xf32>
    %394 = arith.mulf %385, %370 : vector<2x32xf32>
    %395 = arith.addf %393, %394 : vector<2x32xf32>
    %cst_97 = arith.constant dense<0.000000e+00> : vector<2x96xf32>
    %396 = tpu.matmul %395, %218, %cst_97 {dimension_numbers = #tpu.dot_dimension_numbers<[1], [0], [0], [1], [0, 0, 1, 1], [], []>} : vector<2x32xf32>, vector<32x96xf32>, vector<2x96xf32> -> vector<2x96xf32>
    %397 = vector.broadcast %219 : vector<1x96xf32> to vector<2x96xf32>
    %398 = arith.addf %396, %397 : vector<2x96xf32>
    %399 = vector.extract_strided_slice %217 {offsets = [0, 7, 0], sizes = [2, 1, 96], strides = [1, 1, 1]} : vector<2x8x96xf32> to vector<2x1x96xf32>
    %400 = vector.shape_cast %399 : vector<2x1x96xf32> to vector<2x96xf32>
    %401 = vector.extract_strided_slice %400 {offsets = [0, 0], sizes = [2, 64], strides = [1, 1]} : vector<2x96xf32> to vector<2x64xf32>
    %402 = vector.extract_strided_slice %398 {offsets = [0, 0], sizes = [2, 64], strides = [1, 1]} : vector<2x96xf32> to vector<2x64xf32>
    %403 = arith.addf %401, %402 : vector<2x64xf32>
    %404 = arith.negf %403 : vector<2x64xf32>
    %405 = math.exp %404 : vector<2x64xf32>
    %cst_98 = arith.constant 1.000000e+00 : f32
    %406 = vector.broadcast %cst_98 : f32 to vector<2x64xf32>
    %407 = arith.addf %406, %405 : vector<2x64xf32>
    %408 = arith.divf %406, %407 : vector<2x64xf32>
    %409 = vector.extract_strided_slice %408 {offsets = [0, 0], sizes = [2, 32], strides = [1, 1]} : vector<2x64xf32> to vector<2x32xf32>
    %410 = vector.extract_strided_slice %408 {offsets = [0, 32], sizes = [2, 32], strides = [1, 1]} : vector<2x64xf32> to vector<2x32xf32>
    %411 = vector.extract_strided_slice %400 {offsets = [0, 64], sizes = [2, 32], strides = [1, 1]} : vector<2x96xf32> to vector<2x32xf32>
    %412 = vector.extract_strided_slice %398 {offsets = [0, 64], sizes = [2, 32], strides = [1, 1]} : vector<2x96xf32> to vector<2x32xf32>
    %413 = arith.mulf %409, %412 : vector<2x32xf32>
    %414 = arith.addf %411, %413 : vector<2x32xf32>
    %415 = math.tanh %414 : vector<2x32xf32>
    %cst_99 = arith.constant 1.000000e+00 : f32
    %416 = vector.broadcast %cst_99 : f32 to vector<2x32xf32>
    %417 = arith.subf %416, %410 : vector<2x32xf32>
    %418 = arith.mulf %417, %415 : vector<2x32xf32>
    %419 = arith.mulf %410, %395 : vector<2x32xf32>
    %420 = arith.addf %418, %419 : vector<2x32xf32>
    %c0_100 = arith.constant 0 : index
    %c0_101 = arith.constant 0 : index
    %421 = vector.load %arg17[%c0_100, %c0_101] : memref<10x10xf32, #tpu.memory_space<vmem>>, vector<10x10xf32>
    %c0_102 = arith.constant 0 : index
    %c0_103 = arith.constant 0 : index
    %c0_104 = arith.constant 0 : index
    %c0_105 = arith.constant 0 : index
    %422 = vector.load %arg18[%c0_102, %c0_103, %c0_104, %c0_105] : memref<3x2x10x10xf32, #tpu.memory_space<vmem>>, vector<3x2x10x10xf32>
    %423 = vector.shape_cast %420 : vector<2x32xf32> to vector<2x1x32xf32>
    %424 = tpu.transpose %423, [0, 2, 1] : vector<2x1x32xf32> -> vector<2x32x1xf32>
    %425 = vector.extract_strided_slice %421 {offsets = [0, 0], sizes = [2, 10], strides = [1, 1]} : vector<10x10xf32> to vector<2x10xf32>
    %426 = vector.extract_strided_slice %421 {offsets = [2, 0], sizes = [1, 10], strides = [1, 1]} : vector<10x10xf32> to vector<1x10xf32>
    %cst_106 = arith.constant 0.000000e+00 : f32
    %427 = vector.broadcast %cst_106 : f32 to vector<2x1x1xf32>
    %428 = vector.extract_strided_slice %424 {offsets = [0, 0, 0], sizes = [2, 31, 1], strides = [1, 1, 1]} : vector<2x32x1xf32> to vector<2x31x1xf32>
    %429 = tpu.concatenate %427, %428 in 1 : vector<2x1x1xf32>, vector<2x31x1xf32> -> vector<2x32x1xf32>
    %430 = vector.extract_strided_slice %425 {offsets = [0, 0], sizes = [1, 10], strides = [1, 1]} : vector<2x10xf32> to vector<1x10xf32>
    %431 = vector.shape_cast %430 : vector<1x10xf32> to vector<1x1x10xf32>
    %432 = vector.broadcast %429 : vector<2x32x1xf32> to vector<2x32x10xf32>
    %433 = vector.broadcast %431 : vector<1x1x10xf32> to vector<2x32x10xf32>
    %434 = arith.mulf %432, %433 : vector<2x32x10xf32>
    %435 = vector.extract_strided_slice %425 {offsets = [1, 0], sizes = [1, 10], strides = [1, 1]} : vector<2x10xf32> to vector<1x10xf32>
    %436 = vector.shape_cast %435 : vector<1x10xf32> to vector<1x1x10xf32>
    %437 = vector.broadcast %424 : vector<2x32x1xf32> to vector<2x32x10xf32>
    %438 = vector.broadcast %436 : vector<1x1x10xf32> to vector<2x32x10xf32>
    %439 = arith.mulf %437, %438 : vector<2x32x10xf32>
    %440 = arith.addf %434, %439 : vector<2x32x10xf32>
    %441 = vector.shape_cast %426 : vector<1x10xf32> to vector<1x1x10xf32>
    %442 = vector.broadcast %441 : vector<1x1x10xf32> to vector<2x32x10xf32>
    %443 = arith.addf %440, %442 : vector<2x32x10xf32>
    %cst_107 = arith.constant 0.000000e+00 : f32
    %444 = vector.broadcast %cst_107 : f32 to vector<2x32x10xf32>
    %445 = arith.maximumf %443, %444 : vector<2x32x10xf32>
    %446 = vector.extract_strided_slice %422 {offsets = [0, 0, 0, 0], sizes = [1, 2, 10, 10], strides = [1, 1, 1, 1]} : vector<3x2x10x10xf32> to vector<1x2x10x10xf32>
    %447 = vector.shape_cast %446 : vector<1x2x10x10xf32> to vector<2x10x10xf32>
    %448 = vector.extract_strided_slice %421 {offsets = [3, 0], sizes = [1, 10], strides = [1, 1]} : vector<10x10xf32> to vector<1x10xf32>
    %cst_108 = arith.constant 0.000000e+00 : f32
    %449 = vector.broadcast %cst_108 : f32 to vector<2x1x10xf32>
    %450 = vector.extract_strided_slice %445 {offsets = [0, 0, 0], sizes = [2, 31, 10], strides = [1, 1, 1]} : vector<2x32x10xf32> to vector<2x31x10xf32>
    %451 = tpu.concatenate %449, %450 in 1 : vector<2x1x10xf32>, vector<2x31x10xf32> -> vector<2x32x10xf32>
    %452 = vector.shape_cast %451 : vector<2x32x10xf32> to vector<64x10xf32>
    %453 = vector.extract_strided_slice %447 {offsets = [0, 0, 0], sizes = [1, 10, 10], strides = [1, 1, 1]} : vector<2x10x10xf32> to vector<1x10x10xf32>
    %454 = vector.shape_cast %453 : vector<1x10x10xf32> to vector<10x10xf32>
    %cst_109 = arith.constant dense<0.000000e+00> : vector<64x10xf32>
    %455 = tpu.matmul %452, %454, %cst_109 {dimension_numbers = #tpu.dot_dimension_numbers<[1], [0], [0], [1], [0, 0, 1, 1], [], []>} : vector<64x10xf32>, vector<10x10xf32>, vector<64x10xf32> -> vector<64x10xf32>
    %456 = vector.shape_cast %445 : vector<2x32x10xf32> to vector<64x10xf32>
    %457 = vector.extract_strided_slice %447 {offsets = [1, 0, 0], sizes = [1, 10, 10], strides = [1, 1, 1]} : vector<2x10x10xf32> to vector<1x10x10xf32>
    %458 = vector.shape_cast %457 : vector<1x10x10xf32> to vector<10x10xf32>
    %cst_110 = arith.constant dense<0.000000e+00> : vector<64x10xf32>
    %459 = tpu.matmul %456, %458, %cst_110 {dimension_numbers = #tpu.dot_dimension_numbers<[1], [0], [0], [1], [0, 0, 1, 1], [], []>} : vector<64x10xf32>, vector<10x10xf32>, vector<64x10xf32> -> vector<64x10xf32>
    %460 = arith.addf %455, %459 : vector<64x10xf32>
    %461 = vector.broadcast %448 : vector<1x10xf32> to vector<64x10xf32>
    %462 = arith.addf %460, %461 : vector<64x10xf32>
    %463 = vector.shape_cast %462 : vector<64x10xf32> to vector<2x32x10xf32>
    %cst_111 = arith.constant 0.000000e+00 : f32
    %464 = vector.broadcast %cst_111 : f32 to vector<2x32x10xf32>
    %465 = arith.maximumf %463, %464 : vector<2x32x10xf32>
    %466 = vector.extract_strided_slice %421 {offsets = [6, 0], sizes = [1, 10], strides = [1, 1]} : vector<10x10xf32> to vector<1x10xf32>
    %467 = vector.shape_cast %466 : vector<1x10xf32> to vector<1x1x10xf32>
    %468 = vector.broadcast %424 : vector<2x32x1xf32> to vector<2x32x10xf32>
    %469 = vector.broadcast %467 : vector<1x1x10xf32> to vector<2x32x10xf32>
    %470 = arith.mulf %468, %469 : vector<2x32x10xf32>
    %471 = vector.extract_strided_slice %421 {offsets = [7, 0], sizes = [1, 10], strides = [1, 1]} : vector<10x10xf32> to vector<1x10xf32>
    %472 = vector.shape_cast %471 : vector<1x10xf32> to vector<1x1x10xf32>
    %473 = vector.broadcast %472 : vector<1x1x10xf32> to vector<2x32x10xf32>
    %474 = arith.addf %470, %473 : vector<2x32x10xf32>
    %475 = arith.addf %465, %474 : vector<2x32x10xf32>
    %cst_112 = arith.constant 0.000000e+00 : f32
    %476 = vector.broadcast %cst_112 : f32 to vector<2x32x10xf32>
    %477 = arith.maximumf %475, %476 : vector<2x32x10xf32>
    %478 = vector.extract_strided_slice %422 {offsets = [1, 0, 0, 0], sizes = [1, 2, 10, 10], strides = [1, 1, 1, 1]} : vector<3x2x10x10xf32> to vector<1x2x10x10xf32>
    %479 = vector.shape_cast %478 : vector<1x2x10x10xf32> to vector<2x10x10xf32>
    %480 = vector.extract_strided_slice %421 {offsets = [4, 0], sizes = [1, 10], strides = [1, 1]} : vector<10x10xf32> to vector<1x10xf32>
    %cst_113 = arith.constant 0.000000e+00 : f32
    %481 = vector.broadcast %cst_113 : f32 to vector<2x2x10xf32>
    %482 = vector.extract_strided_slice %477 {offsets = [0, 0, 0], sizes = [2, 30, 10], strides = [1, 1, 1]} : vector<2x32x10xf32> to vector<2x30x10xf32>
    %483 = tpu.concatenate %481, %482 in 1 : vector<2x2x10xf32>, vector<2x30x10xf32> -> vector<2x32x10xf32>
    %484 = vector.shape_cast %483 : vector<2x32x10xf32> to vector<64x10xf32>
    %485 = vector.extract_strided_slice %479 {offsets = [0, 0, 0], sizes = [1, 10, 10], strides = [1, 1, 1]} : vector<2x10x10xf32> to vector<1x10x10xf32>
    %486 = vector.shape_cast %485 : vector<1x10x10xf32> to vector<10x10xf32>
    %cst_114 = arith.constant dense<0.000000e+00> : vector<64x10xf32>
    %487 = tpu.matmul %484, %486, %cst_114 {dimension_numbers = #tpu.dot_dimension_numbers<[1], [0], [0], [1], [0, 0, 1, 1], [], []>} : vector<64x10xf32>, vector<10x10xf32>, vector<64x10xf32> -> vector<64x10xf32>
    %488 = vector.shape_cast %477 : vector<2x32x10xf32> to vector<64x10xf32>
    %489 = vector.extract_strided_slice %479 {offsets = [1, 0, 0], sizes = [1, 10, 10], strides = [1, 1, 1]} : vector<2x10x10xf32> to vector<1x10x10xf32>
    %490 = vector.shape_cast %489 : vector<1x10x10xf32> to vector<10x10xf32>
    %cst_115 = arith.constant dense<0.000000e+00> : vector<64x10xf32>
    %491 = tpu.matmul %488, %490, %cst_115 {dimension_numbers = #tpu.dot_dimension_numbers<[1], [0], [0], [1], [0, 0, 1, 1], [], []>} : vector<64x10xf32>, vector<10x10xf32>, vector<64x10xf32> -> vector<64x10xf32>
    %492 = arith.addf %487, %491 : vector<64x10xf32>
    %493 = vector.broadcast %480 : vector<1x10xf32> to vector<64x10xf32>
    %494 = arith.addf %492, %493 : vector<64x10xf32>
    %495 = vector.shape_cast %494 : vector<64x10xf32> to vector<2x32x10xf32>
    %cst_116 = arith.constant 0.000000e+00 : f32
    %496 = vector.broadcast %cst_116 : f32 to vector<2x32x10xf32>
    %497 = arith.maximumf %495, %496 : vector<2x32x10xf32>
    %498 = vector.extract_strided_slice %422 {offsets = [2, 0, 0, 0], sizes = [1, 2, 10, 10], strides = [1, 1, 1, 1]} : vector<3x2x10x10xf32> to vector<1x2x10x10xf32>
    %499 = vector.shape_cast %498 : vector<1x2x10x10xf32> to vector<2x10x10xf32>
    %500 = vector.extract_strided_slice %421 {offsets = [5, 0], sizes = [1, 10], strides = [1, 1]} : vector<10x10xf32> to vector<1x10xf32>
    %cst_117 = arith.constant 0.000000e+00 : f32
    %501 = vector.broadcast %cst_117 : f32 to vector<2x2x10xf32>
    %502 = vector.extract_strided_slice %497 {offsets = [0, 0, 0], sizes = [2, 30, 10], strides = [1, 1, 1]} : vector<2x32x10xf32> to vector<2x30x10xf32>
    %503 = tpu.concatenate %501, %502 in 1 : vector<2x2x10xf32>, vector<2x30x10xf32> -> vector<2x32x10xf32>
    %504 = vector.shape_cast %503 : vector<2x32x10xf32> to vector<64x10xf32>
    %505 = vector.extract_strided_slice %499 {offsets = [0, 0, 0], sizes = [1, 10, 10], strides = [1, 1, 1]} : vector<2x10x10xf32> to vector<1x10x10xf32>
    %506 = vector.shape_cast %505 : vector<1x10x10xf32> to vector<10x10xf32>
    %cst_118 = arith.constant dense<0.000000e+00> : vector<64x10xf32>
    %507 = tpu.matmul %504, %506, %cst_118 {dimension_numbers = #tpu.dot_dimension_numbers<[1], [0], [0], [1], [0, 0, 1, 1], [], []>} : vector<64x10xf32>, vector<10x10xf32>, vector<64x10xf32> -> vector<64x10xf32>
    %508 = vector.shape_cast %497 : vector<2x32x10xf32> to vector<64x10xf32>
    %509 = vector.extract_strided_slice %499 {offsets = [1, 0, 0], sizes = [1, 10, 10], strides = [1, 1, 1]} : vector<2x10x10xf32> to vector<1x10x10xf32>
    %510 = vector.shape_cast %509 : vector<1x10x10xf32> to vector<10x10xf32>
    %cst_119 = arith.constant dense<0.000000e+00> : vector<64x10xf32>
    %511 = tpu.matmul %508, %510, %cst_119 {dimension_numbers = #tpu.dot_dimension_numbers<[1], [0], [0], [1], [0, 0, 1, 1], [], []>} : vector<64x10xf32>, vector<10x10xf32>, vector<64x10xf32> -> vector<64x10xf32>
    %512 = arith.addf %507, %511 : vector<64x10xf32>
    %513 = vector.broadcast %500 : vector<1x10xf32> to vector<64x10xf32>
    %514 = arith.addf %512, %513 : vector<64x10xf32>
    %515 = vector.shape_cast %514 : vector<64x10xf32> to vector<2x32x10xf32>
    %cst_120 = arith.constant 0.000000e+00 : f32
    %516 = vector.broadcast %cst_120 : f32 to vector<2x32x10xf32>
    %517 = arith.maximumf %515, %516 : vector<2x32x10xf32>
    %518 = arith.addf %517, %477 : vector<2x32x10xf32>
    %cst_121 = arith.constant 0.000000e+00 : f32
    %519 = vector.broadcast %cst_121 : f32 to vector<2x32x10xf32>
    %520 = arith.maximumf %518, %519 : vector<2x32x10xf32>
    %521 = vector.extract_strided_slice %421 {offsets = [8, 0], sizes = [1, 10], strides = [1, 1]} : vector<10x10xf32> to vector<1x10xf32>
    %522 = vector.shape_cast %521 : vector<1x10xf32> to vector<1x1x10xf32>
    %523 = vector.broadcast %522 : vector<1x1x10xf32> to vector<2x32x10xf32>
    %524 = arith.mulf %520, %523 : vector<2x32x10xf32>
    %cst_122 = arith.constant dense<0.000000e+00> : vector<2x32xf32>
    %525 = vector.multi_reduction <add>, %524, %cst_122 [2] : vector<2x32x10xf32> to vector<2x32xf32>
    %526 = vector.extract_strided_slice %421 {offsets = [9, 0], sizes = [1, 1], strides = [1, 1]} : vector<10x10xf32> to vector<1x1xf32>
    %527 = vector.broadcast %526 : vector<1x1xf32> to vector<2x32xf32>
    %528 = arith.addf %525, %527 : vector<2x32xf32>
    %c0_123 = arith.constant 0 : index
    %c0_124 = arith.constant 0 : index
    %529 = vector.load %arg4[%c0_123, %c0_124] : memref<32x32xf32, #tpu.memory_space<vmem>>, vector<32x32xf32>
    %cst_125 = arith.constant dense<0.000000e+00> : vector<2x32xf32>
    %530 = tpu.matmul %528, %529, %cst_125 {dimension_numbers = #tpu.dot_dimension_numbers<[1], [0], [0], [1], [0, 0, 1, 1], [], []>} : vector<2x32xf32>, vector<32x32xf32>, vector<2x32xf32> -> vector<2x32xf32>
    %531 = vector.extract_strided_slice %0 {offsets = [0, 0], sizes = [1, 32], strides = [1, 1]} : vector<4x32xf32> to vector<1x32xf32>
    %532 = vector.broadcast %531 : vector<1x32xf32> to vector<2x32xf32>
    %533 = arith.addf %530, %532 : vector<2x32xf32>
    %cst_126 = arith.constant 0.000000e+00 : f32
    %534 = vector.broadcast %cst_126 : f32 to vector<2x32xf32>
    %535 = arith.maximumf %533, %534 : vector<2x32xf32>
    %c0_127 = arith.constant 0 : index
    %c0_128 = arith.constant 0 : index
    %536 = vector.load %arg5[%c0_127, %c0_128] : memref<32x16xf32, #tpu.memory_space<vmem>>, vector<32x16xf32>
    %cst_129 = arith.constant dense<0.000000e+00> : vector<2x16xf32>
    %537 = tpu.matmul %535, %536, %cst_129 {dimension_numbers = #tpu.dot_dimension_numbers<[1], [0], [0], [1], [0, 0, 1, 1], [], []>} : vector<2x32xf32>, vector<32x16xf32>, vector<2x16xf32> -> vector<2x16xf32>
    %538 = vector.extract_strided_slice %0 {offsets = [1, 0], sizes = [1, 16], strides = [1, 1]} : vector<4x32xf32> to vector<1x16xf32>
    %539 = vector.broadcast %538 : vector<1x16xf32> to vector<2x16xf32>
    %540 = arith.addf %537, %539 : vector<2x16xf32>
    %c0_130 = arith.constant 0 : index
    %c0_131 = arith.constant 0 : index
    %541 = vector.load %arg27[%c0_130, %c0_131] : memref<2x16xf32, #tpu.memory_space<vmem>>, vector<2x16xf32>
    tpu.vector_store %arg27[%c0_130, %c0_131], %540 {strides = array<i32>} : memref<2x16xf32, #tpu.memory_space<vmem>>, vector<2x16xf32>,
    %c0_132 = arith.constant 0 : index
    %c0_133 = arith.constant 0 : index
    %542 = vector.load %arg22[%c0_132, %c0_133] : memref<4x200xf32, #tpu.memory_space<vmem>>, vector<4x200xf32>
    %543 = vector.shape_cast %106 : vector<2x4x8xf32> to vector<8x8xf32>
    %c0_134 = arith.constant 0 : index
    %c0_135 = arith.constant 0 : index
    %544 = vector.load %arg25[%c0_134, %c0_135] : memref<8x200xf32, #tpu.memory_space<vmem>>, vector<8x200xf32>
    %cst_136 = arith.constant dense<0.000000e+00> : vector<8x200xf32>
    %545 = tpu.matmul %543, %544, %cst_136 {dimension_numbers = #tpu.dot_dimension_numbers<[1], [0], [0], [1], [0, 0, 1, 1], [], []>} : vector<8x8xf32>, vector<8x200xf32>, vector<8x200xf32> -> vector<8x200xf32>
    %546 = vector.extract_strided_slice %542 {offsets = [0, 0], sizes = [1, 200], strides = [1, 1]} : vector<4x200xf32> to vector<1x200xf32>
    %547 = vector.broadcast %546 : vector<1x200xf32> to vector<8x200xf32>
    %548 = arith.addf %545, %547 : vector<8x200xf32>
    %cst_137 = arith.constant 0.000000e+00 : f32
    %549 = vector.broadcast %cst_137 : f32 to vector<8x200xf32>
    %550 = arith.maximumf %548, %549 : vector<8x200xf32>
    %c0_138 = arith.constant 0 : index
    %c0_139 = arith.constant 0 : index
    %551 = vector.load %arg26[%c0_138, %c0_139] : memref<200x64xf32, #tpu.memory_space<vmem>>, vector<200x64xf32>
    %cst_140 = arith.constant dense<0.000000e+00> : vector<8x64xf32>
    %552 = tpu.matmul %550, %551, %cst_140 {dimension_numbers = #tpu.dot_dimension_numbers<[1], [0], [0], [1], [0, 0, 1, 1], [], []>} : vector<8x200xf32>, vector<200x64xf32>, vector<8x64xf32> -> vector<8x64xf32>
    %553 = vector.extract_strided_slice %542 {offsets = [1, 0], sizes = [1, 64], strides = [1, 1]} : vector<4x200xf32> to vector<1x64xf32>
    %554 = vector.broadcast %553 : vector<1x64xf32> to vector<8x64xf32>
    %555 = arith.addf %552, %554 : vector<8x64xf32>
    %556 = vector.extract_strided_slice %555 {offsets = [0, 0], sizes = [8, 32], strides = [1, 1]} : vector<8x64xf32> to vector<8x32xf32>
    %557 = vector.extract_strided_slice %555 {offsets = [0, 32], sizes = [8, 32], strides = [1, 1]} : vector<8x64xf32> to vector<8x32xf32>
    %c0_141 = arith.constant 0 : index
    %c0_142 = arith.constant 0 : index
    %c0_143 = arith.constant 0 : index
    %558 = vector.load %arg1[%c0_141, %c0_142, %c0_143] : memref<2x4x32xf32, #tpu.memory_space<vmem>>, vector<2x4x32xf32>
    %559 = vector.shape_cast %558 : vector<2x4x32xf32> to vector<8x32xf32>
    %cst_144 = arith.constant 5.000000e-01 : f32
    %560 = vector.broadcast %cst_144 : f32 to vector<8x32xf32>
    %561 = arith.mulf %560, %557 : vector<8x32xf32>
    %562 = math.exp %561 : vector<8x32xf32>
    %563 = arith.mulf %559, %562 : vector<8x32xf32>
    %564 = arith.addf %556, %563 : vector<8x32xf32>
    %c0_145 = arith.constant 0 : index
    %c0_146 = arith.constant 0 : index
    %565 = vector.load %arg23[%c0_145, %c0_146] : memref<32x200xf32, #tpu.memory_space<vmem>>, vector<32x200xf32>
    %cst_147 = arith.constant dense<0.000000e+00> : vector<8x200xf32>
    %566 = tpu.matmul %564, %565, %cst_147 {dimension_numbers = #tpu.dot_dimension_numbers<[1], [0], [0], [1], [0, 0, 1, 1], [], []>} : vector<8x32xf32>, vector<32x200xf32>, vector<8x200xf32> -> vector<8x200xf32>
    %567 = vector.extract_strided_slice %542 {offsets = [2, 0], sizes = [1, 200], strides = [1, 1]} : vector<4x200xf32> to vector<1x200xf32>
    %568 = vector.broadcast %567 : vector<1x200xf32> to vector<8x200xf32>
    %569 = arith.addf %566, %568 : vector<8x200xf32>
    %cst_148 = arith.constant 0.000000e+00 : f32
    %570 = vector.broadcast %cst_148 : f32 to vector<8x200xf32>
    %571 = arith.maximumf %569, %570 : vector<8x200xf32>
    %c0_149 = arith.constant 0 : index
    %c0_150 = arith.constant 0 : index
    %572 = vector.load %arg24[%c0_149, %c0_150] : memref<200x8xf32, #tpu.memory_space<vmem>>, vector<200x8xf32>
    %cst_151 = arith.constant dense<0.000000e+00> : vector<8x8xf32>
    %573 = tpu.matmul %571, %572, %cst_151 {dimension_numbers = #tpu.dot_dimension_numbers<[1], [0], [0], [1], [0, 0, 1, 1], [], []>} : vector<8x200xf32>, vector<200x8xf32>, vector<8x8xf32> -> vector<8x8xf32>
    %574 = vector.extract_strided_slice %542 {offsets = [3, 0], sizes = [1, 8], strides = [1, 1]} : vector<4x200xf32> to vector<1x8xf32>
    %575 = vector.broadcast %574 : vector<1x8xf32> to vector<8x8xf32>
    %576 = arith.addf %573, %575 : vector<8x8xf32>
    %577 = arith.negf %576 : vector<8x8xf32>
    %578 = math.exp %577 : vector<8x8xf32>
    %cst_152 = arith.constant 1.000000e+00 : f32
    %579 = vector.broadcast %cst_152 : f32 to vector<8x8xf32>
    %580 = arith.addf %579, %578 : vector<8x8xf32>
    %581 = arith.divf %579, %580 : vector<8x8xf32>
    %582 = vector.shape_cast %581 : vector<8x8xf32> to vector<2x4x8xf32>
    %583 = tpu.transpose %582, [0, 2, 1] : vector<2x4x8xf32> -> vector<2x8x4xf32>
    %584 = vector.extract_strided_slice %14 {offsets = [4, 0, 0, 0], sizes = [4, 2, 4, 4], strides = [1, 1, 1, 1]} : vector<8x2x4x4xf32> to vector<4x2x4x4xf32>
    %585 = vector.extract_strided_slice %15 {offsets = [4, 0], sizes = [4, 4], strides = [1, 1]} : vector<8x4xf32> to vector<4x4xf32>
    %586 = vector.extract_strided_slice %16 {offsets = [1, 0, 0], sizes = [1, 4, 4], strides = [1, 1, 1]} : vector<2x4x4xf32> to vector<1x4x4xf32>
    %587 = vector.shape_cast %586 : vector<1x4x4xf32> to vector<4x4xf32>
    %588 = vector.extract_strided_slice %17 {offsets = [1, 0], sizes = [1, 4], strides = [1, 1]} : vector<2x4xf32> to vector<1x4xf32>
    %cst_153 = arith.constant 0.000000e+00 : f32
    %589 = vector.broadcast %cst_153 : f32 to vector<2x1x4xf32>
    %590 = vector.extract_strided_slice %583 {offsets = [0, 0, 0], sizes = [2, 7, 4], strides = [1, 1, 1]} : vector<2x8x4xf32> to vector<2x7x4xf32>
    %591 = tpu.concatenate %589, %590 in 1 : vector<2x1x4xf32>, vector<2x7x4xf32> -> vector<2x8x4xf32>
    %592 = vector.shape_cast %591 : vector<2x8x4xf32> to vector<16x4xf32>
    %593 = vector.extract_strided_slice %584 {offsets = [0, 0, 0, 0], sizes = [1, 1, 4, 4], strides = [1, 1, 1, 1]} : vector<4x2x4x4xf32> to vector<1x1x4x4xf32>
    %594 = vector.shape_cast %593 : vector<1x1x4x4xf32> to vector<4x4xf32>
    %cst_154 = arith.constant dense<0.000000e+00> : vector<16x4xf32>
    %595 = tpu.matmul %592, %594, %cst_154 {dimension_numbers = #tpu.dot_dimension_numbers<[1], [0], [0], [1], [0, 0, 1, 1], [], []>} : vector<16x4xf32>, vector<4x4xf32>, vector<16x4xf32> -> vector<16x4xf32>
    %596 = vector.shape_cast %583 : vector<2x8x4xf32> to vector<16x4xf32>
    %597 = vector.extract_strided_slice %584 {offsets = [0, 1, 0, 0], sizes = [1, 1, 4, 4], strides = [1, 1, 1, 1]} : vector<4x2x4x4xf32> to vector<1x1x4x4xf32>
    %598 = vector.shape_cast %597 : vector<1x1x4x4xf32> to vector<4x4xf32>
    %cst_155 = arith.constant dense<0.000000e+00> : vector<16x4xf32>
    %599 = tpu.matmul %596, %598, %cst_155 {dimension_numbers = #tpu.dot_dimension_numbers<[1], [0], [0], [1], [0, 0, 1, 1], [], []>} : vector<16x4xf32>, vector<4x4xf32>, vector<16x4xf32> -> vector<16x4xf32>
    %600 = arith.addf %595, %599 : vector<16x4xf32>
    %601 = vector.extract_strided_slice %585 {offsets = [0, 0], sizes = [1, 4], strides = [1, 1]} : vector<4x4xf32> to vector<1x4xf32>
    %602 = vector.broadcast %601 : vector<1x4xf32> to vector<16x4xf32>
    %603 = arith.addf %600, %602 : vector<16x4xf32>
    %604 = vector.shape_cast %603 : vector<16x4xf32> to vector<2x8x4xf32>
    %cst_156 = arith.constant 0.000000e+00 : f32
    %605 = vector.broadcast %cst_156 : f32 to vector<2x8x4xf32>
    %606 = arith.maximumf %604, %605 : vector<2x8x4xf32>
    %cst_157 = arith.constant 0.000000e+00 : f32
    %607 = vector.broadcast %cst_157 : f32 to vector<2x1x4xf32>
    %608 = vector.extract_strided_slice %606 {offsets = [0, 0, 0], sizes = [2, 7, 4], strides = [1, 1, 1]} : vector<2x8x4xf32> to vector<2x7x4xf32>
    %609 = tpu.concatenate %607, %608 in 1 : vector<2x1x4xf32>, vector<2x7x4xf32> -> vector<2x8x4xf32>
    %610 = vector.shape_cast %609 : vector<2x8x4xf32> to vector<16x4xf32>
    %611 = vector.extract_strided_slice %584 {offsets = [1, 0, 0, 0], sizes = [1, 1, 4, 4], strides = [1, 1, 1, 1]} : vector<4x2x4x4xf32> to vector<1x1x4x4xf32>
    %612 = vector.shape_cast %611 : vector<1x1x4x4xf32> to vector<4x4xf32>
    %cst_158 = arith.constant dense<0.000000e+00> : vector<16x4xf32>
    %613 = tpu.matmul %610, %612, %cst_158 {dimension_numbers = #tpu.dot_dimension_numbers<[1], [0], [0], [1], [0, 0, 1, 1], [], []>} : vector<16x4xf32>, vector<4x4xf32>, vector<16x4xf32> -> vector<16x4xf32>
    %614 = vector.shape_cast %606 : vector<2x8x4xf32> to vector<16x4xf32>
    %615 = vector.extract_strided_slice %584 {offsets = [1, 1, 0, 0], sizes = [1, 1, 4, 4], strides = [1, 1, 1, 1]} : vector<4x2x4x4xf32> to vector<1x1x4x4xf32>
    %616 = vector.shape_cast %615 : vector<1x1x4x4xf32> to vector<4x4xf32>
    %cst_159 = arith.constant dense<0.000000e+00> : vector<16x4xf32>
    %617 = tpu.matmul %614, %616, %cst_159 {dimension_numbers = #tpu.dot_dimension_numbers<[1], [0], [0], [1], [0, 0, 1, 1], [], []>} : vector<16x4xf32>, vector<4x4xf32>, vector<16x4xf32> -> vector<16x4xf32>
    %618 = arith.addf %613, %617 : vector<16x4xf32>
    %619 = vector.extract_strided_slice %585 {offsets = [1, 0], sizes = [1, 4], strides = [1, 1]} : vector<4x4xf32> to vector<1x4xf32>
    %620 = vector.broadcast %619 : vector<1x4xf32> to vector<16x4xf32>
    %621 = arith.addf %618, %620 : vector<16x4xf32>
    %622 = vector.shape_cast %621 : vector<16x4xf32> to vector<2x8x4xf32>
    %cst_160 = arith.constant 0.000000e+00 : f32
    %623 = vector.broadcast %cst_160 : f32 to vector<2x8x4xf32>
    %624 = arith.maximumf %622, %623 : vector<2x8x4xf32>
    %625 = arith.addf %624, %583 : vector<2x8x4xf32>
    %cst_161 = arith.constant 0.000000e+00 : f32
    %626 = vector.broadcast %cst_161 : f32 to vector<2x8x4xf32>
    %627 = arith.maximumf %625, %626 : vector<2x8x4xf32>
    %cst_162 = arith.constant 0.000000e+00 : f32
    %628 = vector.broadcast %cst_162 : f32 to vector<2x2x4xf32>
    %629 = vector.extract_strided_slice %627 {offsets = [0, 0, 0], sizes = [2, 6, 4], strides = [1, 1, 1]} : vector<2x8x4xf32> to vector<2x6x4xf32>
    %630 = tpu.concatenate %628, %629 in 1 : vector<2x2x4xf32>, vector<2x6x4xf32> -> vector<2x8x4xf32>
    %631 = vector.shape_cast %630 : vector<2x8x4xf32> to vector<16x4xf32>
    %632 = vector.extract_strided_slice %584 {offsets = [2, 0, 0, 0], sizes = [1, 1, 4, 4], strides = [1, 1, 1, 1]} : vector<4x2x4x4xf32> to vector<1x1x4x4xf32>
    %633 = vector.shape_cast %632 : vector<1x1x4x4xf32> to vector<4x4xf32>
    %cst_163 = arith.constant dense<0.000000e+00> : vector<16x4xf32>
    %634 = tpu.matmul %631, %633, %cst_163 {dimension_numbers = #tpu.dot_dimension_numbers<[1], [0], [0], [1], [0, 0, 1, 1], [], []>} : vector<16x4xf32>, vector<4x4xf32>, vector<16x4xf32> -> vector<16x4xf32>
    %635 = vector.shape_cast %627 : vector<2x8x4xf32> to vector<16x4xf32>
    %636 = vector.extract_strided_slice %584 {offsets = [2, 1, 0, 0], sizes = [1, 1, 4, 4], strides = [1, 1, 1, 1]} : vector<4x2x4x4xf32> to vector<1x1x4x4xf32>
    %637 = vector.shape_cast %636 : vector<1x1x4x4xf32> to vector<4x4xf32>
    %cst_164 = arith.constant dense<0.000000e+00> : vector<16x4xf32>
    %638 = tpu.matmul %635, %637, %cst_164 {dimension_numbers = #tpu.dot_dimension_numbers<[1], [0], [0], [1], [0, 0, 1, 1], [], []>} : vector<16x4xf32>, vector<4x4xf32>, vector<16x4xf32> -> vector<16x4xf32>
    %639 = arith.addf %634, %638 : vector<16x4xf32>
    %640 = vector.extract_strided_slice %585 {offsets = [2, 0], sizes = [1, 4], strides = [1, 1]} : vector<4x4xf32> to vector<1x4xf32>
    %641 = vector.broadcast %640 : vector<1x4xf32> to vector<16x4xf32>
    %642 = arith.addf %639, %641 : vector<16x4xf32>
    %643 = vector.shape_cast %642 : vector<16x4xf32> to vector<2x8x4xf32>
    %cst_165 = arith.constant 0.000000e+00 : f32
    %644 = vector.broadcast %cst_165 : f32 to vector<2x8x4xf32>
    %645 = arith.maximumf %643, %644 : vector<2x8x4xf32>
    %cst_166 = arith.constant 0.000000e+00 : f32
    %646 = vector.broadcast %cst_166 : f32 to vector<2x2x4xf32>
    %647 = vector.extract_strided_slice %645 {offsets = [0, 0, 0], sizes = [2, 6, 4], strides = [1, 1, 1]} : vector<2x8x4xf32> to vector<2x6x4xf32>
    %648 = tpu.concatenate %646, %647 in 1 : vector<2x2x4xf32>, vector<2x6x4xf32> -> vector<2x8x4xf32>
    %649 = vector.shape_cast %648 : vector<2x8x4xf32> to vector<16x4xf32>
    %650 = vector.extract_strided_slice %584 {offsets = [3, 0, 0, 0], sizes = [1, 1, 4, 4], strides = [1, 1, 1, 1]} : vector<4x2x4x4xf32> to vector<1x1x4x4xf32>
    %651 = vector.shape_cast %650 : vector<1x1x4x4xf32> to vector<4x4xf32>
    %cst_167 = arith.constant dense<0.000000e+00> : vector<16x4xf32>
    %652 = tpu.matmul %649, %651, %cst_167 {dimension_numbers = #tpu.dot_dimension_numbers<[1], [0], [0], [1], [0, 0, 1, 1], [], []>} : vector<16x4xf32>, vector<4x4xf32>, vector<16x4xf32> -> vector<16x4xf32>
    %653 = vector.shape_cast %645 : vector<2x8x4xf32> to vector<16x4xf32>
    %654 = vector.extract_strided_slice %584 {offsets = [3, 1, 0, 0], sizes = [1, 1, 4, 4], strides = [1, 1, 1, 1]} : vector<4x2x4x4xf32> to vector<1x1x4x4xf32>
    %655 = vector.shape_cast %654 : vector<1x1x4x4xf32> to vector<4x4xf32>
    %cst_168 = arith.constant dense<0.000000e+00> : vector<16x4xf32>
    %656 = tpu.matmul %653, %655, %cst_168 {dimension_numbers = #tpu.dot_dimension_numbers<[1], [0], [0], [1], [0, 0, 1, 1], [], []>} : vector<16x4xf32>, vector<4x4xf32>, vector<16x4xf32> -> vector<16x4xf32>
    %657 = arith.addf %652, %656 : vector<16x4xf32>
    %658 = vector.extract_strided_slice %585 {offsets = [3, 0], sizes = [1, 4], strides = [1, 1]} : vector<4x4xf32> to vector<1x4xf32>
    %659 = vector.broadcast %658 : vector<1x4xf32> to vector<16x4xf32>
    %660 = arith.addf %657, %659 : vector<16x4xf32>
    %661 = vector.shape_cast %660 : vector<16x4xf32> to vector<2x8x4xf32>
    %cst_169 = arith.constant 0.000000e+00 : f32
    %662 = vector.broadcast %cst_169 : f32 to vector<2x8x4xf32>
    %663 = arith.maximumf %661, %662 : vector<2x8x4xf32>
    %664 = arith.addf %663, %627 : vector<2x8x4xf32>
    %cst_170 = arith.constant 0.000000e+00 : f32
    %665 = vector.broadcast %cst_170 : f32 to vector<2x8x4xf32>
    %666 = arith.maximumf %664, %665 : vector<2x8x4xf32>
    %667 = vector.shape_cast %666 : vector<2x8x4xf32> to vector<16x4xf32>
    %cst_171 = arith.constant dense<0.000000e+00> : vector<16x4xf32>
    %668 = tpu.matmul %667, %587, %cst_171 {dimension_numbers = #tpu.dot_dimension_numbers<[1], [0], [0], [1], [0, 0, 1, 1], [], []>} : vector<16x4xf32>, vector<4x4xf32>, vector<16x4xf32> -> vector<16x4xf32>
    %669 = vector.broadcast %588 : vector<1x4xf32> to vector<16x4xf32>
    %670 = arith.addf %668, %669 : vector<16x4xf32>
    %671 = vector.shape_cast %670 : vector<16x4xf32> to vector<2x8x4xf32>
    %672 = vector.shape_cast %671 : vector<2x8x4xf32> to vector<16x4xf32>
    %c0_172 = arith.constant 0 : index
    %c0_173 = arith.constant 0 : index
    %673 = vector.load %arg3[%c0_172, %c0_173] : memref<4x16xf32, #tpu.memory_space<vmem>>, vector<4x16xf32>
    %cst_174 = arith.constant dense<0.000000e+00> : vector<16x16xf32>
    %674 = tpu.matmul %672, %673, %cst_174 {dimension_numbers = #tpu.dot_dimension_numbers<[1], [0], [0], [1], [0, 0, 1, 1], [], []>} : vector<16x4xf32>, vector<4x16xf32>, vector<16x16xf32> -> vector<16x16xf32>
    %675 = vector.extract_strided_slice %0 {offsets = [2, 0], sizes = [1, 16], strides = [1, 1]} : vector<4x32xf32> to vector<1x16xf32>
    %676 = vector.broadcast %675 : vector<1x16xf32> to vector<16x16xf32>
    %677 = arith.addf %674, %676 : vector<16x16xf32>
    %cst_175 = arith.constant 0.000000e+00 : f32
    %678 = vector.broadcast %cst_175 : f32 to vector<16x16xf32>
    %679 = arith.cmpf ogt, %677, %678 : vector<16x16xf32>
    %cst_176 = arith.constant 0.00999999977 : f32
    %680 = vector.broadcast %cst_176 : f32 to vector<16x16xf32>
    %681 = arith.mulf %680, %677 : vector<16x16xf32>
    %682 = arith.select %679, %677, %681 : vector<16x16xi1>, vector<16x16xf32>
    %683 = vector.shape_cast %682 : vector<16x16xf32> to vector<2x8x16xf32>
    %684 = vector.extract_strided_slice %683 {offsets = [0, 0, 0], sizes = [2, 1, 16], strides = [1, 1, 1]} : vector<2x8x16xf32> to vector<2x1x16xf32>
    %685 = vector.shape_cast %684 : vector<2x1x16xf32> to vector<2x16xf32>
    %c0_177 = arith.constant 0 : index
    %c0_178 = arith.constant 0 : index
    %686 = vector.load %arg28[%c0_177, %c0_178] : memref<2x128xf32, #tpu.memory_space<vmem>>, vector<2x16xf32>
    tpu.vector_store %arg28[%c0_177, %c0_178], %685 {strides = array<i32>} : memref<2x128xf32, #tpu.memory_space<vmem>>, vector<2x16xf32>,
    %687 = vector.extract_strided_slice %683 {offsets = [0, 1, 0], sizes = [2, 1, 16], strides = [1, 1, 1]} : vector<2x8x16xf32> to vector<2x1x16xf32>
    %688 = vector.shape_cast %687 : vector<2x1x16xf32> to vector<2x16xf32>
    %c0_179 = arith.constant 0 : index
    %c16 = arith.constant 16 : index
    %689 = vector.load %arg28[%c0_179, %c16] : memref<2x128xf32, #tpu.memory_space<vmem>>, vector<2x16xf32>
    tpu.vector_store %arg28[%c0_179, %c16], %688 {strides = array<i32>} : memref<2x128xf32, #tpu.memory_space<vmem>>, vector<2x16xf32>,
    %690 = vector.extract_strided_slice %683 {offsets = [0, 2, 0], sizes = [2, 1, 16], strides = [1, 1, 1]} : vector<2x8x16xf32> to vector<2x1x16xf32>
    %691 = vector.shape_cast %690 : vector<2x1x16xf32> to vector<2x16xf32>
    %c0_180 = arith.constant 0 : index
    %c32 = arith.constant 32 : index
    %692 = vector.load %arg28[%c0_180, %c32] : memref<2x128xf32, #tpu.memory_space<vmem>>, vector<2x16xf32>
    tpu.vector_store %arg28[%c0_180, %c32], %691 {strides = array<i32>} : memref<2x128xf32, #tpu.memory_space<vmem>>, vector<2x16xf32>,
    %693 = vector.extract_strided_slice %683 {offsets = [0, 3, 0], sizes = [2, 1, 16], strides = [1, 1, 1]} : vector<2x8x16xf32> to vector<2x1x16xf32>
    %694 = vector.shape_cast %693 : vector<2x1x16xf32> to vector<2x16xf32>
    %c0_181 = arith.constant 0 : index
    %c48 = arith.constant 48 : index
    %695 = vector.load %arg28[%c0_181, %c48] : memref<2x128xf32, #tpu.memory_space<vmem>>, vector<2x16xf32>
    tpu.vector_store %arg28[%c0_181, %c48], %694 {strides = array<i32>} : memref<2x128xf32, #tpu.memory_space<vmem>>, vector<2x16xf32>,
    %696 = vector.extract_strided_slice %683 {offsets = [0, 4, 0], sizes = [2, 1, 16], strides = [1, 1, 1]} : vector<2x8x16xf32> to vector<2x1x16xf32>
    %697 = vector.shape_cast %696 : vector<2x1x16xf32> to vector<2x16xf32>
    %c0_182 = arith.constant 0 : index
    %c64 = arith.constant 64 : index
    %698 = vector.load %arg28[%c0_182, %c64] : memref<2x128xf32, #tpu.memory_space<vmem>>, vector<2x16xf32>
    tpu.vector_store %arg28[%c0_182, %c64], %697 {strides = array<i32>} : memref<2x128xf32, #tpu.memory_space<vmem>>, vector<2x16xf32>,
    %699 = vector.extract_strided_slice %683 {offsets = [0, 5, 0], sizes = [2, 1, 16], strides = [1, 1, 1]} : vector<2x8x16xf32> to vector<2x1x16xf32>
    %700 = vector.shape_cast %699 : vector<2x1x16xf32> to vector<2x16xf32>
    %c0_183 = arith.constant 0 : index
    %c80 = arith.constant 80 : index
    %701 = vector.load %arg28[%c0_183, %c80] : memref<2x128xf32, #tpu.memory_space<vmem>>, vector<2x16xf32>
    tpu.vector_store %arg28[%c0_183, %c80], %700 {strides = array<i32>} : memref<2x128xf32, #tpu.memory_space<vmem>>, vector<2x16xf32>,
    %702 = vector.extract_strided_slice %683 {offsets = [0, 6, 0], sizes = [2, 1, 16], strides = [1, 1, 1]} : vector<2x8x16xf32> to vector<2x1x16xf32>
    %703 = vector.shape_cast %702 : vector<2x1x16xf32> to vector<2x16xf32>
    %c0_184 = arith.constant 0 : index
    %c96 = arith.constant 96 : index
    %704 = vector.load %arg28[%c0_184, %c96] : memref<2x128xf32, #tpu.memory_space<vmem>>, vector<2x16xf32>
    tpu.vector_store %arg28[%c0_184, %c96], %703 {strides = array<i32>} : memref<2x128xf32, #tpu.memory_space<vmem>>, vector<2x16xf32>,
    %705 = vector.extract_strided_slice %683 {offsets = [0, 7, 0], sizes = [2, 1, 16], strides = [1, 1, 1]} : vector<2x8x16xf32> to vector<2x1x16xf32>
    %706 = vector.shape_cast %705 : vector<2x1x16xf32> to vector<2x16xf32>
    %c0_185 = arith.constant 0 : index
    %c112 = arith.constant 112 : index
    %707 = vector.load %arg28[%c0_185, %c112] : memref<2x128xf32, #tpu.memory_space<vmem>>, vector<2x16xf32>
    tpu.vector_store %arg28[%c0_185, %c112], %706 {strides = array<i32>} : memref<2x128xf32, #tpu.memory_space<vmem>>, vector<2x16xf32>,
    return
  }
}

</mosaic_0001>

<bundles_post_ra>
// kernel: mtad_gat_forward.1
= control target key start
LH: loop header
LB: loop body
LE: loop exit
PB: predicated region body
PF: predicated region fallthrough
CT: control target
= control target key end

     0   :  { %s10074_s0 = inlined_call_operand.vmem [shape: f32[2,8,16], index: 0, kind: input, shape index: {}]   ;;  %s10075_s1 = inlined_call_operand.vmem [shape: f32[2,4,32], index: 1, kind: input, shape index: {}]   ;;  %s10076_s2 = inlined_call_operand.vmem [shape: f32[16,4], index: 2, kind: input, shape index: {}]   ;;  %s10077_s3 = inlined_call_operand.vmem [shape: f32[4,16], index: 3, kind: input, shape index: {}]   ;;  %s10078_s4 = inlined_call_operand.vmem [shape: f32[32,32], index: 4, kind: input, shape index: {}]   ;;  %s10079_s5 = inlined_call_operand.vmem [shape: f32[32,16], index: 5, kind: input, shape index: {}]   ;;  %s10080_s6 = inlined_call_operand.vmem [shape: f32[2,16], index: 6, kind: input, shape index: {}]   ;;  %s10081_s7 = inlined_call_operand.vmem [shape: f32[4,4], index: 7, kind: input, shape index: {}]   ;;  %s10082_s8 = inlined_call_operand.vmem [shape: f32[8,32], index: 8, kind: input, shape index: {}]   ;;  %s10083_s9 = inlined_call_operand.vmem [shape: f32[2,96], index: 9, kind: input, shape index: {}]   ;;  %s10084_s10 = inlined_call_operand.vmem [shape: f32[32,96], index: 10, kind: input, shape index: {}]   ;;  %s10085_s11 = inlined_call_operand.vmem [shape: f32[12,96], index: 11, kind: input, shape index: {}]   ;;  %s10086_s12 = inlined_call_operand.vmem [shape: f32[4,32], index: 12, kind: input, shape index: {}]   ;;  %s10087_s13 = inlined_call_operand.vmem [shape: f32[8,4], index: 13, kind: input, shape index: {}]   ;;  %s10088_s14 = inlined_call_operand.vmem [shape: f32[2,4], index: 14, kind: input, shape index: {}]   ;;  %s10089_s15 = inlined_call_operand.vmem [shape: f32[2,4,4], index: 15, kind: input, shape index: {}]   ;;  %s10090_s16 = inlined_call_operand.vmem [shape: f32[8,2,4,4], index: 16, kind: input, shape index: {}]   ;;  %s10091_s17 = inlined_call_operand.vmem [shape: f32[10,10], index: 17, kind: input, shape index: {}]   ;;  %s10092_s18 = inlined_call_operand.vmem [shape: f32[3,2,10,10], index: 18, kind: input, shape index: {}]   ;;  %s10093_s19 = inlined_call_operand.vmem [shape: f32[2,8], index: 19, kind: input, shape index: {}]   ;;  %s10094_s20 = inlined_call_operand.vmem [shape: f32[8,8], index: 20, kind: input, shape index: {}]   ;;  %s10095_s21 = inlined_call_operand.vmem [shape: f32[4,16], index: 21, kind: input, shape index: {}]   ;;  %s10096_s22 = inlined_call_operand.vmem [shape: f32[4,200], index: 22, kind: input, shape index: {}]   ;;  %s10097_s23 = inlined_call_operand.vmem [shape: f32[32,200], index: 23, kind: input, shape index: {}]   ;;  %s10098_s24 = inlined_call_operand.vmem [shape: f32[200,8], index: 24, kind: input, shape index: {}]   ;;  %s10099_s25 = inlined_call_operand.vmem [shape: f32[8,200], index: 25, kind: input, shape index: {}]   ;;  %s10100_s26 = inlined_call_operand.vmem [shape: f32[200,64], index: 26, kind: input, shape index: {}]   ;;  %s10101_s27 = inlined_call_operand.hbm [shape: f32[2,16], index: 27, kind: output, shape index: {0}]   ;;  %s10102_s28 = inlined_call_operand.vmem [shape: f32[2,128], index: 28, kind: output, shape index: {1}]  }
   0x1   :  { %10136 = sst [smem:[#allocation13_spill]] %s10074_s0 }
   0x2   :  { %10137 = sst [smem:[#allocation14_spill]] %s10075_s1 }
   0x3   :  { %10138 = sst [smem:[#allocation15_spill]] %s10076_s2 }
   0x4   :  { %10139 = sst [smem:[#allocation16_spill]] %s10077_s3 }
   0x5   :  { %10140 = sst [smem:[#allocation17_spill]] %s10078_s4 }
   0x6   :  { %10141 = sst [smem:[#allocation18_spill]] %s10079_s5 }
   0x7   :  { %10142 = sst [smem:[#allocation19_spill]] %s10080_s6 }
   0x8   :  { %10143 = sst [smem:[#allocation20_spill]] %s10081_s7 }
   0x9   :  { %10144 = sst [smem:[#allocation21_spill]] %s10082_s8 }
   0xa   :  { %10145 = sst [smem:[#allocation22_spill]] %s10083_s9 }
   0xb   :  { %10146 = sst [smem:[#allocation23_spill]] %s10084_s10 }
   0xc   :  { %10147 = sst [smem:[#allocation24_spill]] %s10085_s11 }
   0xd   :  { %10148 = sst [smem:[#allocation25_spill]] %s10086_s12 }
   0xe   :  { %s10149_s9 = sld [smem:[#allocation15_spill]]  ;;  %vm95_vm0 = vcmask 130048  }
   0xf   :  { %s10150_s0 = sld [smem:[#allocation13_spill]] }
  0x14   :  { %v93_v0 = vld [vmem:[%s10149_s9 + $0x8] sm:$0xff]  ;;  %v92_v1 = vld [vmem:[%s10149_s9] sm:$0xff] }
  0x15   :  { %116 = vmatpush.msra.mxu0 %v93_v0  ;;  %v90_v2 = vld [vmem:[%s10150_s0] sm:$0xff] }
  0x16   :  { %34 = vsyncpa [#allocation3], 0  ;;  %v91_v3 = vld [vmem:[%s10150_s0 + $0x8] sm:$0xff]  ;;  %v132_v4 = vld [vmem:[%s10090_s16 + $0x4] sm:$0xf]  ;;  %vm10124_vm1 = vcmask 1043456  }
  0x17   :  { %117 = vmatpush.msra.mxu0 %v92_v1  ;;  %6026 = vmatpush.msk.msra.mxu1 %vm10124_vm1, %v132_v4  ;;  %v131_v5 = vld [vmem:[%s10090_s16] sm:$0xf]  ;;  %s10151_s5 = sld [smem:[#allocation25_spill]]  ;;  %vm10114_vm3 = vcmask 31744   ;;  %vm10112_vm4 = vcmask 1040384   ;;  %vm10111_vm6 = vcmask 1041408  }
  0x18   :  { %6024 = vmatmul.msk.f32.vlgmr.msra.gmra.mxu0 %vm95_vm0, %v90_v2  ;;  %6029 = vmatpush.msk.msra.mxu2 %vm10124_vm1, %v131_v5  ;;  %v133_v20 = vld [vmem:[%s10090_s16 + $0x8] sm:$0xf]  ;;  %v134_v21 = vld [vmem:[%s10090_s16 + $0xc] sm:$0xf]  ;;  %v6788_v22 = vld [vmem:[%s10087_s13] sm:$0xff]  ;;  %s10152_s10 = sld [smem:[#allocation21_spill]] }
  0x19   :  { %6212 = vmatpush.msk.msra.mxu3 %vm10124_vm1, %v131_v5  ;;  %6035 = vmatpush.msk.msrb.mxu1 %vm10124_vm1, %v133_v20  ;;  %v224_v24 = vperm.slane %v6788_v22, 0  ;;  %v135_v38 = vld [vmem:[%s10090_s16 + $0x10] sm:$0xf]  ;;  %v136_v39 = vld [vmem:[%s10090_s16 + $0x14] sm:$0xf]  ;;  %v299_v43 = vperm.slane %v6788_v22, 1 }
  0x1a   :  { %6038 = vmatpush.msk.msrb.mxu2 %vm10124_vm1, %v136_v39  ;;  %v138_v40 = vld [vmem:[%s10090_s16 + $0x1c] sm:$0xf]  ;;  %v137_v41 = vld [vmem:[%s10090_s16 + $0x18] sm:$0xf]  ;;  %v148_v61 = vld [vmem:[%s10089_s15] sm:$0xf] }
  0x1b   :  { %6032 = vmatpush.msk.msrb.mxu3 %vm10124_vm1, %v134_v21  ;;  %6044 = vmatpush.msk.msrb.mxu0 %vm10124_vm1, %v138_v40  ;;  %v379_v63 = vperm.slane %v6788_v22, 2  ;;  %s6591_s29 = smov 112   ;;  %s6592_s2 = smov 120   ;;  %v454_v21 = vperm.slane %v6788_v22, 3  ;;  %vm10113_vm7 = vcmask 64512   ;;  %vm691_vm8 = vcmask 125952  }
  0x1c   :  { %s10153_s4 = sld [smem:[#allocation20_spill]]  ;;  %s6596_s8 = smov 96  }
  0x1d   :  { %v89_v6 = vld [vmem:[%s10151_s5] sm:$0xf]  ;;  %s10156_s3 = sld [smem:[#allocation19_spill]]  ;;  %s6600_s1 = smov 80  }
  0x1e   :  { %v94_v7 = vperm.slane %v89_v6, 3  ;;  %s10210_s11 = sld [smem:[#allocation23_spill]]  ;;  %s6601_s6 = smov [#allocation2]  }
  0x1f   :  { %s10281_s9 = sld [smem:[#allocation24_spill]] }
  0x20   :  { %6025 = vmatmul.msk.f32.gmra.mxu0 %vm95_vm0, %v91_v3 }
  0x95   :  { %v119_v8 = vpop.f32.mrf.mxu0 }
  0x96   :  { %v120_v9 = vadd.f32 %v119_v8, %v94_v7 }
  0x98   :  { %vm125_vm2 = vcmp.gt.f32.partialorder %v120_v9, 0.0  ;;  %v127_v10 = vmul.f32 0.01, %v120_v9 }
  0x9a   :  { %v129_v11 = vsel %vm125_vm2, %v120_v9, %v127_v10 }
  0x9b   :  { %6027 = vmatmul.msk.f32.vlgmr.msra.gmra.mxu1 %vm10114_vm3, %v129_v11  ;;  %v153_v12 = vrot.slane %v129_v11, 7 }
  0x9c   :  { %6047 = vmatpush.msk.msra.mxu1 %vm10124_vm1, %v137_v41 }
  0x9d   :  { %v122_v13 = vpop.f32.mrf.mxu0  ;;  %v158_v14 = vsel %vm10112_vm4, 0.0, %v153_v12 }
  0x9e   :  { %v123_v15 = vadd.f32 %v122_v13, %v94_v7  ;;  %6030 = vmatmul.msk.f32.vlgmr.msra.gmra.mxu2 %vm10114_vm3, %v158_v14  ;;  %v718_v13 = vlaneseq  ;;  %v560_v14 = vld [vmem:[%s10152_s10] sm:$0xff]  ;;  %s6009_s10 = sshll.u32 %s6601_s6, 4  ;;  %s6010_s10 = int_to_ptr.vmem [resolvable:$true] %s6009_s10 }
  0x9f   :  { %6050 = vmatpush.msk.msra.mxu2 %vm10124_vm1, %v148_v61  ;;  %598 = vrot.lane.b32.xlu0 %v560_v14, %s6591_s29 }
  0xa0   :  { %vm126_vm5 = vcmp.gt.f32.partialorder %v123_v15, 0.0  ;;  %v128_v16 = vmul.f32 0.01, %v123_v15 }
  0xa2   :  { %v130_v17 = vsel %vm126_vm5, %v123_v15, %v128_v16  ;;  %v1051_v15 = vld [vmem:[%s10095_s21] sm:$0xf]  ;;  %v719_v16 = vshrl.u32 %v718_v13, 7  ;;  %s10470_s21 = sld [smem:[#allocation16_spill]] }
  0xa3   :  { %6028 = vmatmul.msk.f32.gmra.mxu1 %vm10114_vm3, %v130_v17  ;;  %v154_v18 = vrot.slane %v130_v17, 7  ;;  %1087 = vrot.lane.b32.xlu1 %v1051_v15, %s6592_s2 }
  0xa4   :  { %6227 = vset.pattern.permute.xlu0 %v719_v16  ;;  %6228 = vset.pattern.permute.xlu1 %v719_v16 }
  0xa5   :  { %v159_v19 = vsel %vm10112_vm4, 0.0, %v154_v18  ;;  %6226 = vset.pattern.permute.xlu2 %v719_v16 }
  0xa6   :  { %6031 = vmatmul.msk.f32.vlgmr.msra.gmra.mxu3 %vm10114_vm3, %v159_v19 }
  0xa7   :  { %6041 = vmatpush.msk.msra.mxu3 %vm10124_vm1, %v135_v38 }
 0x111   :  { %v599_v40 = vpop.permute.xlu0 %598 }
 0x112   :  { %618 = vmatpush.msra.mxu0 %v599_v40 }
 0x118   :  { %v186_v23 = vpop.f32.mrf.mxu1 }
 0x120   :  { %v189_v30 = vpop.f32.mrf.mxu1 }
 0x121   :  { %v218_v25 = vpop.f32.mrf.mxu2 }
 0x122   :  { %v219_v26 = vadd.f32 %v218_v25, %v186_v23  ;;  %v562_v25 = vld [vmem:[%s10153_s4] sm:$0xf]  ;;  %s10366_s4 = sld [smem:[#allocation22_spill]] }
 0x123   :  { %v738_v39 = vperm.slane %v562_v25, 3 }
 0x124   :  { %v225_v27 = vadd.f32 %v224_v24, %v219_v26 }
 0x126   :  { %v227_v28 = vmax.f32 %v225_v27, 0.0 }
 0x128   :  { %6033 = vmatmul.msk.f32.vlgmr.msrb.gmra.mxu3 %vm10114_vm3, %v227_v28  ;;  %v231_v29 = vrot.slane %v227_v28, 7  ;;  %v717_v28 = vperm.slane %v562_v25, 0 }
 0x129   :  { %v221_v31 = vpop.f32.mrf.mxu3  ;;  %588 = vmatpush.msrb.mxu3 %v560_v14 }
 0x12a   :  { %v222_v32 = vadd.f32 %v221_v31, %v189_v30  ;;  %v235_v33 = vsel %vm10112_vm4, 0.0, %v231_v29 }
 0x12b   :  { %6036 = vmatmul.msk.f32.vlgmr.msrb.gmra.mxu1 %vm10114_vm3, %v235_v33 }
 0x12c   :  { %v226_v34 = vadd.f32 %v224_v24, %v222_v32 }
 0x12e   :  { %v228_v35 = vmax.f32 %v226_v34, 0.0 }
 0x130   :  { %6034 = vmatmul.msk.f32.gmra.mxu3 %vm10114_vm3, %v228_v35  ;;  %v232_v36 = vrot.slane %v228_v35, 7  ;;  %v724_v35 = vperm.slane %v562_v25, 1 }
 0x132   :  { %v236_v37 = vsel %vm10112_vm4, 0.0, %v232_v36 }
 0x133   :  { %6037 = vmatmul.msk.f32.gmra.mxu1 %vm10114_vm3, %v236_v37 }
 0x1a8   :  { %v293_v42 = vpop.f32.mrf.mxu1 }
 0x1ab   :  { %v261_v44 = vpop.f32.mrf.mxu3 }
 0x1ac   :  { %v294_v45 = vadd.f32 %v293_v42, %v261_v44  ;;  %v1088_v42 = vpop.permute.xlu1 %1087 }
 0x1ae   :  { %v300_v46 = vadd.f32 %v299_v43, %v294_v45  ;;  %v150_v45 = vld [vmem:[%s10088_s14] sm:$0x3] }
 0x1b0   :  { %v302_v47 = vmax.f32 %v300_v46, 0.0  ;;  %v296_v49 = vpop.f32.mrf.mxu1  ;;  %v463_v46 = vperm.slane %v150_v45, 0 }
 0x1b2   :  { %v304_v48 = vadd.f32 %v302_v47, %v129_v11 }
 0x1b3   :  { %v264_v50 = vpop.f32.mrf.mxu3 }
 0x1b4   :  { %v6814_v51 = vmax.f32 %v304_v48, 0.0  ;;  %v297_v52 = vadd.f32 %v296_v49, %v264_v50 }
 0x1b6   :  { %v301_v53 = vadd.f32 %v299_v43, %v297_v52  ;;  %6039 = vmatmul.msk.f32.vlgmr.msrb.gmra.mxu2 %vm10114_vm3, %v6814_v51  ;;  %v310_v54 = vrot.slane %v6814_v51, 6 }
 0x1b8   :  { %v303_v55 = vmax.f32 %v301_v53, 0.0  ;;  %v315_v56 = vsel %vm10111_vm6, 0.0, %v310_v54  ;;  %v731_v53 = vperm.slane %v562_v25, 2 }
 0x1b9   :  { %6042 = vmatmul.msk.f32.vlgmr.msra.gmra.mxu3 %vm10114_vm3, %v315_v56 }
 0x1ba   :  { %v305_v57 = vadd.f32 %v303_v55, %v130_v17  ;;  %6055 = vmatpush.msk.msra.mxu3 %vm10124_vm1, %v1051_v15  ;;  %v1053_v17 = vld [vmem:[%s10094_s20] sm:$0xff]  ;;  %s6595_s20 = smov 64  }
 0x1bb   :  { %v1299_v18 = vperm.slane %v1053_v17, 1  ;;  %v1320_v19 = vperm.slane %v1053_v17, 4  ;;  %v1341_v27 = vperm.slane %v1053_v17, 7  ;;  %v1292_v41 = vperm.slane %v1053_v17, 0 }
 0x1bc   :  { %v6821_v58 = vmax.f32 %v305_v57, 0.0  ;;  %v1306_v43 = vperm.slane %v1053_v17, 2  ;;  %v1313_v44 = vperm.slane %v1053_v17, 3  ;;  %v1327_v49 = vperm.slane %v1053_v17, 5 }
 0x1bd   :  { %1304 = vperm.xlu0 %6227, %v1299_v18   ;;  %1325 = vperm.xlu1 %6228, %v1320_v19   ;;  %v1334_v52 = vperm.slane %v1053_v17, 6 }
 0x1be   :  { %6040 = vmatmul.msk.f32.gmra.mxu2 %vm10114_vm3, %v6821_v58  ;;  %v311_v59 = vrot.slane %v6821_v58, 6  ;;  %1297 = vperm.xlu2 %6226, %v1292_v41  }
 0x1c0   :  { %v316_v60 = vsel %vm10111_vm6, 0.0, %v311_v59 }
 0x1c1   :  { %6043 = vmatmul.msk.f32.gmra.mxu3 %vm10114_vm3, %v316_v60 }
 0x1c5   :  { %1346 = vperm.xlu0 %6227, %v1341_v27   ;;  %722 = vperm.xlu1 %6228, %v717_v28  }
 0x1c6   :  { %1311 = vperm.xlu2 %6226, %v1306_v43  }
 0x1cd   :  { %729 = vperm.xlu0 %6227, %v724_v35  }
 0x1ce   :  { %1318 = vperm.xlu2 %6226, %v1313_v44  }
 0x1d5   :  { %743 = vperm.xlu0 %6227, %v738_v39  }
 0x1d6   :  { %1332 = vperm.xlu2 %6226, %v1327_v49  }
 0x1de   :  { %1339 = vperm.xlu2 %6226, %v1334_v52  }
 0x1e6   :  { %736 = vperm.xlu2 %6226, %v731_v53  }
 0x22f   :  { %v6869_v54 = vpop.permute.xlu0 %1304  ;;  %v6875_v57 = vpop.permute.xlu1 %1325 }
 0x237   :  { %v6871_v55 = vpop.permute.xlu0 %1346  ;;  %v6879_v59 = vpop.permute.xlu1 %722 }
 0x239   :  { %v341_v62 = vpop.f32.mrf.mxu2 }
 0x23c   :  { %v373_v0 = vpop.f32.mrf.mxu3 }
 0x23d   :  { %v374_v1 = vadd.f32 %v373_v0, %v341_v62 }
 0x23f   :  { %v380_v2 = vadd.f32 %v379_v63, %v374_v1  ;;  %v6873_v56 = vpop.permute.xlu0 %729 }
 0x241   :  { %v382_v3 = vmax.f32 %v380_v2, 0.0  ;;  %v344_v5 = vpop.f32.mrf.mxu2 }
 0x243   :  { %v386_v4 = vrot.slane %v382_v3, 6  ;;  %6045 = vmatmul.msk.f32.vlgmr.msrb.gmra.mxu0 %vm10114_vm3, %v382_v3 }
 0x244   :  { %v376_v6 = vpop.f32.mrf.mxu3  ;;  %6058 = vmatpush.msk.msrb.mxu0 %vm10124_vm1, %v1088_v42 }
 0x245   :  { %v377_v7 = vadd.f32 %v376_v6, %v344_v5  ;;  %v390_v8 = vsel %vm10111_vm6, 0.0, %v386_v4 }
 0x246   :  { %6048 = vmatmul.msk.f32.vlgmr.msra.gmra.mxu1 %vm10114_vm3, %v390_v8  ;;  %v561_v8 = vld [vmem:[%s10156_s3] sm:$0x3] }
 0x247   :  { %v381_v9 = vadd.f32 %v379_v63, %v377_v7  ;;  %v6906_v28 = vperm.slane %v561_v8, 1 }
 0x249   :  { %v383_v10 = vmax.f32 %v381_v9, 0.0  ;;  %v563_v9 = vperm.slane %v561_v8, 0 }
 0x24b   :  { %6046 = vmatmul.msk.f32.gmra.mxu0 %vm10114_vm3, %v383_v10  ;;  %v387_v11 = vrot.slane %v383_v10, 6 }
 0x24d   :  { %v391_v12 = vsel %vm10111_vm6, 0.0, %v387_v11 }
 0x24e   :  { %6049 = vmatmul.msk.f32.gmra.mxu1 %vm10114_vm3, %v391_v12  ;;  %v1052_v12 = vld [vmem:[%s10093_s19] sm:$0x3] }
 0x24f   :  { %v1054_v19 = vperm.slane %v1052_v12, 0 }
 0x2c0   :  { %v416_v20 = vpop.f32.mrf.mxu0 }
 0x2c3   :  { %v448_v23 = vpop.f32.mrf.mxu1 }
 0x2c4   :  { %v449_v24 = vadd.f32 %v448_v23, %v416_v20 }
 0x2c6   :  { %v455_v26 = vadd.f32 %v454_v21, %v449_v24 }
 0x2c8   :  { %v457_v29 = vmax.f32 %v455_v26, 0.0  ;;  %v419_v31 = vpop.f32.mrf.mxu0 }
 0x2ca   :  { %v459_v30 = vadd.f32 %v457_v29, %v6814_v51 }
 0x2cb   :  { %v451_v32 = vpop.f32.mrf.mxu1 }
 0x2cc   :  { %v461_v33 = vmax.f32 %v459_v30, 0.0  ;;  %v452_v22 = vadd.f32 %v451_v32, %v419_v31 }
 0x2ce   :  { %v456_v34 = vadd.f32 %v454_v21, %v452_v22  ;;  %6051 = vmatmul.msk.f32.vlgmr.msra.gmra.mxu2 %vm10114_vm3, %v461_v33 }
 0x2d0   :  { %v458_v36 = vmax.f32 %v456_v34, 0.0 }
 0x2d2   :  { %v460_v37 = vadd.f32 %v458_v36, %v6821_v58  ;;  %v6877_v58 = vpop.permute.xlu0 %743 }
 0x2d4   :  { %v462_v38 = vmax.f32 %v460_v37, 0.0 }
 0x2d6   :  { %6052 = vmatmul.msk.f32.gmra.mxu2 %vm10114_vm3, %v462_v38 }
 0x351   :  { %v490_v47 = vpop.f32.mrf.mxu2 }
 0x352   :  { %v6863_v48 = vadd.f32 %v490_v47, %v463_v46 }
 0x354   :  { %10154 = vst [vmem:[#allocation5_spill] sm:$0xff] %v6863_v48  ;;  %496 = vxpose.xlu0.b32.start.end [1/1] (short) (narrow) %v6863_v48, 8 }
 0x359   :  { %v493_v50 = vpop.f32.mrf.mxu2 }
 0x35a   :  { %v6866_v51 = vadd.f32 %v493_v50, %v463_v46 }
 0x35c   :  { %10155 = vst [vmem:[#allocation6_spill] sm:$0xff] %v6866_v51  ;;  %528 = vxpose.xlu1.b32.start.end [1/1] (short) (narrow) %v6866_v51, 8 }
 0x3f8   :  { %v512_v60 = vpop.trf.xlu0 }
 0x3f9   :  { %566 = vst [vmem:[#allocation1] ss:$2 sm:$0xff] %v512_v60  ;;  %v2412_v61 = vperm.slane %v512_v60, 2  ;;  %v2405_v62 = vperm.slane %v512_v60, 1  ;;  %v2398_v63 = vperm.slane %v512_v60, 0  ;;  %v2419_v0 = vperm.slane %v512_v60, 3 }
 0x3fb   :  { %2417 = vperm.xlu1 %6228, %v2412_v61   ;;  %2410 = vperm.xlu2 %6226, %v2405_v62  }
 0x3fc   :  { %2403 = vperm.xlu0 %6227, %v2398_v63  }
 0x400   :  { %v544_v1 = vpop.trf.xlu1 }
 0x401   :  { %568 = vst [vmem:[#allocation1 + $0x1] ss:$2 sm:$0xff] %v544_v1  ;;  %v2426_v2 = vperm.slane %v544_v1, 0  ;;  %v2447_v3 = vperm.slane %v544_v1, 3  ;;  %v2440_v5 = vperm.slane %v544_v1, 2  ;;  %v2433_v6 = vperm.slane %v544_v1, 1 }
 0x403   :  { %2431 = vperm.xlu1 %6228, %v2426_v2   ;;  %2424 = vperm.xlu2 %6226, %v2419_v0  }
 0x404   :  { %2452 = vperm.xlu0 %6227, %v2447_v3  }
 0x408   :  { %v569_v4 = vld.sshfl [vmem:[#allocation1] sm:$0xff pattern:$0x75316420] }
 0x409   :  { %6053 = vmatmul.msk.f32.vlgmr.msrb.gmra.mxu3 %vm10113_vm7, %v569_v4  ;;  %593 = vst [vmem:[#allocation1] ss:$2 sm:$0xff] %v512_v60 }
 0x40a   :  { %595 = vst [vmem:[#allocation1 + $0x1] ss:$2 sm:$0xff] %v544_v1 }
 0x40b   :  { %2445 = vperm.xlu1 %6228, %v2440_v5   ;;  %2438 = vperm.xlu2 %6226, %v2433_v6   ;;  %v6927_v5 = vperm.slane %v1052_v12, 1 }
 0x411   :  { %v596_v7 = vld.sshfl [vmem:[#allocation1] sm:$0xff pattern:$0x75316420]  ;;  %6056 = vmatmul.msk.f32.vlgmr.msra.gmra.mxu3 %vm10114_vm3, %v6863_v48 }
 0x412   :  { %6054 = vmatmul.msk.f32.vlgmr.msra.gmra.mxu0 %vm10113_vm7, %v596_v7  ;;  %5216 = vst [vmem:[#allocation1] ss:$2 sm:$0xff] %v512_v60 }
 0x413   :  { %5218 = vst [vmem:[#allocation1 + $0x1] ss:$2 sm:$0xff] %v544_v1 }
 0x419   :  { %6057 = vmatmul.msk.f32.gmra.mxu3 %vm10114_vm3, %v6866_v51 }
 0x41a   :  { %6059 = vmatmul.msk.f32.vlgmr.msrb.gmra.mxu0 %vm10114_vm3, %v6863_v48 }
 0x422   :  { %6060 = vmatmul.msk.f32.gmra.mxu0 %vm10114_vm3, %v6866_v51 }
 0x48c   :  { %v590_v10 = vpop.f32.mrf.mxu3 }
 0x48d   :  { %v6894_v11 = vadd.f32 %v590_v10, %v563_v9 }
 0x48f   :  { %v620_v14 = vpop.f32.mrf.mxu0  ;;  %v634_v15 = vperm.slane %v6894_v11, 0  ;;  %v625_v16 = vrot.slane %v6894_v11, 2  ;;  %v624_v17 = vrot.slane %v6894_v11, 1  ;;  %v626_v18 = vrot.slane %v6894_v11, 3 }
 0x490   :  { %v627_v20 = vrot.slane %v6894_v11, 4  ;;  %v628_v21 = vrot.slane %v6894_v11, 5  ;;  %v629_v23 = vrot.slane %v6894_v11, 6  ;;  %v6908_v29 = vrot.slane %v620_v14, 4 }
 0x491   :  { %v650_v24 = vadd.f32 %v634_v15, %v620_v14  ;;  %v636_v25 = vperm.slane %v625_v16, 0  ;;  %v635_v26 = vperm.slane %v624_v17, 0  ;;  %v637_v27 = vperm.slane %v626_v18, 0 }
 0x492   :  { %v638_v30 = vperm.slane %v627_v20, 0  ;;  %v639_v36 = vperm.slane %v628_v21, 0  ;;  %v640_v37 = vperm.slane %v629_v23, 0  ;;  %v630_v1 = vrot.slane %v6894_v11, 7 }
 0x493   :  { %vm658_vm9 = vcmp.gt.f32.partialorder %v650_v24, 0.0  ;;  %v666_v31 = vmul.f32 0.2, %v650_v24  ;;  %v652_v32 = vadd.f32 %v636_v25, %v620_v14  ;;  %v651_v33 = vadd.f32 %v635_v26, %v620_v14 }
 0x494   :  { %v1081_v22 = vpop.f32.mrf.mxu3  ;;  %v653_v34 = vadd.f32 %v637_v27, %v620_v14  ;;  %v654_v35 = vadd.f32 %v638_v30, %v6908_v29  ;;  %v655_v62 = vadd.f32 %v639_v36, %v6908_v29  ;;  %v656_v0 = vadd.f32 %v640_v37, %v6908_v29 }
 0x495   :  { %v6911_v38 = vadd.f32 %v1081_v22, %v1054_v19  ;;  %v674_v39 = vsel %vm658_vm9, %v650_v24, %v666_v31  ;;  %vm660_vm10 = vcmp.gt.f32.partialorder %v652_v32, 0.0  ;;  %v668_v40 = vmul.f32 0.2, %v652_v32 }
 0x496   :  { %v683_v41 = vmul.f32 %v6906_v28, %v674_v39  ;;  %vm659_vm11 = vcmp.gt.f32.partialorder %v651_v33, 0.0  ;;  %v667_v42 = vmul.f32 0.2, %v651_v33  ;;  %vm661_vm12 = vcmp.gt.f32.partialorder %v653_v34, 0.0 }
 0x497   :  { %v6914_v43 = vpop.f32.mrf.mxu0  ;;  %v676_v44 = vsel %vm660_vm10, %v652_v32, %v668_v40  ;;  %v1121_v45 = vrot.slane %v6911_v38, 6  ;;  %v669_v46 = vmul.f32 0.2, %v653_v34  ;;  %vm662_vm13 = vcmp.gt.f32.partialorder %v654_v35, 0.0 }
 0x498   :  { %v692_v47 = vsel %vm691_vm8, %v683_v41, 0.0  ;;  %v685_v49 = vmul.f32 %v6906_v28, %v676_v44  ;;  %v675_v50 = vsel %vm659_vm11, %v651_v33, %v667_v42  ;;  %v670_v52 = vmul.f32 0.2, %v654_v35 }
 0x499   :  { %693 = vadd.xlane.f32.xlu0 %v692_v47  ;;  %v684_v53 = vmul.f32 %v6906_v28, %v675_v50  ;;  %v1136_v60 = vperm.slane %v1121_v45, 0  ;;  %v677_v61 = vsel %vm661_vm12, %v653_v34, %v669_v46  ;;  %v671_v10 = vmul.f32 0.2, %v655_v62 }
 0x49a   :  { %v698_v63 = vsel %vm691_vm8, %v685_v49, 0.0  ;;  %v678_v4 = vsel %vm662_vm13, %v654_v35, %v670_v52  ;;  %v686_v7 = vmul.f32 %v6906_v28, %v677_v61  ;;  %vm663_vm15 = vcmp.gt.f32.partialorder %v655_v62, 0.0 }
 0x49b   :  { %699 = vadd.xlane.f32.xlu1 %v698_v63  ;;  %v695_v2 = vsel %vm691_vm8, %v684_v53, 0.0  ;;  %v1168_v3 = vadd.f32 %v1136_v60, %v6914_v43  ;;  %v687_v11 = vmul.f32 %v6906_v28, %v678_v4  ;;  %v672_v14 = vmul.f32 0.2, %v656_v0 }
 0x49c   :  { %696 = vadd.xlane.f32.xlu2 %v695_v2  ;;  %v1084_v6 = vpop.f32.mrf.mxu3  ;;  %v641_v15 = vperm.slane %v630_v1, 0  ;;  %vm664_vm0 = vcmp.gt.f32.partialorder %v656_v0, 0.0  ;;  %v701_v21 = vsel %vm691_vm8, %v686_v7, 0.0  ;;  %v679_v24 = vsel %vm663_vm15, %v655_v62, %v671_v10 }
 0x49d   :  { %v6930_v8 = vadd.f32 %v1084_v6, %v1054_v19  ;;  %vm1184_vm14 = vcmp.gt.f32.partialorder %v1168_v3, 0.0  ;;  %v1200_v9 = vmul.f32 0.2, %v1168_v3  ;;  %v1130_v19 = vperm.slane %v6911_v38, 0 }
 0x49e   :  { %v704_v27 = vsel %vm691_vm8, %v687_v11, 0.0  ;;  %v680_v30 = vsel %vm664_vm0, %v656_v0, %v672_v14  ;;  %v657_v31 = vadd.f32 %v641_v15, %v6908_v29  ;;  %v1119_v22 = vrot.slane %v6911_v38, 4 }
 0x49f   :  { %v1216_v16 = vsel %vm1184_vm14, %v1168_v3, %v1200_v9  ;;  %v1138_v17 = vperm.slane %v6930_v8, 0  ;;  %v1127_v12 = vrot.slane %v6930_v8, 5  ;;  %v6935_v18 = vpop.f32.mrf.mxu0  ;;  %v1162_v34 = vadd.f32 %v1130_v19, %v6914_v43  ;;  %v6969_v19 = vpop.permute.xlu2 %1297 }
 0x4a0   :  { %v1233_v20 = vmul.f32 %v6927_v5, %v1216_v16  ;;  %v1116_v35 = vrot.slane %v6911_v38, 1  ;;  %v688_v39 = vmul.f32 %v6906_v28, %v679_v24  ;;  %v689_v29 = vmul.f32 %v6906_v28, %v680_v30 }
 0x4a1   :  { %v1170_v23 = vadd.f32 %v1138_v17, %v6935_v18  ;;  %v1143_v25 = vperm.slane %v1127_v12, 0  ;;  %v673_v41 = vmul.f32 0.2, %v657_v31  ;;  %v1134_v42 = vperm.slane %v1119_v22, 0 }
 0x4a2   :  { %v1261_v26 = vsel %vm10113_vm7, %v1233_v20, 0.0  ;;  %vm665_vm9 = vcmp.gt.f32.partialorder %v657_v31, 0.0  ;;  %v1194_v44 = vmul.f32 0.2, %v1162_v34  ;;  %v1131_v45 = vperm.slane %v1116_v35, 0 }
 0x4a3   :  { %1262 = vadd.xlane.f32.xlu0 %v1261_v26  ;;  %702 = vadd.xlane.f32.xlu1 %v701_v21  ;;  %vm1186_vm2 = vcmp.gt.f32.partialorder %v1170_v23, 0.0  ;;  %v1202_v32 = vmul.f32 0.2, %v1170_v23  ;;  %v1175_v33 = vadd.f32 %v1143_v25, %v6935_v18  ;;  %vm1178_vm10 = vcmp.gt.f32.partialorder %v1162_v34, 0.0 }
 0x4a4   :  { %705 = vadd.xlane.f32.xlu2 %v704_v27  ;;  %v707_v47 = vsel %vm691_vm8, %v688_v39, 0.0  ;;  %v710_v49 = vsel %vm691_vm8, %v689_v29, 0.0  ;;  %v681_v52 = vsel %vm665_vm9, %v657_v31, %v673_v41  ;;  %v1166_v53 = vadd.f32 %v1134_v42, %v6914_v43 }
 0x4a5   :  { %v1218_v36 = vsel %vm1186_vm2, %v1170_v23, %v1202_v32  ;;  %v1207_v40 = vmul.f32 0.2, %v1175_v33  ;;  %vm1191_vm5 = vcmp.gt.f32.partialorder %v1175_v33, 0.0  ;;  %v1122_v60 = vrot.slane %v6911_v38, 7 }
 0x4a6   :  { %v1235_v37 = vmul.f32 %v6927_v5, %v1218_v36  ;;  %v1210_v61 = vsel %vm1178_vm10, %v1162_v34, %v1194_v44  ;;  %v1163_v62 = vadd.f32 %v1131_v45, %v6914_v43  ;;  %v1117_v63 = vrot.slane %v6911_v38, 2 }
 0x4a7   :  { %v1223_v50 = vsel %vm1191_vm5, %v1175_v33, %v1207_v40  ;;  %v690_v1 = vmul.f32 %v6906_v28, %v681_v52  ;;  %v1227_v2 = vmul.f32 %v6927_v5, %v1210_v61  ;;  %v1198_v3 = vmul.f32 0.2, %v1166_v53  ;;  %v6980_v42 = vpop.permute.xlu2 %1311 }
 0x4a8   :  { %v1267_v46 = vsel %vm10113_vm7, %v1235_v37, 0.0  ;;  %v1240_v0 = vmul.f32 %v6927_v5, %v1223_v50  ;;  %v1137_v4 = vperm.slane %v1122_v60, 0  ;;  %vm1182_vm11 = vcmp.gt.f32.partialorder %v1166_v53, 0.0 }
 0x4a9   :  { %v1195_v6 = vmul.f32 0.2, %v1163_v62  ;;  %v1132_v7 = vperm.slane %v1117_v63, 0  ;;  %vm1179_vm12 = vcmp.gt.f32.partialorder %v1163_v62, 0.0  ;;  %v713_v10 = vsel %vm691_vm8, %v690_v1, 0.0 }
 0x4aa   :  { %v1282_v9 = vsel %vm10113_vm7, %v1240_v0, 0.0  ;;  %v1243_v11 = vsel %vm10113_vm7, %v1227_v2, 0.0  ;;  %v1214_v14 = vsel %vm1182_vm11, %v1166_v53, %v1198_v3  ;;  %v1169_v15 = vadd.f32 %v1137_v4, %v6914_v43 }
 0x4ab   :  { %1268 = vadd.xlane.f32.xlu0 %v1267_v46  ;;  %708 = vadd.xlane.f32.xlu1 %v707_v47  ;;  %v1125_v28 = vrot.slane %v6930_v8, 3  ;;  %v1211_v16 = vsel %vm1179_vm12, %v1163_v62, %v1195_v6  ;;  %v1164_v17 = vadd.f32 %v1132_v7, %v6914_v43  ;;  %v1118_v12 = vrot.slane %v6911_v38, 3 }
 0x4ac   :  { %711 = vadd.xlane.f32.xlu2 %v710_v49  ;;  %v1231_v20 = vmul.f32 %v6927_v5, %v1214_v14  ;;  %v1228_v21 = vmul.f32 %v6927_v5, %v1211_v16  ;;  %v1201_v23 = vmul.f32 0.2, %v1169_v15  ;;  %vm1185_vm8 = vcmp.gt.f32.partialorder %v1169_v15, 0.0 }
 0x4ad   :  { %v1141_v24 = vperm.slane %v1125_v28, 0  ;;  %v1196_v25 = vmul.f32 0.2, %v1164_v17  ;;  %v1133_v26 = vperm.slane %v1118_v12, 0  ;;  %vm1180_vm13 = vcmp.gt.f32.partialorder %v1164_v17, 0.0 }
 0x4ae   :  { %v1255_v27 = vsel %vm10113_vm7, %v1231_v20, 0.0  ;;  %v1246_v30 = vsel %vm10113_vm7, %v1228_v21, 0.0  ;;  %v1217_v31 = vsel %vm1185_vm8, %v1169_v15, %v1201_v23  ;;  %v1126_v33 = vrot.slane %v6930_v8, 4 }
 0x4af   :  { %v1173_v32 = vadd.f32 %v1141_v24, %v6935_v18  ;;  %v1212_v22 = vsel %vm1180_vm13, %v1164_v17, %v1196_v25  ;;  %v1165_v34 = vadd.f32 %v1133_v26, %v6914_v43  ;;  %v1120_v35 = vrot.slane %v6911_v38, 5  ;;  %v6991_v2 = vpop.permute.xlu2 %1318 }
 0x4b0   :  { %v1234_v36 = vmul.f32 %v6927_v5, %v1217_v31  ;;  %v1229_v37 = vmul.f32 %v6927_v5, %v1212_v22  ;;  %v1142_v29 = vperm.slane %v1126_v33, 0  ;;  %v1128_v47 = vrot.slane %v6930_v8, 6 }
 0x4b1   :  { %v1205_v39 = vmul.f32 0.2, %v1173_v32  ;;  %vm1189_vm14 = vcmp.gt.f32.partialorder %v1173_v32, 0.0  ;;  %v1197_v40 = vmul.f32 0.2, %v1165_v34  ;;  %v1135_v41 = vperm.slane %v1120_v35, 0 }
 0x4b2   :  { %vm1181_vm15 = vcmp.gt.f32.partialorder %v1165_v34, 0.0  ;;  %v1264_v44 = vsel %vm10113_vm7, %v1234_v36, 0.0  ;;  %v1249_v45 = vsel %vm10113_vm7, %v1229_v37, 0.0  ;;  %v1174_v38 = vadd.f32 %v1142_v29, %v6935_v18 }
 0x4b3   :  { %1283 = vadd.xlane.f32.xlu0 %v1282_v9  ;;  %714 = vadd.xlane.f32.xlu1 %v713_v10  ;;  %v1221_v46 = vsel %vm1189_vm14, %v1173_v32, %v1205_v39  ;;  %v1213_v49 = vsel %vm1181_vm15, %v1165_v34, %v1197_v40  ;;  %v1167_v50 = vadd.f32 %v1135_v41, %v6914_v43  ;;  %v1123_v52 = vrot.slane %v6930_v8, 1  ;;  %v7016_v41 = vpop.permute.xlu1 %2417 }
 0x4b4   :  { %1244 = vadd.xlane.f32.xlu2 %v1243_v11  ;;  %v1238_v53 = vmul.f32 %v6927_v5, %v1221_v46  ;;  %v1230_v60 = vmul.f32 %v6927_v5, %v1213_v49  ;;  %v1206_v61 = vmul.f32 0.2, %v1174_v38  ;;  %v1144_v62 = vperm.slane %v1128_v47, 0 }
 0x4b5   :  { %vm1190_vm0 = vcmp.gt.f32.partialorder %v1174_v38, 0.0  ;;  %v1199_v63 = vmul.f32 0.2, %v1167_v50  ;;  %v1139_v0 = vperm.slane %v1123_v52, 0  ;;  %vm1183_vm2 = vcmp.gt.f32.partialorder %v1167_v50, 0.0 }
 0x4b6   :  { %v1276_v1 = vsel %vm10113_vm7, %v1238_v53, 0.0  ;;  %v1252_v3 = vsel %vm10113_vm7, %v1230_v60, 0.0  ;;  %v1222_v43 = vsel %vm1190_vm0, %v1174_v38, %v1206_v61  ;;  %v1176_v4 = vadd.f32 %v1144_v62, %v6935_v18 }
 0x4b7   :  { %v1129_v6 = vrot.slane %v6930_v8, 7  ;;  %v1215_v7 = vsel %vm1183_vm2, %v1167_v50, %v1199_v63  ;;  %v1171_v9 = vadd.f32 %v1139_v0, %v6935_v18  ;;  %v1124_v10 = vrot.slane %v6930_v8, 2  ;;  %v7004_v25 = vpop.permute.xlu2 %1332 }
 0x4b8   :  { %v1239_v11 = vmul.f32 %v6927_v5, %v1222_v43  ;;  %v1232_v14 = vmul.f32 %v6927_v5, %v1215_v7  ;;  %v1208_v15 = vmul.f32 0.2, %v1176_v4  ;;  %vm1192_vm5 = vcmp.gt.f32.partialorder %v1176_v4, 0.0 }
 0x4b9   :  { %v1145_v28 = vperm.slane %v1129_v6, 0  ;;  %v1203_v16 = vmul.f32 0.2, %v1171_v9  ;;  %v1140_v17 = vperm.slane %v1124_v10, 0  ;;  %vm1187_vm9 = vcmp.gt.f32.partialorder %v1171_v9, 0.0 }
 0x4ba   :  { %v1279_v12 = vsel %vm10113_vm7, %v1239_v11, 0.0  ;;  %v1258_v20 = vsel %vm10113_vm7, %v1232_v14, 0.0  ;;  %v1224_v21 = vsel %vm1192_vm5, %v1176_v4, %v1208_v15  ;;  %v6593_v40 = vmov 0  }
 0x4bb   :  { %1256 = vadd.xlane.f32.xlu1 %v1255_v27  ;;  %v1177_v23 = vadd.f32 %v1145_v28, %v6935_v18  ;;  %v1219_v8 = vsel %vm1187_vm9, %v1171_v9, %v1203_v16  ;;  %v1172_v24 = vadd.f32 %v1140_v17, %v6935_v18  ;;  %v1241_v26 = vmul.f32 %v6927_v5, %v1224_v21  ;;  %v7022_v46 = vpop.permute.xlu1 %2431 }
 0x4bc   :  { %1247 = vadd.xlane.f32.xlu2 %v1246_v30  ;;  %v1236_v27 = vmul.f32 %v6927_v5, %v1219_v8  ;;  %6229 = vset.pattern.permute.xlu1 %v6593_v40  ;;  %vm10135_vm12 = vcmask 1041409   ;;  %vm10134_vm8 = vcmask 1042434   ;;  %vm10126_vm13 = vcmask 1043459  }
 0x4bd   :  { %v1209_v30 = vmul.f32 0.2, %v1177_v23  ;;  %vm1193_vm10 = vcmp.gt.f32.partialorder %v1177_v23, 0.0  ;;  %v1204_v31 = vmul.f32 0.2, %v1172_v24  ;;  %vm1188_vm11 = vcmp.gt.f32.partialorder %v1172_v24, 0.0  ;;  %6230 = vset.pattern.permute.xlu2 %v6593_v40  ;;  %6231 = vset.pattern.permute.xlu0 %v6593_v40 }
 0x4be   :  { %v1285_v32 = vsel %vm10113_vm7, %v1241_v26, 0.0  ;;  %v1270_v33 = vsel %vm10113_vm7, %v1236_v27, 0.0  ;;  %vm10125_vm14 = vcmask 27648   ;;  %vm10123_vm15 = vcmask 1044484  }
 0x4bf   :  { %v1225_v22 = vsel %vm1193_vm10, %v1177_v23, %v1209_v30  ;;  %v1220_v34 = vsel %vm1188_vm11, %v1172_v24, %v1204_v31  ;;  %v7011_v35 = vpop.permute.xlu2 %1339  ;;  %vm10119_vm0 = vcmask 1045509   ;;  %vm10118_vm2 = vcmask 1046534  }
 0x4c0   :  { %v1242_v18 = vmul.f32 %v6927_v5, %v1225_v22  ;;  %v1237_v36 = vmul.f32 %v6927_v5, %v1220_v34  ;;  %vm10117_vm5 = vcmask 1047559  }
 0x4c2   :  { %v1288_v37 = vsel %vm10113_vm7, %v1242_v18, 0.0  ;;  %v1273_v39 = vsel %vm10113_vm7, %v1237_v36, 0.0 }
 0x4c3   :  { %1265 = vadd.xlane.f32.xlu1 %v1264_v44  ;;  %v7028_v47 = vpop.permute.xlu1 %2445 }
 0x4c4   :  { %1250 = vadd.xlane.f32.xlu2 %v1249_v45  ;;  %v7020_v45 = vpop.permute.xlu0 %2403 }
 0x4c7   :  { %v737_v29 = vpop.permute.xlu2 %736 }
 0x4cb   :  { %1277 = vadd.xlane.f32.xlu1 %v1276_v1 }
 0x4cc   :  { %1253 = vadd.xlane.f32.xlu2 %v1252_v3  ;;  %v7026_v38 = vpop.permute.xlu0 %2452 }
 0x4cf   :  { %v7018_v44 = vpop.permute.xlu2 %2410 }
 0x4d3   :  { %1280 = vadd.xlane.f32.xlu1 %v1279_v12 }
 0x4d4   :  { %1259 = vadd.xlane.f32.xlu2 %v1258_v20 }
 0x4d7   :  { %v7024_v5 = vpop.permute.xlu2 %2424 }
 0x4db   :  { %1286 = vadd.xlane.f32.xlu1 %v1285_v32 }
 0x4dc   :  { %1271 = vadd.xlane.f32.xlu2 %v1270_v33 }
 0x4df   :  { %v7030_v49 = vpop.permute.xlu2 %2438 }
 0x4e3   :  { %1289 = vadd.xlane.f32.xlu1 %v1288_v37 }
 0x4e4   :  { %1274 = vadd.xlane.f32.xlu2 %v1273_v39 }
 0x50c   :  { %v694_v50 = vpop.xlane.xlu0 %693 }
 0x50d   :  { %v7033_v52 = vadd.f32 %v6879_v59, %v694_v50  ;;  %v7127_v50 = vand.u32 127, %v718_v13 }
 0x50e   :  { %v700_v53 = vpop.xlane.xlu1 %699 }
 0x50f   :  { %v7035_v60 = vadd.f32 %v737_v29, %v700_v53  ;;  %v697_v61 = vpop.xlane.xlu2 %696  ;;  %766 = vperm.xlu1 %6229, %v7033_v52   ;;  %10157 = vst [vmem:[#allocation7_spill] sm:$0xff] %v7127_v50 }
 0x510   :  { %v7039_v62 = vadd.f32 %v6873_v56, %v697_v61 }
 0x511   :  { %772 = vperm.xlu0 %6231, %v7035_v60  }
 0x512   :  { %769 = vperm.xlu2 %6230, %v7039_v62  }
 0x516   :  { %v703_v63 = vpop.xlane.xlu1 %702  ;;  %v1263_v12 = vpop.xlane.xlu0 %1262 }
 0x517   :  { %v7044_v0 = vadd.f32 %v6877_v58, %v703_v63  ;;  %v706_v1 = vpop.xlane.xlu2 %705  ;;  %v7079_v23 = vadd.f32 %v7011_v35, %v1263_v12 }
 0x518   :  { %v7047_v3 = vadd.f32 %v6879_v59, %v706_v1 }
 0x519   :  { %775 = vperm.xlu0 %6231, %v7044_v0  }
 0x51a   :  { %778 = vperm.xlu1 %6229, %v7047_v3  }
 0x51e   :  { %v709_v43 = vpop.xlane.xlu1 %708  ;;  %v1269_v24 = vpop.xlane.xlu0 %1268 }
 0x51f   :  { %v7052_v4 = vadd.f32 %v6873_v56, %v709_v43  ;;  %v712_v6 = vpop.xlane.xlu2 %711  ;;  %v7090_v31 = vadd.f32 %v6969_v19, %v1269_v24 }
 0x520   :  { %v7054_v7 = vadd.f32 %v737_v29, %v712_v6 }
 0x521   :  { %781 = vperm.xlu2 %6230, %v7052_v4  }
 0x522   :  { %784 = vperm.xlu0 %6231, %v7054_v7  }
 0x526   :  { %v715_v9 = vpop.xlane.xlu1 %714  ;;  %v1284_v39 = vpop.xlane.xlu0 %1283 }
 0x527   :  { %v7059_v10 = vadd.f32 %v6877_v58, %v715_v9  ;;  %v1245_v59 = vpop.xlane.xlu2 %1244  ;;  %v7115_v29 = vadd.f32 %v7004_v25, %v1284_v39 }
 0x528   :  { %v7062_v11 = vadd.f32 %v6969_v19, %v1245_v59 }
 0x529   :  { %787 = vperm.xlu1 %6229, %v7059_v10  }
 0x52a   :  { %1389 = vperm.xlu2 %6230, %v7062_v11  }
 0x52e   :  { %v1257_v56 = vpop.xlane.xlu1 %1256 }
 0x52f   :  { %v1248_v14 = vpop.xlane.xlu2 %1247  ;;  %v7071_v58 = vadd.f32 %v6875_v57, %v1257_v56 }
 0x530   :  { %v7067_v15 = vadd.f32 %v6869_v54, %v1248_v14 }
 0x532   :  { %1392 = vperm.xlu1 %6229, %v7067_v15  }
 0x536   :  { %v1266_v28 = vpop.xlane.xlu1 %1265 }
 0x537   :  { %v1251_v16 = vpop.xlane.xlu2 %1250  ;;  %v7099_v34 = vadd.f32 %v6871_v55, %v1266_v28 }
 0x538   :  { %v7074_v17 = vadd.f32 %v6980_v42, %v1251_v16 }
 0x53a   :  { %1401 = vperm.xlu1 %6229, %v7071_v58   ;;  %1395 = vperm.xlu0 %6231, %v7074_v17  }
 0x53e   :  { %v1278_v20 = vpop.xlane.xlu1 %1277 }
 0x53f   :  { %v1254_v21 = vpop.xlane.xlu2 %1253 }
 0x540   :  { %v7082_v8 = vadd.f32 %v6991_v2, %v1254_v21 }
 0x542   :  { %1407 = vperm.xlu1 %6229, %v7079_v23   ;;  %1398 = vperm.xlu2 %6230, %v7082_v8  }
 0x546   :  { %v1281_v26 = vpop.xlane.xlu1 %1280 }
 0x547   :  { %v7087_v27 = vadd.f32 %v6875_v57, %v1281_v26  ;;  %v1260_v30 = vpop.xlane.xlu2 %1259 }
 0x548   :  { %v7093_v32 = vadd.f32 %v7004_v25, %v1260_v30 }
 0x549   :  { %1425 = vperm.xlu0 %6231, %v7087_v27  }
 0x54a   :  { %1413 = vperm.xlu1 %6229, %v7090_v31   ;;  %1404 = vperm.xlu2 %6230, %v7093_v32  }
 0x54e   :  { %v1287_v33 = vpop.xlane.xlu1 %1286 }
 0x54f   :  { %v1272_v22 = vpop.xlane.xlu2 %1271 }
 0x550   :  { %v7106_v36 = vadd.f32 %v6869_v54, %v1272_v22  ;;  %v7123_v54 = vadd.f32 %v7011_v35, %v1287_v33 }
 0x552   :  { %1410 = vperm.xlu2 %6230, %v7099_v34  }
 0x556   :  { %v1290_v57 = vpop.xlane.xlu1 %1289 }
 0x557   :  { %v7103_v19 = vadd.f32 %v6871_v55, %v1290_v57  ;;  %v1275_v18 = vpop.xlane.xlu2 %1274  ;;  %v7118_v55 = vadd.f32 %v6991_v2, %v1278_v20 }
 0x558   :  { %v7109_v37 = vadd.f32 %v6980_v42, %v1275_v18 }
 0x559   :  { %1434 = vperm.xlu0 %6231, %v7103_v19  }
 0x55a   :  { %1416 = vperm.xlu2 %6230, %v7106_v36   ;;  %1419 = vperm.xlu1 %6229, %v7109_v37  }
 0x562   :  { %1422 = vperm.xlu2 %6230, %v7118_v55   ;;  %1428 = vperm.xlu1 %6229, %v7115_v29  }
 0x56a   :  { %1431 = vperm.xlu2 %6230, %v7123_v54  }
 0x56c   :  { %v770_v53 = vpop.permute.xlu2 %769 }
 0x56d   :  { %v792_v2 = vperm.slane %v770_v53, %v7127_v50 }
 0x57b   :  { %v782_v43 = vpop.permute.xlu2 %781 }
 0x57c   :  { %v796_v12 = vperm.slane %v782_v43, %v7127_v50 }
 0x581   :  { %v767_v42 = vpop.permute.xlu1 %766 }
 0x582   :  { %v791_v25 = vperm.slane %v767_v42, %v7127_v50 }
 0x583   :  { %v773_v40 = vpop.permute.xlu0 %772 }
 0x584   :  { %v793_v61 = vperm.slane %v773_v40, %v7127_v50  ;;  %v800_v63 = vsel %vm10135_vm12, %v792_v2, %v791_v25  ;;  %v1390_v14 = vpop.permute.xlu2 %1389 }
 0x585   :  { %v1436_v42 = vperm.slane %v1390_v14, %v7127_v50 }
 0x586   :  { %v802_v13 = vsel %vm10134_vm8, %v793_v61, %v800_v63 }
 0x58b   :  { %v776_v35 = vpop.permute.xlu0 %775 }
 0x58c   :  { %v794_v1 = vperm.slane %v776_v35, %v7127_v50  ;;  %v779_v59 = vpop.permute.xlu1 %778 }
 0x58d   :  { %v795_v28 = vperm.slane %v779_v59, %v7127_v50 }
 0x58e   :  { %v804_v6 = vsel %vm10126_vm13, %v794_v1, %v802_v13 }
 0x58f   :  { %v811_v9 = vsel %vm10125_vm14, %v804_v6, -inf  ;;  %v805_v24 = vsel %vm10135_vm12, %v796_v12, %v795_v28 }
 0x590   :  { %812 = vmax.xlane.f32.xlu0 %v811_v9 }
 0x594   :  { %v785_v56 = vpop.permute.xlu0 %784 }
 0x595   :  { %v797_v16 = vperm.slane %v785_v56, %v7127_v50 }
 0x597   :  { %v806_v26 = vsel %vm10134_vm8, %v797_v16, %v805_v24 }
 0x59b   :  { %v788_v20 = vpop.permute.xlu1 %787 }
 0x59c   :  { %v798_v21 = vperm.slane %v788_v20, %v7127_v50  ;;  %v1399_v33 = vpop.permute.xlu2 %1398 }
 0x59d   :  { %v1439_v2 = vperm.slane %v1399_v33, %v7127_v50 }
 0x59e   :  { %v807_v30 = vsel %vm10126_vm13, %v798_v21, %v806_v26 }
 0x59f   :  { %v814_v22 = vsel %vm10125_vm14, %v807_v30, -inf }
 0x5a0   :  { %815 = vmax.xlane.f32.xlu2 %v814_v22 }
 0x5a4   :  { %v1393_v57 = vpop.permute.xlu1 %1392  ;;  %v1405_v18 = vpop.permute.xlu2 %1404 }
 0x5a5   :  { %v1437_v39 = vperm.slane %v1393_v57, %v7127_v50  ;;  %v1441_v6 = vperm.slane %v1405_v18, %v7127_v50 }
 0x5a7   :  { %v1452_v61 = vsel %vm10135_vm12, %v1437_v39, %v1436_v42 }
 0x5ac   :  { %v1402_v40 = vpop.permute.xlu1 %1401  ;;  %v1396_v53 = vpop.permute.xlu0 %1395 }
 0x5ad   :  { %v1438_v25 = vperm.slane %v1396_v53, %v7127_v50  ;;  %v1440_v1 = vperm.slane %v1402_v40, %v7127_v50  ;;  %v1411_v43 = vpop.permute.xlu2 %1410 }
 0x5ae   :  { %v1443_v56 = vperm.slane %v1411_v43, %v7127_v50 }
 0x5af   :  { %v1453_v63 = vsel %vm10134_vm8, %v1438_v25, %v1452_v61 }
 0x5b0   :  { %v1454_v35 = vsel %vm10126_vm13, %v1439_v2, %v1453_v63 }
 0x5b1   :  { %v1456_v13 = vsel %vm10123_vm15, %v1440_v1, %v1454_v35 }
 0x5b2   :  { %v1458_v14 = vsel %vm10119_vm0, %v1441_v6, %v1456_v13 }
 0x5b4   :  { %v1408_v9 = vpop.permute.xlu1 %1407 }
 0x5b5   :  { %v1442_v59 = vperm.slane %v1408_v9, %v7127_v50  ;;  %v1417_v20 = vpop.permute.xlu2 %1416 }
 0x5b6   :  { %v1445_v22 = vperm.slane %v1417_v20, %v7127_v50 }
 0x5b7   :  { %v1460_v28 = vsel %vm10118_vm2, %v1442_v59, %v1458_v14 }
 0x5b8   :  { %v1462_v16 = vsel %vm10117_vm5, %v1443_v56, %v1460_v28 }
 0x5b9   :  { %v1472_v12 = vsel %vm10113_vm7, %v1462_v16, -inf }
 0x5ba   :  { %1473 = vmax.xlane.f32.xlu2 %v1472_v12 }
 0x5bb   :  { %v1426_v30 = vpop.permute.xlu0 %1425 }
 0x5bc   :  { %v1414_v21 = vpop.permute.xlu1 %1413  ;;  %v1448_v25 = vperm.slane %v1426_v30, %v7127_v50 }
 0x5bd   :  { %v1423_v24 = vpop.permute.xlu2 %1422  ;;  %v1444_v26 = vperm.slane %v1414_v21, %v7127_v50 }
 0x5be   :  { %v1447_v42 = vperm.slane %v1423_v24, %v7127_v50 }
 0x5bf   :  { %v1463_v18 = vsel %vm10135_vm12, %v1445_v22, %v1444_v26 }
 0x5c5   :  { %v1432_v40 = vpop.permute.xlu2 %1431 }
 0x5c6   :  { %v1450_v35 = vperm.slane %v1432_v40, %v7127_v50 }
 0x5cb   :  { %v1435_v2 = vpop.permute.xlu0 %1434 }
 0x5cc   :  { %v1420_v33 = vpop.permute.xlu1 %1419  ;;  %v1451_v43 = vperm.slane %v1435_v2, %v7127_v50 }
 0x5cd   :  { %v1446_v57 = vperm.slane %v1420_v33, %v7127_v50 }
 0x5cf   :  { %v1464_v39 = vsel %vm10134_vm8, %v1446_v57, %v1463_v18 }
 0x5d0   :  { %v1465_v53 = vsel %vm10126_vm13, %v1447_v42, %v1464_v39 }
 0x5d1   :  { %v1466_v1 = vsel %vm10123_vm15, %v1448_v25, %v1465_v53 }
 0x5d4   :  { %v1429_v61 = vpop.permute.xlu1 %1428 }
 0x5d5   :  { %v1449_v63 = vperm.slane %v1429_v61, %v7127_v50 }
 0x5d7   :  { %v1467_v13 = vsel %vm10119_vm0, %v1449_v63, %v1466_v1 }
 0x5d8   :  { %v1468_v6 = vsel %vm10118_vm2, %v1450_v35, %v1467_v13 }
 0x5d9   :  { %v1469_v9 = vsel %vm10117_vm5, %v1451_v43, %v1468_v6 }
 0x5da   :  { %v1475_v59 = vsel %vm10113_vm7, %v1469_v9, -inf }
 0x5db   :  { %1476 = vmax.xlane.f32.xlu1 %v1475_v59 }
 0x603   :  { %v813_v56 = vpop.xlane.xlu0 %812 }
 0x604   :  { %v819_v14 = vperm.slane %v813_v56, 0  ;;  %v820_v28 = vperm.slane %v813_v56, 1  ;;  %v822_v16 = vperm.slane %v813_v56, 3  ;;  %v821_v12 = vperm.slane %v813_v56, 2 }
 0x606   :  { %v835_v20 = vsub.f32 %v7033_v52, %v819_v14  ;;  %v836_v21 = vsub.f32 %v7039_v62, %v820_v28  ;;  %v838_v24 = vsub.f32 %v7044_v0, %v822_v16  ;;  %v837_v22 = vsub.f32 %v7035_v60, %v821_v12 }
 0x608   :  { %v843_v26 = vmul.f32 1.442695, %v835_v20  ;;  %v845_v30 = vmul.f32 1.442695, %v836_v21  ;;  %v849_v33 = vmul.f32 1.442695, %v838_v24 }
 0x609   :  { %v847_v57 = vmul.f32 1.442695, %v837_v22 }
 0x60a   :  { %6232 = vpow2.f32 %v843_v26 }
 0x60b   :  { %6234 = vpow2.f32 %v845_v30 }
 0x60c   :  { %6236 = vpow2.f32 %v849_v33 }
 0x60d   :  { %6238 = vpow2.f32 %v847_v57 }
 0x610   :  { %v7181_v18 = vpop.eup %6232 }
 0x611   :  { %v7183_v39 = vpop.eup %6234  ;;  %868 = vperm.xlu0 %6231, %v7181_v18  }
 0x612   :  { %871 = vperm.xlu2 %6230, %v7183_v39   ;;  %v7187_v52 = vpop.eup %6236 }
 0x613   :  { %v816_v62 = vpop.xlane.xlu2 %815  ;;  %877 = vperm.xlu1 %6229, %v7187_v52   ;;  %v7193_v61 = vpop.eup %6238 }
 0x614   :  { %v823_v0 = vperm.slane %v816_v62, 0  ;;  %v824_v60 = vperm.slane %v816_v62, 1  ;;  %v826_v42 = vperm.slane %v816_v62, 3  ;;  %v825_v40 = vperm.slane %v816_v62, 2 }
 0x616   :  { %v839_v53 = vsub.f32 %v7047_v3, %v823_v0  ;;  %v840_v25 = vsub.f32 %v7052_v4, %v824_v60  ;;  %v842_v2 = vsub.f32 %v7059_v10, %v826_v42  ;;  %v841_v43 = vsub.f32 %v7054_v7, %v825_v40 }
 0x618   :  { %v851_v63 = vmul.f32 1.442695, %v839_v53  ;;  %v853_v35 = vmul.f32 1.442695, %v840_v25  ;;  %v857_v1 = vmul.f32 1.442695, %v842_v2 }
 0x619   :  { %874 = vperm.xlu0 %6231, %v7193_v61   ;;  %v855_v13 = vmul.f32 1.442695, %v841_v43 }
 0x61a   :  { %6240 = vpow2.f32 %v851_v63 }
 0x61b   :  { %6242 = vpow2.f32 %v853_v35 }
 0x61c   :  { %6244 = vpow2.f32 %v857_v1 }
 0x61d   :  { %6246 = vpow2.f32 %v855_v13 }
 0x620   :  { %v7197_v6 = vpop.eup %6240 }
 0x621   :  { %v7199_v3 = vpop.eup %6242  ;;  %880 = vperm.xlu0 %6231, %v7197_v6  }
 0x622   :  { %883 = vperm.xlu2 %6230, %v7199_v3   ;;  %v7203_v4 = vpop.eup %6244 }
 0x623   :  { %889 = vperm.xlu1 %6229, %v7203_v4   ;;  %v7206_v10 = vpop.eup %6246 }
 0x629   :  { %886 = vperm.xlu0 %6231, %v7206_v10  }
 0x62d   :  { %v1474_v7 = vpop.xlane.xlu2 %1473 }
 0x62e   :  { %v1482_v9 = vperm.slane %v1474_v7, 2  ;;  %v1481_v59 = vperm.slane %v1474_v7, 1  ;;  %v1480_v56 = vperm.slane %v1474_v7, 0  ;;  %v1485_v12 = vperm.slane %v1474_v7, 5 }
 0x62f   :  { %v1484_v20 = vperm.slane %v1474_v7, 4  ;;  %v1483_v21 = vperm.slane %v1474_v7, 3  ;;  %v1487_v62 = vperm.slane %v1474_v7, 7  ;;  %v1486_v60 = vperm.slane %v1474_v7, 6 }
 0x630   :  { %v1514_v14 = vsub.f32 %v7074_v17, %v1482_v9  ;;  %v1513_v28 = vsub.f32 %v7067_v15, %v1481_v59  ;;  %v1512_v16 = vsub.f32 %v7062_v11, %v1480_v56  ;;  %v1517_v33 = vsub.f32 %v7093_v32, %v1485_v12 }
 0x631   :  { %v1516_v22 = vsub.f32 %v7071_v58, %v1484_v20  ;;  %v1515_v57 = vsub.f32 %v7082_v8, %v1483_v21  ;;  %v1519_v58 = vsub.f32 %v7099_v34, %v1487_v62  ;;  %v1518_v8 = vsub.f32 %v7079_v23, %v1486_v60 }
 0x632   :  { %v1532_v24 = vmul.f32 1.442695, %v1514_v14  ;;  %v1530_v26 = vmul.f32 1.442695, %v1513_v28  ;;  %v1528_v30 = vmul.f32 1.442695, %v1512_v16 }
 0x633   :  { %v1538_v17 = vmul.f32 1.442695, %v1517_v33  ;;  %v1536_v15 = vmul.f32 1.442695, %v1516_v22  ;;  %v1534_v11 = vmul.f32 1.442695, %v1515_v57 }
 0x634   :  { %6248 = vpow2.f32 %v1532_v24  ;;  %v1542_v32 = vmul.f32 1.442695, %v1519_v58  ;;  %v1540_v25 = vmul.f32 1.442695, %v1518_v8 }
 0x635   :  { %6250 = vpow2.f32 %v1530_v26 }
 0x636   :  { %6252 = vpow2.f32 %v1528_v30 }
 0x637   :  { %6254 = vpow2.f32 %v1538_v17 }
 0x638   :  { %6256 = vpow2.f32 %v1536_v15 }
 0x639   :  { %6258 = vpow2.f32 %v1534_v11 }
 0x63a   :  { %v7215_v0 = vpop.eup %6248  ;;  %6260 = vpow2.f32 %v1542_v32 }
 0x63b   :  { %v7217_v42 = vpop.eup %6250  ;;  %1583 = vperm.xlu2 %6230, %v7215_v0   ;;  %6262 = vpow2.f32 %v1540_v25 }
 0x63c   :  { %v7220_v40 = vpop.eup %6252  ;;  %1580 = vperm.xlu1 %6229, %v7217_v42  }
 0x63d   :  { %1577 = vperm.xlu0 %6231, %v7220_v40   ;;  %v7226_v53 = vpop.eup %6254 }
 0x63e   :  { %v7228_v2 = vpop.eup %6256 }
 0x63f   :  { %v7231_v63 = vpop.eup %6258 }
 0x640   :  { %v7235_v34 = vpop.eup %6260 }
 0x641   :  { %v7238_v23 = vpop.eup %6262 }
 0x643   :  { %1592 = vperm.xlu2 %6230, %v7226_v53  }
 0x644   :  { %1589 = vperm.xlu1 %6229, %v7228_v2  }
 0x645   :  { %1586 = vperm.xlu0 %6231, %v7231_v63  }
 0x64b   :  { %1598 = vperm.xlu2 %6230, %v7235_v34  }
 0x64d   :  { %1595 = vperm.xlu0 %6231, %v7238_v23  }
 0x64e   :  { %v1477_v35 = vpop.xlane.xlu1 %1476 }
 0x64f   :  { %v1490_v1 = vperm.slane %v1477_v35, 2  ;;  %v1488_v43 = vperm.slane %v1477_v35, 0  ;;  %v1489_v13 = vperm.slane %v1477_v35, 1  ;;  %v1493_v56 = vperm.slane %v1477_v35, 5 }
 0x650   :  { %v1491_v14 = vperm.slane %v1477_v35, 3  ;;  %v1494_v28 = vperm.slane %v1477_v35, 6  ;;  %v1495_v30 = vperm.slane %v1477_v35, 7  ;;  %v1492_v33 = vperm.slane %v1477_v35, 4 }
 0x651   :  { %v1522_v7 = vsub.f32 %v7109_v37, %v1490_v1  ;;  %v1520_v9 = vsub.f32 %v7090_v31, %v1488_v43  ;;  %v1521_v59 = vsub.f32 %v7106_v36, %v1489_v13  ;;  %v1525_v21 = vsub.f32 %v7115_v29, %v1493_v56 }
 0x652   :  { %v1523_v24 = vsub.f32 %v7118_v55, %v1491_v14  ;;  %v1526_v26 = vsub.f32 %v7123_v54, %v1494_v28  ;;  %v1527_v29 = vsub.f32 %v7103_v19, %v1495_v30  ;;  %v1524_v55 = vsub.f32 %v7087_v27, %v1492_v33 }
 0x653   :  { %v1548_v16 = vmul.f32 1.442695, %v1522_v7  ;;  %v1544_v12 = vmul.f32 1.442695, %v1520_v9  ;;  %v1546_v20 = vmul.f32 1.442695, %v1521_v59 }
 0x654   :  { %v1554_v37 = vmul.f32 1.442695, %v1525_v21  ;;  %v1550_v31 = vmul.f32 1.442695, %v1523_v24  ;;  %v1556_v22 = vmul.f32 1.442695, %v1526_v26 }
 0x655   :  { %6264 = vpow2.f32 %v1548_v16  ;;  %v1558_v54 = vmul.f32 1.442695, %v1527_v29  ;;  %v1552_v62 = vmul.f32 1.442695, %v1524_v55 }
 0x656   :  { %6266 = vpow2.f32 %v1544_v12 }
 0x657   :  { %6268 = vpow2.f32 %v1546_v20 }
 0x658   :  { %6270 = vpow2.f32 %v1554_v37 }
 0x659   :  { %6272 = vpow2.f32 %v1550_v31 }
 0x65a   :  { %6274 = vpow2.f32 %v1556_v22 }
 0x65b   :  { %v7247_v36 = vpop.eup %6264  ;;  %6276 = vpow2.f32 %v1558_v54 }
 0x65c   :  { %v7249_v57 = vpop.eup %6266  ;;  %1607 = vperm.xlu2 %6230, %v7247_v36   ;;  %6278 = vpow2.f32 %v1552_v62 }
 0x65d   :  { %v7252_v17 = vpop.eup %6268  ;;  %1601 = vperm.xlu1 %6229, %v7249_v57  }
 0x65e   :  { %1604 = vperm.xlu0 %6231, %v7252_v17   ;;  %v7258_v15 = vpop.eup %6270 }
 0x65f   :  { %v7260_v11 = vpop.eup %6272 }
 0x660   :  { %v7263_v60 = vpop.eup %6274 }
 0x661   :  { %v7267_v19 = vpop.eup %6276 }
 0x662   :  { %10158 = vst [vmem:[#allocation8_spill] sm:$0xff] %v7267_v19  ;;  %v7269_v27 = vpop.eup %6278 }
 0x664   :  { %1616 = vperm.xlu2 %6230, %v7258_v15  }
 0x665   :  { %1610 = vperm.xlu1 %6229, %v7260_v11  }
 0x666   :  { %1619 = vperm.xlu0 %6231, %v7263_v60  }
 0x66c   :  { %1622 = vperm.xlu2 %6230, %v7267_v19   ;;  %v872_v8 = vpop.permute.xlu2 %871 }
 0x66d   :  { %1613 = vperm.xlu1 %6229, %v7269_v27   ;;  %v892_v1 = vperm.slane %v872_v8, %v7127_v50 }
 0x67c   :  { %v884_v28 = vpop.permute.xlu2 %883 }
 0x67d   :  { %v896_v20 = vperm.slane %v884_v28, %v7127_v50 }
 0x683   :  { %v869_v58 = vpop.permute.xlu0 %868 }
 0x684   :  { %v891_v32 = vperm.slane %v869_v58, %v7127_v50 }
 0x685   :  { %v878_v43 = vpop.permute.xlu1 %877 }
 0x686   :  { %v899_v13 = vsel %vm10135_vm12, %v892_v1, %v891_v32  ;;  %v894_v9 = vperm.slane %v878_v43, %v7127_v50 }
 0x68b   :  { %v875_v25 = vpop.permute.xlu0 %874 }
 0x68c   :  { %v893_v35 = vperm.slane %v875_v25, %v7127_v50 }
 0x68e   :  { %v900_v7 = vsel %vm10134_vm8, %v893_v35, %v899_v13 }
 0x68f   :  { %v901_v56 = vsel %vm10126_vm13, %v894_v9, %v900_v7 }
 0x690   :  { %v907_v14 = vsel %vm10125_vm14, %v901_v56, 0.0 }
 0x693   :  { %v881_v59 = vpop.permute.xlu0 %880 }
 0x694   :  { %v895_v16 = vperm.slane %v881_v59, %v7127_v50 }
 0x695   :  { %v890_v12 = vpop.permute.xlu1 %889  ;;  %v1584_v22 = vpop.permute.xlu2 %1583 }
 0x696   :  { %v898_v26 = vperm.slane %v890_v12, %v7127_v50  ;;  %v902_v37 = vsel %vm10135_vm12, %v896_v20, %v895_v16  ;;  %v1626_v35 = vperm.slane %v1584_v22, %v7127_v50 }
 0x697   :  { %908 = vadd.xlane.f32.xlu1 %v907_v14 }
 0x69b   :  { %v887_v21 = vpop.permute.xlu0 %886 }
 0x69c   :  { %v897_v24 = vperm.slane %v887_v21, %v7127_v50 }
 0x69d   :  { %v1593_v58 = vpop.permute.xlu2 %1592 }
 0x69e   :  { %v903_v30 = vsel %vm10134_vm8, %v897_v24, %v902_v37  ;;  %v1629_v56 = vperm.slane %v1593_v58, %v7127_v50 }
 0x69f   :  { %v904_v31 = vsel %vm10126_vm13, %v898_v26, %v903_v30 }
 0x6a0   :  { %v910_v33 = vsel %vm10125_vm14, %v904_v31, 0.0 }
 0x6a1   :  { %911 = vadd.xlane.f32.xlu2 %v910_v33 }
 0x6a5   :  { %v1599_v9 = vpop.permute.xlu2 %1598 }
 0x6a6   :  { %v1631_v16 = vperm.slane %v1599_v9, %v7127_v50 }
 0x6ae   :  { %v1581_v29 = vpop.permute.xlu1 %1580 }
 0x6af   :  { %v1578_v55 = vpop.permute.xlu0 %1577  ;;  %v1625_v54 = vperm.slane %v1581_v29, %v7127_v50 }
 0x6b0   :  { %v1624_v62 = vperm.slane %v1578_v55, %v7127_v50 }
 0x6b2   :  { %v1640_v8 = vsel %vm10135_vm12, %v1625_v54, %v1624_v62 }
 0x6b3   :  { %v1641_v13 = vsel %vm10134_vm8, %v1626_v35, %v1640_v8 }
 0x6b6   :  { %v1590_v32 = vpop.permute.xlu1 %1589  ;;  %v1608_v26 = vpop.permute.xlu2 %1607 }
 0x6b7   :  { %v1587_v25 = vpop.permute.xlu0 %1586  ;;  %v1628_v43 = vperm.slane %v1590_v32, %v7127_v50  ;;  %v1634_v62 = vperm.slane %v1608_v26, %v7127_v50 }
 0x6b8   :  { %v1627_v1 = vperm.slane %v1587_v25, %v7127_v50 }
 0x6ba   :  { %v1642_v7 = vsel %vm10126_vm13, %v1627_v1, %v1641_v13 }
 0x6bb   :  { %v1643_v59 = vsel %vm10123_vm15, %v1628_v43, %v1642_v7 }
 0x6bc   :  { %v1644_v12 = vsel %vm10119_vm0, %v1629_v56, %v1643_v59 }
 0x6be   :  { %v1617_v31 = vpop.permute.xlu2 %1616 }
 0x6bf   :  { %v1596_v14 = vpop.permute.xlu0 %1595  ;;  %v1637_v1 = vperm.slane %v1617_v31, %v7127_v50 }
 0x6c0   :  { %v1630_v28 = vperm.slane %v1596_v14, %v7127_v50 }
 0x6c2   :  { %v1645_v20 = vsel %vm10118_vm2, %v1630_v28, %v1644_v12 }
 0x6c3   :  { %v1646_v21 = vsel %vm10117_vm5, %v1631_v16, %v1645_v20 }
 0x6c4   :  { %v1656_v24 = vsel %vm10113_vm7, %v1646_v21, 0.0 }
 0x6c5   :  { %1657 = vadd.xlane.f32.xlu0 %v1656_v24 }
 0x6c6   :  { %v1623_v32 = vpop.permute.xlu2 %1622 }
 0x6c7   :  { %v1639_v9 = vperm.slane %v1623_v32, %v7127_v50 }
 0x6cf   :  { %v1602_v37 = vpop.permute.xlu1 %1601 }
 0x6d0   :  { %v1605_v30 = vpop.permute.xlu0 %1604  ;;  %v1632_v22 = vperm.slane %v1602_v37, %v7127_v50 }
 0x6d1   :  { %v1633_v29 = vperm.slane %v1605_v30, %v7127_v50 }
 0x6d3   :  { %v1647_v55 = vsel %vm10135_vm12, %v1633_v29, %v1632_v22 }
 0x6d4   :  { %v1648_v25 = vsel %vm10134_vm8, %v1634_v62, %v1647_v55 }
 0x6d7   :  { %v1611_v33 = vpop.permute.xlu1 %1610 }
 0x6d8   :  { %v1635_v54 = vperm.slane %v1611_v33, %v7127_v50  ;;  %v1620_v58 = vpop.permute.xlu0 %1619 }
 0x6d9   :  { %v1638_v13 = vperm.slane %v1620_v58, %v7127_v50 }
 0x6da   :  { %v1649_v43 = vsel %vm10126_vm13, %v1635_v54, %v1648_v25 }
 0x6df   :  { %v1614_v8 = vpop.permute.xlu1 %1613 }
 0x6e0   :  { %v1636_v35 = vperm.slane %v1614_v8, %v7127_v50 }
 0x6e2   :  { %v1650_v7 = vsel %vm10123_vm15, %v1636_v35, %v1649_v43 }
 0x6e3   :  { %v1651_v59 = vsel %vm10119_vm0, %v1637_v1, %v1650_v7 }
 0x6e4   :  { %v1652_v56 = vsel %vm10118_vm2, %v1638_v13, %v1651_v59 }
 0x6e5   :  { %v1653_v14 = vsel %vm10117_vm5, %v1639_v9, %v1652_v56 }
 0x6e6   :  { %v1659_v28 = vsel %vm10113_vm7, %v1653_v14, 0.0 }
 0x6e7   :  { %1660 = vadd.xlane.f32.xlu1 %v1659_v28 }
 0x70a   :  { %v909_v16 = vpop.xlane.xlu1 %908 }
 0x70b   :  { %v915_v12 = vperm.slane %v909_v16, 0  ;;  %v7321_v20 = vperm.slane %v909_v16, 1  ;;  %v917_v21 = vperm.slane %v909_v16, 2  ;;  %v7323_v24 = vperm.slane %v909_v16, 3 }
 0x70d   :  { %6280 = vrcp.f32 %v915_v12  ;;  %v940_v26 = vand.u32 2147483647, %v915_v12  ;;  %v942_v37 = vand.u32 2147483648, %v915_v12  ;;  %v972_v30 = vand.u32 2147483648, %v917_v21 }
 0x70e   :  { %6282 = vrcp.f32 %v7321_v20  ;;  %v970_v31 = vand.u32 2147483647, %v917_v21  ;;  %v955_v33 = vand.u32 2147483647, %v7321_v20  ;;  %vm936_vm9 = vweird.f32 %v915_v12 }
 0x70f   :  { %6284 = vrcp.f32 %v917_v21  ;;  %vm966_vm10 = vweird.f32 %v917_v21  ;;  %v957_v29 = vand.u32 2147483648, %v7321_v20  ;;  %vm7329_vm11 = vcmp.eq.f32.partialorder %v940_v26, 8.507059e+37 }
 0x710   :  { %6286 = vrcp.f32 %v7323_v24  ;;  %v943_v8 = vor.u32 1.1754944e-38, %v942_v37  ;;  %v973_v32 = vor.u32 1.1754944e-38, %v972_v30  ;;  %vm951_vm6 = vweird.f32 %v7321_v20 }
 0x711   :  { %vm981_vm4 = vweird.f32 %v7323_v24  ;;  %v985_v43 = vand.u32 2147483647, %v7323_v24  ;;  %v987_v13 = vand.u32 2147483648, %v7323_v24  ;;  %vm7343_vm7 = vcmp.eq.f32.partialorder %v970_v31, 8.507059e+37 }
 0x712   :  { %vm7348_vm3 = vcmp.eq.f32.partialorder %v955_v33, 8.507059e+37  ;;  %v958_v37 = vor.u32 1.1754944e-38, %v957_v29 }
 0x713   :  { %v6281_v22 = vpop.eup %6280  ;;  %vm7360_vm14 = vcmp.eq.f32.partialorder %v985_v43, 8.507059e+37 }
 0x714   :  { %v6283_v55 = vpop.eup %6282  ;;  %v912_v54 = vpop.xlane.xlu2 %911  ;;  %v932_v62 = vmul.f32 %v6281_v22, %v915_v12  ;;  %vm937_vm5 = vweird.f32 %v6281_v22 }
 0x715   :  { %v6285_v25 = vpop.eup %6284  ;;  %v7334_v35 = vperm.slane %v912_v54, 0  ;;  %v7336_v1 = vperm.slane %v912_v54, 1  ;;  %v7341_v9 = vperm.slane %v912_v54, 3  ;;  %v947_v28 = vmul.f32 %v6283_v55, %v7321_v20  ;;  %vm938_vm15 = vmor %vm936_vm9, %vm937_vm5 }
 0x716   :  { %v6287_v7 = vpop.eup %6286  ;;  %v933_v59 = vsub.f32 1.0, %v932_v62  ;;  %v962_v56 = vmul.f32 %v6285_v25, %v917_v21  ;;  %v7352_v26 = vperm.slane %v912_v54, 2  ;;  %vm967_vm2 = vweird.f32 %v6285_v25 }
 0x717   :  { %6288 = vrcp.f32 %v7334_v35  ;;  %v977_v30 = vmul.f32 %v6287_v7, %v7323_v24  ;;  %v948_v31 = vsub.f32 1.0, %v947_v28  ;;  %vm952_vm0 = vweird.f32 %v6283_v55  ;;  %vm7365_vm13 = vmor %vm966_vm10, %vm967_vm2 }
 0x718   :  { %v934_v51 = vmul.f32 %v6281_v22, %v933_v59  ;;  %v963_v62 = vsub.f32 1.0, %v962_v56  ;;  %6290 = vrcp.f32 %v7336_v1  ;;  %vm982_vm1 = vweird.f32 %v6287_v7  ;;  %vm953_vm5 = vmor %vm951_vm6, %vm952_vm0 }
 0x719   :  { %v978_v48 = vsub.f32 1.0, %v977_v30  ;;  %6292 = vrcp.f32 %v7341_v9  ;;  %v949_v54 = vmul.f32 %v6283_v55, %v948_v31  ;;  %v1047_v43 = vand.u32 2147483648, %v7341_v9 }
 0x71a   :  { %v935_v33 = vadd.f32 %v6281_v22, %v934_v51  ;;  %v964_v19 = vmul.f32 %v6285_v25, %v963_v62  ;;  %6294 = vrcp.f32 %v7352_v26  ;;  %v988_v62 = vor.u32 1.1754944e-38, %v987_v13 }
 0x71b   :  { %v979_v29 = vmul.f32 %v6287_v7, %v978_v48  ;;  %v950_v51 = vadd.f32 %v6283_v55, %v949_v54 }
 0x71c   :  { %v939_v56 = vsel %vm938_vm15, %v6281_v22, %v935_v33  ;;  %v965_v28 = vadd.f32 %v6285_v25, %v964_v19  ;;  %v1000_v19 = vand.u32 2147483647, %v7334_v35  ;;  %vm983_vm15 = vmor %vm981_vm4, %vm982_vm1  ;;  %vm1041_vm1 = vweird.f32 %v7341_v9 }
 0x71d   :  { %v6289_v31 = vpop.eup %6288  ;;  %v944_v12 = vsel %vm7329_vm11, %v943_v8, %v939_v56  ;;  %v980_v48 = vadd.f32 %v6287_v7, %v979_v29  ;;  %v954_v33 = vsel %vm953_vm5, %v6283_v55, %v950_v51  ;;  %vm1026_vm5 = vweird.f32 %v7352_v26 }
 0x71e   :  { %v945_v21 = vmul.f32 %v7181_v18, %v944_v12  ;;  %v969_v22 = vsel %vm7365_vm13, %v6285_v25, %v965_v28  ;;  %v992_v58 = vmul.f32 %v6289_v31, %v7334_v35  ;;  %v6291_v8 = vpop.eup %6290  ;;  %v959_v13 = vsel %vm7348_vm3, %v958_v37, %v954_v33 }
 0x71f   :  { %v974_v20 = vsel %vm7343_vm7, %v973_v32, %v969_v22  ;;  %v984_v54 = vsel %vm983_vm15, %v6287_v7, %v980_v48  ;;  %v1002_v18 = vand.u32 2147483648, %v7334_v35  ;;  %v6293_v29 = vpop.eup %6292  ;;  %v960_v25 = vmul.f32 %v7183_v39, %v959_v13 }
 0x720   :  { %1991 = vperm.xlu2 %6230, %v945_v21   ;;  %v975_v55 = vmul.f32 %v7193_v61, %v974_v20  ;;  %v989_v24 = vsel %vm7360_vm14, %v988_v62, %v984_v54  ;;  %v993_v56 = vsub.f32 1.0, %v992_v58  ;;  %v6295_v28 = vpop.eup %6294  ;;  %v1037_v14 = vmul.f32 %v6293_v29, %v7341_v9 }
 0x721   :  { %v1045_v32 = vand.u32 2147483647, %v7341_v9  ;;  %vm996_vm3 = vweird.f32 %v7334_v35  ;;  %1994 = vperm.xlu1 %6229, %v960_v25   ;;  %v1048_v7 = vor.u32 1.1754944e-38, %v1047_v43  ;;  %vm997_vm4 = vweird.f32 %v6289_v31 }
 0x722   :  { %1997 = vperm.xlu0 %6231, %v975_v55   ;;  %v994_v16 = vmul.f32 %v6289_v31, %v993_v56  ;;  %v1007_v39 = vmul.f32 %v6291_v8, %v7336_v1  ;;  %v990_v61 = vmul.f32 %v7187_v52, %v989_v24  ;;  %v1038_v37 = vsub.f32 1.0, %v1037_v14  ;;  %vm998_vm13 = vmor %vm996_vm3, %vm997_vm4 }
 0x723   :  { %vm1042_vm6 = vweird.f32 %v6293_v29  ;;  %vm1001_vm7 = vcmp.eq.f32.partialorder %v1000_v19, 8.507059e+37  ;;  %v1003_v30 = vor.u32 1.1754944e-38, %v1002_v18  ;;  %v1022_v62 = vmul.f32 %v6295_v28, %v7352_v26 }
 0x724   :  { %v995_v59 = vadd.f32 %v6289_v31, %v994_v16  ;;  %v1008_v51 = vsub.f32 1.0, %v1007_v39  ;;  %v1039_v12 = vmul.f32 %v6293_v29, %v1038_v37  ;;  %vm1011_vm14 = vweird.f32 %v7336_v1  ;;  %vm1043_vm9 = vmor %vm1041_vm1, %vm1042_vm6 }
 0x725   :  { %vm1012_vm0 = vweird.f32 %v6291_v8  ;;  %v1017_v48 = vand.u32 2147483648, %v7336_v1  ;;  %v1015_v52 = vand.u32 2147483647, %v7336_v1  ;;  %v1023_v22 = vsub.f32 1.0, %v1022_v62 }
 0x726   :  { %v999_v43 = vsel %vm998_vm13, %v6289_v31, %v995_v59  ;;  %v1009_v21 = vmul.f32 %v6291_v8, %v1008_v51  ;;  %v1040_v19 = vadd.f32 %v6293_v29, %v1039_v12  ;;  %vm1027_vm2 = vweird.f32 %v6295_v28  ;;  %vm1013_vm11 = vmor %vm1011_vm14, %vm1012_vm0 }
 0x727   :  { %v1004_v33 = vsel %vm1001_vm7, %v1003_v30, %v999_v43  ;;  %v1032_v58 = vand.u32 2147483648, %v7352_v26  ;;  %v1024_v13 = vmul.f32 %v6295_v28, %v1023_v22  ;;  %v1030_v31 = vand.u32 2147483647, %v7352_v26  ;;  %vm1028_vm1 = vmor %vm1026_vm5, %vm1027_vm2 }
 0x728   :  { %2000 = vperm.xlu2 %6230, %v990_v61   ;;  %v1005_v35 = vmul.f32 %v7197_v6, %v1004_v33  ;;  %v1010_v20 = vadd.f32 %v6291_v8, %v1009_v21  ;;  %v1044_v54 = vsel %vm1043_vm9, %v6293_v29, %v1040_v19  ;;  %vm1046_vm10 = vcmp.eq.f32.partialorder %v1045_v32, 8.507059e+37 }
 0x729   :  { %v1018_v18 = vor.u32 1.1754944e-38, %v1017_v48  ;;  %v1049_v55 = vsel %vm1046_vm10, %v1048_v7, %v1044_v54  ;;  %vm1016_vm15 = vcmp.eq.f32.partialorder %v1015_v52, 8.507059e+37  ;;  %v1025_v9 = vadd.f32 %v6295_v28, %v1024_v13 }
 0x72a   :  { %2003 = vperm.xlu0 %6231, %v1005_v35   ;;  %v1014_v25 = vsel %vm1013_vm11, %v6291_v8, %v1010_v20  ;;  %v1050_v6 = vmul.f32 %v7203_v4, %v1049_v55  ;;  %v1033_v56 = vor.u32 1.1754944e-38, %v1032_v58  ;;  %vm1031_vm3 = vcmp.eq.f32.partialorder %v1030_v31, 8.507059e+37 }
 0x72b   :  { %v1019_v24 = vsel %vm1016_vm15, %v1018_v18, %v1014_v25  ;;  %v1029_v29 = vsel %vm1028_vm1, %v6295_v28, %v1025_v9 }
 0x72c   :  { %2012 = vperm.xlu1 %6229, %v1050_v6   ;;  %v1034_v14 = vsel %vm1031_vm3, %v1033_v56, %v1029_v29  ;;  %v1020_v1 = vmul.f32 %v7199_v3, %v1019_v24 }
 0x72d   :  { %v1035_v26 = vmul.f32 %v7206_v10, %v1034_v14 }
 0x730   :  { %2006 = vperm.xlu2 %6230, %v1020_v1  }
 0x732   :  { %2009 = vperm.xlu0 %6231, %v1035_v26  }
 0x738   :  { %v7418_v32 = vpop.xlane.xlu0 %1657 }
 0x739   :  { %v1664_v8 = vperm.slane %v7418_v32, 0  ;;  %v1665_v4 = vperm.slane %v7418_v32, 1  ;;  %v1666_v7 = vperm.slane %v7418_v32, 2  ;;  %v7424_v28 = vperm.slane %v7418_v32, 3 }
 0x73a   :  { %v7428_v51 = vperm.slane %v7418_v32, 4 }
 0x73b   :  { %6296 = vrcp.f32 %v1664_v8  ;;  %v1705_v59 = vand.u32 2147483647, %v1664_v8  ;;  %v1707_v62 = vand.u32 2147483648, %v1664_v8  ;;  %v1722_v43 = vand.u32 2147483648, %v1665_v4 }
 0x73c   :  { %6298 = vrcp.f32 %v1665_v4  ;;  %vm1701_vm6 = vweird.f32 %v1664_v8  ;;  %v1720_v22 = vand.u32 2147483647, %v1665_v4  ;;  %vm1716_vm14 = vweird.f32 %v1665_v4 }
 0x73d   :  { %6300 = vrcp.f32 %v1666_v7  ;;  %vm1706_vm13 = vcmp.eq.f32.partialorder %v1705_v59, 8.507059e+37  ;;  %v1708_v58 = vor.u32 1.1754944e-38, %v1707_v62  ;;  %vm1731_vm2 = vweird.f32 %v1666_v7 }
 0x73e   :  { %6302 = vrcp.f32 %v7424_v28  ;;  %v1723_v31 = vor.u32 1.1754944e-38, %v1722_v43  ;;  %v1737_v18 = vand.u32 2147483648, %v1666_v7  ;;  %vm1721_vm11 = vcmp.eq.f32.partialorder %v1720_v22, 8.507059e+37 }
 0x73f   :  { %v1735_v9 = vand.u32 2147483647, %v1666_v7  ;;  %6304 = vrcp.f32 %v7428_v51  ;;  %vm1746_vm3 = vweird.f32 %v7424_v28 }
 0x741   :  { %v6297_v16 = vpop.eup %6296  ;;  %vm1736_vm15 = vcmp.eq.f32.partialorder %v1735_v9, 8.507059e+37 }
 0x742   :  { %v6299_v3 = vpop.eup %6298  ;;  %v1697_v39 = vmul.f32 %v6297_v16, %v1664_v8  ;;  %vm1702_vm4 = vweird.f32 %v6297_v16  ;;  %v1738_v8 = vor.u32 1.1754944e-38, %v1737_v18 }
 0x743   :  { %v6301_v61 = vpop.eup %6300  ;;  %v1712_v10 = vmul.f32 %v6299_v3, %v1665_v4  ;;  %vm1717_vm7 = vweird.f32 %v6299_v3  ;;  %vm1703_vm0 = vmor %vm1701_vm6, %vm1702_vm4 }
 0x744   :  { %v1698_v37 = vsub.f32 1.0, %v1697_v39  ;;  %v1727_v30 = vmul.f32 %v6301_v61, %v1666_v7  ;;  %vm1732_vm9 = vweird.f32 %v6301_v61  ;;  %v6303_v20 = vpop.eup %6302  ;;  %vm1718_vm10 = vmor %vm1716_vm14, %vm1717_vm7 }
 0x745   :  { %v1713_v12 = vsub.f32 1.0, %v1712_v10  ;;  %vm1733_vm5 = vmor %vm1731_vm2, %vm1732_vm9  ;;  %v1742_v14 = vmul.f32 %v6303_v20, %v7424_v28  ;;  %v6305_v7 = vpop.eup %6304  ;;  %vm1747_vm1 = vweird.f32 %v6303_v20 }
 0x746   :  { %v1699_v48 = vmul.f32 %v6297_v16, %v1698_v37  ;;  %v1728_v21 = vsub.f32 1.0, %v1727_v30  ;;  %v1757_v39 = vmul.f32 %v6305_v7, %v7428_v51  ;;  %v7443_v37 = vperm.slane %v7418_v32, 5  ;;  %vm1748_vm4 = vmor %vm1746_vm3, %vm1747_vm1 }
 0x747   :  { %v1714_v52 = vmul.f32 %v6299_v3, %v1713_v12  ;;  %v1750_v12 = vand.u32 2147483647, %v7424_v28  ;;  %vm1762_vm7 = vweird.f32 %v6305_v7 }
 0x748   :  { %v1700_v19 = vadd.f32 %v6297_v16, %v1699_v48  ;;  %v1729_v33 = vmul.f32 %v6301_v61, %v1728_v21  ;;  %v1758_v62 = vsub.f32 1.0, %v1757_v39  ;;  %6306 = vrcp.f32 %v7443_v37 }
 0x749   :  { %v1715_v35 = vadd.f32 %v6299_v3, %v1714_v52  ;;  %vm1751_vm6 = vcmp.eq.f32.partialorder %v1750_v12, 8.507059e+37  ;;  %v1782_v39 = vand.u32 2147483648, %v7443_v37  ;;  %vm1776_vm9 = vweird.f32 %v7443_v37 }
 0x74a   :  { %v1704_v13 = vsel %vm1703_vm0, %v6297_v16, %v1700_v19  ;;  %v1730_v54 = vadd.f32 %v6301_v61, %v1729_v33  ;;  %v1759_v43 = vmul.f32 %v6305_v7, %v1758_v62  ;;  %v7453_v19 = vperm.slane %v7418_v32, 6 }
 0x74b   :  { %v1709_v55 = vsel %vm1706_vm13, %v1708_v58, %v1704_v13  ;;  %v1719_v25 = vsel %vm1718_vm10, %v6299_v3, %v1715_v35  ;;  %v7457_v58 = vperm.slane %v7418_v32, 7  ;;  %v1767_v13 = vand.u32 2147483648, %v7428_v51 }
 0x74c   :  { %v1710_v6 = vmul.f32 %v7220_v40, %v1709_v55  ;;  %v1724_v24 = vsel %vm1721_vm11, %v1723_v31, %v1719_v25  ;;  %v1734_v29 = vsel %vm1733_vm5, %v6301_v61, %v1730_v54  ;;  %v1743_v40 = vsub.f32 1.0, %v1742_v14 }
 0x74d   :  { %v1725_v56 = vmul.f32 %v7217_v42, %v1724_v24  ;;  %v1739_v16 = vsel %vm1736_vm15, %v1738_v8, %v1734_v29  ;;  %6308 = vrcp.f32 %v7453_v19  ;;  %vm1761_vm13 = vweird.f32 %v7428_v51 }
 0x74e   :  { %v2462_v1 = vmul.f32 %v7020_v45, %v1710_v6  ;;  %v2463_v26 = vmul.f32 %v7018_v44, %v1710_v6  ;;  %v1740_v3 = vmul.f32 %v7215_v0, %v1739_v16  ;;  %v1744_v42 = vmul.f32 %v6303_v20, %v1743_v40  ;;  %v6307_v35 = vpop.eup %6306  ;;  %vm1763_vm14 = vmor %vm1761_vm13, %vm1762_vm7 }
 0x74f   :  { %v2467_v4 = vmul.f32 %v7018_v44, %v1725_v56  ;;  %v2466_v61 = vmul.f32 %v7020_v45, %v1725_v56  ;;  %v2464_v10 = vmul.f32 %v7016_v41, %v1710_v6  ;;  %v1752_v0 = vand.u32 2147483648, %v7424_v28 }
 0x750   :  { %2591 = vperm.xlu1 %6229, %v2462_v1   ;;  %2594 = vperm.xlu2 %6230, %v2463_v26   ;;  %v2470_v59 = vmul.f32 %v7020_v45, %v1740_v3  ;;  %v1745_v30 = vadd.f32 %v6303_v20, %v1744_v42  ;;  %v2468_v21 = vmul.f32 %v7016_v41, %v1725_v56  ;;  %v1765_v54 = vand.u32 2147483647, %v7428_v51 }
 0x751   :  { %2606 = vperm.xlu0 %6231, %v2467_v4   ;;  %v2471_v52 = vmul.f32 %v7018_v44, %v1740_v3  ;;  %v1753_v22 = vor.u32 1.1754944e-38, %v1752_v0  ;;  %v2469_v33 = vmul.f32 %v7024_v5, %v1725_v56  ;;  %6310 = vrcp.f32 %v7457_v58 }
 0x752   :  { %v1749_v48 = vsel %vm1748_vm4, %v6303_v20, %v1745_v30  ;;  %v1760_v20 = vadd.f32 %v6305_v7, %v1759_v43  ;;  %v1772_v32 = vmul.f32 %v6307_v35, %v7443_v37  ;;  %v2465_v55 = vmul.f32 %v7024_v5, %v1710_v6 }
 0x753   :  { %v1754_v28 = vsel %vm1751_vm6, %v1753_v22, %v1749_v48  ;;  %v2472_v25 = vmul.f32 %v7016_v41, %v1740_v3  ;;  %v1768_v9 = vor.u32 1.1754944e-38, %v1767_v13  ;;  %vm1766_vm0 = vcmp.eq.f32.partialorder %v1765_v54, 8.507059e+37  ;;  %v7472_v51 = vpop.eup %6308 }
 0x754   :  { %v7462_v31 = vmul.f32 %v7231_v63, %v1754_v28  ;;  %v1764_v18 = vsel %vm1763_vm14, %v6305_v7, %v1760_v20  ;;  %v1773_v56 = vsub.f32 1.0, %v1772_v32  ;;  %v1787_v1 = vmul.f32 %v7472_v51, %v7453_v19 }
 0x755   :  { %v1769_v63 = vsel %vm1766_vm0, %v1768_v9, %v1764_v18  ;;  %v2473_v16 = vmul.f32 %v7024_v5, %v1740_v3  ;;  %vm1777_vm2 = vweird.f32 %v6307_v35  ;;  %v1783_v30 = vor.u32 1.1754944e-38, %v1782_v39 }
 0x756   :  { %v2475_v24 = vmul.f32 %v7018_v44, %v7462_v31  ;;  %v7477_v14 = vmul.f32 %v7228_v2, %v1769_v63  ;;  %v1774_v6 = vmul.f32 %v6307_v35, %v1773_v56  ;;  %v2474_v4 = vmul.f32 %v7020_v45, %v7462_v31  ;;  %vm1778_vm10 = vmor %vm1776_vm9, %vm1777_vm2 }
 0x757   :  { %v7474_v29 = vpop.eup %6310  ;;  %v1788_v42 = vsub.f32 1.0, %v1787_v1  ;;  %v2476_v0 = vmul.f32 %v7016_v41, %v7462_v31  ;;  %vm1792_vm5 = vweird.f32 %v7472_v51  ;;  %vm1791_vm1 = vweird.f32 %v7453_v19 }
 0x758   :  { %2603 = vperm.xlu1 %6229, %v2466_v61   ;;  %2597 = vperm.xlu2 %6230, %v2464_v10   ;;  %v1802_v8 = vmul.f32 %v7474_v29, %v7457_v58  ;;  %v2478_v40 = vmul.f32 %v7020_v45, %v7477_v14  ;;  %v1775_v7 = vadd.f32 %v6307_v35, %v1774_v6  ;;  %v1780_v10 = vand.u32 2147483647, %v7443_v37  ;;  %vm1793_vm3 = vmor %vm1791_vm1, %vm1792_vm5 }
 0x759   :  { %2615 = vperm.xlu0 %6231, %v2470_v59   ;;  %v1789_v59 = vmul.f32 %v7472_v51, %v1788_v42  ;;  %v2479_v12 = vmul.f32 %v7018_v44, %v7477_v14  ;;  %v2480_v48 = vmul.f32 %v7016_v41, %v7477_v14  ;;  %vm1807_vm15 = vweird.f32 %v7474_v29 }
 0x75a   :  { %v7481_v26 = vpop.xlane.xlu1 %1660  ;;  %v1803_v61 = vsub.f32 1.0, %v1802_v8  ;;  %v1779_v3 = vsel %vm1778_vm10, %v6307_v35, %v1775_v7  ;;  %vm1781_vm11 = vcmp.eq.f32.partialorder %v1780_v10, 8.507059e+37  ;;  %v1795_v35 = vand.u32 2147483647, %v7453_v19 }
 0x75b   :  { %v7491_v2 = vperm.slane %v7481_v26, 0  ;;  %v1784_v37 = vsel %vm1781_vm11, %v1783_v30, %v1779_v3  ;;  %v7506_v43 = vperm.slane %v7481_v26, 1  ;;  %v1812_v20 = vand.u32 2147483648, %v7457_v58 }
 0x75c   :  { %v1804_v62 = vmul.f32 %v7474_v29, %v1803_v61  ;;  %v1785_v28 = vmul.f32 %v7226_v53, %v1784_v37  ;;  %vm1806_vm4 = vweird.f32 %v7457_v58  ;;  %v1810_v13 = vand.u32 2147483647, %v7457_v58 }
 0x75d   :  { %6312 = vrcp.f32 %v7491_v2  ;;  %vm1808_vm6 = vmor %vm1806_vm4, %vm1807_vm15  ;;  %vm1796_vm7 = vcmp.eq.f32.partialorder %v1795_v35, 8.507059e+37  ;;  %v1827_v7 = vand.u32 2147483648, %v7491_v2  ;;  %vm1821_vm0 = vweird.f32 %v7491_v2 }
 0x75e   :  { %v1805_v22 = vadd.f32 %v7474_v29, %v1804_v62  ;;  %6314 = vrcp.f32 %v7506_v43  ;;  %v2484_v9 = vmul.f32 %v7016_v41, %v1785_v28  ;;  %vm1811_vm13 = vcmp.eq.f32.partialorder %v1810_v13, 8.507059e+37 }
 0x75f   :  { %v2483_v8 = vmul.f32 %v7018_v44, %v1785_v28  ;;  %v1825_v42 = vand.u32 2147483647, %v7491_v2  ;;  %v1828_v30 = vor.u32 1.1754944e-38, %v1827_v7  ;;  %v1842_v37 = vand.u32 2147483648, %v7506_v43 }
 0x760   :  { %2609 = vperm.xlu1 %6229, %v2468_v21   ;;  %2618 = vperm.xlu2 %6230, %v2471_v52   ;;  %v1790_v21 = vadd.f32 %v7472_v51, %v1789_v59  ;;  %v1797_v52 = vand.u32 2147483648, %v7453_v19  ;;  %v1809_v18 = vsel %vm1808_vm6, %v7474_v29, %v1805_v22  ;;  %v2477_v19 = vmul.f32 %v7024_v5, %v7462_v31 }
 0x761   :  { %2612 = vperm.xlu0 %6231, %v2469_v33   ;;  %v2485_v59 = vmul.f32 %v7024_v5, %v1785_v28  ;;  %vm1826_vm9 = vcmp.eq.f32.partialorder %v1825_v42, 8.507059e+37  ;;  %vm1836_vm11 = vweird.f32 %v7506_v43  ;;  %v1843_v35 = vor.u32 1.1754944e-38, %v1842_v37 }
 0x762   :  { %v1794_v54 = vsel %vm1793_vm3, %v7472_v51, %v1790_v21  ;;  %v1798_v32 = vor.u32 1.1754944e-38, %v1797_v52  ;;  %v1840_v21 = vand.u32 2147483647, %v7506_v43 }
 0x763   :  { %v6313_v33 = vpop.eup %6312 }
 0x764   :  { %v1817_v53 = vmul.f32 %v6313_v33, %v7491_v2  ;;  %v1799_v58 = vsel %vm1796_vm7, %v1798_v32, %v1794_v54  ;;  %v6315_v51 = vpop.eup %6314  ;;  %vm1822_vm14 = vweird.f32 %v6313_v33  ;;  %vm1841_vm15 = vcmp.eq.f32.partialorder %v1840_v21, 8.507059e+37 }
 0x765   :  { %v7531_v29 = vmul.f32 %v7238_v23, %v1799_v58  ;;  %v1832_v1 = vmul.f32 %v6315_v51, %v7506_v43  ;;  %vm1823_vm2 = vmor %vm1821_vm0, %vm1822_vm14  ;;  %vm1837_vm10 = vweird.f32 %v6315_v51 }
 0x766   :  { %v1818_v56 = vsub.f32 1.0, %v1817_v53  ;;  %vm1838_vm5 = vmor %vm1836_vm11, %vm1837_vm10 }
 0x767   :  { %v2489_v62 = vmul.f32 %v7024_v5, %v7531_v29 }
 0x768   :  { %2600 = vperm.xlu1 %6229, %v2465_v55   ;;  %2621 = vperm.xlu2 %6230, %v2472_v25   ;;  %v2482_v55 = vmul.f32 %v7020_v45, %v1785_v28  ;;  %v1813_v25 = vor.u32 1.1754944e-38, %v1812_v20  ;;  %v1819_v6 = vmul.f32 %v6313_v33, %v1818_v56  ;;  %v7571_v20 = vperm.slane %v7481_v26, 4 }
 0x769   :  { %2630 = vperm.xlu0 %6231, %v2475_v24   ;;  %v7528_v24 = vperm.slane %v7481_v26, 2 }
 0x76a   :  { %v1814_v63 = vsel %vm1811_vm13, %v1813_v25, %v1809_v18  ;;  %v1820_v23 = vadd.f32 %v6313_v33, %v1819_v6  ;;  %v2488_v25 = vmul.f32 %v7016_v41, %v7531_v29  ;;  %v1885_v21 = vand.u32 2147483647, %v7571_v20 }
 0x76b   :  { %v7534_v31 = vmul.f32 %v7235_v34, %v1814_v63  ;;  %6316 = vrcp.f32 %v7528_v24  ;;  %v1833_v34 = vsub.f32 1.0, %v1832_v1  ;;  %v1857_v18 = vand.u32 2147483648, %v7528_v24 }
 0x76c   :  { %v1824_v39 = vsel %vm1823_vm2, %v6313_v33, %v1820_v23  ;;  %v2487_v33 = vmul.f32 %v7018_v44, %v7531_v29  ;;  %vm1851_vm3 = vweird.f32 %v7528_v24  ;;  %v1855_v53 = vand.u32 2147483647, %v7528_v24 }
 0x76d   :  { %v1834_v61 = vmul.f32 %v6315_v51, %v1833_v34  ;;  %v1829_v2 = vsel %vm1826_vm9, %v1828_v30, %v1824_v39  ;;  %v2491_v28 = vmul.f32 %v7018_v44, %v7534_v31  ;;  %v1858_v58 = vor.u32 1.1754944e-38, %v1857_v18 }
 0x76e   :  { %vm1856_vm6 = vcmp.eq.f32.partialorder %v1855_v53, 8.507059e+37  ;;  %vm1881_vm9 = vweird.f32 %v7571_v20  ;;  %vm1886_vm11 = vcmp.eq.f32.partialorder %v1885_v21, 8.507059e+37 }
 0x770   :  { %2627 = vperm.xlu1 %6229, %v2474_v4   ;;  %2624 = vperm.xlu2 %6230, %v2473_v16   ;;  %v2486_v4 = vmul.f32 %v7020_v45, %v7531_v29  ;;  %v2490_v16 = vmul.f32 %v7020_v45, %v7534_v31  ;;  %v2481_v45 = vmul.f32 %v7024_v5, %v7477_v14 }
 0x771   :  { %2639 = vperm.xlu0 %6231, %v2478_v40   ;;  %v6317_v40 = vpop.eup %6316  ;;  %v7559_v14 = vmul.f32 %v7249_v57, %v1829_v2 }
 0x772   :  { %v1847_v10 = vmul.f32 %v6317_v40, %v7528_v24  ;;  %vm1852_vm1 = vweird.f32 %v6317_v40 }
 0x773   :  { %v2494_v57 = vmul.f32 %v7022_v46, %v7559_v14  ;;  %vm1853_vm4 = vmor %vm1851_vm3, %vm1852_vm1  ;;  %v2496_v39 = vmul.f32 %v7028_v47, %v7559_v14 }
 0x778   :  { %2633 = vperm.xlu1 %6229, %v2476_v0   ;;  %2642 = vperm.xlu2 %6230, %v2479_v12   ;;  %v7555_v0 = vperm.slane %v7481_v26, 3  ;;  %v1835_v12 = vadd.f32 %v6315_v51, %v1834_v61 }
 0x779   :  { %2645 = vperm.xlu0 %6231, %v2480_v48   ;;  %v1848_v48 = vsub.f32 1.0, %v1847_v10  ;;  %v7613_v10 = vperm.slane %v7481_v26, 5 }
 0x77a   :  { %v7547_v3 = vpop.permute.xlu2 %1991  ;;  %6318 = vrcp.f32 %v7555_v0  ;;  %v1839_v52 = vsel %vm1838_vm5, %v6315_v51, %v1835_v12  ;;  %vm1866_vm13 = vweird.f32 %v7555_v0 }
 0x77b   :  { %v1849_v22 = vmul.f32 %v6317_v40, %v1848_v48  ;;  %v1844_v13 = vsel %vm1841_vm15, %v1843_v35, %v1839_v52  ;;  %6320 = vrcp.f32 %v7571_v20  ;;  %v1887_v48 = vand.u32 2147483648, %v7571_v20 }
 0x77c   :  { %v7577_v44 = vmul.f32 %v7252_v17, %v1844_v13  ;;  %6322 = vrcp.f32 %v7613_v10  ;;  %vm1896_vm1 = vweird.f32 %v7613_v10 }
 0x77d   :  { %v1850_v54 = vadd.f32 %v6317_v40, %v1849_v22 }
 0x77e   :  { %v2499_v17 = vmul.f32 %v7030_v49, %v7577_v44  ;;  %v2498_v42 = vmul.f32 %v7022_v46, %v7577_v44  ;;  %v2500_v22 = vmul.f32 %v7028_v47, %v7577_v44 }
 0x780   :  { %2636 = vperm.xlu1 %6229, %v2477_v19   ;;  %2651 = vperm.xlu2 %6230, %v2482_v55   ;;  %v6319_v32 = vpop.eup %6318  ;;  %v1854_v19 = vsel %vm1853_vm4, %v6317_v40, %v1850_v54  ;;  %v1872_v40 = vand.u32 2147483648, %v7555_v0 }
 0x781   :  { %2657 = vperm.xlu0 %6231, %v2484_v9   ;;  %v1862_v55 = vmul.f32 %v6319_v32, %v7555_v0  ;;  %v2492_v9 = vmul.f32 %v7016_v41, %v7534_v31  ;;  %v1859_v24 = vsel %vm1856_vm6, %v1858_v58, %v1854_v19  ;;  %v6321_v56 = vpop.eup %6320  ;;  %v2493_v41 = vmul.f32 %v7024_v5, %v7534_v31 }
 0x782   :  { %v7573_v43 = vpop.permute.xlu2 %2000  ;;  %v7592_v6 = vmul.f32 %v7247_v36, %v1859_v24  ;;  %v1877_v1 = vmul.f32 %v6321_v56, %v7571_v20  ;;  %vm1867_vm7 = vweird.f32 %v6319_v32  ;;  %v1870_v5 = vand.u32 2147483647, %v7555_v0  ;;  %v7643_v20 = vpop.eup %6322 }
 0x783   :  { %v1863_v63 = vsub.f32 1.0, %v1862_v55  ;;  %vm1868_vm14 = vmor %vm1866_vm13, %vm1867_vm7  ;;  %v1873_v61 = vor.u32 1.1754944e-38, %v1872_v40  ;;  %vm1882_vm2 = vweird.f32 %v6321_v56  ;;  %v2497_v19 = vmul.f32 %v7026_v38, %v7559_v14 }
 0x784   :  { %v1878_v36 = vsub.f32 1.0, %v1877_v1  ;;  %vm1871_vm0 = vcmp.eq.f32.partialorder %v1870_v5, 8.507059e+37  ;;  %vm1883_vm10 = vmor %vm1881_vm9, %vm1882_vm2  ;;  %v2504_v55 = vmul.f32 %v7028_v47, %v7592_v6  ;;  %vm1897_vm5 = vweird.f32 %v7643_v20 }
 0x785   :  { %v1864_v29 = vmul.f32 %v6319_v32, %v1863_v63  ;;  %vm7689_vm3 = vmor %vm1896_vm1, %vm1897_vm5  ;;  %vm10177_vm5 = vcmask 27648  }
 0x786   :  { %v1879_v7 = vmul.f32 %v6321_v56, %v1878_v36  ;;  %v1902_v36 = vand.u32 2147483648, %v7613_v10  ;;  %vm10179_vm1 = vmmov %vm10177_vm5 }
 0x787   :  { %v1865_v23 = vadd.f32 %v6319_v32, %v1864_v29 }
 0x788   :  { %2654 = vperm.xlu1 %6229, %v2483_v8   ;;  %2663 = vperm.xlu2 %6230, %v2486_v4   ;;  %v2495_v8 = vmul.f32 %v7030_v49, %v7559_v14  ;;  %v2502_v4 = vmul.f32 %v7022_v46, %v7592_v6  ;;  %v1880_v0 = vadd.f32 %v6321_v56, %v1879_v7 }
 0x789   :  { %2675 = vperm.xlu0 %6231, %v2490_v16   ;;  %v1869_v31 = vsel %vm1868_vm14, %v6319_v32, %v1865_v23  ;;  %v1900_v23 = vand.u32 2147483647, %v7613_v10  ;;  %vm10173_vm14 = vcmask 1043459  }
 0x78a   :  { %v7589_v51 = vpop.permute.xlu2 %2006  ;;  %v1874_v30 = vsel %vm1871_vm0, %v1873_v61, %v1869_v31  ;;  %v1884_v52 = vsel %vm1883_vm10, %v6321_v56, %v1880_v0 }
 0x78b   :  { %v7629_v37 = vmul.f32 %v7260_v11, %v1874_v30  ;;  %v7641_v11 = vperm.slane %v7481_v26, 7  ;;  %vm1901_vm6 = vcmp.eq.f32.partialorder %v1900_v23, 8.507059e+37 }
 0x78d   :  { %v2507_v35 = vmul.f32 %v7030_v49, %v7629_v37  ;;  %v2506_v1 = vmul.f32 %v7022_v46, %v7629_v37  ;;  %vm1926_vm2 = vweird.f32 %v7641_v11 }
 0x790   :  { %2648 = vperm.xlu1 %6229, %v2481_v45   ;;  %2660 = vperm.xlu2 %6230, %v2485_v59   ;;  %v2501_v45 = vmul.f32 %v7026_v38, %v7577_v44  ;;  %v7618_v59 = vperm.slane %v7481_v26, 6  ;;  %v1892_v26 = vmul.f32 %v7643_v20, %v7613_v10 }
 0x791   :  { %2672 = vperm.xlu0 %6231, %v2489_v62  }
 0x792   :  { %6324 = vrcp.f32 %v7618_v59  ;;  %v1917_v7 = vand.u32 2147483648, %v7618_v59  ;;  %vm1911_vm4 = vweird.f32 %v7618_v59 }
 0x793   :  { %v7622_v2 = vpop.permute.xlu1 %1994  ;;  %6326 = vrcp.f32 %v7641_v11 }
 0x794   :  { %v7601_v16 = vpop.permute.xlu0 %1997 }
 0x798   :  { %2666 = vperm.xlu1 %6229, %v2487_v33   ;;  %2678 = vperm.xlu2 %6230, %v2491_v28   ;;  %v2503_v33 = vmul.f32 %v7030_v49, %v7592_v6  ;;  %v1888_v28 = vor.u32 1.1754944e-38, %v1887_v48  ;;  %v7645_v13 = vpop.eup %6324 }
 0x799   :  { %2687 = vperm.xlu0 %6231, %v2494_v57   ;;  %v1907_v53 = vmul.f32 %v7645_v13, %v7618_v59  ;;  %v7662_v58 = vpop.eup %6326  ;;  %vm1912_vm15 = vweird.f32 %v7645_v13 }
 0x79a   :  { %v1889_v57 = vsel %vm1886_vm11, %v1888_v28, %v1884_v52  ;;  %v1922_v29 = vmul.f32 %v7662_v58, %v7641_v11  ;;  %vm7702_vm7 = vmor %vm1911_vm4, %vm1912_vm15  ;;  %v1903_v52 = vor.u32 1.1754944e-38, %v1902_v36  ;;  %vm1927_vm0 = vweird.f32 %v7662_v58 }
 0x79b   :  { %v1890_v44 = vmul.f32 %v7269_v27, %v1889_v57  ;;  %v1908_v27 = vsub.f32 1.0, %v1907_v53  ;;  %v1918_v57 = vor.u32 1.1754944e-38, %v1917_v7  ;;  %vm1928_vm9 = vmor %vm1926_vm2, %vm1927_vm0 }
 0x79c   :  { %v7620_v62 = vpop.permute.xlu0 %2003  ;;  %v1923_v5 = vsub.f32 1.0, %v1922_v29  ;;  %v2509_v29 = vmul.f32 %v7026_v38, %v7629_v37  ;;  %vm10176_vm11 = vmmov %vm10173_vm14 }
 0x79d   :  { %v1909_v14 = vmul.f32 %v7645_v13, %v1908_v27  ;;  %vm10178_vm15 = vmmov %vm10177_vm5 }
 0x79e   :  { %v7647_v54 = vpop.permute.xlu1 %2012  ;;  %vm10182_vm4 = vmmov %vm10179_vm1 }
 0x79f   :  { %v1910_v40 = vadd.f32 %v7645_v13, %v1909_v14  ;;  %vm10187_vm0 = vmmov %vm10179_vm1 }
 0x7a0   :  { %2669 = vperm.xlu1 %6229, %v2488_v25   ;;  %2681 = vperm.xlu2 %6230, %v2492_v9   ;;  %v2510_v25 = vmul.f32 %v7022_v46, %v1890_v44  ;;  %v1893_v9 = vsub.f32 1.0, %v1892_v26  ;;  %vm10188_vm2 = vmmov %vm10187_vm0 }
 0x7a1   :  { %2702 = vperm.xlu0 %6231, %v2499_v17  }
 0x7a2   :  { %v1894_v56 = vmul.f32 %v7643_v20, %v1893_v9  ;;  %v1932_v9 = vand.u32 2147483648, %v7641_v11 }
 0x7a4   :  { %v7649_v18 = vpop.permute.xlu0 %2009 }
 0x7a8   :  { %2684 = vperm.xlu1 %6229, %v2493_v41   ;;  %2690 = vperm.xlu2 %6230, %v2495_v8   ;;  %v2505_v41 = vmul.f32 %v7026_v38, %v7592_v6  ;;  %v2512_v8 = vmul.f32 %v7028_v47, %v1890_v44 }
 0x7a9   :  { %2711 = vperm.xlu0 %6231, %v2502_v4   ;;  %v1895_v4 = vadd.f32 %v7643_v20, %v1894_v56  ;;  %v1930_v56 = vand.u32 2147483647, %v7641_v11 }
 0x7aa   :  { %v7603_v34 = vpop.permute.xlu2 %2594 }
 0x7ab   :  { %v1899_v10 = vsel %vm7689_vm3, %v7643_v20, %v1895_v4  ;;  %v2513_v20 = vmul.f32 %v7026_v38, %v1890_v44  ;;  %vm1931_vm10 = vcmp.eq.f32.partialorder %v1930_v56, 8.507059e+37  ;;  %v10175_v56 = vld [vmem:[#allocation5_spill] sm:$0xff]  ;;  %vm10181_vm3 = vmmov %vm10179_vm1 }
 0x7b0   :  { %2699 = vperm.xlu1 %6229, %v2498_v42   ;;  %2693 = vperm.xlu2 %6230, %v2496_v39   ;;  %v2508_v39 = vmul.f32 %v7028_v47, %v7629_v37 }
 0x7b1   :  { %2708 = vperm.xlu0 %6231, %v2501_v45   ;;  %v1915_v45 = vand.u32 2147483647, %v7618_v59  ;;  %v1914_v59 = vsel %vm7702_vm7, %v7645_v13, %v1910_v40  ;;  %vm10184_vm7 = vmmov %vm10179_vm1 }
 0x7b2   :  { %v7624_v12 = vpop.permute.xlu2 %2597 }
 0x7b3   :  { %vm1916_vm13 = vcmp.eq.f32.partialorder %v1915_v45, 8.507059e+37 }
 0x7b4   :  { %v1919_v53 = vsel %vm1916_vm13, %v1918_v57, %v1914_v59  ;;  %vm10185_vm13 = vmmov %vm10179_vm1 }
 0x7b8   :  { %2705 = vperm.xlu1 %6229, %v2500_v22   ;;  %2714 = vperm.xlu2 %6230, %v2503_v33   ;;  %v1924_v22 = vmul.f32 %v7662_v58, %v1923_v5 }
 0x7b9   :  { %2726 = vperm.xlu0 %6231, %v2507_v35   ;;  %v2511_v35 = vmul.f32 %v7030_v49, %v1890_v44 }
 0x7ba   :  { %v2619_v32 = vpop.permute.xlu2 %2618 }
 0x7bb   :  { %v2791_v30 = vperm.slane %v2619_v32, %v7127_v50  ;;  %v1904_v32 = vsel %vm1901_vm6, %v1903_v52, %v1899_v10  ;;  %vm10183_vm6 = vmmov %vm10176_vm11 }
 0x7bc   :  { %v1905_v44 = vmul.f32 %v7258_v15, %v1904_v32 }
 0x7be   :  { %v2515_v37 = vmul.f32 %v7030_v49, %v1905_v44  ;;  %v2516_v36 = vmul.f32 %v7028_v47, %v1905_v44 }
 0x7c0   :  { %2696 = vperm.xlu1 %6229, %v2497_v19   ;;  %2717 = vperm.xlu2 %6230, %v2504_v55   ;;  %v1925_v19 = vadd.f32 %v7662_v58, %v1924_v22 }
 0x7c1   :  { %2735 = vperm.xlu0 %6231, %v2510_v25  }
 0x7c2   :  { %v7664_v17 = vpop.permute.xlu1 %2591  ;;  %v2622_v24 = vpop.permute.xlu2 %2621  ;;  %v1929_v14 = vsel %vm1928_vm9, %v7662_v58, %v1925_v19  ;;  %v10174_v58 = vld [vmem:[#allocation8_spill] sm:$0xff]  ;;  %v2014_v19 = vperm.slane %v7547_v3, %v7127_v50  ;;  %vm10189_vm9 = vmmov %vm10187_vm0 }
 0x7c3   :  { %v7666_v63 = vpop.permute.xlu0 %2606  ;;  %v2792_v21 = vperm.slane %v2622_v24, %v7127_v50  ;;  %v1920_v24 = vmul.f32 %v7263_v60, %v1919_v53 }
 0x7c5   :  { %v2519_v15 = vmul.f32 %v7030_v49, %v1920_v24  ;;  %v2520_v52 = vmul.f32 %v7028_v47, %v1920_v24  ;;  %v2521_v57 = vmul.f32 %v7026_v38, %v1920_v24 }
 0x7c8   :  { %2723 = vperm.xlu1 %6229, %v2506_v1   ;;  %2720 = vperm.xlu2 %6230, %v2505_v41   ;;  %v2514_v1 = vmul.f32 %v7022_v46, %v1905_v44  ;;  %v1933_v41 = vor.u32 1.1754944e-38, %v1932_v9 }
 0x7c9   :  { %2741 = vperm.xlu0 %6231, %v2512_v8  }
 0x7ca   :  { %v7683_v31 = vpop.permute.xlu1 %2603  ;;  %v2625_v6 = vpop.permute.xlu2 %2624  ;;  %v1934_v8 = vsel %vm1931_vm10, %v1933_v41, %v1929_v14  ;;  %v1936_v14 = vrot.slane %v10175_v56, 1  ;;  %vm10190_vm10 = vmmov %vm10183_vm6 }
 0x7cb   :  { %v2616_v42 = vpop.permute.xlu0 %2615  ;;  %v2793_v28 = vperm.slane %v2625_v6, %v7127_v50  ;;  %v1935_v23 = vmul.f32 %v10174_v58, %v1934_v8  ;;  %v1938_v8 = vrot.slane %v10175_v56, 3 }
 0x7cc   :  { %v2790_v0 = vperm.slane %v2616_v42, %v7127_v50  ;;  %v2518_v42 = vmul.f32 %v7022_v46, %v1920_v24  ;;  %v1951_v41 = vperm.slane %v1936_v14, 0 }
 0x7cd   :  { %v2522_v40 = vmul.f32 %v7022_v46, %v1935_v23  ;;  %v2524_v61 = vmul.f32 %v7028_v47, %v1935_v23  ;;  %v2523_v59 = vmul.f32 %v7030_v49, %v1935_v23 }
 0x7ce   :  { %v2852_v33 = vsel %vm10135_vm12, %v2791_v30, %v2790_v0 }
 0x7cf   :  { %v2853_v26 = vsel %vm10134_vm8, %v2792_v21, %v2852_v33 }
 0x7d0   :  { %2729 = vperm.xlu1 %6229, %v2508_v39   ;;  %2738 = vperm.xlu2 %6230, %v2511_v35   ;;  %v7717_v13 = vsel %vm10173_vm14, %v2793_v28, %v2853_v26  ;;  %v2517_v39 = vmul.f32 %v7026_v38, %v1905_v44  ;;  %v2015_v26 = vperm.slane %v7622_v2, %v7127_v50  ;;  %vm10186_vm14 = vmmov %vm10179_vm1 }
 0x7d1   :  { %2744 = vperm.xlu0 %6231, %v2513_v20   ;;  %v2525_v20 = vmul.f32 %v7026_v38, %v1935_v23  ;;  %v2016_v38 = vperm.slane %v7601_v16, %v7127_v50  ;;  %v2017_v2 = vperm.slane %v7573_v43, %v7127_v50  ;;  %v1953_v43 = vperm.slane %v1938_v8, 0 }
 0x7d2   :  { %v7721_v55 = vpop.permute.xlu1 %2609  ;;  %v2643_v25 = vpop.permute.xlu2 %2642  ;;  %v2022_v9 = vsel %vm10135_vm12, %v2015_v26, %v2014_v19 }
 0x7d3   :  { %v7725_v27 = vpop.permute.xlu0 %2612  ;;  %v2799_v10 = vperm.slane %v2643_v25, %v7127_v50  ;;  %v2023_v24 = vsel %vm10134_vm8, %v2016_v38, %v2022_v9  ;;  %v1940_v38 = vrot.slane %v10175_v56, 5 }
 0x7d4   :  { %v7799_v3 = vsel %vm10176_vm11, %v2017_v2, %v2023_v24  ;;  %v10180_v24 = vld [vmem:[#allocation6_spill] sm:$0xff]  ;;  %v2021_v2 = vperm.slane %v7647_v54, %v7127_v50  ;;  %vm10191_vm11 = vmmov %vm10187_vm0 }
 0x7d5   :  { %v1943_v14 = vrot.slane %v10180_v24, 1 }
 0x7d8   :  { %2732 = vperm.xlu1 %6229, %v2509_v29   ;;  %2747 = vperm.xlu2 %6230, %v2514_v1  }
 0x7d9   :  { %2762 = vperm.xlu0 %6231, %v2519_v15   ;;  %v2031_v15 = vmul.f32 %v7799_v3, %v1951_v41 }
 0x7da   :  { %v7735_v60 = vpop.permute.xlu1 %2600  ;;  %v7737_v4 = vpop.permute.xlu2 %2651 }
 0x7db   :  { %v7739_v11 = vpop.permute.xlu0 %2630  ;;  %v2049_v23 = vsel %vm10177_vm5, %v2031_v15, 0.0  ;;  %vm10192_vm5 = vmmov %vm10187_vm0 }
 0x7e0   :  { %2750 = vperm.xlu1 %6229, %v2515_v37   ;;  %2753 = vperm.xlu2 %6230, %v2516_v36   ;;  %v2033_v36 = vmul.f32 %v7799_v3, %v1953_v43 }
 0x7e1   :  { %2771 = vperm.xlu0 %6231, %v2522_v40   ;;  %v1937_v40 = vrot.slane %v10175_v56, 2 }
 0x7e2   :  { %v7745_v5 = vpop.permute.xlu1 %2627  ;;  %v7747_v6 = vpop.permute.xlu2 %2663 }
 0x7e3   :  { %v2640_v7 = vpop.permute.xlu0 %2639 }
 0x7e4   :  { %v2798_v45 = vperm.slane %v2640_v7, %v7127_v50 }
 0x7e6   :  { %v2858_v46 = vsel %vm10135_vm12, %v2799_v10, %v2798_v45  ;;  %v1952_v45 = vperm.slane %v1937_v40, 0  ;;  %v2018_v10 = vperm.slane %v7620_v62, %v7127_v50  ;;  %v1939_v62 = vrot.slane %v10175_v56, 4 }
 0x7e7   :  { %v1955_v40 = vperm.slane %v1940_v38, 0 }
 0x7e8   :  { %2759 = vperm.xlu1 %6229, %v2518_v42   ;;  %2756 = vperm.xlu2 %6230, %v2517_v39   ;;  %v1941_v42 = vrot.slane %v10175_v56, 6 }
 0x7e9   :  { %2777 = vperm.xlu0 %6231, %v2524_v61   ;;  %v2055_v61 = vsel %vm10178_vm15, %v2033_v36, 0.0  ;;  %vm2910_vm15 = vcmask 60416  }
 0x7ea   :  { %v7753_v30 = vpop.permute.xlu1 %2633  ;;  %v7755_v0 = vpop.permute.xlu2 %2660 }
 0x7eb   :  { %v2646_v48 = vpop.permute.xlu0 %2645 }
 0x7ec   :  { %v2800_v21 = vperm.slane %v2646_v48, %v7127_v50 }
 0x7ee   :  { %v7763_v22 = vsel %vm10134_vm8, %v2800_v21, %v2858_v46  ;;  %v1950_v21 = vperm.slane %v10175_v56, 0  ;;  %v2020_v46 = vperm.slane %v7649_v18, %v7127_v50 }
 0x7f0   :  { %2765 = vperm.xlu1 %6229, %v2520_v52   ;;  %2774 = vperm.xlu2 %6230, %v2523_v59   ;;  %v2032_v52 = vmul.f32 %v7799_v3, %v1952_v45  ;;  %v1956_v59 = vperm.slane %v1941_v42, 0  ;;  %v1959_v42 = vperm.slane %v1943_v14, 0 }
 0x7f2   :  { %v7765_v33 = vpop.permute.xlu1 %2636  ;;  %v7767_v28 = vpop.permute.xlu2 %2678  ;;  %v2036_v26 = vmul.f32 %v7799_v3, %v1956_v59  ;;  %v2052_v18 = vsel %vm10179_vm1, %v2032_v52, 0.0  ;;  %v1946_v52 = vrot.slane %v10180_v24, 4  ;;  %vm10193_vm1 = vmmov %vm10183_vm6 }
 0x7f3   :  { %v7769_v35 = vpop.permute.xlu0 %2657 }
 0x7f4   :  { %v2064_v8 = vsel %vm10182_vm4, %v2036_v26, 0.0  ;;  %vm10195_vm4 = vmmov %vm10187_vm0 }
 0x7f8   :  { %2768 = vperm.xlu1 %6229, %v2521_v57   ;;  %2780 = vperm.xlu2 %6230, %v2525_v20   ;;  %v2019_v57 = vperm.slane %v7589_v51, %v7127_v50  ;;  %v2030_v20 = vmul.f32 %v7799_v3, %v1950_v21  ;;  %v1944_v21 = vrot.slane %v10180_v24, 2 }
 0x7fa   :  { %v7773_v47 = vpop.permute.xlu1 %2654  ;;  %v7775_v49 = vpop.permute.xlu2 %2681  ;;  %v2025_v19 = vsel %vm10135_vm12, %v2019_v57, %v2018_v10  ;;  %v2046_v51 = vsel %vm10181_vm3, %v2030_v20, 0.0  ;;  %v1942_v10 = vrot.slane %v10175_v56, 7  ;;  %vm10194_vm3 = vmmov %vm10187_vm0 }
 0x7fb   :  { %v7777_v32 = vpop.permute.xlu0 %2675  ;;  %v2026_v9 = vsel %vm10134_vm8, %v2020_v46, %v2025_v19  ;;  %v1960_v19 = vperm.slane %v1944_v21, 0 }
 0x7fc   :  { %v7847_v43 = vsel %vm10183_vm6, %v2021_v2, %v2026_v9  ;;  %v1957_v26 = vperm.slane %v1942_v10, 0  ;;  %v2797_v10 = vperm.slane %v7765_v33, %v7127_v50  ;;  %vm10196_vm6 = vmmov %vm10193_vm1 }
 0x7fd   :  { %v2039_v45 = vmul.f32 %v7847_v43, %v1959_v42  ;;  %v2040_v14 = vmul.f32 %v7847_v43, %v1960_v19  ;;  %v1948_v19 = vrot.slane %v10180_v24, 6 }
 0x7fe   :  { %v2037_v9 = vmul.f32 %v7799_v3, %v1957_v26  ;;  %v1947_v26 = vrot.slane %v10180_v24, 5 }
 0x7ff   :  { %v2073_v20 = vsel %vm10186_vm14, %v2039_v45, 0.0  ;;  %v2795_v45 = vperm.slane %v7739_v11, %v7127_v50  ;;  %vm10199_vm14 = vmmov %vm10193_vm1 }
 0x802   :  { %v7781_v53 = vpop.permute.xlu1 %2648  ;;  %v7789_v44 = vpop.permute.xlu2 %2690 }
 0x803   :  { %v7785_v25 = vpop.permute.xlu0 %2672 }
 0x80a   :  { %v7796_v29 = vpop.permute.xlu1 %2666  ;;  %v7803_v16 = vpop.permute.xlu2 %2693 }
 0x80b   :  { %v7801_v1 = vpop.permute.xlu0 %2687  ;;  %v2807_v11 = vperm.slane %v7796_v29, %v7127_v50 }
 0x812   :  { %v7807_v58 = vpop.permute.xlu1 %2669  ;;  %v7814_v7 = vpop.permute.xlu2 %2714 }
 0x813   :  { %v7810_v37 = vpop.permute.xlu0 %2702  ;;  %2050 = vadd.xlane.f32.xlu0 %v2049_v23  ;;  %v1954_v23 = vperm.slane %v1939_v62, 0 }
 0x815   :  { %v2034_v54 = vmul.f32 %v7799_v3, %v1954_v23  ;;  %v2794_v23 = vperm.slane %v7745_v5, %v7127_v50 }
 0x817   :  { %v2058_v46 = vsel %vm10184_vm7, %v2034_v54, 0.0  ;;  %v2796_v54 = vperm.slane %v7753_v30, %v7127_v50  ;;  %v2855_v30 = vsel %vm10135_vm12, %v2795_v45, %v2794_v23  ;;  %vm10197_vm7 = vmmov %vm10193_vm1 }
 0x81a   :  { %v7817_v39 = vpop.permute.xlu1 %2684  ;;  %v7841_v41 = vpop.permute.xlu2 %2717 }
 0x81b   :  { %v7822_v48 = vpop.permute.xlu0 %2711  ;;  %2056 = vadd.xlane.f32.xlu0 %v2055_v61  ;;  %v2035_v61 = vmul.f32 %v7799_v3, %v1955_v40  ;;  %v2076_v40 = vsel %vm10188_vm2, %v2040_v14, 0.0  ;;  %v2806_v14 = vperm.slane %v7747_v6, %v7127_v50  ;;  %v2786_v6 = vperm.slane %v7683_v31, %v7127_v50 }
 0x81c   :  { %v2783_v31 = vperm.slane %v7603_v34, %v7127_v50 }
 0x81d   :  { %v2061_v59 = vsel %vm10185_vm13, %v2035_v61, 0.0  ;;  %v1958_v61 = vperm.slane %v10180_v24, 0  ;;  %v2864_v23 = vsel %vm10135_vm12, %v2807_v11, %v2806_v14  ;;  %vm10198_vm13 = vmmov %vm10193_vm1 }
 0x821   :  { %2053 = vadd.xlane.f32.xlu2 %v2052_v18  ;;  %v1962_v18 = vperm.slane %v1946_v52, 0 }
 0x822   :  { %v7843_v15 = vpop.permute.xlu1 %2699  ;;  %2047 = vadd.xlane.f32.xlu1 %v2046_v51  ;;  %v7864_v38 = vpop.permute.xlu2 %2720  ;;  %v1945_v51 = vrot.slane %v10180_v24, 3 }
 0x823   :  { %v7849_v36 = vpop.permute.xlu0 %2708  ;;  %2065 = vadd.xlane.f32.xlu0 %v2064_v8  ;;  %v2042_v2 = vmul.f32 %v7847_v43, %v1962_v18  ;;  %v2067_v8 = vsel %vm10187_vm0, %v2037_v9, 0.0  ;;  %v2808_v9 = vperm.slane %v7807_v58, %v7127_v50  ;;  %v1964_v58 = vperm.slane %v1948_v19, 0  ;;  %vm10200_vm0 = vmmov %vm10193_vm1 }
 0x824   :  { %v1961_v21 = vperm.slane %v1945_v51, 0  ;;  %vm10201_vm2 = vmmov %vm10200_vm0 }
 0x825   :  { %v2082_v3 = vsel %vm10189_vm9, %v2042_v2, 0.0  ;;  %v2044_v45 = vmul.f32 %v7847_v43, %v1964_v58  ;;  %vm10202_vm9 = vmmov %vm10200_vm0 }
 0x826   :  { %v2041_v52 = vmul.f32 %v7847_v43, %v1961_v21  ;;  %v2788_v21 = vperm.slane %v7721_v55, %v7127_v50 }
 0x828   :  { %v2079_v2 = vsel %vm10192_vm5, %v2041_v52, 0.0  ;;  %vm10205_vm5 = vmmov %vm10200_vm0 }
 0x829   :  { %2059 = vadd.xlane.f32.xlu2 %v2058_v46  ;;  %v2038_v46 = vmul.f32 %v7847_v43, %v1958_v61  ;;  %v2809_v61 = vperm.slane %v7785_v25, %v7127_v50 }
 0x82a   :  { %v7859_v57 = vpop.permute.xlu1 %2705  ;;  %2062 = vadd.xlane.f32.xlu1 %v2061_v59  ;;  %v7889_v59 = vpop.permute.xlu2 %2738 }
 0x82b   :  { %v7862_v62 = vpop.permute.xlu0 %2726  ;;  %2074 = vadd.xlane.f32.xlu0 %v2073_v20  ;;  %v2856_v20 = vsel %vm10134_vm8, %v2796_v54, %v2855_v30  ;;  %v2070_v18 = vsel %vm10191_vm11, %v2038_v46, 0.0  ;;  %v2787_v46 = vperm.slane %v7666_v63, %v7127_v50  ;;  %v2818_v30 = vperm.slane %v7843_v15, %v7127_v50  ;;  %vm10204_vm11 = vmmov %vm10200_vm0 }
 0x82c   :  { %v2857_v33 = vsel %vm10190_vm10, %v2797_v10, %v2856_v20  ;;  %v2782_v10 = vperm.slane %v7664_v17, %v7127_v50  ;;  %v2820_v25 = vperm.slane %v7859_v57, %v7127_v50  ;;  %v2789_v63 = vperm.slane %v7725_v27, %v7127_v50  ;;  %vm10203_vm10 = vmmov %vm10194_vm3 }
 0x82d   :  { %v2920_v29 = vsel %vm2910_vm15, %v2857_v33, 0.0  ;;  %v2849_v55 = vsel %vm10135_vm12, %v2787_v46, %v2786_v6  ;;  %v2819_v15 = vperm.slane %v7810_v37, %v7127_v50  ;;  %v2785_v57 = vperm.slane %v7735_v60, %v7127_v50 }
 0x82e   :  { %v2846_v34 = vsel %vm10135_vm12, %v2783_v31, %v2782_v10  ;;  %v2850_v19 = vsel %vm10134_vm8, %v2788_v21, %v2849_v55  ;;  %v2784_v27 = vperm.slane %v7624_v12, %v7127_v50  ;;  %v2801_v12 = vperm.slane %v7781_v53, %v7127_v50 }
 0x82f   :  { %v2873_v37 = vsel %vm10135_vm12, %v2819_v15, %v2818_v30  ;;  %v2851_v60 = vsel %vm10196_vm6, %v2789_v63, %v2850_v19  ;;  %v2814_v10 = vperm.slane %v7801_v1, %v7127_v50  ;;  %v2802_v46 = vperm.slane %v7737_v4, %v7127_v50  ;;  %vm10209_vm6 = vmmov %vm10200_vm0 }
 0x830   :  { %v2860_v21 = vsel %vm10199_vm14, %v2801_v12, %v7763_v22  ;;  %v2816_v1 = vperm.slane %v7803_v16, %v7127_v50  ;;  %v1949_v22 = vrot.slane %v10180_v24, 7  ;;  %v2804_v4 = vperm.slane %v7769_v35, %v7127_v50 }
 0x831   :  { %2068 = vadd.xlane.f32.xlu2 %v2067_v8  ;;  %v1963_v8 = vperm.slane %v1947_v26, 0  ;;  %v2088_v26 = vsel %vm10195_vm4, %v2044_v45, 0.0  ;;  %v2831_v45 = vperm.slane %v7889_v59, %v7127_v50  ;;  %v2815_v59 = vperm.slane %v7789_v44, %v7127_v50  ;;  %vm10208_vm4 = vmmov %vm10200_vm0 }
 0x832   :  { %v7876_v42 = vpop.permute.xlu1 %2696  ;;  %2077 = vadd.xlane.f32.xlu1 %v2076_v40  ;;  %v7927_v20 = vpop.permute.xlu2 %2747  ;;  %v2917_v55 = vsel %vm2910_vm15, %v7717_v13, 0.0  ;;  %v2810_v13 = vperm.slane %v7777_v32, %v7127_v50 }
 0x833   :  { %v7884_v5 = vpop.permute.xlu0 %2735  ;;  %2083 = vadd.xlane.f32.xlu0 %v2082_v3  ;;  %v2043_v54 = vmul.f32 %v7847_v43, %v1963_v8  ;;  %v2865_v3 = vsel %vm10134_vm8, %v2808_v9, %v2864_v23  ;;  %v2874_v9 = vsel %vm10134_vm8, %v2820_v25, %v2873_v37  ;;  %v2914_v23 = vsel %vm2910_vm15, %v2851_v60, 0.0 }
 0x834   :  { %v2866_v52 = vsel %vm10193_vm1, %v2809_v61, %v2865_v3  ;;  %v2830_v58 = vperm.slane %v7884_v5, %v7127_v50  ;;  %v2803_v5 = vperm.slane %v7773_v47, %v7127_v50  ;;  %v2923_v25 = vsel %vm2910_vm15, %v2860_v21, 0.0  ;;  %vm10206_vm1 = vmmov %vm10200_vm0 }
 0x835   :  { %v2085_v17 = vsel %vm10194_vm3, %v2043_v54, 0.0  ;;  %v2929_v33 = vsel %vm2910_vm15, %v2866_v52, 0.0  ;;  %v2817_v44 = vperm.slane %v7876_v42, %v7127_v50  ;;  %v2822_v42 = vperm.slane %v7822_v48, %v7127_v50  ;;  %vm10207_vm3 = vmmov %vm10200_vm0 }
 0x836   :  { %v2861_v31 = vsel %vm10135_vm12, %v2803_v5, %v2802_v46  ;;  %v2823_v37 = vperm.slane %v7814_v7, %v7127_v50 }
 0x837   :  { %v2862_v15 = vsel %vm10134_vm8, %v2804_v4, %v2861_v31 }
 0x838   :  { %v2876_v32 = vsel %vm10135_vm12, %v2823_v37, %v2822_v42  ;;  %v3405_v42 = vld [vmem:[%s10210_s11 + $0x18] sm:$0xff] }
 0x839   :  { %2071 = vadd.xlane.f32.xlu2 %v2070_v18  ;;  %v2821_v18 = vperm.slane %v7849_v36, %v7127_v50  ;;  %3423 = vmatpush.msrb.mxu2 %v3405_v42 }
 0x83a   :  { %v7903_v51 = vpop.permute.xlu1 %2723  ;;  %2080 = vadd.xlane.f32.xlu1 %v2079_v2  ;;  %v2847_v2 = vsel %vm10134_vm8, %v2784_v27, %v2846_v34  ;;  %v7960_v3 = vpop.permute.xlu2 %2753  ;;  %3642 = vmatpush.msrb.mxu3 %v3405_v42 }
 0x83b   :  { %v2742_v40 = vpop.permute.xlu0 %2741  ;;  %2921 = vadd.xlane.f32.xlu0 %v2920_v29  ;;  %v2848_v29 = vsel %vm10197_vm7, %v2785_v57, %v2847_v2  ;;  %v2875_v8 = vsel %vm10198_vm13, %v2821_v18, %v2874_v9  ;;  %v1965_v57 = vperm.slane %v1949_v22, 0  ;;  %v2824_v9 = vperm.slane %v7841_v41, %v7127_v50  ;;  %3756 = vmatpush.msra.mxu0 %v3405_v42 }
 0x83c   :  { %v2911_v36 = vsel %vm2910_vm15, %v2848_v29, 0.0  ;;  %v2832_v54 = vperm.slane %v2742_v40, %v7127_v50  ;;  %v2938_v61 = vsel %vm2910_vm15, %v2875_v8, 0.0  ;;  %v2882_v40 = vsel %vm10135_vm12, %v2831_v45, %v2830_v58 }
 0x83d   :  { %v2045_v27 = vmul.f32 %v7847_v43, %v1965_v57  ;;  %v2812_v18 = vperm.slane %v7775_v49, %v7127_v50  ;;  %v2877_v29 = vsel %vm10134_vm8, %v2824_v9, %v2876_v32 }
 0x83e   :  { %v2883_v30 = vsel %vm10134_vm8, %v2832_v54, %v2882_v40  ;;  %v2836_v54 = vperm.slane %v7960_v3, %v7127_v50 }
 0x83f   :  { %v2091_v2 = vsel %vm10203_vm10, %v2045_v27, 0.0  ;;  %v3403_v27 = vld [vmem:[%s10210_s11 + $0x8] sm:$0xff] }
 0x841   :  { %2086 = vadd.xlane.f32.xlu2 %v2085_v17  ;;  %v2870_v17 = vsel %vm10135_vm12, %v2815_v59, %v2814_v10 }
 0x842   :  { %v7939_v11 = vpop.permute.xlu1 %2729  ;;  %2089 = vadd.xlane.f32.xlu1 %v2088_v26  ;;  %v2805_v26 = vperm.slane %v7755_v0, %v7127_v50  ;;  %v2757_v35 = vpop.permute.xlu2 %2756  ;;  %v2871_v34 = vsel %vm10134_vm8, %v2816_v1, %v2870_v17  ;;  %v2811_v0 = vperm.slane %v7767_v28, %v7127_v50  ;;  %v2813_v28 = vperm.slane %v7817_v39, %v7127_v50 }
 0x843   :  { %2930 = vadd.xlane.f32.xlu0 %v2929_v33  ;;  %v2745_v14 = vpop.permute.xlu0 %2744  ;;  %v2872_v33 = vsel %vm10201_vm2, %v2817_v44, %v2871_v34  ;;  %v2837_v3 = vperm.slane %v2757_v35, %v7127_v50 }
 0x844   :  { %v2833_v53 = vperm.slane %v2745_v14, %v7127_v50  ;;  %v2863_v19 = vsel %vm10202_vm9, %v2805_v26, %v2862_v15  ;;  %v2935_v48 = vsel %vm2910_vm15, %v2872_v33, 0.0  ;;  %v2825_v14 = vperm.slane %v7864_v38, %v7127_v50 }
 0x845   :  { %v2926_v7 = vsel %vm2910_vm15, %v2863_v19, 0.0  ;;  %v2867_v60 = vsel %vm10135_vm12, %v2811_v0, %v2810_v13  ;;  %v2834_v38 = vperm.slane %v7927_v20, %v7127_v50  ;;  %v2828_v20 = vperm.slane %v7939_v11, %v7127_v50  ;;  %v3404_v19 = vld [vmem:[%s10210_s11 + $0x10] sm:$0xff] }
 0x846   :  { %v2884_v47 = vsel %vm10200_vm0, %v2833_v53, %v2883_v30  ;;  %v2878_v8 = vsel %vm10204_vm11, %v2825_v14, %v2877_v29  ;;  %v2827_v53 = vperm.slane %v7862_v62, %v7127_v50  ;;  %3424 = vmatpush.msrb.mxu2 %v3404_v19  ;;  %3643 = vmatpush.msrb.mxu3 %v3404_v19 }
 0x847   :  { %v2947_v16 = vsel %vm2910_vm15, %v2884_v47, 0.0  ;;  %3757 = vmatpush.msra.mxu0 %v3404_v19 }
 0x848   :  { %3425 = vmatpush.msrb.mxu2 %v3403_v27  ;;  %3644 = vmatpush.msrb.mxu3 %v3403_v27 }
 0x849   :  { %2915 = vadd.xlane.f32.xlu2 %v2914_v23  ;;  %v2868_v23 = vsel %vm10134_vm8, %v2812_v18, %v2867_v60  ;;  %3758 = vmatpush.msra.mxu0 %v3403_v27 }
 0x84a   :  { %v7962_v6 = vpop.permute.xlu1 %2732  ;;  %2912 = vadd.xlane.f32.xlu1 %v2911_v36  ;;  %v2775_v12 = vpop.permute.xlu2 %2774  ;;  %v2869_v58 = vsel %vm10205_vm5, %v2813_v28, %v2868_v23  ;;  %v2826_v36 = vperm.slane %v7903_v51, %v7127_v50 }
 0x84b   :  { %2939 = vadd.xlane.f32.xlu0 %v2938_v61  ;;  %v7980_v52 = vpop.permute.xlu0 %2762  ;;  %v2941_v61 = vsel %vm2910_vm15, %v2878_v8, 0.0  ;;  %v2932_v45 = vsel %vm2910_vm15, %v2869_v58, 0.0  ;;  %v2829_v5 = vperm.slane %v7962_v6, %v7127_v50  ;;  %v2843_v6 = vperm.slane %v2775_v12, %v7127_v50 }
 0x84c   :  { %v2879_v21 = vsel %vm10135_vm12, %v2827_v53, %v2826_v36  ;;  %v2839_v17 = vperm.slane %v7980_v52, %v7127_v50 }
 0x84d   :  { %v2880_v30 = vsel %vm10134_vm8, %v2828_v20, %v2879_v21 }
 0x84e   :  { %v2881_v59 = vsel %vm10207_vm3, %v2829_v5, %v2880_v30 }
 0x84f   :  { %v2944_v4 = vsel %vm2910_vm15, %v2881_v59, 0.0 }
 0x851   :  { %2924 = vadd.xlane.f32.xlu2 %v2923_v25 }
 0x852   :  { %v2751_v63 = vpop.permute.xlu1 %2750  ;;  %2918 = vadd.xlane.f32.xlu1 %v2917_v55  ;;  %v2781_v47 = vpop.permute.xlu2 %2780 }
 0x853   :  { %2948 = vadd.xlane.f32.xlu0 %v2947_v16  ;;  %v2772_v43 = vpop.permute.xlu0 %2771  ;;  %v2835_v49 = vperm.slane %v2751_v63, %v7127_v50  ;;  %v2845_v63 = vperm.slane %v2781_v47, %v7127_v50 }
 0x854   :  { %v2842_v11 = vperm.slane %v2772_v43, %v7127_v50  ;;  %v3402_v43 = vld [vmem:[%s10210_s11] sm:$0xff] }
 0x855   :  { %v2885_v39 = vsel %vm10135_vm12, %v2835_v49, %v2834_v38  ;;  %3426 = vmatpush.msrb.mxu2 %v3402_v43  ;;  %3645 = vmatpush.msrb.mxu3 %v3402_v43 }
 0x856   :  { %v2886_v51 = vsel %vm10134_vm8, %v2836_v54, %v2885_v39  ;;  %v2891_v25 = vsel %vm10135_vm12, %v2843_v6, %v2842_v11  ;;  %3759 = vmatpush.msra.mxu0 %v3402_v43 }
 0x857   :  { %v2887_v46 = vsel %vm10206_vm1, %v2837_v3, %v2886_v51  ;;  %3531 = vmatpush.msra.mxu2 %v3405_v42  ;;  %4098 = vmatpush.msra.mxu3 %v3405_v42 }
 0x858   :  { %v2950_v1 = vsel %vm2910_vm15, %v2887_v46, 0.0  ;;  %4212 = vmatpush.msrb.mxu0 %v3405_v42 }
 0x859   :  { %2936 = vadd.xlane.f32.xlu2 %v2935_v48  ;;  %3532 = vmatpush.msra.mxu2 %v3404_v19 }
 0x85a   :  { %v2760_v41 = vpop.permute.xlu1 %2759  ;;  %2927 = vadd.xlane.f32.xlu1 %v2926_v7  ;;  %4099 = vmatpush.msra.mxu3 %v3404_v19 }
 0x85b   :  { %2092 = vadd.xlane.f32.xlu0 %v2091_v2  ;;  %v2778_v40 = vpop.permute.xlu0 %2777  ;;  %v2838_v31 = vperm.slane %v2760_v41, %v7127_v50  ;;  %v6594_v41 = vmov 0.0   ;;  %4213 = vmatpush.msrb.mxu0 %v3404_v19 }
 0x85c   :  { %v2844_v62 = vperm.slane %v2778_v40, %v7127_v50  ;;  %3427 = vmatmul.f32.vlgmr.msrb.gmra.mxu2 %v6594_v41  ;;  %4100 = vmatpush.msra.mxu3 %v3403_v27 }
 0x85d   :  { %v2888_v15 = vsel %vm10135_vm12, %v2839_v17, %v2838_v31  ;;  %3533 = vmatpush.msra.mxu2 %v3403_v27  ;;  %4214 = vmatpush.msrb.mxu0 %v3403_v27 }
 0x85e   :  { %v2892_v55 = vsel %vm10134_vm8, %v2844_v62, %v2891_v25  ;;  %4101 = vmatpush.msra.mxu3 %v3402_v43 }
 0x85f   :  { %v2893_v26 = vsel %vm10208_vm4, %v2845_v63, %v2892_v55  ;;  %3534 = vmatpush.msra.mxu2 %v3402_v43  ;;  %4215 = vmatpush.msrb.mxu0 %v3402_v43 }
 0x860   :  { %v2956_v57 = vsel %vm2910_vm15, %v2893_v26, 0.0 }
 0x861   :  { %2942 = vadd.xlane.f32.xlu2 %v2941_v61  ;;  %3984 = vmatpush.msrb.mxu2 %v3405_v42 }
 0x862   :  { %v2766_v10 = vpop.permute.xlu1 %2765  ;;  %2933 = vadd.xlane.f32.xlu1 %v2932_v45 }
 0x863   :  { %v2840_v22 = vperm.slane %v2766_v10, %v7127_v50  ;;  %3985 = vmatpush.msrb.mxu2 %v3404_v19 }
 0x865   :  { %v2889_v35 = vsel %vm10134_vm8, %v2840_v22, %v2888_v15  ;;  %3986 = vmatpush.msrb.mxu2 %v3403_v27 }
 0x867   :  { %3987 = vmatpush.msrb.mxu2 %v3402_v43 }
 0x869   :  { %2951 = vadd.xlane.f32.xlu2 %v2950_v1 }
 0x86a   :  { %v2769_v44 = vpop.permute.xlu1 %2768  ;;  %2945 = vadd.xlane.f32.xlu1 %v2944_v4 }
 0x86b   :  { %v2841_v16 = vperm.slane %v2769_v44, %v7127_v50 }
 0x86d   :  { %v2890_v34 = vsel %vm10209_vm6, %v2841_v16, %v2889_v35 }
 0x86e   :  { %v2953_v52 = vsel %vm2910_vm15, %v2890_v34, 0.0 }
 0x871   :  { %2957 = vadd.xlane.f32.xlu2 %v2956_v57 }
 0x872   :  { %2954 = vadd.xlane.f32.xlu1 %v2953_v52 }
 0x886   :  { %v2051_v33 = vpop.xlane.xlu0 %2050 }
 0x887   :  { %v6062_v13 = vmul.f32 -1.442695, %v2051_v33 }
 0x889   :  { %6328 = vpow2.f32 %v6062_v13  ;;  %v8140_v13 = vadd.s32 4294967292, %v7127_v50 }
 0x88e   :  { %v2057_v37 = vpop.xlane.xlu0 %2056 }
 0x88f   :  { %v6329_v0 = vpop.eup %6328  ;;  %v6064_v9 = vmul.f32 -1.442695, %v2057_v37 }
 0x890   :  { %v8078_v48 = vadd.f32 1.0, %v6329_v0 }
 0x891   :  { %6330 = vpow2.f32 %v6064_v9 }
 0x892   :  { %6332 = vrcp.f32 %v8078_v48  ;;  %v2184_v46 = vand.u32 2147483648, %v8078_v48  ;;  %vm2178_vm7 = vweird.f32 %v8078_v48  ;;  %v2182_v22 = vand.u32 2147483647, %v8078_v48 }
 0x894   :  { %v2054_v18 = vpop.xlane.xlu2 %2053  ;;  %v2185_v4 = vor.u32 1.1754944e-38, %v2184_v46  ;;  %vm2183_vm0 = vcmp.eq.f32.partialorder %v2182_v22, 8.507059e+37 }
 0x895   :  { %v6063_v32 = vmul.f32 -1.442695, %v2054_v18  ;;  %v2048_v14 = vpop.xlane.xlu1 %2047 }
 0x896   :  { %v6061_v7 = vmul.f32 -1.442695, %v2048_v14  ;;  %v2066_v60 = vpop.xlane.xlu0 %2065 }
 0x897   :  { %v6331_v28 = vpop.eup %6330  ;;  %6334 = vpow2.f32 %v6063_v32  ;;  %v6067_v29 = vmul.f32 -1.442695, %v2066_v60 }
 0x898   :  { %v8084_v2 = vadd.f32 1.0, %v6331_v28  ;;  %6336 = vpow2.f32 %v6061_v7  ;;  %v8086_v49 = vpop.eup %6332 }
 0x899   :  { %v2174_v38 = vmul.f32 %v8086_v49, %v8078_v48  ;;  %vm2179_vm15 = vweird.f32 %v8086_v49 }
 0x89a   :  { %6338 = vrcp.f32 %v8084_v2  ;;  %vm8117_vm13 = vmor %vm2178_vm7, %vm2179_vm15  ;;  %v2212_v55 = vand.u32 2147483647, %v8084_v2  ;;  %v2214_v26 = vand.u32 2147483648, %v8084_v2  ;;  %vm2208_vm2 = vweird.f32 %v8084_v2 }
 0x89b   :  { %6340 = vpow2.f32 %v6067_v29  ;;  %v2175_v45 = vsub.f32 1.0, %v2174_v38 }
 0x89c   :  { %v2060_v8 = vpop.xlane.xlu2 %2059  ;;  %vm8153_vm10 = vcmp.eq.f32.partialorder %v2212_v55, 8.507059e+37  ;;  %v2215_v32 = vor.u32 1.1754944e-38, %v2214_v26 }
 0x89d   :  { %v6335_v23 = vpop.eup %6334  ;;  %v6065_v12 = vmul.f32 -1.442695, %v2060_v8  ;;  %v2063_v58 = vpop.xlane.xlu1 %2062  ;;  %v2176_v3 = vmul.f32 %v8086_v49, %v2175_v45 }
 0x89e   :  { %v6337_v39 = vpop.eup %6336  ;;  %v8091_v36 = vadd.f32 1.0, %v6335_v23  ;;  %v2075_v54 = vpop.xlane.xlu0 %2074  ;;  %v6066_v53 = vmul.f32 -1.442695, %v2063_v58 }
 0x89f   :  { %v8093_v61 = vadd.f32 1.0, %v6337_v39  ;;  %6342 = vpow2.f32 %v6065_v12  ;;  %v6070_v10 = vmul.f32 -1.442695, %v2075_v54  ;;  %v2177_v47 = vadd.f32 %v8086_v49, %v2176_v3 }
 0x8a0   :  { %v8095_v20 = vpop.eup %6338  ;;  %6344 = vrcp.f32 %v8091_v36  ;;  %v2199_v52 = vand.u32 2147483648, %v8091_v36  ;;  %v2197_v14 = vand.u32 2147483647, %v8091_v36  ;;  %vm2193_vm11 = vweird.f32 %v8091_v36 }
 0x8a1   :  { %v2204_v5 = vmul.f32 %v8095_v20, %v8084_v2  ;;  %6346 = vrcp.f32 %v8093_v61  ;;  %v6341_v51 = vpop.eup %6340  ;;  %v2181_v15 = vsel %vm8117_vm13, %v8086_v49, %v2177_v47  ;;  %vm2209_vm14 = vweird.f32 %v8095_v20 }
 0x8a2   :  { %6348 = vpow2.f32 %v6066_v53  ;;  %v8103_v62 = vadd.f32 1.0, %v6341_v51  ;;  %v2169_v19 = vand.u32 2147483648, %v8093_v61  ;;  %v8145_v0 = vsel %vm2183_vm0, %v2185_v4, %v2181_v15  ;;  %vm8149_vm9 = vmor %vm2208_vm2, %vm2209_vm14 }
 0x8a3   :  { %v2205_v11 = vsub.f32 1.0, %v2204_v5  ;;  %6350 = vpow2.f32 %v6070_v10  ;;  %v8164_v28 = vor.u32 1.1754944e-38, %v2199_v52  ;;  %v2167_v41 = vand.u32 2147483647, %v8093_v61 }
 0x8a4   :  { %v2069_v40 = vpop.xlane.xlu2 %2068  ;;  %vm2163_vm5 = vweird.f32 %v8093_v61  ;;  %v8172_v29 = vor.u32 1.1754944e-38, %v2169_v19  ;;  %v2257_v38 = vand.u32 2147483647, %v8103_v62  ;;  %v2259_v58 = vand.u32 2147483648, %v8103_v62 }
 0x8a5   :  { %v6343_v21 = vpop.eup %6342  ;;  %v2078_v30 = vpop.xlane.xlu1 %2077  ;;  %v2206_v1 = vmul.f32 %v8095_v20, %v2205_v11  ;;  %v6068_v8 = vmul.f32 -1.442695, %v2069_v40  ;;  %vm8190_vm4 = vcmp.eq.f32.partialorder %v2197_v14, 8.507059e+37  ;;  %vm8198_vm6 = vcmp.eq.f32.partialorder %v2167_v41, 8.507059e+37 }
 0x8a6   :  { %v8105_v59 = vadd.f32 1.0, %v6343_v21  ;;  %v8107_v6 = vpop.eup %6344  ;;  %v2084_v42 = vpop.xlane.xlu0 %2083  ;;  %v6071_v39 = vmul.f32 -1.442695, %v2078_v30  ;;  %v8210_v55 = vor.u32 1.1754944e-38, %v2259_v58  ;;  %vm2253_vm15 = vweird.f32 %v8103_v62 }
 0x8a7   :  { %v8111_v31 = vpop.eup %6346  ;;  %v2189_v63 = vmul.f32 %v8107_v6, %v8091_v36  ;;  %v2207_v57 = vadd.f32 %v8095_v20, %v2206_v1  ;;  %vm2194_vm1 = vweird.f32 %v8107_v6  ;;  %v6073_v3 = vmul.f32 -1.442695, %v2084_v42 }
 0x8a8   :  { %6352 = vrcp.f32 %v8105_v59  ;;  %v6349_v25 = vpop.eup %6348  ;;  %v2159_v35 = vmul.f32 %v8111_v31, %v8093_v61  ;;  %vm2164_vm3 = vweird.f32 %v8111_v31  ;;  %v2227_v11 = vand.u32 2147483647, %v8105_v59  ;;  %vm8221_vm13 = vmor %vm2193_vm11, %vm2194_vm1 }
 0x8a9   :  { %v6351_v17 = vpop.eup %6350  ;;  %6354 = vrcp.f32 %v8103_v62  ;;  %v8125_v16 = vadd.f32 1.0, %v6349_v25  ;;  %v2190_v9 = vsub.f32 1.0, %v2189_v63  ;;  %v2211_v60 = vsel %vm8149_vm9, %v8095_v20, %v2207_v57  ;;  %vm8233_vm0 = vmor %vm2163_vm5, %vm2164_vm3 }
 0x8aa   :  { %v8133_v34 = vadd.f32 1.0, %v6351_v17  ;;  %v2160_v43 = vsub.f32 1.0, %v2159_v35  ;;  %v8182_v54 = vsel %vm8153_vm10, %v2215_v32, %v2211_v60  ;;  %v2229_v46 = vand.u32 2147483648, %v8105_v59 }
 0x8ab   :  { %6356 = vrcp.f32 %v8125_v16  ;;  %v2191_v12 = vmul.f32 %v8107_v6, %v2190_v9  ;;  %vm2223_vm7 = vweird.f32 %v8105_v59  ;;  %vm8237_vm2 = vcmp.eq.f32.partialorder %v2227_v11, 8.507059e+37 }
 0x8ac   :  { %v2072_v33 = vpop.xlane.xlu2 %2071  ;;  %6358 = vrcp.f32 %v8133_v34  ;;  %v2161_v20 = vmul.f32 %v8111_v31, %v2160_v43  ;;  %v2230_v52 = vor.u32 1.1754944e-38, %v2229_v46  ;;  %vm2238_vm9 = vweird.f32 %v8125_v16 }
 0x8ad   :  { %v2081_v27 = vpop.xlane.xlu1 %2080  ;;  %6360 = vpow2.f32 %v6071_v39  ;;  %v2192_v1 = vadd.f32 %v8107_v6, %v2191_v12  ;;  %v6069_v25 = vmul.f32 -1.442695, %v2072_v33  ;;  %v2242_v9 = vand.u32 2147483647, %v8125_v16 }
 0x8ae   :  { %v8143_v37 = vpop.eup %6352  ;;  %6362 = vpow2.f32 %v6068_v8  ;;  %v6072_v22 = vmul.f32 -1.442695, %v2081_v27  ;;  %v2922_v4 = vpop.xlane.xlu0 %2921  ;;  %v2162_v17 = vadd.f32 %v8111_v31, %v2161_v20  ;;  %v2244_v18 = vand.u32 2147483648, %v8125_v16 }
 0x8af   :  { %v8158_v7 = vpop.eup %6354  ;;  %v2219_v2 = vmul.f32 %v8143_v37, %v8105_v59  ;;  %6364 = vpow2.f32 %v6073_v3  ;;  %v6080_v42 = vmul.f32 -1.442695, %v2922_v4  ;;  %v2196_v19 = vsel %vm8221_vm13, %v8107_v6, %v2192_v1 }
 0x8b0   :  { %v2249_v45 = vmul.f32 %v8158_v7, %v8103_v62  ;;  %6366 = vpow2.f32 %v6069_v25  ;;  %vm2254_vm14 = vweird.f32 %v8158_v7  ;;  %v2166_v6 = vsel %vm8233_vm0, %v8111_v31, %v2162_v17 }
 0x8b1   :  { %v8175_v23 = vpop.eup %6356  ;;  %v2220_v10 = vsub.f32 1.0, %v2219_v2  ;;  %6368 = vpow2.f32 %v6072_v22  ;;  %vm2224_vm10 = vweird.f32 %v8143_v37  ;;  %v8259_v31 = vsel %vm8190_vm4, %v8164_v28, %v2196_v19 }
 0x8b2   :  { %v8188_v53 = vpop.eup %6358  ;;  %v2234_v51 = vmul.f32 %v8175_v23, %v8125_v16  ;;  %v2250_v44 = vsub.f32 1.0, %v2249_v45  ;;  %vm2298_vm11 = vweird.f32 %v8133_v34  ;;  %6370 = vpow2.f32 %v6080_v42  ;;  %vm8286_vm1 = vmor %vm2223_vm7, %vm2224_vm10 }
 0x8b3   :  { %v2294_v30 = vmul.f32 %v8188_v53, %v8133_v34  ;;  %v2221_v15 = vmul.f32 %v8143_v37, %v2220_v10  ;;  %v6361_v33 = vpop.eup %6360  ;;  %v8269_v39 = vsel %vm8198_vm6, %v8172_v29, %v2166_v6  ;;  %vm8273_vm5 = vcmp.eq.f32.partialorder %v2257_v38, 8.507059e+37  ;;  %vm8305_vm6 = vmor %vm2253_vm15, %vm2254_vm14 }
 0x8b4   :  { %v8196_v40 = vpop.xlane.xlu2 %2086  ;;  %v2235_v26 = vsub.f32 1.0, %v2234_v51  ;;  %v6363_v48 = vpop.eup %6362  ;;  %v2251_v61 = vmul.f32 %v8158_v7, %v2250_v44  ;;  %v8252_v41 = vadd.f32 1.0, %v6361_v33  ;;  %v2302_v28 = vand.u32 2147483647, %v8133_v34 }
 0x8b5   :  { %v8206_v47 = vpop.xlane.xlu1 %2089  ;;  %v2295_v63 = vsub.f32 1.0, %v2294_v30  ;;  %v6365_v14 = vpop.eup %6364  ;;  %v2222_v43 = vadd.f32 %v8143_v37, %v2221_v15  ;;  %v8278_v45 = vadd.f32 1.0, %v6363_v48  ;;  %vm2299_vm3 = vweird.f32 %v8188_v53 }
 0x8b6   :  { %v2236_v60 = vmul.f32 %v8175_v23, %v2235_v26  ;;  %v8262_v8 = vadd.f32 1.0, %v6365_v14  ;;  %v6367_v58 = vpop.eup %6366  ;;  %6372 = vrcp.f32 %v8252_v41  ;;  %v2252_v5 = vadd.f32 %v8158_v7, %v2251_v61  ;;  %vm8321_vm13 = vmor %vm2298_vm11, %vm2299_vm3  ;;  %v2931_v15 = vpop.xlane.xlu0 %2930 }
 0x8b7   :  { %v2296_v32 = vmul.f32 %v8188_v53, %v2295_v63  ;;  %v2304_v10 = vand.u32 2147483648, %v8133_v34  ;;  %v6369_v51 = vpop.eup %6368  ;;  %v2226_v3 = vsel %vm8286_vm1, %v8143_v37, %v2222_v43  ;;  %vm2239_vm4 = vweird.f32 %v8175_v23 }
 0x8b8   :  { %v2237_v21 = vadd.f32 %v8175_v23, %v2236_v60  ;;  %6374 = vrcp.f32 %v8262_v8  ;;  %vm8309_vm7 = vcmp.eq.f32.partialorder %v2242_v9, 8.507059e+37  ;;  %v8313_v37 = vadd.f32 1.0, %v6367_v58  ;;  %v6371_v4 = vpop.eup %6370  ;;  %vm8336_vm14 = vmor %vm2238_vm9, %vm2239_vm4 }
 0x8b9   :  { %v2297_v38 = vadd.f32 %v8188_v53, %v2296_v32  ;;  %v8315_v30 = vadd.f32 1.0, %v6369_v51  ;;  %v2245_v25 = vor.u32 1.1754944e-38, %v2244_v18  ;;  %vm8325_vm15 = vcmp.eq.f32.partialorder %v2302_v28, 8.507059e+37 }
 0x8ba   :  { %6376 = vrcp.f32 %v8278_v45  ;;  %v8332_v17 = vsel %vm8237_vm2, %v2230_v52, %v2226_v3  ;;  %v6074_v63 = vmul.f32 -1.442695, %v8196_v40  ;;  %v2256_v57 = vsel %vm8305_vm6, %v8158_v7, %v2252_v5 }
 0x8bb   :  { %v2301_v34 = vsel %vm8321_vm13, %v8188_v53, %v2297_v38  ;;  %6378 = vrcp.f32 %v8313_v37  ;;  %v2241_v16 = vsel %vm8336_vm14, %v8175_v23, %v2237_v21  ;;  %v2305_v52 = vor.u32 1.1754944e-38, %v2304_v10 }
 0x8bc   :  { %v8254_v2 = vpop.xlane.xlu2 %2915  ;;  %v8345_v26 = vpop.eup %6372  ;;  %6380 = vrcp.f32 %v8315_v30  ;;  %v2274_v53 = vand.u32 2147483648, %v8278_v45  ;;  %v8358_v40 = vadd.s32 4294967288, %v7127_v50  ;;  %v6075_v33 = vmul.f32 -1.442695, %v8206_v47 }
 0x8bd   :  { %v8264_v12 = vpop.xlane.xlu1 %2912  ;;  %v2309_v42 = vmul.f32 %v8345_v26, %v8252_v41  ;;  %v8367_v23 = vsel %vm8325_vm15, %v2305_v52, %v2301_v34  ;;  %v8369_v27 = vadd.f32 1.0, %v6371_v4  ;;  %v6083_v36 = vmul.f32 -1.442695, %v2931_v15 }
 0x8be   :  { %v8361_v19 = vpop.eup %6374  ;;  %10241 = vst [vmem:[#allocation8_spill] sm:$0xff] %v8367_v23  ;;  %v8377_v6 = vsel %vm8309_vm7, %v2245_v25, %v2241_v16  ;;  %v2319_v47 = vand.u32 2147483648, %v8252_v41  ;;  %6382 = vpow2.f32 %v6074_v63  ;;  %v8383_v61 = vsel %vm8273_vm5, %v8210_v55, %v2256_v57 }
 0x8bf   :  { %v2339_v14 = vmul.f32 %v8361_v19, %v8262_v8  ;;  %v2349_v43 = vand.u32 2147483648, %v8262_v8  ;;  %6384 = vrcp.f32 %v8369_v27  ;;  %v8396_v28 = vor.u32 1.1754944e-38, %v2274_v53 }
 0x8c0   :  { %v8385_v18 = vpop.eup %6376  ;;  %v2310_v55 = vsub.f32 1.0, %v2309_v42  ;;  %v6078_v20 = vmul.f32 -1.442695, %v8254_v2  ;;  %v2317_v29 = vand.u32 2147483647, %v8252_v41  ;;  %6386 = vpow2.f32 %v6075_v33  ;;  %v2940_v42 = vpop.xlane.xlu0 %2939 }
 0x8c1   :  { %v8392_v60 = vpop.eup %6378  ;;  %v2347_v38 = vand.u32 2147483647, %v8262_v8  ;;  %v2264_v51 = vmul.f32 %v8385_v18, %v8278_v45  ;;  %vm2313_vm0 = vweird.f32 %v8252_v41  ;;  %v8408_v3 = vor.u32 1.1754944e-38, %v2319_v47 }
 0x8c2   :  { %v8399_v5 = vpop.eup %6380  ;;  %v2279_v10 = vmul.f32 %v8392_v60, %v8313_v37  ;;  %v6077_v21 = vmul.f32 -1.442695, %v8264_v12  ;;  %v2340_v11 = vsub.f32 1.0, %v2339_v14  ;;  %v8413_v46 = vor.u32 1.1754944e-38, %v2349_v43 }
 0x8c3   :  { %v2324_v2 = vmul.f32 %v8399_v5, %v8315_v30  ;;  %v2287_v62 = vand.u32 2147483647, %v8313_v37  ;;  %v2311_v4 = vmul.f32 %v8345_v26, %v2310_v55  ;;  %vm2283_vm2 = vweird.f32 %v8313_v37 }
 0x8c4   :  { %v8371_v9 = vpop.xlane.xlu2 %2924  ;;  %v2280_v25 = vsub.f32 1.0, %v2279_v10  ;;  %v6383_v22 = vpop.eup %6382  ;;  %v2289_v44 = vand.u32 2147483648, %v8313_v37  ;;  %6388 = vpow2.f32 %v6078_v20  ;;  %vm2343_vm9 = vweird.f32 %v8262_v8 }
 0x8c5   :  { %v8373_v48 = vpop.xlane.xlu1 %2918  ;;  %v8419_v34 = vpop.eup %6384  ;;  %v2325_v63 = vsub.f32 1.0, %v2324_v2  ;;  %v8423_v15 = vadd.f32 1.0, %v6383_v22  ;;  %6390 = vpow2.f32 %v6083_v36  ;;  %v2265_v57 = vsub.f32 1.0, %v2264_v51 }
 0x8c6   :  { %v2281_v12 = vmul.f32 %v8392_v60, %v2280_v25  ;;  %vm8425_vm10 = vcmp.eq.f32.partialorder %v2317_v29, 8.507059e+37  ;;  %v2332_v52 = vand.u32 2147483647, %v8315_v30  ;;  %v3069_v53 = vmul.f32 %v8419_v34, %v8369_v27  ;;  %v6387_v33 = vpop.eup %6386 }
 0x8c7   :  { %6392 = vpow2.f32 %v6077_v21  ;;  %vm2314_vm11 = vweird.f32 %v8345_v26  ;;  %v2341_v47 = vmul.f32 %v8361_v19, %v2340_v11  ;;  %vm8434_vm5 = vcmp.eq.f32.partialorder %v2287_v62, 8.507059e+37 }
 0x8c8   :  { %vm2328_vm1 = vweird.f32 %v8315_v30  ;;  %6394 = vrcp.f32 %v8423_v15  ;;  %v2312_v55 = vadd.f32 %v8345_v26, %v2311_v4  ;;  %vm2284_vm3 = vweird.f32 %v8392_v60  ;;  %vm8462_vm7 = vmor %vm2313_vm0, %vm2314_vm11 }
 0x8c9   :  { %v2290_v20 = vor.u32 1.1754944e-38, %v2289_v44  ;;  %v3070_v29 = vsub.f32 1.0, %v3069_v53  ;;  %vm8446_vm4 = vcmp.eq.f32.partialorder %v2347_v38, 8.507059e+37  ;;  %v2282_v51 = vadd.f32 %v8392_v60, %v2281_v12  ;;  %vm8481_vm15 = vmor %vm2283_vm2, %vm2284_vm3 }
 0x8ca   :  { %v2326_v2 = vmul.f32 %v8399_v5, %v2325_v63  ;;  %v8452_v21 = vadd.f32 1.0, %v6387_v33  ;;  %v6086_v11 = vmul.f32 -1.442695, %v2940_v42  ;;  %v6389_v25 = vpop.eup %6388  ;;  %v2266_v62 = vmul.f32 %v8385_v18, %v2265_v57 }
 0x8cb   :  { %vm2344_vm6 = vweird.f32 %v8361_v19  ;;  %v2334_v22 = vand.u32 2147483648, %v8315_v30  ;;  %v3071_v4 = vmul.f32 %v8419_v34, %v3070_v29  ;;  %v6391_v38 = vpop.eup %6390  ;;  %v2342_v12 = vadd.f32 %v8361_v19, %v2341_v47 }
 0x8cc   :  { %v8440_v36 = vpop.xlane.xlu2 %2936  ;;  %vm8467_vm13 = vcmp.eq.f32.partialorder %v2332_v52, 8.507059e+37  ;;  %v3077_v57 = vand.u32 2147483647, %v8369_v27  ;;  %v3079_v53 = vand.u32 2147483648, %v8369_v27  ;;  %6396 = vrcp.f32 %v8452_v21  ;;  %vm8503_vm2 = vmor %vm2343_vm9, %vm2344_vm6 }
 0x8cd   :  { %v8442_v43 = vpop.xlane.xlu1 %2927  ;;  %v6393_v42 = vpop.eup %6392  ;;  %v2316_v41 = vsel %vm8462_vm7, %v8345_v26, %v2312_v55  ;;  %vm2329_vm14 = vweird.f32 %v8399_v5  ;;  %v3072_v33 = vadd.f32 %v8419_v34, %v3071_v4  ;;  %vm3074_vm0 = vweird.f32 %v8419_v34 }
 0x8ce   :  { %v8488_v47 = vpop.eup %6394  ;;  %v2286_v26 = vsel %vm8481_vm15, %v8392_v60, %v2282_v51  ;;  %v2327_v55 = vadd.f32 %v8399_v5, %v2326_v2  ;;  %v8494_v29 = vadd.f32 1.0, %v6389_v25  ;;  %6398 = vpow2.f32 %v6086_v11 }
 0x8cf   :  { %v8497_v37 = vadd.f32 %v8385_v18, %v2266_v62  ;;  %vm3073_vm11 = vweird.f32 %v8369_v27  ;;  %v2354_v60 = vmul.f32 %v8488_v47, %v8423_v15  ;;  %v8510_v51 = vadd.f32 1.0, %v6391_v38 }
 0x8d0   :  { %v8515_v2 = vsel %vm8425_vm10, %v8408_v3, %v2316_v41  ;;  %v2346_v8 = vsel %vm8503_vm2, %v8361_v19, %v2342_v12  ;;  %v2335_v11 = vor.u32 1.1754944e-38, %v2334_v22  ;;  %vm8520_vm9 = vmor %vm3073_vm11, %vm3074_vm0  ;;  %v8524_v27 = vadd.f32 1.0, %v6393_v42 }
 0x8d1   :  { %10256 = vst [vmem:[#allocation5_spill] sm:$0xff] %v8515_v2  ;;  %vm2269_vm3 = vweird.f32 %v8385_v18  ;;  %v8529_v62 = vsel %vm8434_vm5, %v2290_v20, %v2286_v26  ;;  %vm8535_vm10 = vmor %vm2328_vm1, %vm2329_vm14  ;;  %v3076_v19 = vsel %vm8520_vm9, %v8419_v34, %v3072_v33  ;;  %v2364_v16 = vand.u32 2147483648, %v8423_v15 }
 0x8d2   :  { %10259 = vst [vmem:[#allocation9_spill] sm:$0xff] %v8529_v62  ;;  %6400 = vrcp.f32 %v8494_v29  ;;  %v8544_v22 = vpop.eup %6396  ;;  %v2331_v14 = vsel %vm8535_vm10, %v8399_v5, %v2327_v55  ;;  %vm3078_vm5 = vcmp.eq.f32.partialorder %v3077_v57, 8.507059e+37  ;;  %v3080_v30 = vor.u32 1.1754944e-38, %v3079_v53  ;;  %v2949_v5 = vpop.xlane.xlu0 %2948 }
 0x8d3   :  { %v2379_v20 = vand.u32 2147483648, %v8452_v21  ;;  %vm2268_vm1 = vweird.f32 %v8278_v45  ;;  %v8560_v12 = vsel %vm8446_vm4, %v8413_v46, %v2346_v8  ;;  %v2355_v42 = vsub.f32 1.0, %v2354_v60 }
 0x8d4   :  { %v8550_v38 = vpop.xlane.xlu2 %2942  ;;  %10262 = vst [vmem:[#allocation10_spill] sm:$0xff] %v8560_v12  ;;  %6402 = vrcp.f32 %v8510_v51  ;;  %v6399_v57 = vpop.eup %6398  ;;  %v8565_v41 = vsel %vm3078_vm5, %v3080_v30, %v3076_v19  ;;  %v8571_v33 = vsel %vm8467_vm13, %v2335_v11, %v2331_v14  ;;  %v8573_v46 = vor.u32 1.1754944e-38, %v2364_v16  ;;  %vm8615_vm7 = vmor %vm2268_vm1, %vm2269_vm3 }
 0x8d5   :  { %v8552_v44 = vpop.xlane.xlu1 %2933  ;;  %6404 = vrcp.f32 %v8524_v27  ;;  %10263 = vst [vmem:[#allocation11_spill] sm:$0xff] %v8571_v33  ;;  %v2369_v10 = vmul.f32 %v8544_v22, %v8452_v21  ;;  %v3124_v26 = vand.u32 2147483648, %v8510_v51  ;;  %v8579_v4 = vor.u32 1.1754944e-38, %v2379_v20 }
 0x8d6   :  { %v8581_v60 = vadd.f32 1.0, %v6399_v57  ;;  %v6081_v8 = vmul.f32 -1.442695, %v8371_v9  ;;  %v2356_v11 = vmul.f32 %v8488_v47, %v2355_v42  ;;  %v3049_v19 = vand.u32 2147483648, %v8494_v29 }
 0x8d7   :  { %vm3043_vm4 = vweird.f32 %v8494_v29  ;;  %v6079_v9 = vmul.f32 -1.442695, %v8373_v48  ;;  %v2370_v30 = vsub.f32 1.0, %v2369_v10  ;;  %v8598_v20 = vor.u32 1.1754944e-38, %v3124_v26 }
 0x8d8   :  { %v8584_v25 = vpop.eup %6400  ;;  %6406 = vrcp.f32 %v8581_v60  ;;  %v3047_v42 = vand.u32 2147483647, %v8494_v29  ;;  %v3032_v57 = vand.u32 2147483647, %v8524_v27  ;;  %v6089_v53 = vmul.f32 -1.442695, %v2949_v5 }
 0x8d9   :  { %v3039_v16 = vmul.f32 %v8584_v25, %v8494_v29  ;;  %6408 = vpow2.f32 %v6081_v8  ;;  %v6085_v55 = vmul.f32 -1.442695, %v8440_v36  ;;  %v8606_v63 = vadd.f32 %v8488_v47, %v2356_v11 }
 0x8da   :  { %v8596_v14 = vpop.eup %6402  ;;  %v3050_v48 = vor.u32 1.1754944e-38, %v3049_v19  ;;  %vm3028_vm6 = vweird.f32 %v8524_v27  ;;  %v3034_v8 = vand.u32 2147483648, %v8524_v27  ;;  %6410 = vpow2.f32 %v6079_v9  ;;  %v2093_v35 = vpop.xlane.xlu0 %2092 }
 0x8db   :  { %v8602_v34 = vpop.eup %6404  ;;  %v3040_v58 = vsub.f32 1.0, %v3039_v16  ;;  %v3114_v36 = vmul.f32 %v8596_v14, %v8510_v51  ;;  %v8624_v16 = vmul.f32 %v8544_v22, %v2370_v30  ;;  %vm8626_vm13 = vcmp.eq.f32.partialorder %v3047_v42, 8.507059e+37 }
 0x8dc   :  { %v3024_v10 = vmul.f32 %v8602_v34, %v8524_v27  ;;  %v2952_v11 = vpop.xlane.xlu2 %2951  ;;  %6412 = vpow2.f32 %v6089_v53  ;;  %vm3044_vm15 = vweird.f32 %v8584_v25  ;;  %vm8637_vm14 = vcmp.eq.f32.partialorder %v3032_v57, 8.507059e+37 }
 0x8dd   :  { %v3041_v5 = vmul.f32 %v8584_v25, %v3040_v58  ;;  %v2946_v19 = vpop.xlane.xlu1 %2945  ;;  %6414 = vpow2.f32 %v6085_v55  ;;  %v6082_v30 = vmul.f32 -1.442695, %v8442_v43  ;;  %vm3029_vm0 = vweird.f32 %v8602_v34  ;;  %vm8650_vm2 = vmor %vm3043_vm4, %vm3044_vm15 }
 0x8de   :  { %v3025_v7 = vsub.f32 1.0, %v3024_v10  ;;  %v8634_v59 = vpop.eup %6406  ;;  %v3115_v1 = vsub.f32 1.0, %v3114_v36  ;;  %v3035_v58 = vor.u32 1.1754944e-38, %v3034_v8  ;;  %v3167_v57 = vand.u32 2147483647, %v8581_v60  ;;  %vm8660_vm11 = vmor %vm3028_vm6, %vm3029_vm0 }
 0x8df   :  { %v3042_v42 = vadd.f32 %v8584_v25, %v3041_v5  ;;  %v3159_v10 = vmul.f32 %v8634_v59, %v8581_v60  ;;  %v6409_v49 = vpop.eup %6408  ;;  %v6076_v3 = vmul.f32 -1.442695, %v2093_v35  ;;  %v6087_v32 = vmul.f32 -1.442695, %v8550_v38 }
 0x8e0   :  { %v3026_v53 = vmul.f32 %v8602_v34, %v3025_v7  ;;  %v8655_v5 = vadd.f32 1.0, %v6409_v49  ;;  %v6411_v50 = vpop.eup %6410  ;;  %vm3163_vm9 = vweird.f32 %v8581_v60  ;;  %vm3164_vm3 = vweird.f32 %v8634_v59 }
 0x8e1   :  { %v3160_v7 = vsub.f32 1.0, %v3159_v10  ;;  %v3169_v35 = vand.u32 2147483648, %v8581_v60  ;;  %6416 = vpow2.f32 %v6082_v30  ;;  %v3046_v49 = vsel %vm8650_vm2, %v8584_v25, %v3042_v42  ;;  %vm8699_vm5 = vmor %vm3163_vm9, %vm3164_vm3 }
 0x8e2   :  { %v3027_v43 = vadd.f32 %v8602_v34, %v3026_v53  ;;  %v6413_v29 = vpop.eup %6412  ;;  %6418 = vrcp.f32 %v8655_v5  ;;  %v3116_v53 = vmul.f32 %v8596_v14, %v3115_v1  ;;  %vm8676_vm10 = vcmp.eq.f32.partialorder %v3167_v57, 8.507059e+37 }
 0x8e3   :  { %v3161_v38 = vmul.f32 %v8634_v59, %v3160_v7  ;;  %v6415_v8 = vpop.eup %6414  ;;  %v8680_v30 = vadd.f32 1.0, %v6411_v50  ;;  %6420 = vpow2.f32 %v6076_v3  ;;  %v8683_v42 = vadd.f32 1.0, %v6413_v29 }
 0x8e4   :  { %v3031_v27 = vsel %vm8660_vm11, %v8602_v34, %v3027_v43  ;;  %v8685_v55 = vadd.f32 1.0, %v6415_v8  ;;  %6422 = vpow2.f32 %v6087_v32  ;;  %v8689_v34 = vsel %vm8626_vm13, %v3050_v48, %v3046_v49  ;;  %v2958_v32 = vpop.xlane.xlu2 %2957  ;;  %v6559_v8 = vld [vmem:[%s10210_s11 + $0x10] sm:$0xff] }
 0x8e5   :  { %v3162_v25 = vadd.f32 %v8634_v59, %v3161_v38  ;;  %v8693_v1 = vsel %vm8637_vm14, %v3035_v58, %v3031_v27  ;;  %v3170_v3 = vor.u32 1.1754944e-38, %v3169_v35  ;;  %6424 = vrcp.f32 %v8680_v30  ;;  %v2955_v57 = vpop.xlane.xlu1 %2954 }
 0x8e6   :  { %v3092_v48 = vand.u32 2147483647, %v8655_v5  ;;  %v3094_v58 = vand.u32 2147483648, %v8655_v5  ;;  %6426 = vrcp.f32 %v8683_v42  ;;  %v8711_v9 = vadd.f32 %v8596_v14, %v3116_v53 }
 0x8e7   :  { %v3166_v52 = vsel %vm8699_vm5, %v8634_v59, %v3162_v25  ;;  %v6417_v60 = vpop.eup %6416  ;;  %v6084_v43 = vmul.f32 -1.442695, %v8552_v44  ;;  %v8714_v7 = vmul.f32 -1.442695, %v2952_v11  ;;  %v8716_v36 = vmul.f32 -1.442695, %v2946_v19 }
 0x8e8   :  { %v8718_v35 = vpop.eup %6418  ;;  %6428 = vrcp.f32 %v8685_v55  ;;  %v8723_v29 = vmul.f32 -1.442695, %v2958_v32  ;;  %v8725_v49 = vmul.f32 -1.442695, %v2955_v57  ;;  %v8731_v44 = vsel %vm8676_vm10, %v3170_v3, %v3166_v52  ;;  %v3367_v57 = vld [vmem:[%s10281_s9 + $0x8] sm:$0xf] }
 0x8e9   :  { %v6421_v27 = vpop.eup %6420  ;;  %10278 = vst [vmem:[#allocation12_spill] sm:$0xff] %v8731_v44  ;;  %v3084_v11 = vmul.f32 %v8718_v35, %v8655_v5  ;;  %vm3088_vm1 = vweird.f32 %v8655_v5  ;;  %vm8736_vm4 = vcmp.eq.f32.partialorder %v3092_v48, 8.507059e+37  ;;  %v3095_v53 = vor.u32 1.1754944e-38, %v3094_v58 }
 0x8ea   :  { %v6423_v19 = vpop.eup %6422  ;;  %vm3058_vm6 = vweird.f32 %v8680_v30  ;;  %v3062_v25 = vand.u32 2147483647, %v8680_v30  ;;  %v8742_v50 = vadd.f32 1.0, %v6417_v60  ;;  %v3064_v32 = vand.u32 2147483648, %v8680_v30 }
 0x8eb   :  { %v8744_v10 = vpop.eup %6424  ;;  %v3085_v3 = vsub.f32 1.0, %v3084_v11  ;;  %v3214_v52 = vand.u32 2147483648, %v8683_v42  ;;  %v8755_v38 = vadd.f32 1.0, %v6421_v27  ;;  %6430 = vpow2.f32 %v6084_v43 }
 0x8ec   :  { %v8749_v48 = vpop.eup %6426  ;;  %v3054_v59 = vmul.f32 %v8744_v10, %v8680_v30  ;;  %vm3089_vm13 = vweird.f32 %v8718_v35  ;;  %6432 = vrcp.f32 %v8742_v50  ;;  %vm8767_vm15 = vcmp.eq.f32.partialorder %v3062_v25, 8.507059e+37 }
 0x8ed   :  { %v3086_v60 = vmul.f32 %v8718_v35, %v3085_v3  ;;  %v3204_v11 = vmul.f32 %v8749_v48, %v8683_v42  ;;  %v3152_v43 = vand.u32 2147483647, %v8685_v55  ;;  %v8772_v3 = vadd.f32 1.0, %v6423_v19  ;;  %vm8786_vm2 = vmor %vm3088_vm1, %vm3089_vm13 }
 0x8ee   :  { %v8765_v58 = vpop.eup %6428  ;;  %v3055_v24 = vsub.f32 1.0, %v3054_v59  ;;  %vm10284_vm14 = vcmask 1043456   ;;  %v3065_v2 = vor.u32 1.1754944e-38, %v3064_v32  ;;  %v3366_v59 = vld [vmem:[%s10281_s9] sm:$0xff]  ;;  %vm3119_vm0 = vweird.f32 %v8596_v14  ;;  %s10431_s9 = sld [smem:[#allocation17_spill]] }
 0x8ef   :  { %6093 = vmatpush.msk.msrb.mxu1 %vm10284_vm14, %v3367_v57  ;;  %v3087_v44 = vadd.f32 %v8718_v35, %v3086_v60  ;;  %v3205_v23 = vsub.f32 1.0, %v3204_v11  ;;  %v3144_v62 = vmul.f32 %v8765_v58, %v8685_v55  ;;  %vm3059_vm11 = vweird.f32 %v8744_v10 }
 0x8f0   :  { %v3056_v25 = vmul.f32 %v8744_v10, %v3055_v24  ;;  %v3154_v32 = vand.u32 2147483648, %v8685_v55  ;;  %6434 = vrcp.f32 %v8755_v38  ;;  %v8797_v60 = vor.u32 1.1754944e-38, %v3214_v52  ;;  %v6558_v24 = vld [vmem:[%s10210_s11 + $0x18] sm:$0xff]  ;;  %vm8821_vm5 = vmor %vm3058_vm6, %vm3059_vm11 }
 0x8f1   :  { %3394 = vmatpush.msrb.mxu1 %v3366_v59  ;;  %v3091_v57 = vsel %vm8786_vm2, %v8718_v35, %v3087_v44  ;;  %v3145_v5 = vsub.f32 1.0, %v3144_v62  ;;  %v3109_v11 = vand.u32 2147483648, %v8742_v50  ;;  %v6431_v12 = vpop.eup %6430  ;;  %vm3118_vm9 = vweird.f32 %v8510_v51 }
 0x8f2   :  { %v3057_v33 = vadd.f32 %v8744_v10, %v3056_v25  ;;  %vm3148_vm3 = vweird.f32 %v8685_v55  ;;  %vm8806_vm10 = vcmp.eq.f32.partialorder %v3152_v43, 8.507059e+37  ;;  %6436 = vrcp.f32 %v8772_v3  ;;  %v8811_v62 = vpop.eup %6432 }
 0x8f3   :  { %3870 = vmatpush.msra.mxu1 %v6558_v24  ;;  %v8815_v35 = vsel %vm8736_vm4, %v3095_v53, %v3091_v57  ;;  %v3206_v52 = vmul.f32 %v8749_v48, %v3205_v23  ;;  %v3146_v43 = vmul.f32 %v8765_v58, %v3145_v5  ;;  %v3107_v19 = vand.u32 2147483647, %v8742_v50  ;;  %v6560_v24 = vld [vmem:[%s10210_s11 + $0x8] sm:$0xff] }
 0x8f4   :  { %v3061_v53 = vsel %vm8821_vm5, %v8744_v10, %v3057_v33  ;;  %vm3149_vm1 = vweird.f32 %v8765_v58  ;;  %v3155_v30 = vor.u32 1.1754944e-38, %v3154_v32  ;;  %v3099_v25 = vmul.f32 %v8811_v62, %v8742_v50 }
 0x8f5   :  { %3871 = vmatpush.msra.mxu1 %v6559_v8  ;;  %v3147_v23 = vadd.f32 %v8765_v58, %v3146_v43  ;;  %vm3103_vm4 = vweird.f32 %v8742_v50  ;;  %v3110_v57 = vor.u32 1.1754944e-38, %v3109_v11  ;;  %v2394_v5 = vand.u32 2147483648, %v8755_v38  ;;  %vm8873_vm14 = vmor %vm3148_vm3, %vm3149_vm1 }
 0x8f6   :  { %v8843_v44 = vpop.eup %6434  ;;  %v10291_v33 = vand.u32 2147483647, %v8278_v45  ;;  %v3100_v43 = vsub.f32 1.0, %v3099_v25  ;;  %v8853_v11 = vadd.f32 1.0, %v6431_v12  ;;  %6438 = vpow2.f32 %v8714_v7  ;;  %vm8906_vm3 = vmor %vm3118_vm9, %vm3119_vm0 }
 0x8f7   :  { %3872 = vmatpush.msra.mxu1 %v6560_v24  ;;  %v10294_v8 = vand.u32 2147483647, %v8510_v51  ;;  %v8864_v45 = vsel %vm8767_vm15, %v3065_v2, %v3061_v53  ;;  %vm8877_vm2 = vcmp.eq.f32.partialorder %v3107_v19, 8.507059e+37  ;;  %v2384_v27 = vmul.f32 %v8843_v44, %v8755_v38 }
 0x8f8   :  { %vm8847_vm6 = vcmp.eq.f32.partialorder %v10291_v33, 8.507059e+37  ;;  %v8867_v33 = vadd.f32 %v8749_v48, %v3206_v52  ;;  %v3182_v2 = vand.u32 2147483647, %v8772_v3  ;;  %v6561_v52 = vld [vmem:[%s10210_s11] sm:$0xff]  ;;  %v6437_v53 = vpop.eup %6436  ;;  %v3151_v55 = vsel %vm8873_vm14, %v8765_v58, %v3147_v23  ;;  %s10432_s11 = sld [smem:[#allocation18_spill]] }
 0x8f9   :  { %vm8858_vm13 = vcmp.eq.f32.partialorder %v10294_v8, 8.507059e+37  ;;  %3873 = vmatpush.msra.mxu1 %v6561_v52  ;;  %v3101_v19 = vmul.f32 %v8811_v62, %v3100_v43  ;;  %v3184_v25 = vand.u32 2147483648, %v8772_v3  ;;  %6440 = vrcp.f32 %v8853_v11 }
 0x8fa   :  { %vm3104_vm15 = vweird.f32 %v8811_v62  ;;  %v8894_v8 = vor.u32 1.1754944e-38, %v2394_v5  ;;  %v3174_v32 = vmul.f32 %v6437_v53, %v8772_v3  ;;  %vm3178_vm11 = vweird.f32 %v8772_v3 }
 0x8fb   :  { %v3102_v12 = vadd.f32 %v8811_v62, %v3101_v19  ;;  %v2385_v58 = vsub.f32 1.0, %v2384_v27  ;;  %6442 = vpow2.f32 %v8716_v36  ;;  %v8912_v5 = vsel %vm8806_vm10, %v3155_v30, %v3151_v55  ;;  %vm8921_vm1 = vmor %vm3103_vm4, %vm3104_vm15 }
 0x8fc   :  { %v3175_v43 = vsub.f32 1.0, %v3174_v32  ;;  %vm8914_vm5 = vcmp.eq.f32.partialorder %v3182_v2, 8.507059e+37  ;;  %6444 = vpow2.f32 %v8723_v29  ;;  %v6439_v36 = vpop.eup %6438  ;;  %vm3179_vm0 = vweird.f32 %v6437_v53 }
 0x8fd   :  { %v3185_v27 = vor.u32 1.1754944e-38, %v3184_v25  ;;  %v3139_v59 = vand.u32 2147483648, %v8853_v11  ;;  %6446 = vpow2.f32 %v8725_v49  ;;  %v3106_v30 = vsel %vm8921_vm1, %v8811_v62, %v3102_v12  ;;  %vm3180_vm10 = vmor %vm3178_vm11, %vm3179_vm0 }
 0x8fe   :  { %v3176_v32 = vmul.f32 %v6437_v53, %v3175_v43  ;;  %v8930_v2 = vadd.f32 1.0, %v6439_v36  ;;  %v3121_v29 = vsel %vm8906_vm3, %v8596_v14, %v8711_v9  ;;  %v3338_v55 = vperm.slane %v8912_v5, %v8358_v40 }
 0x8ff   :  { %v6441_v50 = vpop.eup %6440  ;;  %v8939_v19 = vmul.f32 %v8843_v44, %v2385_v58  ;;  %vm3133_vm9 = vweird.f32 %v8853_v11  ;;  %v3137_v49 = vand.u32 2147483647, %v8853_v11  ;;  %v10307_v14 = vsel %vm8615_vm7, %v8385_v18, %v8497_v37 }
 0x900   :  { %v3177_v62 = vadd.f32 %v6437_v53, %v3176_v32  ;;  %v3129_v25 = vmul.f32 %v6441_v50, %v8853_v11  ;;  %6448 = vrcp.f32 %v8930_v2  ;;  %v8953_v9 = vsel %vm8847_vm6, %v8396_v28, %v10307_v14 }
 0x901   :  { %v6443_v12 = vpop.eup %6442  ;;  %v3140_v58 = vor.u32 1.1754944e-38, %v3139_v59  ;;  %v8960_v23 = vsel %vm8877_vm2, %v3110_v57, %v3106_v30  ;;  %v8965_v26 = vsel %vm8858_vm13, %v8598_v20, %v3121_v29  ;;  %v10308_v18 = vperm.slane %v8269_v39, %v8140_v13 }
 0x902   :  { %v10309_v28 = vperm.slane %v8145_v0, %v8140_v13  ;;  %v6445_v3 = vpop.eup %6444  ;;  %v3181_v10 = vsel %vm3180_vm10, %v6437_v53, %v3177_v62  ;;  %v3130_v43 = vsub.f32 1.0, %v3129_v25  ;;  %v3229_v7 = vand.u32 2147483648, %v8930_v2 }
 0x903   :  { %v8975_v57 = vadd.f32 1.0, %v6443_v12  ;;  %v6447_v36 = vpop.eup %6446  ;;  %v8979_v20 = vsel %vm8914_vm5, %v3185_v27, %v3181_v10  ;;  %v8981_v24 = vadd.f32 1.0, %v6445_v3  ;;  %vm8983_vm7 = vcmp.eq.f32.partialorder %v3137_v49, 8.507059e+37 }
 0x904   :  { %v3297_v37 = vsel %vm10135_vm12, %v10309_v28, %v10308_v18  ;;  %v3286_v0 = vperm.slane %v8377_v6, %v8140_v13  ;;  %vm2359_vm4 = vweird.f32 %v8488_v47  ;;  %v3131_v53 = vmul.f32 %v6441_v50, %v3130_v43 }
 0x905   :  { %vm3134_vm6 = vweird.f32 %v6441_v50  ;;  %6450 = vrcp.f32 %v8975_v57  ;;  %v10312_v52 = vperm.slane %v8259_v31, %v8140_v13  ;;  %vm2374_vm13 = vweird.f32 %v8544_v22 }
 0x906   :  { %6452 = vrcp.f32 %v8981_v24  ;;  %v8997_v27 = vadd.f32 1.0, %v6447_v36  ;;  %v3287_v6 = vperm.slane %v8383_v61, %v8140_v13  ;;  %v3288_v59 = vperm.slane %v8953_v9, %v8140_v13  ;;  %v9003_v30 = vpop.eup %6448  ;;  %vm3135_vm11 = vmor %vm3133_vm9, %vm3134_vm6 }
 0x907   :  { %v3298_v51 = vsel %vm10134_vm8, %v10312_v52, %v3297_v37  ;;  %vm2358_vm14 = vweird.f32 %v8423_v15  ;;  %vm3209_vm2 = vweird.f32 %v8749_v48  ;;  %v3340_v31 = vperm.slane %v8979_v20, %v8358_v40 }
 0x908   :  { %v3132_v32 = vadd.f32 %v6441_v50, %v3131_v53  ;;  %v3227_v29 = vand.u32 2147483647, %v8930_v2  ;;  %v9010_v49 = vor.u32 1.1754944e-38, %v3229_v7  ;;  %vm2373_vm15 = vweird.f32 %v8452_v21 }
 0x909   :  { %v3219_v61 = vmul.f32 %v9003_v30, %v8930_v2  ;;  %v3197_v62 = vand.u32 2147483647, %v8975_v57  ;;  %v3199_v25 = vand.u32 2147483648, %v8975_v57  ;;  %v10313_v14 = vperm.slane %v8182_v54, %v8140_v13 }
 0x90a   :  { %vm10314_vm3 = vcmask 1043459   ;;  %vm3208_vm5 = vweird.f32 %v8683_v42  ;;  %6454 = vrcp.f32 %v8997_v27  ;;  %v3244_v12 = vand.u32 2147483648, %v8997_v27 }
 0x90b   :  { %v3299_v9 = vsel %vm10314_vm3, %v10313_v14, %v3298_v51  ;;  %v3136_v11 = vsel %vm3135_vm11, %v6441_v50, %v3132_v32  ;;  %v3335_v18 = vperm.slane %v8960_v23, %v8358_v40  ;;  %v3220_v28 = vsub.f32 1.0, %v3219_v61  ;;  %v6451_v23 = vpop.eup %6450 }
 0x90c   :  { %v3141_v37 = vsel %vm8983_vm7, %v3140_v58, %v3136_v11  ;;  %v10315_v54 = vperm.slane %v8332_v17, %v8140_v13  ;;  %vm10316_vm0 = vcmask 1044484   ;;  %v10317_v10 = vperm.slane %v8693_v1, %v8358_v40  ;;  %v9058_v39 = vpop.eup %6452 }
 0x90d   :  { %v10318_v50 = vperm.slane %v8689_v34, %v8358_v40  ;;  %v10319_v7 = vand.u32 2147483647, %v8423_v15  ;;  %vm10322_vm6 = vcmask 1045509   ;;  %v3336_v1 = vperm.slane %v8965_v26, %v8358_v40 }
 0x90e   :  { %v3300_v3 = vsel %vm10316_vm0, %v10315_v54, %v3299_v9  ;;  %v10323_v34 = vperm.slane %v8864_v45, %v8358_v40  ;;  %v10324_v53 = vand.u32 2147483647, %v8683_v42  ;;  %v3189_v51 = vmul.f32 %v6451_v23, %v8975_v57 }
 0x90f   :  { %v3346_v43 = vsel %vm10135_vm12, %v10318_v50, %v10317_v10  ;;  %vm9045_vm9 = vcmp.eq.f32.partialorder %v10319_v7, 8.507059e+37  ;;  %v3301_v17 = vsel %vm10322_vm6, %v3286_v0, %v3300_v3  ;;  %v3221_v0 = vmul.f32 %v9003_v30, %v3220_v28 }
 0x910   :  { %v3347_v58 = vsel %vm10134_vm8, %v10323_v34, %v3346_v43  ;;  %vm9062_vm11 = vcmp.eq.f32.partialorder %v10324_v53, 8.507059e+37  ;;  %vm9069_vm0 = vcmp.eq.f32.partialorder %v3197_v62, 8.507059e+37  ;;  %v3200_v45 = vor.u32 1.1754944e-38, %v3199_v25  ;;  %vm10331_vm8 = vmmov %vm10314_vm3  ;;  %v6455_v3 = vpop.eup %6454 }
 0x911   :  { %v9073_v32 = vor.u32 1.1754944e-38, %v3244_v12  ;;  %v3249_v61 = vmul.f32 %v9058_v39, %v8981_v24  ;;  %vm10329_vm6 = vcmask 1046534   ;;  %v3337_v9 = vperm.slane %v3141_v37, %v8358_v40 }
 0x912   :  { %v3302_v14 = vsel %vm10329_vm6, %v3287_v6, %v3301_v17  ;;  %v10330_v11 = vperm.slane %v8565_v41, %v8358_v40  ;;  %v3190_v54 = vsub.f32 1.0, %v3189_v51  ;;  %vm3194_vm12 = vweird.f32 %v6451_v23 }
 0x913   :  { %vm3238_vm3 = vweird.f32 %v8997_v27  ;;  %vm10332_vm10 = vcmask 1047559   ;;  %v10333_v25 = vperm.slane %v8815_v35, %v8358_v40  ;;  %vm10334_vm7 = vcmask 1044484  }
 0x914   :  { %v3348_v28 = vsel %vm10331_vm8, %v10330_v11, %v3347_v58  ;;  %v3303_v62 = vsel %vm10332_vm10, %v3288_v59, %v3302_v14  ;;  %v3250_v6 = vsub.f32 1.0, %v3249_v61  ;;  %vm10335_vm6 = vcmask 1045509   ;;  %vm9096_vm8 = vmor %vm2358_vm14, %vm2359_vm4  ;;  %v10359_v61 = vld [vmem:[#allocation11_spill] sm:$0xff]  ;;  %v10370_v59 = vld [vmem:[#allocation12_spill] sm:$0xff] }
 0x915   :  { %v3349_v12 = vsel %vm10334_vm7, %v10333_v25, %v3348_v28  ;;  %vm3369_vm1 = vcmask 97280   ;;  %v2372_v41 = vadd.f32 %v8544_v22, %v8624_v16  ;;  %v3222_v35 = vadd.f32 %v9003_v30, %v3221_v0  ;;  %v10361_v28 = vld [vmem:[#allocation9_spill] sm:$0xff] }
 0x916   :  { %v3350_v37 = vsel %vm10335_vm6, %v3335_v18, %v3349_v12  ;;  %vm9101_vm10 = vcmp.eq.f32.partialorder %v3227_v29, 8.507059e+37  ;;  %v3191_v50 = vmul.f32 %v6451_v23, %v3190_v54  ;;  %v3234_v18 = vmul.f32 %v6455_v3, %v8997_v27  ;;  %vm9111_vm6 = vmor %vm2373_vm15, %vm2374_vm13 }
 0x917   :  { %vm10340_vm7 = vcmask 1046534   ;;  %v3251_v16 = vmul.f32 %v9058_v39, %v3250_v6  ;;  %vm10343_vm4 = vcmask 1047559   ;;  %vm10344_vm14 = vcmask 31744   ;;  %vm9127_vm13 = vmor %vm3208_vm5, %vm3209_vm2 }
 0x918   :  { %v3351_v43 = vsel %vm10340_vm7, %v3336_v1, %v3350_v37  ;;  %v3362_v7 = vsel %vm10344_vm14, %v10175_v56, %v3303_v62  ;;  %v2361_v17 = vsel %vm9096_vm8, %v8488_v47, %v8606_v63  ;;  %v3192_v34 = vadd.f32 %v6451_v23, %v3191_v50  ;;  %v10363_v62 = vld [vmem:[#allocation8_spill] sm:$0xff]  ;;  %v10367_v37 = vld [vmem:[#allocation5_spill] sm:$0xff] }
 0x919   :  { %v3352_v29 = vsel %vm10343_vm4, %v3337_v9, %v3351_v43  ;;  %v3235_v58 = vsub.f32 1.0, %v3234_v18  ;;  %vm10347_vm15 = vcmask 64512   ;;  %v2376_v56 = vsel %vm9111_vm6, %v8544_v22, %v2372_v41 }
 0x91a   :  { %v3364_v53 = vsel %vm10347_vm15, %v3362_v7, %v3352_v29  ;;  %vm10348_vm7 = vweird.f32 %v8975_v57  ;;  %v2387_v47 = vadd.f32 %v8843_v44, %v8939_v19  ;;  %vm2389_vm2 = vweird.f32 %v8843_v44  ;;  %v3428_v29 = vpop.f32.mrf.mxu2 }
 0x91b   :  { %vm3195_vm8 = vmor %vm10348_vm7, %vm3194_vm12  ;;  %6094 = vmatmul.msk.f32.vlgmr.msrb.gmra.mxu1 %vm3369_vm1, %v3364_v53  ;;  %v2392_v63 = vand.u32 2147483647, %v8755_v38  ;;  %v3211_v42 = vsel %vm9127_vm13, %v8749_v48, %v8867_v33  ;;  %vm10349_vm5 = vweird.f32 %v9003_v30  ;;  %vm10350_vm6 = vweird.f32 %v8930_v2 }
 0x91c   :  { %vm9151_vm4 = vmor %vm10350_vm6, %vm10349_vm5  ;;  %v3196_v57 = vsel %vm3195_vm8, %v6451_v23, %v3192_v34  ;;  %v3236_v0 = vmul.f32 %v6455_v3, %v3235_v58  ;;  %v2366_v19 = vsel %vm9045_vm9, %v8573_v46, %v2361_v17  ;;  %v10353_v51 = vand.u32 2147483647, %v8452_v21 }
 0x91d   :  { %v3201_v48 = vsel %vm9069_vm0, %v3200_v45, %v3196_v57  ;;  %vm10354_vm14 = vweird.f32 %v8755_v38  ;;  %v3216_v23 = vsel %vm9062_vm11, %v8797_v60, %v3211_v42  ;;  %v3226_v21 = vsel %vm9151_vm4, %v9003_v30, %v3222_v35  ;;  %v10384_v42 = vld [vmem:[#allocation6_spill] sm:$0xff] }
 0x91e   :  { %vm2378_vm12 = vcmp.eq.f32.partialorder %v10353_v51, 8.507059e+37  ;;  %vm9165_vm13 = vmor %vm10354_vm14, %vm2389_vm2  ;;  %v3237_v36 = vadd.f32 %v6455_v3, %v3236_v0  ;;  %vm3239_vm9 = vweird.f32 %v6455_v3  ;;  %vm2393_vm0 = vcmp.eq.f32.partialorder %v2392_v63, 8.507059e+37 }
 0x91f   :  { %v2381_v33 = vsel %vm2378_vm12, %v8579_v4, %v2376_v56  ;;  %v2391_v46 = vsel %vm9165_vm13, %v8843_v44, %v2387_v47  ;;  %v3242_v4 = vand.u32 2147483647, %v8997_v27  ;;  %vm3240_vm15 = vmor %vm3238_vm3, %vm3239_vm9  ;;  %v3252_v38 = vadd.f32 %v9058_v39, %v3251_v16 }
 0x920   :  { %vm3254_vm11 = vweird.f32 %v9058_v39  ;;  %v3257_v60 = vand.u32 2147483647, %v8981_v24  ;;  %v3241_v52 = vsel %vm3240_vm15, %v6455_v3, %v3237_v36  ;;  %vm3253_vm8 = vweird.f32 %v8981_v24 }
 0x921   :  { %vm3243_vm7 = vcmp.eq.f32.partialorder %v3242_v4, 8.507059e+37  ;;  %v3259_v44 = vand.u32 2147483648, %v8981_v24  ;;  %v2396_v30 = vsel %vm2393_vm0, %v8894_v8, %v2391_v46  ;;  %v3231_v26 = vsel %vm9101_vm10, %v9010_v49, %v3226_v21  ;;  %vm9191_vm3 = vmor %vm3253_vm8, %vm3254_vm11  ;;  %v10360_v8 = vld [vmem:[#allocation10_spill] sm:$0xff] }
 0x922   :  { %v3246_v27 = vsel %vm3243_vm7, %v9073_v32, %v3241_v52  ;;  %v3292_v14 = vperm.slane %v10359_v61, %v8140_v13  ;;  %v3256_v9 = vsel %vm9191_vm3, %v9058_v39, %v3252_v38  ;;  %vm3258_vm2 = vcmp.eq.f32.partialorder %v3257_v60, 8.507059e+37  ;;  %v3263_v39 = vld [vmem:[%s10366_s4] sm:$0x3]  ;;  %s10437_s4 = sld [smem:[#allocation14_spill]] }
 0x923   :  { %v3260_v24 = vor.u32 1.1754944e-38, %v3259_v44  ;;  %v3293_v11 = vperm.slane %v10360_v8, %v8140_v13  ;;  %v3294_v49 = vperm.slane %v2366_v19, %v8140_v13  ;;  %v3295_v32 = vperm.slane %v2381_v33, %v8140_v13 }
 0x924   :  { %v10362_v54 = vperm.slane %v10361_v28, %v8140_v13  ;;  %v10364_v25 = vperm.slane %v10363_v62, %v8140_v13  ;;  %vm10365_vm10 = vcmask 1041409   ;;  %v3341_v3 = vperm.slane %v3201_v48, %v8358_v40 }
 0x925   :  { %v3296_v6 = vperm.slane %v2396_v30, %v8140_v13  ;;  %v10368_v41 = vperm.slane %v10367_v37, %v8140_v13  ;;  %vm10369_vm5 = vcmask 1042434   ;;  %v3342_v35 = vperm.slane %v3216_v23, %v8358_v40  ;;  %vm10372_vm6 = vmmov %vm10365_vm10 }
 0x926   :  { %v3304_v12 = vsel %vm10365_vm10, %v10364_v25, %v10362_v54  ;;  %v10371_v50 = vperm.slane %v10370_v59, %v8358_v40  ;;  %v3261_v43 = vsel %vm3258_vm2, %v3260_v24, %v3256_v9  ;;  %vm10373_vm4 = vcmask 1043459   ;;  %vm10374_vm12 = vmmov %vm10369_vm5 }
 0x927   :  { %v3305_v10 = vsel %vm10369_vm5, %v10368_v41, %v3304_v12  ;;  %v3344_v16 = vperm.slane %v3246_v27, %v8358_v40  ;;  %vm10375_vm14 = vcmask 1044484   ;;  %v3343_v5 = vperm.slane %v3231_v26, %v8358_v40  ;;  %vm10376_vm13 = vmmov %vm10373_vm4 }
 0x928   :  { %v3353_v18 = vsel %vm10372_vm6, %v10371_v50, %v3338_v55  ;;  %v3306_v15 = vsel %vm10373_vm4, %v3292_v14, %v3305_v10  ;;  %v9237_v1 = vperm.slane %v3263_v39, 1  ;;  %vm10377_vm9 = vcmask 1045509   ;;  %vm10378_vm0 = vmmov %vm10375_vm14 }
 0x929   :  { %v3354_v13 = vsel %vm10374_vm12, %v3340_v31, %v3353_v18  ;;  %v3307_v7 = vsel %vm10375_vm14, %v3293_v11, %v3306_v15  ;;  %vm10379_vm15 = vcmask 1046534   ;;  %v3345_v53 = vperm.slane %v3261_v43, %v8358_v40  ;;  %vm10380_vm11 = vmmov %vm10377_vm9 }
 0x92a   :  { %v3355_v17 = vsel %vm10376_vm13, %v3341_v3, %v3354_v13  ;;  %v3308_v55 = vsel %vm10377_vm9, %v3294_v49, %v3307_v7  ;;  %v3429_v31 = vadd.f32 %v3428_v29, %v9237_v1  ;;  %vm10381_vm7 = vcmask 1047559   ;;  %vm10382_vm8 = vmmov %vm10379_vm15 }
 0x92b   :  { %v3356_v34 = vsel %vm10378_vm0, %v3342_v35, %v3355_v17  ;;  %v3309_v58 = vsel %vm10379_vm15, %v3295_v32, %v3308_v55  ;;  %vm10383_vm3 = vmmov %vm10381_vm7  ;;  %vm10385_vm2 = vcmask 31744   ;;  %vm10386_vm10 = vcmask 64512  }
 0x92c   :  { %v3357_v20 = vsel %vm10380_vm11, %v3343_v5, %v3356_v34  ;;  %v3310_v56 = vsel %vm10381_vm7, %v3296_v6, %v3309_v58  ;;  %v3432_v57 = vrot.slane %v3429_v31, 1  ;;  %3475 = vrot.lane.b32.xlu1 %v3429_v31, %s6595_s20  ;;  %v3368_v19 = vperm.slane %v3263_v39, 0 }
 0x92d   :  { %v3358_v47 = vsel %vm10382_vm8, %v3344_v16, %v3357_v20  ;;  %v3363_v22 = vsel %vm10385_vm2, %v10384_v42, %v3310_v56  ;;  %vm10387_vm0 = vcmask 1041409   ;;  %vm3407_vm15 = vcmask 261120  }
 0x92e   :  { %v3359_v63 = vsel %vm10383_vm3, %v3345_v53, %v3358_v47  ;;  %3477 = vrot.lane.b32.xlu0 %v3432_v57, %s6595_s20 }
 0x92f   :  { %v3365_v0 = vsel %vm10386_vm10, %v3363_v22, %v3359_v63 }
 0x930   :  { %6095 = vmatmul.msk.f32.gmra.mxu1 %vm3369_vm1, %v3365_v0 }
 0x998   :  { %v3396_v51 = vpop.f32.mrf.mxu1 }
 0x999   :  { %v9254_v48 = vadd.f32 %v3396_v51, %v3368_v19 }
 0x99b   :  { %v3435_v33 = vadd.f32 %v3429_v31, %v9254_v48 }
 0x99d   :  { %v6096_v2 = vmul.f32 -1.442695, %v3435_v33 }
 0x99e   :  { %v3476_v14 = vpop.permute.xlu1 %3475 }
 0x99f   :  { %6456 = vpow2.f32 %v6096_v2 }
 0x9a0   :  { %v3478_v41 = vpop.permute.xlu0 %3477 }
 0x9a5   :  { %v6457_v23 = vpop.eup %6456 }
 0x9a6   :  { %v3443_v21 = vadd.f32 1.0, %v6457_v23 }
 0x9a8   :  { %6458 = vrcp.f32 %v3443_v21  ;;  %v3456_v30 = vand.u32 2147483648, %v3443_v21  ;;  %v3454_v27 = vand.u32 2147483647, %v3443_v21  ;;  %vm3450_vm5 = vweird.f32 %v3443_v21 }
 0x9aa   :  { %v3457_v9 = vor.u32 1.1754944e-38, %v3456_v30  ;;  %vm3455_vm4 = vcmp.eq.f32.partialorder %v3454_v27, 8.507059e+37 }
 0x9ad   :  { %v3399_v46 = vpop.f32.mrf.mxu1 }
 0x9ae   :  { %v9257_v36 = vadd.f32 %v3399_v46, %v3368_v19  ;;  %v6459_v38 = vpop.eup %6458 }
 0x9af   :  { %v3446_v52 = vmul.f32 %v6459_v38, %v3443_v21  ;;  %vm3451_vm1 = vweird.f32 %v6459_v38 }
 0x9b0   :  { %v3436_v4 = vadd.f32 %v3432_v57, %v9257_v36  ;;  %vm3452_vm6 = vmor %vm3450_vm5, %vm3451_vm1 }
 0x9b1   :  { %v3447_v44 = vsub.f32 1.0, %v3446_v52 }
 0x9b2   :  { %v6097_v60 = vmul.f32 -1.442695, %v3436_v4 }
 0x9b3   :  { %v3448_v26 = vmul.f32 %v6459_v38, %v3447_v44 }
 0x9b4   :  { %6460 = vpow2.f32 %v6097_v60 }
 0x9b5   :  { %v3449_v45 = vadd.f32 %v6459_v38, %v3448_v26 }
 0x9b7   :  { %v3453_v24 = vsel %vm3452_vm6, %v6459_v38, %v3449_v45  ;;  %vm10388_vm6 = vmmov %vm10387_vm0 }
 0x9b8   :  { %v3458_v11 = vsel %vm3455_vm4, %v3457_v9, %v3453_v24 }
 0x9b9   :  { %v3481_v49 = vmul.f32 %v3476_v14, %v3458_v11  ;;  %v3495_v17 = vsub.f32 1.0, %v3458_v11  ;;  %v3507_v34 = vmul.f32 0.0, %v3458_v11 }
 0x9ba   :  { %v6461_v61 = vpop.eup %6460 }
 0x9bb   :  { %v3444_v8 = vadd.f32 1.0, %v6461_v61  ;;  %3485 = vrot.lane.b32.xlu0 %v3481_v49, %s6595_s20 }
 0x9bd   :  { %6462 = vrcp.f32 %v3444_v8  ;;  %v3471_v62 = vand.u32 2147483648, %v3444_v8  ;;  %v3469_v12 = vand.u32 2147483647, %v3444_v8  ;;  %vm3465_vm14 = vweird.f32 %v3444_v8 }
 0x9bf   :  { %v3472_v39 = vor.u32 1.1754944e-38, %v3471_v62  ;;  %vm3470_vm9 = vcmp.eq.f32.partialorder %v3469_v12, 8.507059e+37 }
 0x9c3   :  { %v6463_v32 = vpop.eup %6462 }
 0x9c4   :  { %v3461_v28 = vmul.f32 %v6463_v32, %v3444_v8  ;;  %vm3466_vm12 = vweird.f32 %v6463_v32 }
 0x9c5   :  { %vm3467_vm13 = vmor %vm3465_vm14, %vm3466_vm12 }
 0x9c6   :  { %v3462_v54 = vsub.f32 1.0, %v3461_v28 }
 0x9c8   :  { %v3463_v25 = vmul.f32 %v6463_v32, %v3462_v54 }
 0x9ca   :  { %v3464_v3 = vadd.f32 %v6463_v32, %v3463_v25 }
 0x9cc   :  { %v3468_v6 = vsel %vm3467_vm13, %v6463_v32, %v3464_v3 }
 0x9cd   :  { %v3473_v37 = vsel %vm3470_vm9, %v3472_v39, %v3468_v6 }
 0x9ce   :  { %v3482_v10 = vmul.f32 %v3478_v41, %v3473_v37  ;;  %v3496_v16 = vsub.f32 1.0, %v3473_v37  ;;  %v3508_v7 = vmul.f32 0.0, %v3473_v37 }
 0x9d0   :  { %3487 = vrot.lane.b32.xlu2 %v3482_v10, %s6595_s20 }
 0xa2a   :  { %v3488_v35 = vpop.permute.xlu2 %3487 }
 0xa2b   :  { %v3492_v59 = vadd.f32 %v3488_v35, %v9257_v36 }
 0xa2d   :  { %6464 = vtanh.f32 %v3492_v59  ;;  %v3486_v50 = vpop.permute.xlu0 %3485 }
 0xa2e   :  { %v3491_v18 = vadd.f32 %v3486_v50, %v9254_v48 }
 0xa30   :  { %6466 = vtanh.f32 %v3491_v18 }
 0xa33   :  { %v6465_v43 = vpop.eup %6464 }
 0xa34   :  { %3501 = vrot.lane.b32.xlu0 %v6465_v43, %s6596_s8 }
 0xa36   :  { %v6467_v15 = vpop.eup %6466 }
 0xa37   :  { %3499 = vrot.lane.b32.xlu1 %v6467_v15, %s6596_s8 }
 0xaa6   :  { %v3502_v13 = vpop.permute.xlu0 %3501 }
 0xaa7   :  { %v3506_v29 = vmul.f32 %v3502_v13, %v3496_v16 }
 0xaa9   :  { %v9266_v5 = vadd.f32 %v3508_v7, %v3506_v29  ;;  %v3500_v55 = vpop.permute.xlu1 %3499 }
 0xaaa   :  { %v3505_v58 = vmul.f32 %v3500_v55, %v3495_v17 }
 0xaab   :  { %v3513_v53 = vrot.slane %v9266_v5, 7 }
 0xaac   :  { %v3509_v20 = vadd.f32 %v3507_v34, %v3505_v58 }
 0xaae   :  { %v3514_v31 = vsel %vm10387_vm0, %v3513_v53, %v3509_v20  ;;  %v3615_v60 = vrot.slane %v3509_v20, 7 }
 0xaaf   :  { %3515 = vrot.lane.b32.xlu2 %v3514_v31, %s6596_s8 }
 0xb09   :  { %v3516_v56 = vpop.permute.xlu2 %3515 }
 0xb0a   :  { %6098 = vmatmul.msk.f32.vlgmr.msra.gmra.mxu2 %vm3407_vm15, %v3516_v56 }
 0xb8d   :  { %v3536_v47 = vpop.f32.mrf.mxu2 }
 0xb8e   :  { %v3537_v63 = vadd.f32 %v3536_v47, %v9237_v1 }
 0xb90   :  { %v3540_v42 = vrot.slane %v3537_v63, 7  ;;  %3585 = vrot.lane.b32.xlu1 %v3537_v63, %s6595_s20  ;;  %v3544_v26 = vadd.f32 %v3537_v63, %v9257_v36 }
 0xb92   :  { %3583 = vrot.lane.b32.xlu0 %v3540_v42, %s6595_s20  ;;  %v3543_v22 = vadd.f32 %v3540_v42, %v9254_v48  ;;  %v6100_v27 = vmul.f32 -1.442695, %v3544_v26 }
 0xb94   :  { %v6099_v57 = vmul.f32 -1.442695, %v3543_v22 }
 0xb96   :  { %6468 = vpow2.f32 %v6099_v57 }
 0xb9c   :  { %v6469_v0 = vpop.eup %6468 }
 0xb9d   :  { %v3551_v19 = vadd.f32 1.0, %v6469_v0 }
 0xb9f   :  { %6470 = vrcp.f32 %v3551_v19  ;;  %v3564_v23 = vand.u32 2147483648, %v3551_v19  ;;  %v3562_v46 = vand.u32 2147483647, %v3551_v19  ;;  %vm3558_vm7 = vweird.f32 %v3551_v19 }
 0xba0   :  { %6472 = vpow2.f32 %v6100_v27 }
 0xba1   :  { %v3565_v38 = vor.u32 1.1754944e-38, %v3564_v23  ;;  %vm3563_vm3 = vcmp.eq.f32.partialorder %v3562_v46, 8.507059e+37 }
 0xba5   :  { %v6471_v51 = vpop.eup %6470 }
 0xba6   :  { %v3554_v33 = vmul.f32 %v6471_v51, %v3551_v19  ;;  %vm3559_vm11 = vweird.f32 %v6471_v51  ;;  %v6473_v45 = vpop.eup %6472 }
 0xba7   :  { %vm3560_vm8 = vmor %vm3558_vm7, %vm3559_vm11  ;;  %v3552_v61 = vadd.f32 1.0, %v6473_v45 }
 0xba8   :  { %v3555_v2 = vsub.f32 1.0, %v3554_v33 }
 0xba9   :  { %6474 = vrcp.f32 %v3552_v61  ;;  %v3579_v49 = vand.u32 2147483648, %v3552_v61  ;;  %vm3573_vm10 = vweird.f32 %v3552_v61  ;;  %v3577_v32 = vand.u32 2147483647, %v3552_v61 }
 0xbaa   :  { %v3556_v21 = vmul.f32 %v6471_v51, %v3555_v2 }
 0xbab   :  { %v3580_v54 = vor.u32 1.1754944e-38, %v3579_v49  ;;  %vm3578_vm5 = vcmp.eq.f32.partialorder %v3577_v32, 8.507059e+37 }
 0xbac   :  { %v3557_v4 = vadd.f32 %v6471_v51, %v3556_v21 }
 0xbae   :  { %v3561_v52 = vsel %vm3560_vm8, %v6471_v51, %v3557_v4  ;;  %vm10389_vm8 = vmmov %vm10388_vm6 }
 0xbaf   :  { %v3566_v44 = vsel %vm3563_vm3, %v3565_v38, %v3561_v52  ;;  %v6475_v14 = vpop.eup %6474 }
 0xbb0   :  { %v3618_v30 = vmul.f32 %v3615_v60, %v3566_v44  ;;  %v3569_v9 = vmul.f32 %v6475_v14, %v3552_v61  ;;  %vm3574_vm2 = vweird.f32 %v6475_v14  ;;  %v3603_v43 = vsub.f32 1.0, %v3566_v44 }
 0xbb1   :  { %vm3575_vm1 = vmor %vm3573_vm10, %vm3574_vm2 }
 0xbb2   :  { %v3570_v24 = vsub.f32 1.0, %v3569_v9 }
 0xbb4   :  { %v3571_v8 = vmul.f32 %v6475_v14, %v3570_v24 }
 0xbb6   :  { %v3572_v11 = vadd.f32 %v6475_v14, %v3571_v8 }
 0xbb8   :  { %v3576_v28 = vsel %vm3575_vm1, %v6475_v14, %v3572_v11 }
 0xbb9   :  { %v3581_v25 = vsel %vm3578_vm5, %v3580_v54, %v3576_v28 }
 0xbba   :  { %v3604_v18 = vsub.f32 1.0, %v3581_v25  ;;  %v3619_v29 = vmul.f32 %v3581_v25, %v3513_v53 }
 0xc02   :  { %v3586_v62 = vpop.permute.xlu1 %3585 }
 0xc03   :  { %v3590_v12 = vmul.f32 %v3586_v62, %v3581_v25 }
 0xc04   :  { %v3584_v3 = vpop.permute.xlu0 %3583 }
 0xc05   :  { %v3589_v39 = vmul.f32 %v3584_v3, %v3566_v44  ;;  %3595 = vrot.lane.b32.xlu0 %v3590_v12, %s6595_s20 }
 0xc07   :  { %3593 = vrot.lane.b32.xlu2 %v3589_v39, %s6595_s20 }
 0xc61   :  { %v3594_v6 = vpop.permute.xlu2 %3593 }
 0xc62   :  { %v3599_v37 = vadd.f32 %v3594_v6, %v9254_v48 }
 0xc64   :  { %6476 = vtanh.f32 %v3599_v37 }
 0xc6a   :  { %v6477_v41 = vpop.eup %6476 }
 0xc6b   :  { %3607 = vrot.lane.b32.xlu1 %v6477_v41, %s6596_s8 }
 0xc77   :  { %v3596_v10 = vpop.permute.xlu0 %3595 }
 0xc78   :  { %v3600_v35 = vadd.f32 %v3596_v10, %v9257_v36 }
 0xc7a   :  { %6478 = vtanh.f32 %v3600_v35 }
 0xc80   :  { %v6479_v59 = vpop.eup %6478 }
 0xc81   :  { %3609 = vrot.lane.b32.xlu2 %v6479_v59, %s6596_s8 }
 0xcdb   :  { %v3610_v50 = vpop.permute.xlu2 %3609 }
 0xcdc   :  { %v3614_v16 = vmul.f32 %v3610_v50, %v3604_v18 }
 0xcdd   :  { %v3608_v15 = vpop.permute.xlu1 %3607 }
 0xcde   :  { %v3613_v13 = vmul.f32 %v3608_v15, %v3603_v43  ;;  %v3621_v17 = vadd.f32 %v3619_v29, %v3614_v16 }
 0xce0   :  { %v3620_v7 = vadd.f32 %v3618_v30, %v3613_v13  ;;  %v3728_v45 = vrot.slane %v3621_v17, 7 }
 0xce2   :  { %v3624_v55 = vrot.slane %v3620_v7, 1  ;;  %v3727_v61 = vrot.slane %v3620_v7, 7 }
 0xce4   :  { %v3625_v34 = vsel %vm10388_vm6, %v3621_v17, %v3624_v55 }
 0xce5   :  { %3626 = vrot.lane.b32.xlu0 %v3625_v34, %s6596_s8 }
 0xd57   :  { %v3627_v58 = vpop.permute.xlu0 %3626 }
 0xd58   :  { %6101 = vmatmul.msk.f32.vlgmr.msrb.gmra.mxu3 %vm3407_vm15, %v3627_v58 }
 0xddb   :  { %v3647_v20 = vpop.f32.mrf.mxu3 }
 0xddc   :  { %v3648_v31 = vadd.f32 %v3647_v20, %v9237_v1 }
 0xdde   :  { %v3651_v56 = vrot.slane %v3648_v31, 6  ;;  %v3652_v47 = vrot.slane %v3648_v31, 7 }
 0xde0   :  { %3697 = vrot.lane.b32.xlu2 %v3652_v47, %s6595_s20  ;;  %3695 = vrot.lane.b32.xlu1 %v3651_v56, %s6595_s20  ;;  %v3655_v5 = vadd.f32 %v3651_v56, %v9254_v48  ;;  %v3656_v53 = vadd.f32 %v3652_v47, %v9257_v36 }
 0xde2   :  { %v6102_v63 = vmul.f32 -1.442695, %v3655_v5  ;;  %v6103_v42 = vmul.f32 -1.442695, %v3656_v53 }
 0xde4   :  { %6480 = vpow2.f32 %v6102_v63 }
 0xde5   :  { %6482 = vpow2.f32 %v6103_v42 }
 0xdea   :  { %v6481_v22 = vpop.eup %6480 }
 0xdeb   :  { %v6483_v57 = vpop.eup %6482  ;;  %v3663_v0 = vadd.f32 1.0, %v6481_v22 }
 0xdec   :  { %v3664_v19 = vadd.f32 1.0, %v6483_v57 }
 0xded   :  { %6484 = vrcp.f32 %v3663_v0  ;;  %v3676_v60 = vand.u32 2147483648, %v3663_v0  ;;  %v3674_v30 = vand.u32 2147483647, %v3663_v0  ;;  %vm3670_vm9 = vweird.f32 %v3663_v0 }
 0xdee   :  { %6486 = vrcp.f32 %v3664_v19  ;;  %v3689_v4 = vand.u32 2147483647, %v3664_v19  ;;  %v3691_v38 = vand.u32 2147483648, %v3664_v19  ;;  %vm3685_vm14 = vweird.f32 %v3664_v19 }
 0xdef   :  { %v3677_v9 = vor.u32 1.1754944e-38, %v3676_v60  ;;  %vm3675_vm7 = vcmp.eq.f32.partialorder %v3674_v30, 8.507059e+37 }
 0xdf0   :  { %v3692_v14 = vor.u32 1.1754944e-38, %v3691_v38  ;;  %vm3690_vm11 = vcmp.eq.f32.partialorder %v3689_v4, 8.507059e+37 }
 0xdf3   :  { %v6485_v51 = vpop.eup %6484 }
 0xdf4   :  { %v6487_v33 = vpop.eup %6486  ;;  %v3666_v23 = vmul.f32 %v6485_v51, %v3663_v0  ;;  %vm3671_vm12 = vweird.f32 %v6485_v51 }
 0xdf5   :  { %v3681_v2 = vmul.f32 %v6487_v33, %v3664_v19  ;;  %vm3686_vm4 = vweird.f32 %v6487_v33  ;;  %vm3672_vm0 = vmor %vm3670_vm9, %vm3671_vm12 }
 0xdf6   :  { %v3667_v46 = vsub.f32 1.0, %v3666_v23  ;;  %vm3687_vm13 = vmor %vm3685_vm14, %vm3686_vm4 }
 0xdf7   :  { %v3682_v21 = vsub.f32 1.0, %v3681_v2  ;;  %vm10390_vm14 = vmmov %vm10389_vm8 }
 0xdf8   :  { %v3668_v44 = vmul.f32 %v6485_v51, %v3667_v46 }
 0xdf9   :  { %v3683_v52 = vmul.f32 %v6487_v33, %v3682_v21 }
 0xdfa   :  { %v3669_v27 = vadd.f32 %v6485_v51, %v3668_v44 }
 0xdfb   :  { %v3684_v26 = vadd.f32 %v6487_v33, %v3683_v52 }
 0xdfc   :  { %v3673_v8 = vsel %vm3672_vm0, %v6485_v51, %v3669_v27 }
 0xdfd   :  { %v3688_v24 = vsel %vm3687_vm13, %v6487_v33, %v3684_v26  ;;  %v3678_v49 = vsel %vm3675_vm7, %v3677_v9, %v3673_v8 }
 0xdfe   :  { %v3693_v11 = vsel %vm3690_vm11, %v3692_v14, %v3688_v24  ;;  %v3731_v32 = vmul.f32 %v3727_v61, %v3678_v49  ;;  %v3715_v35 = vsub.f32 1.0, %v3678_v49 }
 0xdff   :  { %v3732_v28 = vmul.f32 %v3728_v45, %v3693_v11  ;;  %v3716_v59 = vsub.f32 1.0, %v3693_v11 }
 0xe3a   :  { %v3698_v54 = vpop.permute.xlu2 %3697 }
 0xe3b   :  { %v3702_v62 = vmul.f32 %v3698_v54, %v3693_v11 }
 0xe3d   :  { %3707 = vrot.lane.b32.xlu1 %v3702_v62, %s6595_s20 }
 0xe52   :  { %v3696_v25 = vpop.permute.xlu1 %3695 }
 0xe53   :  { %v3701_v12 = vmul.f32 %v3696_v25, %v3678_v49 }
 0xe55   :  { %3705 = vrot.lane.b32.xlu0 %v3701_v12, %s6595_s20 }
 0xeaf   :  { %v3708_v3 = vpop.permute.xlu1 %3707 }
 0xeb0   :  { %v3712_v39 = vadd.f32 %v3708_v3, %v9257_v36 }
 0xeb2   :  { %6488 = vtanh.f32 %v3712_v39 }
 0xeb8   :  { %v6489_v6 = vpop.eup %6488 }
 0xeb9   :  { %3721 = vrot.lane.b32.xlu0 %v6489_v6, %s6596_s8 }
 0xec7   :  { %v3706_v37 = vpop.permute.xlu0 %3705 }
 0xec8   :  { %v3711_v41 = vadd.f32 %v3706_v37, %v9254_v48 }
 0xeca   :  { %6490 = vtanh.f32 %v3711_v41 }
 0xed0   :  { %v6491_v10 = vpop.eup %6490 }
 0xed1   :  { %3719 = vrot.lane.b32.xlu2 %v6491_v10, %s6596_s8 }
 0xf2b   :  { %v3720_v50 = vpop.permute.xlu2 %3719  ;;  %v3722_v18 = vpop.permute.xlu0 %3721 }
 0xf2c   :  { %v3725_v43 = vmul.f32 %v3720_v50, %v3715_v35  ;;  %v3726_v15 = vmul.f32 %v3722_v18, %v3716_v59 }
 0xf2e   :  { %v3733_v16 = vadd.f32 %v3731_v32, %v3725_v43  ;;  %v3734_v13 = vadd.f32 %v3732_v28, %v3726_v15 }
 0xf30   :  { %v3737_v29 = vrot.slane %v3733_v16, 2  ;;  %v3738_v7 = vrot.slane %v3734_v13, 1  ;;  %v3841_v26 = vrot.slane %v3733_v16, 7  ;;  %v3842_v27 = vrot.slane %v3734_v13, 7 }
 0xf32   :  { %v3739_v17 = vsel %vm10389_vm8, %v3738_v7, %v3737_v29 }
 0xf33   :  { %3740 = vrot.lane.b32.xlu1 %v3739_v17, %s6596_s8 }
 0xfa5   :  { %v3741_v55 = vpop.permute.xlu1 %3740 }
 0xfa6   :  { %6104 = vmatmul.msk.f32.vlgmr.msra.gmra.mxu0 %vm3407_vm15, %v3741_v55 }
0x1023   :  { %v3761_v34 = vpop.f32.mrf.mxu0 }
0x1024   :  { %v3762_v58 = vadd.f32 %v3761_v34, %v9237_v1 }
0x1026   :  { %v3765_v20 = vrot.slane %v3762_v58, 5  ;;  %v3766_v31 = vrot.slane %v3762_v58, 6 }
0x1028   :  { %3811 = vrot.lane.b32.xlu0 %v3766_v31, %s6595_s20  ;;  %3809 = vrot.lane.b32.xlu2 %v3765_v20, %s6595_s20  ;;  %v3769_v56 = vadd.f32 %v3765_v20, %v9254_v48  ;;  %v3770_v47 = vadd.f32 %v3766_v31, %v9257_v36 }
0x102a   :  { %v6105_v5 = vmul.f32 -1.442695, %v3769_v56  ;;  %v6106_v53 = vmul.f32 -1.442695, %v3770_v47 }
0x102c   :  { %6492 = vpow2.f32 %v6105_v5 }
0x102d   :  { %6494 = vpow2.f32 %v6106_v53 }
0x1032   :  { %v6493_v63 = vpop.eup %6492 }
0x1033   :  { %v6495_v42 = vpop.eup %6494  ;;  %v3777_v22 = vadd.f32 1.0, %v6493_v63 }
0x1034   :  { %v3778_v57 = vadd.f32 1.0, %v6495_v42 }
0x1035   :  { %6496 = vrcp.f32 %v3777_v22  ;;  %v3788_v21 = vand.u32 2147483647, %v3777_v22  ;;  %v3790_v46 = vand.u32 2147483648, %v3777_v22  ;;  %vm3784_vm10 = vweird.f32 %v3777_v22 }
0x1036   :  { %6498 = vrcp.f32 %v3778_v57  ;;  %v3805_v4 = vand.u32 2147483648, %v3778_v57  ;;  %v3803_v52 = vand.u32 2147483647, %v3778_v57  ;;  %vm3799_vm5 = vweird.f32 %v3778_v57 }
0x1037   :  { %v3791_v45 = vor.u32 1.1754944e-38, %v3790_v46  ;;  %vm3789_vm4 = vcmp.eq.f32.partialorder %v3788_v21, 8.507059e+37 }
0x1038   :  { %v3806_v61 = vor.u32 1.1754944e-38, %v3805_v4  ;;  %vm3804_vm12 = vcmp.eq.f32.partialorder %v3803_v52, 8.507059e+37 }
0x103b   :  { %v6497_v0 = vpop.eup %6496 }
0x103c   :  { %v6499_v19 = vpop.eup %6498  ;;  %v3780_v51 = vmul.f32 %v6497_v0, %v3777_v22  ;;  %vm3785_vm3 = vweird.f32 %v6497_v0 }
0x103d   :  { %v3795_v33 = vmul.f32 %v6499_v19, %v3778_v57  ;;  %vm3800_vm2 = vweird.f32 %v6499_v19  ;;  %vm3786_vm1 = vmor %vm3784_vm10, %vm3785_vm3 }
0x103e   :  { %v3781_v2 = vsub.f32 1.0, %v3780_v51  ;;  %vm3801_vm6 = vmor %vm3799_vm5, %vm3800_vm2 }
0x103f   :  { %v3796_v23 = vsub.f32 1.0, %v3795_v33  ;;  %vm10391_vm10 = vmmov %vm10390_vm14 }
0x1040   :  { %v3782_v38 = vmul.f32 %v6497_v0, %v3781_v2 }
0x1041   :  { %v3797_v60 = vmul.f32 %v6499_v19, %v3796_v23 }
0x1042   :  { %v3783_v44 = vadd.f32 %v6497_v0, %v3782_v38 }
0x1043   :  { %v3798_v30 = vadd.f32 %v6499_v19, %v3797_v60 }
0x1044   :  { %v3787_v14 = vsel %vm3786_vm1, %v6497_v0, %v3783_v44 }
0x1045   :  { %v3802_v9 = vsel %vm3801_vm6, %v6499_v19, %v3798_v30  ;;  %v3792_v24 = vsel %vm3789_vm4, %v3791_v45, %v3787_v14 }
0x1046   :  { %v3807_v8 = vsel %vm3804_vm12, %v3806_v61, %v3802_v9  ;;  %v3845_v11 = vmul.f32 %v3841_v26, %v3792_v24  ;;  %v3829_v10 = vsub.f32 1.0, %v3792_v24 }
0x1047   :  { %v3846_v49 = vmul.f32 %v3842_v27, %v3807_v8  ;;  %v3830_v41 = vsub.f32 1.0, %v3807_v8 }
0x1082   :  { %v3810_v32 = vpop.permute.xlu2 %3809 }
0x1083   :  { %v3815_v28 = vmul.f32 %v3810_v32, %v3792_v24 }
0x1085   :  { %3819 = vrot.lane.b32.xlu1 %v3815_v28, %s6595_s20 }
0x109a   :  { %v3812_v54 = vpop.permute.xlu0 %3811 }
0x109b   :  { %v3816_v62 = vmul.f32 %v3812_v54, %v3807_v8 }
0x109d   :  { %3821 = vrot.lane.b32.xlu2 %v3816_v62, %s6595_s20 }
0x10f7   :  { %v3822_v25 = vpop.permute.xlu2 %3821  ;;  %v3820_v12 = vpop.permute.xlu1 %3819 }
0x10f8   :  { %v3826_v3 = vadd.f32 %v3822_v25, %v9257_v36  ;;  %v3825_v39 = vadd.f32 %v3820_v12, %v9254_v48 }
0x10fa   :  { %6500 = vtanh.f32 %v3826_v3 }
0x10fb   :  { %6502 = vtanh.f32 %v3825_v39 }
0x1100   :  { %v6501_v6 = vpop.eup %6500 }
0x1101   :  { %v6503_v37 = vpop.eup %6502  ;;  %3835 = vrot.lane.b32.xlu1 %v6501_v6, %s6596_s8 }
0x1102   :  { %3833 = vrot.lane.b32.xlu0 %v6503_v37, %s6596_s8 }
0x1173   :  { %v3836_v35 = vpop.permute.xlu1 %3835 }
0x1174   :  { %v3834_v59 = vpop.permute.xlu0 %3833  ;;  %v3840_v50 = vmul.f32 %v3836_v35, %v3830_v41 }
0x1175   :  { %v3839_v18 = vmul.f32 %v3834_v59, %v3829_v10 }
0x1176   :  { %v3848_v43 = vadd.f32 %v3846_v49, %v3840_v50 }
0x1177   :  { %v3847_v15 = vadd.f32 %v3845_v11, %v3839_v18 }
0x1178   :  { %v3852_v16 = vrot.slane %v3848_v43, 2  ;;  %v3956_v30 = vrot.slane %v3848_v43, 7 }
0x1179   :  { %v3851_v13 = vrot.slane %v3847_v15, 3  ;;  %v3955_v44 = vrot.slane %v3847_v15, 7 }
0x117b   :  { %v3853_v29 = vsel %vm10390_vm14, %v3852_v16, %v3851_v13 }
0x117c   :  { %3854 = vrot.lane.b32.xlu2 %v3853_v29, %s6596_s8 }
0x11d6   :  { %v3855_v7 = vpop.permute.xlu2 %3854 }
0x11d7   :  { %6107 = vmatmul.msk.f32.vlgmr.msra.gmra.mxu1 %vm3407_vm15, %v3855_v7 }
0x1254   :  { %v3875_v17 = vpop.f32.mrf.mxu1 }
0x1255   :  { %v3876_v55 = vadd.f32 %v3875_v17, %v9237_v1 }
0x1257   :  { %v3879_v34 = vrot.slane %v3876_v55, 4  ;;  %v3880_v58 = vrot.slane %v3876_v55, 5 }
0x1259   :  { %3925 = vrot.lane.b32.xlu1 %v3880_v58, %s6595_s20  ;;  %3923 = vrot.lane.b32.xlu0 %v3879_v34, %s6595_s20  ;;  %v3883_v20 = vadd.f32 %v3879_v34, %v9254_v48  ;;  %v3884_v31 = vadd.f32 %v3880_v58, %v9257_v36 }
0x125b   :  { %v6108_v56 = vmul.f32 -1.442695, %v3883_v20  ;;  %v6109_v47 = vmul.f32 -1.442695, %v3884_v31 }
0x125d   :  { %6504 = vpow2.f32 %v6108_v56 }
0x125e   :  { %6506 = vpow2.f32 %v6109_v47 }
0x1263   :  { %v6505_v5 = vpop.eup %6504 }
0x1264   :  { %v6507_v53 = vpop.eup %6506  ;;  %v3891_v63 = vadd.f32 1.0, %v6505_v5 }
0x1265   :  { %v3892_v42 = vadd.f32 1.0, %v6507_v53 }
0x1266   :  { %6508 = vrcp.f32 %v3891_v63  ;;  %v3904_v21 = vand.u32 2147483648, %v3891_v63  ;;  %v3902_v38 = vand.u32 2147483647, %v3891_v63  ;;  %vm3898_vm7 = vweird.f32 %v3891_v63 }
0x1267   :  { %6510 = vrcp.f32 %v3892_v42  ;;  %v3917_v2 = vand.u32 2147483647, %v3892_v42  ;;  %v3919_v23 = vand.u32 2147483648, %v3892_v42  ;;  %vm3913_vm0 = vweird.f32 %v3892_v42 }
0x1268   :  { %v3905_v27 = vor.u32 1.1754944e-38, %v3904_v21  ;;  %vm3903_vm2 = vcmp.eq.f32.partialorder %v3902_v38, 8.507059e+37 }
0x1269   :  { %v3920_v26 = vor.u32 1.1754944e-38, %v3919_v23  ;;  %vm3918_vm3 = vcmp.eq.f32.partialorder %v3917_v2, 8.507059e+37 }
0x126c   :  { %v6509_v22 = vpop.eup %6508 }
0x126d   :  { %v6511_v57 = vpop.eup %6510  ;;  %v3894_v19 = vmul.f32 %v6509_v22, %v3891_v63  ;;  %vm3899_vm9 = vweird.f32 %v6509_v22 }
0x126e   :  { %v3909_v0 = vmul.f32 %v6511_v57, %v3892_v42  ;;  %vm3914_vm13 = vweird.f32 %v6511_v57  ;;  %vm3900_vm8 = vmor %vm3898_vm7, %vm3899_vm9 }
0x126f   :  { %v3895_v33 = vsub.f32 1.0, %v3894_v19  ;;  %vm3915_vm11 = vmor %vm3913_vm0, %vm3914_vm13 }
0x1270   :  { %v3910_v51 = vsub.f32 1.0, %v3909_v0  ;;  %vm10392_vm0 = vmmov %vm10391_vm10 }
0x1271   :  { %v3896_v4 = vmul.f32 %v6509_v22, %v3895_v33 }
0x1272   :  { %v3911_v46 = vmul.f32 %v6511_v57, %v3910_v51 }
0x1273   :  { %v3897_v52 = vadd.f32 %v6509_v22, %v3896_v4 }
0x1274   :  { %v3912_v60 = vadd.f32 %v6511_v57, %v3911_v46 }
0x1275   :  { %v3901_v61 = vsel %vm3900_vm8, %v6509_v22, %v3897_v52 }
0x1276   :  { %v3916_v45 = vsel %vm3915_vm11, %v6511_v57, %v3912_v60  ;;  %v3906_v9 = vsel %vm3903_vm2, %v3905_v27, %v3901_v61 }
0x1277   :  { %v3921_v14 = vsel %vm3918_vm3, %v3920_v26, %v3916_v45  ;;  %v3959_v24 = vmul.f32 %v3955_v44, %v3906_v9  ;;  %v3943_v6 = vsub.f32 1.0, %v3906_v9 }
0x1278   :  { %v3960_v8 = vmul.f32 %v3956_v30, %v3921_v14  ;;  %v3944_v37 = vsub.f32 1.0, %v3921_v14 }
0x12cb   :  { %v3926_v11 = vpop.permute.xlu1 %3925  ;;  %v3924_v49 = vpop.permute.xlu0 %3923 }
0x12cc   :  { %v3930_v32 = vmul.f32 %v3926_v11, %v3921_v14  ;;  %v3929_v28 = vmul.f32 %v3924_v49, %v3906_v9 }
0x12ce   :  { %3935 = vrot.lane.b32.xlu0 %v3930_v32, %s6595_s20  ;;  %3933 = vrot.lane.b32.xlu2 %v3929_v28, %s6595_s20 }
0x1328   :  { %v3934_v54 = vpop.permute.xlu2 %3933 }
0x1329   :  { %v3939_v62 = vadd.f32 %v3934_v54, %v9254_v48 }
0x132b   :  { %6512 = vtanh.f32 %v3939_v62 }
0x1331   :  { %v6513_v25 = vpop.eup %6512 }
0x1332   :  { %3947 = vrot.lane.b32.xlu1 %v6513_v25, %s6596_s8 }
0x1340   :  { %v3936_v12 = vpop.permute.xlu0 %3935 }
0x1341   :  { %v3940_v3 = vadd.f32 %v3936_v12, %v9257_v36 }
0x1343   :  { %6514 = vtanh.f32 %v3940_v3 }
0x1349   :  { %v6515_v39 = vpop.eup %6514 }
0x134a   :  { %3949 = vrot.lane.b32.xlu2 %v6515_v39, %s6596_s8 }
0x13a4   :  { %v3948_v41 = vpop.permute.xlu1 %3947  ;;  %v3950_v10 = vpop.permute.xlu2 %3949 }
0x13a5   :  { %v3953_v35 = vmul.f32 %v3948_v41, %v3943_v6  ;;  %v3954_v59 = vmul.f32 %v3950_v10, %v3944_v37 }
0x13a7   :  { %v3961_v50 = vadd.f32 %v3959_v24, %v3953_v35  ;;  %v3962_v18 = vadd.f32 %v3960_v8, %v3954_v59 }
0x13a9   :  { %v3965_v43 = vrot.slane %v3961_v50, 4  ;;  %v3966_v15 = vrot.slane %v3962_v18, 3  ;;  %v4069_v60 = vrot.slane %v3961_v50, 7  ;;  %v4070_v52 = vrot.slane %v3962_v18, 7 }
0x13ab   :  { %v3967_v16 = vsel %vm10391_vm10, %v3966_v15, %v3965_v43 }
0x13ac   :  { %3968 = vrot.lane.b32.xlu0 %v3967_v16, %s6596_s8 }
0x141e   :  { %v3969_v13 = vpop.permute.xlu0 %3968 }
0x141f   :  { %6110 = vmatmul.msk.f32.vlgmr.msrb.gmra.mxu2 %vm3407_vm15, %v3969_v13 }
0x14a2   :  { %v3989_v29 = vpop.f32.mrf.mxu2 }
0x14a3   :  { %v3990_v7 = vadd.f32 %v3989_v29, %v9237_v1 }
0x14a5   :  { %v3993_v17 = vrot.slane %v3990_v7, 3  ;;  %v3994_v55 = vrot.slane %v3990_v7, 4 }
0x14a7   :  { %4039 = vrot.lane.b32.xlu2 %v3994_v55, %s6595_s20  ;;  %4037 = vrot.lane.b32.xlu1 %v3993_v17, %s6595_s20  ;;  %v3997_v34 = vadd.f32 %v3993_v17, %v9254_v48  ;;  %v3998_v58 = vadd.f32 %v3994_v55, %v9257_v36 }
0x14a9   :  { %v6111_v20 = vmul.f32 -1.442695, %v3997_v34  ;;  %v6112_v31 = vmul.f32 -1.442695, %v3998_v58 }
0x14ab   :  { %6516 = vpow2.f32 %v6111_v20 }
0x14ac   :  { %6518 = vpow2.f32 %v6112_v31 }
0x14b1   :  { %v6517_v56 = vpop.eup %6516 }
0x14b2   :  { %v6519_v47 = vpop.eup %6518  ;;  %v4005_v5 = vadd.f32 1.0, %v6517_v56 }
0x14b3   :  { %v4006_v53 = vadd.f32 1.0, %v6519_v47 }
0x14b4   :  { %6520 = vrcp.f32 %v4005_v5  ;;  %v4018_v2 = vand.u32 2147483648, %v4005_v5  ;;  %v4016_v46 = vand.u32 2147483647, %v4005_v5  ;;  %vm4012_vm12 = vweird.f32 %v4005_v5 }
0x14b5   :  { %6522 = vrcp.f32 %v4006_v53  ;;  %v4031_v51 = vand.u32 2147483647, %v4006_v53  ;;  %v4033_v33 = vand.u32 2147483648, %v4006_v53  ;;  %vm4027_vm6 = vweird.f32 %v4006_v53 }
0x14b6   :  { %v4019_v30 = vor.u32 1.1754944e-38, %v4018_v2  ;;  %vm4017_vm9 = vcmp.eq.f32.partialorder %v4016_v46, 8.507059e+37 }
0x14b7   :  { %v4034_v44 = vor.u32 1.1754944e-38, %v4033_v33  ;;  %vm4032_vm13 = vcmp.eq.f32.partialorder %v4031_v51, 8.507059e+37 }
0x14ba   :  { %v6521_v63 = vpop.eup %6520 }
0x14bb   :  { %v6523_v42 = vpop.eup %6522  ;;  %v4008_v57 = vmul.f32 %v6521_v63, %v4005_v5  ;;  %vm4013_vm5 = vweird.f32 %v6521_v63 }
0x14bc   :  { %v4023_v22 = vmul.f32 %v6523_v42, %v4006_v53  ;;  %vm4028_vm1 = vweird.f32 %v6523_v42  ;;  %vm4014_vm14 = vmor %vm4012_vm12, %vm4013_vm5 }
0x14bd   :  { %v4009_v19 = vsub.f32 1.0, %v4008_v57  ;;  %vm4029_vm4 = vmor %vm4027_vm6, %vm4028_vm1 }
0x14be   :  { %v4024_v0 = vsub.f32 1.0, %v4023_v22  ;;  %vm10393_vm6 = vmmov %vm10392_vm0 }
0x14bf   :  { %v4010_v21 = vmul.f32 %v6521_v63, %v4009_v19 }
0x14c0   :  { %v4025_v23 = vmul.f32 %v6523_v42, %v4024_v0 }
0x14c1   :  { %v4011_v38 = vadd.f32 %v6521_v63, %v4010_v21 }
0x14c2   :  { %v4026_v4 = vadd.f32 %v6523_v42, %v4025_v23 }
0x14c3   :  { %v4015_v27 = vsel %vm4014_vm14, %v6521_v63, %v4011_v38 }
0x14c4   :  { %v4030_v26 = vsel %vm4029_vm4, %v6523_v42, %v4026_v4  ;;  %v4020_v61 = vsel %vm4017_vm9, %v4019_v30, %v4015_v27 }
0x14c5   :  { %v4035_v45 = vsel %vm4032_vm13, %v4034_v44, %v4030_v26  ;;  %v4073_v14 = vmul.f32 %v4069_v60, %v4020_v61  ;;  %v4057_v3 = vsub.f32 1.0, %v4020_v61 }
0x14c6   :  { %v4074_v9 = vmul.f32 %v4070_v52, %v4035_v45  ;;  %v4058_v39 = vsub.f32 1.0, %v4035_v45 }
0x1501   :  { %v4040_v24 = vpop.permute.xlu2 %4039 }
0x1502   :  { %v4044_v8 = vmul.f32 %v4040_v24, %v4035_v45 }
0x1504   :  { %4049 = vrot.lane.b32.xlu1 %v4044_v8, %s6595_s20 }
0x1519   :  { %v4038_v11 = vpop.permute.xlu1 %4037 }
0x151a   :  { %v4043_v49 = vmul.f32 %v4038_v11, %v4020_v61 }
0x151c   :  { %4047 = vrot.lane.b32.xlu0 %v4043_v49, %s6595_s20 }
0x1576   :  { %v4050_v32 = vpop.permute.xlu1 %4049 }
0x1577   :  { %v4054_v28 = vadd.f32 %v4050_v32, %v9257_v36 }
0x1579   :  { %6524 = vtanh.f32 %v4054_v28 }
0x157f   :  { %v6525_v54 = vpop.eup %6524 }
0x1580   :  { %4063 = vrot.lane.b32.xlu0 %v6525_v54, %s6596_s8 }
0x158e   :  { %v4048_v62 = vpop.permute.xlu0 %4047 }
0x158f   :  { %v4053_v25 = vadd.f32 %v4048_v62, %v9254_v48 }
0x1591   :  { %6526 = vtanh.f32 %v4053_v25 }
0x1597   :  { %v6527_v12 = vpop.eup %6526 }
0x1598   :  { %4061 = vrot.lane.b32.xlu2 %v6527_v12, %s6596_s8 }
0x15f2   :  { %v4062_v6 = vpop.permute.xlu2 %4061  ;;  %v4064_v37 = vpop.permute.xlu0 %4063 }
0x15f3   :  { %v4067_v41 = vmul.f32 %v4062_v6, %v4057_v3  ;;  %v4068_v10 = vmul.f32 %v4064_v37, %v4058_v39 }
0x15f5   :  { %v4075_v35 = vadd.f32 %v4073_v14, %v4067_v41  ;;  %v4076_v59 = vadd.f32 %v4074_v9, %v4068_v10 }
0x15f7   :  { %v4079_v50 = vrot.slane %v4075_v35, 5  ;;  %v4080_v18 = vrot.slane %v4076_v59, 4  ;;  %v4183_v4 = vrot.slane %v4075_v35, 7  ;;  %v4184_v38 = vrot.slane %v4076_v59, 7 }
0x15f9   :  { %v4081_v43 = vsel %vm10392_vm0, %v4080_v18, %v4079_v50 }
0x15fa   :  { %4082 = vrot.lane.b32.xlu1 %v4081_v43, %s6596_s8 }
0x166c   :  { %v4083_v15 = vpop.permute.xlu1 %4082 }
0x166d   :  { %6113 = vmatmul.msk.f32.vlgmr.msra.gmra.mxu3 %vm3407_vm15, %v4083_v15 }
0x16f0   :  { %v4103_v16 = vpop.f32.mrf.mxu3 }
0x16f1   :  { %v4104_v13 = vadd.f32 %v4103_v16, %v9237_v1 }
0x16f3   :  { %v4107_v29 = vrot.slane %v4104_v13, 2  ;;  %v4108_v7 = vrot.slane %v4104_v13, 3 }
0x16f5   :  { %4153 = vrot.lane.b32.xlu0 %v4108_v7, %s6595_s20  ;;  %4151 = vrot.lane.b32.xlu2 %v4107_v29, %s6595_s20  ;;  %v4111_v17 = vadd.f32 %v4107_v29, %v9254_v48  ;;  %v4112_v55 = vadd.f32 %v4108_v7, %v9257_v36 }
0x16f7   :  { %v6114_v34 = vmul.f32 -1.442695, %v4111_v17  ;;  %v6115_v58 = vmul.f32 -1.442695, %v4112_v55 }
0x16f9   :  { %6528 = vpow2.f32 %v6114_v34 }
0x16fa   :  { %6530 = vpow2.f32 %v6115_v58 }
0x16ff   :  { %v6529_v20 = vpop.eup %6528 }
0x1700   :  { %v6531_v31 = vpop.eup %6530  ;;  %v4119_v56 = vadd.f32 1.0, %v6529_v20 }
0x1701   :  { %v4120_v47 = vadd.f32 1.0, %v6531_v31 }
0x1702   :  { %6532 = vrcp.f32 %v4119_v56  ;;  %v4130_v0 = vand.u32 2147483647, %v4119_v56  ;;  %v4132_v19 = vand.u32 2147483648, %v4119_v56  ;;  %vm4126_vm8 = vweird.f32 %v4119_v56 }
0x1703   :  { %6534 = vrcp.f32 %v4120_v47  ;;  %v4147_v51 = vand.u32 2147483648, %v4120_v47  ;;  %v4145_v23 = vand.u32 2147483647, %v4120_v47  ;;  %vm4141_vm2 = vweird.f32 %v4120_v47 }
0x1704   :  { %v4133_v60 = vor.u32 1.1754944e-38, %v4132_v19  ;;  %vm4131_vm1 = vcmp.eq.f32.partialorder %v4130_v0, 8.507059e+37 }
0x1705   :  { %v4148_v52 = vor.u32 1.1754944e-38, %v4147_v51  ;;  %vm4146_vm5 = vcmp.eq.f32.partialorder %v4145_v23, 8.507059e+37 }
0x1708   :  { %v6533_v5 = vpop.eup %6532 }
0x1709   :  { %v6535_v53 = vpop.eup %6534  ;;  %v4122_v63 = vmul.f32 %v6533_v5, %v4119_v56  ;;  %vm4127_vm11 = vweird.f32 %v6533_v5 }
0x170a   :  { %v4137_v42 = vmul.f32 %v6535_v53, %v4120_v47  ;;  %vm4142_vm7 = vweird.f32 %v6535_v53  ;;  %vm4128_vm3 = vmor %vm4126_vm8, %vm4127_vm11  ;;  %vm10394_vm8 = vcmask 1040384  }
0x170b   :  { %v4123_v22 = vsub.f32 1.0, %v4122_v63  ;;  %vm4143_vm10 = vmor %vm4141_vm2, %vm4142_vm7 }
0x170c   :  { %v4138_v57 = vsub.f32 1.0, %v4137_v42 }
0x170d   :  { %v4124_v33 = vmul.f32 %v6533_v5, %v4123_v22 }
0x170e   :  { %v4139_v2 = vmul.f32 %v6535_v53, %v4138_v57 }
0x170f   :  { %v4125_v21 = vadd.f32 %v6533_v5, %v4124_v33 }
0x1710   :  { %v4140_v46 = vadd.f32 %v6535_v53, %v4139_v2 }
0x1711   :  { %v4129_v44 = vsel %vm4128_vm3, %v6533_v5, %v4125_v21  ;;  %vm10395_vm3 = vmmov %vm10394_vm8 }
0x1712   :  { %v4144_v30 = vsel %vm4143_vm10, %v6535_v53, %v4140_v46  ;;  %v4134_v26 = vsel %vm4131_vm1, %v4133_v60, %v4129_v44  ;;  %vm10396_vm2 = vmmov %vm10395_vm3  ;;  %vm10397_vm10 = vcmask 1041408  }
0x1713   :  { %v4149_v27 = vsel %vm4146_vm5, %v4148_v52, %v4144_v30  ;;  %v4187_v45 = vmul.f32 %v4183_v4, %v4134_v26  ;;  %v4171_v12 = vsub.f32 1.0, %v4134_v26  ;;  %vm10398_vm1 = vmmov %vm10397_vm10  ;;  %vm4554_vm5 = vcmask 80896  }
0x1714   :  { %v4188_v61 = vmul.f32 %v4184_v38, %v4149_v27  ;;  %v4172_v25 = vsub.f32 1.0, %v4149_v27 }
0x174f   :  { %v4152_v14 = vpop.permute.xlu2 %4151 }
0x1750   :  { %v4157_v9 = vmul.f32 %v4152_v14, %v4134_v26 }
0x1752   :  { %4161 = vrot.lane.b32.xlu1 %v4157_v9, %s6595_s20 }
0x1767   :  { %v4154_v24 = vpop.permute.xlu0 %4153 }
0x1768   :  { %v4158_v8 = vmul.f32 %v4154_v24, %v4149_v27 }
0x176a   :  { %4163 = vrot.lane.b32.xlu2 %v4158_v8, %s6595_s20 }
0x17c4   :  { %v4164_v11 = vpop.permute.xlu2 %4163  ;;  %v4162_v49 = vpop.permute.xlu1 %4161 }
0x17c5   :  { %v4168_v32 = vadd.f32 %v4164_v11, %v9257_v36  ;;  %v4167_v28 = vadd.f32 %v4162_v49, %v9254_v48 }
0x17c7   :  { %6536 = vtanh.f32 %v4168_v32 }
0x17c8   :  { %6538 = vtanh.f32 %v4167_v28 }
0x17cd   :  { %v6537_v54 = vpop.eup %6536 }
0x17ce   :  { %v6539_v62 = vpop.eup %6538  ;;  %4177 = vrot.lane.b32.xlu1 %v6537_v54, %s6596_s8 }
0x17cf   :  { %4175 = vrot.lane.b32.xlu0 %v6539_v62, %s6596_s8 }
0x1840   :  { %v4178_v3 = vpop.permute.xlu1 %4177 }
0x1841   :  { %v4176_v39 = vpop.permute.xlu0 %4175  ;;  %v4182_v6 = vmul.f32 %v4178_v3, %v4172_v25 }
0x1842   :  { %v4181_v37 = vmul.f32 %v4176_v39, %v4171_v12 }
0x1843   :  { %v4190_v41 = vadd.f32 %v4188_v61, %v4182_v6 }
0x1844   :  { %v4189_v10 = vadd.f32 %v4187_v45, %v4181_v37 }
0x1845   :  { %v4194_v35 = vrot.slane %v4190_v41, 5  ;;  %v4298_v21 = vrot.slane %v4190_v41, 7 }
0x1846   :  { %v4193_v59 = vrot.slane %v4189_v10, 6  ;;  %v4297_v23 = vrot.slane %v4189_v10, 7 }
0x1848   :  { %v4195_v50 = vsel %vm10393_vm6, %v4194_v35, %v4193_v59  ;;  %vm10399_vm6 = vmmov %vm10396_vm2 }
0x1849   :  { %4196 = vrot.lane.b32.xlu2 %v4195_v50, %s6596_s8 }
0x18a3   :  { %v4197_v18 = vpop.permute.xlu2 %4196 }
0x18a4   :  { %6116 = vmatmul.msk.f32.vlgmr.msrb.gmra.mxu0 %vm3407_vm15, %v4197_v18 }
0x1921   :  { %v4217_v43 = vpop.f32.mrf.mxu0 }
0x1922   :  { %v4218_v15 = vadd.f32 %v4217_v43, %v9237_v1 }
0x1924   :  { %v4221_v16 = vrot.slane %v4218_v15, 1  ;;  %v4222_v13 = vrot.slane %v4218_v15, 2 }
0x1926   :  { %4267 = vrot.lane.b32.xlu1 %v4222_v13, %s6595_s20  ;;  %4265 = vrot.lane.b32.xlu0 %v4221_v16, %s6595_s20  ;;  %v4225_v29 = vadd.f32 %v4221_v16, %v9254_v48  ;;  %v4226_v7 = vadd.f32 %v4222_v13, %v9257_v36 }
0x1928   :  { %v6117_v17 = vmul.f32 -1.442695, %v4225_v29  ;;  %v6118_v55 = vmul.f32 -1.442695, %v4226_v7  ;;  %v4310_v7 = vld [vmem:[%s10092_s18 + $0x18] sm:$0x3] }
0x1929   :  { %6119 = vmatpush.msk.msrb.mxu1 %vm10397_vm10, %v4310_v7 }
0x192a   :  { %6540 = vpow2.f32 %v6117_v17  ;;  %v4309_v17 = vld [vmem:[%s10092_s18 + $0x10] sm:$0xff] }
0x192b   :  { %6542 = vpow2.f32 %v6118_v55  ;;  %v4308_v55 = vld [vmem:[%s10092_s18 + $0x8] sm:$0x3]  ;;  %4589 = vmatpush.msrb.mxu1 %v4309_v17 }
0x192c   :  { %6128 = vmatpush.msk.msra.mxu2 %vm10398_vm1, %v4308_v55 }
0x1930   :  { %v6541_v34 = vpop.eup %6540 }
0x1931   :  { %v6543_v58 = vpop.eup %6542  ;;  %v4233_v20 = vadd.f32 1.0, %v6541_v34  ;;  %v4307_v34 = vld [vmem:[%s10092_s18] sm:$0xff] }
0x1932   :  { %v4234_v31 = vadd.f32 1.0, %v6543_v58  ;;  %4651 = vmatpush.msra.mxu2 %v4307_v34  ;;  %v9402_v58 = vld [vmem:[%s10091_s17] sm:$0xff] }
0x1933   :  { %6544 = vrcp.f32 %v4233_v20  ;;  %v4246_v57 = vand.u32 2147483648, %v4233_v20  ;;  %v4244_v51 = vand.u32 2147483647, %v4233_v20  ;;  %vm4240_vm9 = vweird.f32 %v4233_v20 }
0x1934   :  { %6546 = vrcp.f32 %v4234_v31  ;;  %v4259_v42 = vand.u32 2147483647, %v4234_v31  ;;  %v4261_v22 = vand.u32 2147483648, %v4234_v31  ;;  %vm4255_vm14 = vweird.f32 %v4234_v31 }
0x1935   :  { %v4247_v4 = vor.u32 1.1754944e-38, %v4246_v57  ;;  %vm4245_vm7 = vcmp.eq.f32.partialorder %v4244_v51, 8.507059e+37 }
0x1936   :  { %v4262_v46 = vor.u32 1.1754944e-38, %v4261_v22  ;;  %vm4260_vm11 = vcmp.eq.f32.partialorder %v4259_v42, 8.507059e+37 }
0x1939   :  { %v6545_v1 = vpop.eup %6544 }
0x193a   :  { %v6547_v56 = vpop.eup %6546  ;;  %v4236_v5 = vmul.f32 %v6545_v1, %v4233_v20  ;;  %vm4241_vm12 = vweird.f32 %v6545_v1  ;;  %v9405_v20 = vperm.slane %v9402_v58, 1 }
0x193b   :  { %v4251_v47 = vmul.f32 %v6547_v56, %v4234_v31  ;;  %vm4256_vm4 = vweird.f32 %v6547_v56  ;;  %vm4242_vm0 = vmor %vm4240_vm9, %vm4241_vm12 }
0x193c   :  { %v4237_v63 = vsub.f32 1.0, %v4236_v5  ;;  %vm4257_vm13 = vmor %vm4255_vm14, %vm4256_vm4  ;;  %v9415_v5 = vperm.slane %v9402_v58, 2 }
0x193d   :  { %v4252_v53 = vsub.f32 1.0, %v4251_v47  ;;  %vm10400_vm4 = vmmov %vm10396_vm2 }
0x193e   :  { %v4238_v19 = vmul.f32 %v6545_v1, %v4237_v63  ;;  %vm10401_vm12 = vmmov %vm10396_vm2 }
0x193f   :  { %v4253_v0 = vmul.f32 %v6547_v56, %v4252_v53  ;;  %vm10402_vm14 = vmmov %vm10396_vm2 }
0x1940   :  { %v4239_v2 = vadd.f32 %v6545_v1, %v4238_v19  ;;  %vm10404_vm9 = vmmov %vm10396_vm2 }
0x1941   :  { %v4254_v33 = vadd.f32 %v6547_v56, %v4253_v0 }
0x1942   :  { %v4243_v60 = vsel %vm4242_vm0, %v6545_v1, %v4239_v2  ;;  %v9410_v1 = vperm.slane %v9402_v58, 0  ;;  %vm10405_vm0 = vmmov %vm10398_vm1 }
0x1943   :  { %v4258_v38 = vsel %vm4257_vm13, %v6547_v56, %v4254_v33  ;;  %v4248_v44 = vsel %vm4245_vm7, %v4247_v4, %v4243_v60  ;;  %vm10403_vm13 = vmmov %vm10396_vm2 }
0x1944   :  { %v4263_v52 = vsel %vm4260_vm11, %v4262_v46, %v4258_v38  ;;  %v4301_v30 = vmul.f32 %v4297_v23, %v4248_v44  ;;  %v4285_v28 = vsub.f32 1.0, %v4248_v44  ;;  %vm10406_vm11 = vmmov %vm10405_vm0 }
0x1945   :  { %v4302_v26 = vmul.f32 %v4298_v21, %v4263_v52  ;;  %v4286_v54 = vsub.f32 1.0, %v4263_v52  ;;  %vm10407_vm7 = vmmov %vm10396_vm2 }
0x1946   :  { %vm10411_vm10 = vmmov %vm10405_vm0 }
0x1947   :  { %vm10412_vm1 = vmmov %vm10400_vm4 }
0x1998   :  { %v4268_v27 = vpop.permute.xlu1 %4267  ;;  %v4266_v45 = vpop.permute.xlu0 %4265 }
0x1999   :  { %v4272_v61 = vmul.f32 %v4268_v27, %v4263_v52  ;;  %v4271_v14 = vmul.f32 %v4266_v45, %v4248_v44 }
0x199b   :  { %4277 = vrot.lane.b32.xlu0 %v4272_v61, %s6595_s20  ;;  %4275 = vrot.lane.b32.xlu2 %v4271_v14, %s6595_s20 }
0x19f5   :  { %v4276_v9 = vpop.permute.xlu2 %4275 }
0x19f6   :  { %v4281_v24 = vadd.f32 %v4276_v9, %v9254_v48 }
0x19f8   :  { %6548 = vtanh.f32 %v4281_v24 }
0x19fe   :  { %v6549_v8 = vpop.eup %6548 }
0x19ff   :  { %4289 = vrot.lane.b32.xlu1 %v6549_v8, %s6596_s8 }
0x1a0d   :  { %v4278_v11 = vpop.permute.xlu0 %4277 }
0x1a0e   :  { %v4282_v49 = vadd.f32 %v4278_v11, %v9257_v36 }
0x1a10   :  { %6550 = vtanh.f32 %v4282_v49 }
0x1a16   :  { %v6551_v32 = vpop.eup %6550 }
0x1a17   :  { %4291 = vrot.lane.b32.xlu2 %v6551_v32, %s6596_s8 }
0x1a71   :  { %v4290_v62 = vpop.permute.xlu1 %4289  ;;  %v4292_v25 = vpop.permute.xlu2 %4291 }
0x1a72   :  { %v4295_v12 = vmul.f32 %v4290_v62, %v4285_v28  ;;  %v4296_v3 = vmul.f32 %v4292_v25, %v4286_v54 }
0x1a74   :  { %v4303_v39 = vadd.f32 %v4301_v30, %v4295_v12  ;;  %v4304_v6 = vadd.f32 %v4302_v26, %v4296_v3  ;;  %v4314_v12 = vld [vmem:[%s10092_s18 + $0x38] sm:$0x3]  ;;  %v4313_v3 = vld [vmem:[%s10092_s18 + $0x30] sm:$0xff] }
0x1a75   :  { %6137 = vmatpush.msk.msrb.mxu3 %vm10405_vm0, %v4314_v12 }
0x1a76   :  { %v4321_v48 = vrot.slane %v4303_v39, 7  ;;  %v4322_v37 = vrot.slane %v4304_v6, 7  ;;  %v4312_v39 = vld [vmem:[%s10092_s18 + $0x28] sm:$0x3]  ;;  %v4311_v6 = vld [vmem:[%s10092_s18 + $0x20] sm:$0xff] }
0x1a77   :  { %6146 = vmatpush.msk.msra.mxu0 %vm10406_vm11, %v4312_v39  ;;  %4788 = vmatpush.msrb.mxu3 %v4313_v3  ;;  %vm10419_vm11 = vmmov %vm10405_vm0 }
0x1a78   :  { %4323 = vrot.lane.b32.xlu0 %v4321_v48, %s6596_s8  ;;  %4325 = vrot.lane.b32.xlu1 %v4322_v37, %s6596_s8 }
0x1a79   :  { %4850 = vmatpush.msra.mxu0 %v4311_v6 }
0x1aea   :  { %v4324_v41 = vpop.permute.xlu0 %4323  ;;  %v4326_v29 = vpop.permute.xlu1 %4325 }
0x1aeb   :  { %4329 = vxpose.xlu2.b32.start.end [1/1] (short) (narrow) %v4324_v41, 32 }
0x1b84   :  { %v4345_v36 = vpop.trf.xlu2 }
0x1b85   :  { %v4401_v10 = vrot.slane %v4345_v36, 7  ;;  %4463 = vperm.xlu1 %6229, %v4345_v36   ;;  %v9465_v36 = vperm.slane %v9402_v58, 6 }
0x1b87   :  { %v4417_v35 = vsel %vm10394_vm8, 0.0, %v4401_v10  ;;  %vm10408_vm8 = vmmov %vm10396_vm2 }
0x1b88   :  { %4421 = vperm.xlu0 %6231, %v4417_v35   ;;  %v9468_v35 = vperm.slane %v9402_v58, 3 }
0x1b8c   :  { %v4346_v59 = vpop.trf.xlu2 }
0x1b8d   :  { %v4402_v50 = vrot.slane %v4346_v59, 7  ;;  %4467 = vperm.xlu1 %6229, %v4346_v59  }
0x1b8f   :  { %v4403_v18 = vsel %vm10395_vm3, %v4401_v10, %v4402_v50  ;;  %vm10409_vm3 = vmmov %vm10405_vm0 }
0x1b90   :  { %4425 = vperm.xlu0 %6231, %v4403_v18   ;;  %v9472_v18 = vperm.slane %v9402_v58, 7 }
0x1b94   :  { %v9375_v43 = vpop.trf.xlu2 }
0x1b95   :  { %4471 = vperm.xlu1 %6229, %v9375_v43   ;;  %v4404_v15 = vrot.slane %v9375_v43, 7 }
0x1b97   :  { %v4405_v13 = vsel %vm10396_vm2, %v4402_v50, %v4404_v15  ;;  %vm10410_vm2 = vmmov %vm10405_vm0 }
0x1b9c   :  { %v9379_v16 = vpop.trf.xlu2 }
0x1b9d   :  { %4429 = vperm.xlu1 %6229, %v4405_v13   ;;  %4475 = vperm.xlu2 %6230, %v9379_v16   ;;  %v4406_v28 = vrot.slane %v9379_v16, 7 }
0x1b9f   :  { %v4407_v54 = vsel %vm10404_vm9, %v4404_v15, %v4406_v28  ;;  %vm10418_vm9 = vmmov %vm10412_vm1 }
0x1bb2   :  { %4361 = vxpose.xlu0.b32.start.end [1/1] (short) (narrow) %v4326_v29, 32 }
0x1bf7   :  { %v9407_v31 = vpop.permute.xlu1 %4463 }
0x1bf8   :  { %v4495_v47 = vmul.f32 %v9405_v20, %v9407_v31  ;;  %v4695_v43 = vmul.f32 %v9465_v36, %v9407_v31 }
0x1bfa   :  { %v4422_v56 = vpop.permute.xlu0 %4421  ;;  %v4704_v13 = vadd.f32 %v9472_v18, %v4695_v43 }
0x1bfb   :  { %v4454_v53 = vmul.f32 %v9410_v1, %v4422_v56 }
0x1bfd   :  { %v4503_v63 = vadd.f32 %v4495_v47, %v4454_v53 }
0x1bff   :  { %v4512_v42 = vadd.f32 %v9415_v5, %v4503_v63  ;;  %v9419_v22 = vpop.permute.xlu1 %4467 }
0x1c00   :  { %v4496_v51 = vmul.f32 %v9405_v20, %v9419_v22  ;;  %v4696_v34 = vmul.f32 %v9465_v36, %v9419_v22 }
0x1c01   :  { %v4520_v57 = vmax.f32 %v4512_v42, 0.0 }
0x1c02   :  { %v4426_v0 = vpop.permute.xlu0 %4425  ;;  %v4705_v63 = vadd.f32 %v9472_v18, %v4696_v34  ;;  %v4318_v34 = vld [vmem:[%s10092_s18 + $0x58] sm:$0x3] }
0x1c03   :  { %v4536_v19 = vrot.slane %v4520_v57, 7  ;;  %v4455_v33 = vmul.f32 %v9410_v1, %v4426_v0  ;;  %6120 = vmatmul.msk.f32.vlgmr.msrb.gmra.mxu1 %vm4554_vm5, %v4520_v57 }
0x1c05   :  { %v4504_v2 = vadd.f32 %v4496_v51, %v4455_v33  ;;  %v4552_v23 = vsel %vm10399_vm6, 0.0, %v4536_v19  ;;  %vm10413_vm6 = vmmov %vm10412_vm1 }
0x1c06   :  { %6129 = vmatmul.msk.f32.vlgmr.msra.gmra.mxu2 %vm4554_vm5, %v4552_v23 }
0x1c07   :  { %v9427_v21 = vpop.permute.xlu1 %4471  ;;  %v4513_v46 = vadd.f32 %v9415_v5, %v4504_v2 }
0x1c08   :  { %v4497_v44 = vmul.f32 %v9405_v20, %v9427_v21  ;;  %v4697_v23 = vmul.f32 %v9465_v36, %v9427_v21 }
0x1c09   :  { %v4521_v4 = vmax.f32 %v4513_v46, 0.0 }
0x1c0b   :  { %v4537_v38 = vrot.slane %v4521_v4, 7  ;;  %6121 = vmatmul.msk.f32.gmra.mxu1 %vm4554_vm5, %v4521_v4 }
0x1c0d   :  { %v4538_v60 = vsel %vm10400_vm4, %v4536_v19, %v4537_v38  ;;  %vm10414_vm4 = vmmov %vm10412_vm1 }
0x1c0e   :  { %6130 = vmatmul.msk.f32.gmra.mxu2 %vm4554_vm5, %v4538_v60 }
0x1c0f   :  { %v4430_v52 = vpop.permute.xlu1 %4429 }
0x1c10   :  { %v4456_v30 = vmul.f32 %v9410_v1, %v4430_v52 }
0x1c12   :  { %v4505_v26 = vadd.f32 %v4497_v44, %v4456_v30 }
0x1c14   :  { %v4514_v27 = vadd.f32 %v9415_v5, %v4505_v26 }
0x1c16   :  { %v4522_v45 = vmax.f32 %v4514_v27, 0.0 }
0x1c18   :  { %v9437_v61 = vrot.slane %v4522_v45, 7  ;;  %6122 = vmatmul.msk.f32.gmra.mxu1 %vm4554_vm5, %v4522_v45 }
0x1c1a   :  { %v4540_v14 = vsel %vm10401_vm12, %v4537_v38, %v9437_v61  ;;  %v4706_v38 = vadd.f32 %v9472_v18, %v4697_v23  ;;  %vm10415_vm12 = vmmov %vm10405_vm0 }
0x1c1b   :  { %6131 = vmatmul.msk.f32.gmra.mxu2 %vm4554_vm5, %v4540_v14  ;;  %v9513_v14 = vpop.permute.xlu2 %4475  ;;  %6155 = vmatpush.msk.msra.mxu1 %vm10415_vm12, %v4318_v34  ;;  %vm10428_vm12 = vmmov %vm10405_vm0 }
0x1c56   :  { %v4377_v9 = vpop.trf.xlu0 }
0x1c57   :  { %v4408_v24 = vrot.slane %v4377_v9, 7 }
0x1c59   :  { %v4418_v8 = vsel %vm10402_vm14, 0.0, %v4408_v24  ;;  %vm10416_vm14 = vmmov %vm10405_vm0 }
0x1c5a   :  { %4438 = vperm.xlu1 %6229, %v4418_v8   ;;  %v4498_v8 = vmul.f32 %v9405_v20, %v9513_v14 }
0x1c5e   :  { %v4378_v11 = vpop.trf.xlu0 }
0x1c5f   :  { %v4409_v49 = vrot.slane %v4378_v11, 7 }
0x1c61   :  { %v4410_v32 = vsel %vm10403_vm13, %v4408_v24, %v4409_v49  ;;  %vm10417_vm13 = vmmov %vm10412_vm1 }
0x1c62   :  { %4442 = vperm.xlu0 %6231, %v4410_v32   ;;  %4479 = vperm.xlu1 %6229, %v4377_v9  }
0x1c66   :  { %v4379_v62 = vpop.trf.xlu0 }
0x1c67   :  { %v4411_v25 = vrot.slane %v4379_v62, 7 }
0x1c69   :  { %v4412_v48 = vsel %vm10407_vm7, %v4409_v49, %v4411_v25  ;;  %vm10420_vm7 = vmmov %vm10405_vm0 }
0x1c6a   :  { %4483 = vperm.xlu1 %6229, %v4378_v11  }
0x1c6e   :  { %v4380_v37 = vpop.trf.xlu0 }
0x1c6f   :  { %v4413_v41 = vrot.slane %v4380_v37, 7 }
0x1c71   :  { %v4414_v50 = vsel %vm10408_vm8, %v4411_v25, %v4413_v41  ;;  %vm10421_vm8 = vmmov %vm10405_vm0 }
0x1c72   :  { %4433 = vperm.xlu1 %6229, %v4407_v54  }
0x1c7a   :  { %4446 = vperm.xlu1 %6229, %v4412_v48  }
0x1c80   :  { %v4591_v10 = vpop.f32.mrf.mxu1 }
0x1c82   :  { %4487 = vperm.xlu1 %6229, %v4379_v62  }
0x1c88   :  { %v4594_v17 = vpop.f32.mrf.mxu1 }
0x1c89   :  { %v4653_v59 = vpop.f32.mrf.mxu2 }
0x1c8a   :  { %v4654_v15 = vadd.f32 %v4653_v59, %v4591_v10  ;;  %4450 = vperm.xlu1 %6229, %v4414_v50  }
0x1c8c   :  { %v4678_v16 = vadd.f32 %v9468_v35, %v4654_v15 }
0x1c8e   :  { %v4686_v29 = vmax.f32 %v4678_v16, 0.0 }
0x1c90   :  { %v4712_v7 = vadd.f32 %v4704_v13, %v4686_v29 }
0x1c91   :  { %v4656_v55 = vpop.f32.mrf.mxu2 }
0x1c92   :  { %v9480_v56 = vmax.f32 %v4712_v7, 0.0  ;;  %v4657_v47 = vadd.f32 %v4656_v55, %v4594_v17  ;;  %4491 = vperm.xlu1 %6229, %v4380_v37  }
0x1c94   :  { %v4679_v53 = vadd.f32 %v9468_v35, %v4657_v47  ;;  %6138 = vmatmul.msk.f32.vlgmr.msrb.gmra.mxu3 %vm4554_vm5, %v9480_v56  ;;  %v4736_v31 = vrot.slane %v9480_v56, 6  ;;  %v4317_v47 = vld [vmem:[%s10092_s18 + $0x50] sm:$0xff] }
0x1c95   :  { %v4597_v51 = vpop.f32.mrf.mxu1  ;;  %4953 = vmatpush.msra.mxu1 %v4317_v47 }
0x1c96   :  { %v4687_v42 = vmax.f32 %v4679_v53, 0.0  ;;  %v4752_v57 = vsel %vm10409_vm3, 0.0, %v4736_v31  ;;  %v4316_v53 = vld [vmem:[%s10092_s18 + $0x48] sm:$0x3]  ;;  %vm10422_vm3 = vmmov %vm10405_vm0 }
0x1c97   :  { %6147 = vmatmul.msk.f32.vlgmr.msra.gmra.mxu0 %vm4554_vm5, %v4752_v57  ;;  %6164 = vmatpush.msk.msrb.mxu2 %vm10416_vm14, %v4316_v53  ;;  %vm10429_vm14 = vmmov %vm10405_vm0 }
0x1c98   :  { %v4713_v0 = vadd.f32 %v4705_v63, %v4687_v42 }
0x1c9a   :  { %v9489_v22 = vmax.f32 %v4713_v0, 0.0 }
0x1c9c   :  { %6139 = vmatmul.msk.f32.gmra.mxu3 %vm4554_vm5, %v9489_v22  ;;  %v4737_v19 = vrot.slane %v9489_v22, 6 }
0x1c9e   :  { %v4659_v33 = vpop.f32.mrf.mxu2  ;;  %v4738_v2 = vsel %vm10410_vm2, %v4736_v31, %v4737_v19  ;;  %vm10423_vm2 = vmmov %vm10405_vm0 }
0x1c9f   :  { %v4660_v46 = vadd.f32 %v4659_v33, %v4597_v51  ;;  %6148 = vmatmul.msk.f32.gmra.mxu0 %vm4554_vm5, %v4738_v2  ;;  %v4315_v51 = vld [vmem:[%s10092_s18 + $0x40] sm:$0xff]  ;;  %s6599_s18 = smov 32  }
0x1ca0   :  { %5015 = vmatpush.msrb.mxu2 %v4315_v51 }
0x1ca1   :  { %v4680_v4 = vadd.f32 %v9468_v35, %v4660_v46 }
0x1ca3   :  { %v4688_v60 = vmax.f32 %v4680_v4, 0.0 }
0x1ca5   :  { %v4714_v52 = vadd.f32 %v4706_v38, %v4688_v60  ;;  %v9570_v38 = vperm.slane %v9402_v58, 4 }
0x1ca7   :  { %v9500_v44 = vmax.f32 %v4714_v52, 0.0 }
0x1ca9   :  { %6140 = vmatmul.msk.f32.gmra.mxu3 %vm4554_vm5, %v9500_v44  ;;  %v4739_v30 = vrot.slane %v9500_v44, 6 }
0x1cab   :  { %v4740_v21 = vsel %vm10411_vm10, %v4737_v19, %v4739_v30  ;;  %vm10424_vm10 = vmmov %vm10405_vm0 }
0x1cac   :  { %6149 = vmatmul.msk.f32.gmra.mxu0 %vm4554_vm5, %v4740_v21 }
0x1ccc   :  { %v4439_v26 = vpop.permute.xlu1 %4438 }
0x1ccd   :  { %v4458_v11 = vmul.f32 %v9410_v1, %v4439_v26 }
0x1cd4   :  { %v9509_v27 = vpop.permute.xlu1 %4479  ;;  %v4443_v62 = vpop.permute.xlu0 %4442 }
0x1cd5   :  { %v4499_v9 = vmul.f32 %v9405_v20, %v9509_v27  ;;  %v4459_v6 = vmul.f32 %v9410_v1, %v4443_v62 }
0x1cd7   :  { %v4507_v32 = vadd.f32 %v4499_v9, %v4458_v11 }
0x1cd9   :  { %v4516_v3 = vadd.f32 %v9415_v5, %v4507_v32 }
0x1cdb   :  { %v4524_v10 = vmax.f32 %v4516_v3, 0.0 }
0x1cdc   :  { %v9511_v45 = vpop.permute.xlu1 %4483 }
0x1cdd   :  { %v4500_v25 = vmul.f32 %v9405_v20, %v9511_v45  ;;  %v4543_v59 = vrot.slane %v4524_v10, 7 }
0x1cdf   :  { %v4508_v37 = vadd.f32 %v4500_v25, %v4459_v6  ;;  %v4553_v29 = vsel %vm10413_vm6, 0.0, %v4543_v59  ;;  %vm10426_vm6 = vmmov %vm10405_vm0 }
0x1ce1   :  { %v4517_v50 = vadd.f32 %v9415_v5, %v4508_v37 }
0x1ce3   :  { %v4525_v7 = vmax.f32 %v4517_v50, 0.0 }
0x1ce4   :  { %v4434_v24 = vpop.permute.xlu1 %4433 }
0x1ce5   :  { %v4457_v49 = vmul.f32 %v9410_v1, %v4434_v24 }
0x1ce7   :  { %v4506_v28 = vadd.f32 %v4498_v8, %v4457_v49 }
0x1ce9   :  { %v4515_v54 = vadd.f32 %v9415_v5, %v4506_v28 }
0x1ceb   :  { %v4523_v12 = vmax.f32 %v4515_v54, 0.0 }
0x1cec   :  { %v4447_v39 = vpop.permute.xlu1 %4446 }
0x1ced   :  { %v4541_v48 = vrot.slane %v4523_v12, 7  ;;  %6123 = vmatmul.msk.f32.gmra.mxu1 %vm4554_vm5, %v4523_v12  ;;  %v4460_v15 = vmul.f32 %v9410_v1, %v4447_v39 }
0x1cef   :  { %v4542_v41 = vsel %vm10412_vm1, %v9437_v61, %v4541_v48  ;;  %v4544_v61 = vrot.slane %v4525_v7, 7  ;;  %vm10425_vm1 = vmmov %vm10405_vm0 }
0x1cf0   :  { %6132 = vmatmul.msk.f32.gmra.mxu2 %vm4554_vm5, %v4542_v41 }
0x1cf1   :  { %v4545_v31 = vsel %vm10414_vm4, %v4543_v59, %v4544_v61  ;;  %vm10427_vm4 = vmmov %vm10405_vm0 }
0x1cf4   :  { %v9531_v43 = vpop.permute.xlu1 %4487 }
0x1cf5   :  { %v4501_v16 = vmul.f32 %v9405_v20, %v9531_v43  ;;  %6124 = vmatmul.msk.f32.gmra.mxu1 %vm4554_vm5, %v4524_v10  ;;  %v4698_v10 = vmul.f32 %v9465_v36, %v9513_v14 }
0x1cf7   :  { %v4509_v13 = vadd.f32 %v4501_v16, %v4460_v15  ;;  %v4707_v16 = vadd.f32 %v9472_v18, %v4698_v10  ;;  %v4306_v10 = vld [vmem:[%s10091_s17 + $0x8] sm:$0x3] }
0x1cf8   :  { %6133 = vmatmul.msk.f32.gmra.mxu2 %vm4554_vm5, %v4553_v29 }
0x1cf9   :  { %v4518_v17 = vadd.f32 %v9415_v5, %v4509_v13 }
0x1cfb   :  { %v4526_v63 = vmax.f32 %v4518_v17, 0.0 }
0x1cfc   :  { %v4451_v55 = vpop.permute.xlu1 %4450 }
0x1cfd   :  { %6125 = vmatmul.msk.f32.gmra.mxu1 %vm4554_vm5, %v4525_v7  ;;  %v4546_v42 = vrot.slane %v4526_v63, 7  ;;  %v4461_v0 = vmul.f32 %v9410_v1, %v4451_v55 }
0x1cff   :  { %v4547_v2 = vsel %vm10417_vm13, %v4544_v61, %v4546_v42  ;;  %v4699_v61 = vmul.f32 %v9465_v36, %v9509_v27  ;;  %vm10430_vm13 = vmmov %vm10405_vm0 }
0x1d00   :  { %6134 = vmatmul.msk.f32.gmra.mxu2 %vm4554_vm5, %v4545_v31 }
0x1d01   :  { %v4708_v53 = vadd.f32 %v9472_v18, %v4699_v61 }
0x1d04   :  { %v9554_v57 = vpop.permute.xlu1 %4491 }
0x1d05   :  { %v4502_v19 = vmul.f32 %v9405_v20, %v9554_v57  ;;  %6126 = vmatmul.msk.f32.gmra.mxu1 %vm4554_vm5, %v4526_v63 }
0x1d07   :  { %v4510_v33 = vadd.f32 %v4502_v19, %v4461_v0  ;;  %v4700_v0 = vmul.f32 %v9465_v36, %v9511_v45 }
0x1d08   :  { %6135 = vmatmul.msk.f32.gmra.mxu2 %vm4554_vm5, %v4547_v2 }
0x1d09   :  { %v4519_v23 = vadd.f32 %v9415_v5, %v4510_v33 }
0x1d0b   :  { %v4527_v46 = vmax.f32 %v4519_v23, 0.0  ;;  %v4709_v23 = vadd.f32 %v9472_v18, %v4700_v0 }
0x1d0d   :  { %v4548_v4 = vrot.slane %v4527_v46, 7  ;;  %6127 = vmatmul.msk.f32.gmra.mxu1 %vm4554_vm5, %v4527_v46 }
0x1d0f   :  { %v4549_v20 = vsel %vm10418_vm9, %v4546_v42, %v4548_v4  ;;  %vm5139_vm9 = vcmask 195712  }
0x1d10   :  { %6136 = vmatmul.msk.f32.gmra.mxu2 %vm4554_vm5, %v4549_v20 }
0x1d14   :  { %v4852_v1 = vpop.f32.mrf.mxu0 }
0x1d17   :  { %v4790_v60 = vpop.f32.mrf.mxu3 }
0x1d18   :  { %v4853_v52 = vadd.f32 %v4852_v1, %v4790_v60  ;;  %v4701_v1 = vmul.f32 %v9465_v36, %v9531_v43 }
0x1d1a   :  { %v4877_v21 = vadd.f32 %v9570_v38, %v4853_v52 }
0x1d1c   :  { %v4885_v26 = vmax.f32 %v4877_v21, 0.0  ;;  %v4855_v5 = vpop.f32.mrf.mxu0 }
0x1d1e   :  { %v4901_v9 = vrot.slane %v4885_v26, 6  ;;  %6156 = vmatmul.msk.f32.vlgmr.msra.gmra.mxu1 %vm4554_vm5, %v4885_v26 }
0x1d1f   :  { %v4793_v24 = vpop.f32.mrf.mxu3 }
0x1d20   :  { %v4856_v8 = vadd.f32 %v4855_v5, %v4793_v24  ;;  %v4917_v11 = vsel %vm10405_vm0, 0.0, %v4901_v9  ;;  %vm5143_vm0 = vcmask 261312  }
0x1d21   :  { %6165 = vmatmul.msk.f32.vlgmr.msrb.gmra.mxu2 %vm4554_vm5, %v4917_v11 }
0x1d22   :  { %v4878_v49 = vadd.f32 %v9570_v38, %v4856_v8 }
0x1d24   :  { %v4886_v32 = vmax.f32 %v4878_v49, 0.0  ;;  %v4702_v49 = vmul.f32 %v9465_v36, %v9554_v57 }
0x1d26   :  { %v4902_v28 = vrot.slane %v4886_v32, 6  ;;  %6157 = vmatmul.msk.f32.gmra.mxu1 %vm4554_vm5, %v4886_v32 }
0x1d28   :  { %v4903_v54 = vsel %vm10419_vm11, %v4901_v9, %v4902_v28  ;;  %v4710_v9 = vadd.f32 %v9472_v18, %v4701_v1  ;;  %vm10434_vm11 = vcmask 1041409  }
0x1d29   :  { %6166 = vmatmul.msk.f32.gmra.mxu2 %vm4554_vm5, %v4903_v54  ;;  %v4858_v62 = vpop.f32.mrf.mxu0 }
0x1d2c   :  { %v4796_v25 = vpop.f32.mrf.mxu3 }
0x1d2d   :  { %v4859_v12 = vadd.f32 %v4858_v62, %v4796_v25  ;;  %v4711_v25 = vadd.f32 %v9472_v18, %v4702_v49  ;;  %v9645_v18 = vperm.slane %v9402_v58, 5 }
0x1d2f   :  { %v4879_v3 = vadd.f32 %v9570_v38, %v4859_v12 }
0x1d31   :  { %v4887_v39 = vmax.f32 %v4879_v3, 0.0 }
0x1d33   :  { %v9581_v6 = vrot.slane %v4887_v39, 6  ;;  %6158 = vmatmul.msk.f32.gmra.mxu1 %vm4554_vm5, %v4887_v39 }
0x1d35   :  { %v4905_v48 = vsel %vm10420_vm7, %v4902_v28, %v9581_v6  ;;  %vm10435_vm7 = vcmask 64512  }
0x1d36   :  { %6167 = vmatmul.msk.f32.gmra.mxu2 %vm4554_vm5, %v4905_v48 }
0x1d6a   :  { %v4600_v37 = vpop.f32.mrf.mxu1 }
0x1d72   :  { %v4603_v50 = vpop.f32.mrf.mxu1 }
0x1d73   :  { %v4662_v41 = vpop.f32.mrf.mxu2 }
0x1d74   :  { %v4663_v59 = vadd.f32 %v4662_v41, %v4600_v37 }
0x1d76   :  { %v4681_v15 = vadd.f32 %v9468_v35, %v4663_v59 }
0x1d78   :  { %v4689_v13 = vmax.f32 %v4681_v15, 0.0 }
0x1d7a   :  { %v4715_v29 = vadd.f32 %v4707_v16, %v4689_v13  ;;  %v4606_v47 = vpop.f32.mrf.mxu1  ;;  %v9652_v13 = vperm.slane %v4306_v10, 0 }
0x1d7b   :  { %v4665_v7 = vpop.f32.mrf.mxu2 }
0x1d7c   :  { %v4666_v17 = vadd.f32 %v4665_v7, %v4603_v50  ;;  %v9593_v55 = vmax.f32 %v4715_v29, 0.0  ;;  %v5108_v50 = vrot.slane %v4306_v10, 1 }
0x1d7e   :  { %v4682_v34 = vadd.f32 %v9468_v35, %v4666_v17  ;;  %6141 = vmatmul.msk.f32.gmra.mxu3 %vm4554_vm5, %v9593_v55  ;;  %v4741_v14 = vrot.slane %v9593_v55, 6  ;;  %6213 = vpush %v5108_v50 }
0x1d80   :  { %v4690_v31 = vmax.f32 %v4682_v34, 0.0  ;;  %v4742_v63 = vsel %vm10421_vm8, %v4739_v30, %v4741_v14  ;;  %vm10436_vm8 = vmmov %vm10435_vm7 }
0x1d81   :  { %6150 = vmatmul.msk.f32.gmra.mxu0 %vm4554_vm5, %v4742_v63 }
0x1d82   :  { %v4716_v27 = vadd.f32 %v4708_v53, %v4690_v31  ;;  %v4609_v4 = vpop.f32.mrf.mxu1 }
0x1d83   :  { %v4668_v42 = vpop.f32.mrf.mxu2 }
0x1d84   :  { %v4669_v19 = vadd.f32 %v4668_v42, %v4606_v47  ;;  %v9606_v51 = vmax.f32 %v4716_v27, 0.0 }
0x1d86   :  { %v4683_v33 = vadd.f32 %v9468_v35, %v4669_v19  ;;  %6142 = vmatmul.msk.f32.gmra.mxu3 %vm4554_vm5, %v9606_v51  ;;  %v4743_v2 = vrot.slane %v9606_v51, 6 }
0x1d88   :  { %v4691_v30 = vmax.f32 %v4683_v33, 0.0  ;;  %v4753_v46 = vsel %vm10422_vm3, 0.0, %v4743_v2  ;;  %vm5204_vm3 = vcmask 123904  }
0x1d89   :  { %6151 = vmatmul.msk.f32.gmra.mxu0 %vm4554_vm5, %v4753_v46 }
0x1d8a   :  { %v4717_v20 = vadd.f32 %v4709_v23, %v4691_v30  ;;  %v4612_v11 = vpop.f32.mrf.mxu1 }
0x1d8b   :  { %v4671_v45 = vpop.f32.mrf.mxu2 }
0x1d8c   :  { %v4672_v60 = vadd.f32 %v4671_v45, %v4609_v4  ;;  %v9617_v52 = vmax.f32 %v4717_v20, 0.0 }
0x1d8e   :  { %v4684_v21 = vadd.f32 %v9468_v35, %v4672_v60  ;;  %6143 = vmatmul.msk.f32.gmra.mxu3 %vm4554_vm5, %v9617_v52  ;;  %v4744_v26 = vrot.slane %v9617_v52, 6 }
0x1d90   :  { %v4692_v5 = vmax.f32 %v4684_v21, 0.0  ;;  %v4745_v24 = vsel %vm10423_vm2, %v4743_v2, %v4744_v26  ;;  %vm5290_vm2 = vcmask 588800  }
0x1d91   :  { %6152 = vmatmul.msk.f32.gmra.mxu0 %vm4554_vm5, %v4745_v24 }
0x1d92   :  { %v4718_v8 = vadd.f32 %v4710_v9, %v4692_v5 }
0x1d93   :  { %v4674_v43 = vpop.f32.mrf.mxu2 }
0x1d94   :  { %v4675_v32 = vadd.f32 %v4674_v43, %v4612_v11  ;;  %v9628_v28 = vmax.f32 %v4718_v8, 0.0 }
0x1d96   :  { %v4685_v54 = vadd.f32 %v9468_v35, %v4675_v32  ;;  %6144 = vmatmul.msk.f32.gmra.mxu3 %vm4554_vm5, %v9628_v28  ;;  %v4746_v62 = vrot.slane %v9628_v28, 6 }
0x1d98   :  { %v4693_v12 = vmax.f32 %v4685_v54, 0.0  ;;  %v4747_v3 = vsel %vm10424_vm10, %v4744_v26, %v4746_v62 }
0x1d99   :  { %6153 = vmatmul.msk.f32.gmra.mxu0 %vm4554_vm5, %v4747_v3 }
0x1d9a   :  { %v4719_v39 = vadd.f32 %v4711_v25, %v4693_v12 }
0x1d9b   :  { %v4955_v57 = vpop.f32.mrf.mxu1 }
0x1d9c   :  { %v9637_v48 = vmax.f32 %v4719_v39, 0.0 }
0x1d9e   :  { %6145 = vmatmul.msk.f32.gmra.mxu3 %vm4554_vm5, %v9637_v48  ;;  %v4748_v36 = vrot.slane %v9637_v48, 6 }
0x1da0   :  { %v4749_v35 = vsel %vm10425_vm1, %v4746_v62, %v4748_v36 }
0x1da1   :  { %6154 = vmatmul.msk.f32.gmra.mxu0 %vm4554_vm5, %v4749_v35 }
0x1da3   :  { %v4958_v29 = vpop.f32.mrf.mxu1 }
0x1da4   :  { %v5017_v37 = vpop.f32.mrf.mxu2 }
0x1da5   :  { %v5018_v41 = vadd.f32 %v5017_v37, %v4955_v57 }
0x1da7   :  { %v5042_v59 = vadd.f32 %v9645_v18, %v5018_v41 }
0x1da9   :  { %v5050_v15 = vmax.f32 %v5042_v59, 0.0 }
0x1dab   :  { %v5058_v16 = vadd.f32 %v5050_v15, %v9480_v56 }
0x1dac   :  { %v5020_v7 = vpop.f32.mrf.mxu2 }
0x1dad   :  { %v5066_v61 = vmax.f32 %v5058_v16, 0.0  ;;  %v5021_v58 = vadd.f32 %v5020_v7, %v4958_v29 }
0x1daf   :  { %v5043_v17 = vadd.f32 %v9645_v18, %v5021_v58  ;;  %v5075_v34 = vmul.f32 %v9652_v13, %v5066_v61  ;;  %s6214_s3 = spop %6213 }
0x1db0   :  { %v4961_v56 = vpop.f32.mrf.mxu1 }
0x1db1   :  { %v5051_v14 = vmax.f32 %v5043_v17, 0.0  ;;  %v5083_v47 = vsel %vm4554_vm5, %v5075_v34, 0.0 }
0x1db2   :  { %5084 = vadd.xlane.f32.xlu1 %v5083_v47 }
0x1db3   :  { %v5059_v53 = vadd.f32 %v5051_v14, %v9489_v22 }
0x1db5   :  { %v5067_v31 = vmax.f32 %v5059_v53, 0.0 }
0x1db7   :  { %v5076_v63 = vmul.f32 %v9652_v13, %v5067_v31 }
0x1db9   :  { %v5023_v27 = vpop.f32.mrf.mxu2  ;;  %v5086_v42 = vsel %vm4554_vm5, %v5076_v63, 0.0  ;;  %v5122_v63 = vld [vmem:[%s10431_s9 + $0x10] sm:$0xff] }
0x1dba   :  { %v5024_v0 = vadd.f32 %v5023_v27, %v4961_v56  ;;  %5087 = vadd.xlane.f32.xlu1 %v5086_v42  ;;  %v5121_v42 = vld [vmem:[%s10431_s9 + $0x8] sm:$0xff] }
0x1dbc   :  { %v5044_v19 = vadd.f32 %v9645_v18, %v5024_v0 }
0x1dbe   :  { %v5052_v33 = vmax.f32 %v5044_v19, 0.0 }
0x1dc0   :  { %v5060_v2 = vadd.f32 %v5052_v33, %v9500_v44 }
0x1dc2   :  { %v5068_v23 = vmax.f32 %v5060_v2, 0.0 }
0x1dc4   :  { %v5077_v30 = vmul.f32 %v9652_v13, %v5068_v23 }
0x1dc6   :  { %v5089_v46 = vsel %vm4554_vm5, %v5077_v30, 0.0 }
0x1dc7   :  { %5090 = vadd.xlane.f32.xlu1 %v5089_v46 }
0x1dfe   :  { %v4861_v22 = vpop.f32.mrf.mxu0 }
0x1e01   :  { %v4799_v4 = vpop.f32.mrf.mxu3 }
0x1e02   :  { %v4862_v20 = vadd.f32 %v4861_v22, %v4799_v4 }
0x1e04   :  { %v4880_v45 = vadd.f32 %v9570_v38, %v4862_v20 }
0x1e06   :  { %v4888_v1 = vmax.f32 %v4880_v45, 0.0  ;;  %v4864_v60 = vpop.f32.mrf.mxu0 }
0x1e08   :  { %v4906_v21 = vrot.slane %v4888_v1, 6  ;;  %6159 = vmatmul.msk.f32.gmra.mxu1 %vm4554_vm5, %v4888_v1 }
0x1e09   :  { %v4802_v26 = vpop.f32.mrf.mxu3 }
0x1e0a   :  { %v4865_v9 = vadd.f32 %v4864_v60, %v4802_v26  ;;  %v4907_v44 = vsel %vm10426_vm6, %v9581_v6, %v4906_v21 }
0x1e0b   :  { %6168 = vmatmul.msk.f32.gmra.mxu2 %vm4554_vm5, %v4907_v44 }
0x1e0c   :  { %v4881_v5 = vadd.f32 %v9570_v38, %v4865_v9 }
0x1e0e   :  { %v4889_v24 = vmax.f32 %v4881_v5, 0.0  ;;  %v4867_v8 = vpop.f32.mrf.mxu0 }
0x1e10   :  { %6160 = vmatmul.msk.f32.gmra.mxu1 %vm4554_vm5, %v4889_v24  ;;  %v4908_v11 = vrot.slane %v4889_v24, 6 }
0x1e11   :  { %v4805_v43 = vpop.f32.mrf.mxu3 }
0x1e12   :  { %v4868_v49 = vadd.f32 %v4867_v8, %v4805_v43  ;;  %v4918_v32 = vsel %vm10427_vm4, 0.0, %v4908_v11 }
0x1e13   :  { %6169 = vmatmul.msk.f32.gmra.mxu2 %vm4554_vm5, %v4918_v32 }
0x1e14   :  { %v4882_v54 = vadd.f32 %v9570_v38, %v4868_v49 }
0x1e16   :  { %v4890_v62 = vmax.f32 %v4882_v54, 0.0  ;;  %v4870_v25 = vpop.f32.mrf.mxu0 }
0x1e18   :  { %v4909_v6 = vrot.slane %v4890_v62, 6  ;;  %6161 = vmatmul.msk.f32.gmra.mxu1 %vm4554_vm5, %v4890_v62 }
0x1e19   :  { %v4808_v12 = vpop.f32.mrf.mxu3 }
0x1e1a   :  { %v4871_v3 = vadd.f32 %v4870_v25, %v4808_v12  ;;  %v4910_v39 = vsel %vm10428_vm12, %v4908_v11, %v4909_v6 }
0x1e1b   :  { %6170 = vmatmul.msk.f32.gmra.mxu2 %vm4554_vm5, %v4910_v39 }
0x1e1c   :  { %v4883_v36 = vadd.f32 %v9570_v38, %v4871_v3 }
0x1e1e   :  { %v4891_v35 = vmax.f32 %v4883_v36, 0.0  ;;  %v4873_v37 = vpop.f32.mrf.mxu0 }
0x1e20   :  { %v4911_v57 = vrot.slane %v4891_v35, 6  ;;  %6162 = vmatmul.msk.f32.gmra.mxu1 %vm4554_vm5, %v4891_v35 }
0x1e21   :  { %v4811_v41 = vpop.f32.mrf.mxu3 }
0x1e22   :  { %v4874_v10 = vadd.f32 %v4873_v37, %v4811_v41  ;;  %v4912_v59 = vsel %vm10429_vm14, %v4909_v6, %v4911_v57  ;;  %vm10440_vm14 = vcmask 31744  }
0x1e23   :  { %6171 = vmatmul.msk.f32.gmra.mxu2 %vm4554_vm5, %v4912_v59  ;;  %v5176_v59 = vld [vmem:[%s10432_s11] sm:$0xff] }
0x1e24   :  { %v4884_v50 = vadd.f32 %v9570_v38, %v4874_v10  ;;  %v5123_v38 = vld [vmem:[%s10431_s9 + $0x18] sm:$0xff]  ;;  %v5177_v10 = vld [vmem:[%s10432_s11 + $0x8] sm:$0xff] }
0x1e25   :  { %5167 = vmatpush.msra.mxu3 %v5123_v38  ;;  %v5085_v39 = vpop.xlane.xlu1 %5084 }
0x1e26   :  { %v4892_v15 = vmax.f32 %v4884_v50, 0.0 }
0x1e27   :  { %5168 = vmatpush.msra.mxu3 %v5122_v63 }
0x1e28   :  { %v4913_v16 = vrot.slane %v4892_v15, 6  ;;  %6163 = vmatmul.msk.f32.gmra.mxu1 %vm4554_vm5, %v4892_v15 }
0x1e29   :  { %5169 = vmatpush.msra.mxu3 %v5121_v42 }
0x1e2a   :  { %v4914_v29 = vsel %vm10430_vm13, %v4911_v57, %v4913_v16  ;;  %v5207_v57 = vld [vmem:[%s10099_s25] sm:$0xff]  ;;  %v5110_v16 = vstv %s6214_s3  ;;  %vm10441_vm13 = vcmask 1040384   ;;  %s6011_s3 = sshll.u32 %s10101_s27, 4  ;;  %s6012_s3 = int_to_ptr.hbm [resolvable:$true] %s6011_s3 }
0x1e2b   :  { %6172 = vmatmul.msk.f32.gmra.mxu2 %vm4554_vm5, %v4914_v29 }
0x1e2d   :  { %v5088_v36 = vpop.xlane.xlu1 %5087 }
0x1e2e   :  { %v5113_v29 = vadd.f32 %v5110_v16, %v5088_v36  ;;  %v5288_v36 = vld [vmem:[%s10100_s26 + $0xc0] sm:$0xff] }
0x1e30   :  { %v5134_v38 = vperm.slane %v5113_v29, %v8358_v40  ;;  %v5280_v29 = vld [vmem:[%s10100_s26 + $0x80] sm:$0xff] }
0x1e3a   :  { %v5091_v35 = vpop.xlane.xlu1 %5090 }
0x1e85   :  { %v4964_v7 = vpop.f32.mrf.mxu1 }
0x1e8d   :  { %v4967_v58 = vpop.f32.mrf.mxu1 }
0x1e8e   :  { %v5026_v61 = vpop.f32.mrf.mxu2 }
0x1e8f   :  { %v5027_v53 = vadd.f32 %v5026_v61, %v4964_v7  ;;  %v10433_v61 = vld [vmem:[#allocation7_spill] sm:$0xff] }
0x1e91   :  { %v5045_v0 = vadd.f32 %v9645_v18, %v5027_v53  ;;  %v5141_v53 = vadd.s32 4294967272, %v10433_v61 }
0x1e93   :  { %v5053_v30 = vmax.f32 %v5045_v0, 0.0 }
0x1e95   :  { %v4970_v47 = vpop.f32.mrf.mxu1  ;;  %v5061_v45 = vadd.f32 %v5053_v30, %v9593_v55 }
0x1e96   :  { %v5029_v17 = vpop.f32.mrf.mxu2 }
0x1e97   :  { %v5030_v34 = vadd.f32 %v5029_v17, %v4967_v58  ;;  %v5069_v9 = vmax.f32 %v5061_v45, 0.0  ;;  %v5137_v58 = vadd.s32 4294967280, %v10433_v61  ;;  %v5114_v17 = vadd.f32 %v5110_v16, %v5091_v35 }
0x1e99   :  { %v5046_v14 = vadd.f32 %v9645_v18, %v5030_v34  ;;  %v5078_v49 = vmul.f32 %v9652_v13, %v5069_v9  ;;  %v5219_v9 = vld.sshfl [vmem:[#allocation1] sm:$0xff pattern:$0x75316420] }
0x1e9b   :  { %v5054_v31 = vmax.f32 %v5046_v14, 0.0  ;;  %v5092_v25 = vsel %vm4554_vm5, %v5078_v49, 0.0  ;;  %v5112_v14 = vadd.f32 %v5110_v16, %v5085_v39  ;;  %v5208_v49 = vld [vmem:[%s10099_s25 + $0x8] sm:$0xff] }
0x1e9d   :  { %v5062_v56 = vadd.f32 %v5054_v31, %v9606_v51  ;;  %v4973_v22 = vpop.f32.mrf.mxu1  ;;  %v5133_v0 = vperm.slane %v5112_v14, %v10433_v61 }
0x1e9e   :  { %v5032_v27 = vpop.f32.mrf.mxu2 }
0x1e9f   :  { %v5070_v19 = vmax.f32 %v5062_v56, 0.0  ;;  %v5033_v33 = vadd.f32 %v5032_v27, %v4970_v47  ;;  %v5138_v56 = vperm.slane %v5114_v17, %v5137_v58 }
0x1ea1   :  { %v5047_v2 = vadd.f32 %v9645_v18, %v5033_v33  ;;  %v5079_v23 = vmul.f32 %v9652_v13, %v5070_v19 }
0x1ea3   :  { %v5055_v46 = vmax.f32 %v5047_v2, 0.0  ;;  %v5095_v51 = vsel %vm4554_vm5, %v5079_v23, 0.0 }
0x1ea4   :  { %5096 = vadd.xlane.f32.xlu1 %v5095_v51 }
0x1ea5   :  { %v5063_v4 = vadd.f32 %v5055_v46, %v9617_v52  ;;  %v4976_v8 = vpop.f32.mrf.mxu1 }
0x1ea6   :  { %v5035_v20 = vpop.f32.mrf.mxu2 }
0x1ea7   :  { %v5071_v1 = vmax.f32 %v5063_v4, 0.0  ;;  %v5036_v60 = vadd.f32 %v5035_v20, %v4973_v22 }
0x1ea9   :  { %v5048_v21 = vadd.f32 %v9645_v18, %v5036_v60  ;;  %v5080_v26 = vmul.f32 %v9652_v13, %v5071_v1  ;;  %v5278_v1 = vld [vmem:[%s10100_s26 + $0x70] sm:$0xff]  ;;  %v5277_v60 = vld [vmem:[%s10100_s26 + $0x68] sm:$0xff] }
0x1eab   :  { %v5056_v44 = vmax.f32 %v5048_v21, 0.0  ;;  %v5098_v5 = vsel %vm4554_vm5, %v5080_v26, 0.0  ;;  %v5276_v21 = vld [vmem:[%s10100_s26 + $0x60] sm:$0xff]  ;;  %v5275_v26 = vld [vmem:[%s10100_s26 + $0x58] sm:$0xff] }
0x1eac   :  { %5099 = vadd.xlane.f32.xlu1 %v5098_v5  ;;  %v5273_v5 = vld [vmem:[%s10100_s26 + $0x48] sm:$0xff] }
0x1ead   :  { %v5064_v24 = vadd.f32 %v5056_v44, %v9628_v28  ;;  %v5274_v44 = vld [vmem:[%s10100_s26 + $0x50] sm:$0xff] }
0x1eae   :  { %v5038_v11 = vpop.f32.mrf.mxu2 }
0x1eaf   :  { %v5072_v43 = vmax.f32 %v5064_v24, 0.0  ;;  %v5039_v52 = vadd.f32 %v5038_v11, %v4976_v8  ;;  %v5272_v24 = vld [vmem:[%s10100_s26 + $0x40] sm:$0xff]  ;;  %v5271_v8 = vld [vmem:[%s10100_s26 + $0x38] sm:$0xff]  ;;  %v5270_v11 = vld [vmem:[%s10100_s26 + $0x30] sm:$0xff] }
0x1eb1   :  { %v5049_v55 = vadd.f32 %v9645_v18, %v5039_v52  ;;  %v5081_v32 = vmul.f32 %v9652_v13, %v5072_v43  ;;  %v5120_v18 = vld [vmem:[%s10431_s9] sm:$0xff]  ;;  %v5269_v43 = vld [vmem:[%s10100_s26 + $0x28] sm:$0xff] }
0x1eb2   :  { %5170 = vmatpush.msra.mxu3 %v5120_v18  ;;  %v5268_v52 = vld [vmem:[%s10100_s26 + $0x20] sm:$0xff] }
0x1eb3   :  { %v5057_v54 = vmax.f32 %v5049_v55, 0.0  ;;  %v5101_v62 = vsel %vm4554_vm5, %v5081_v32, 0.0  ;;  %v5267_v55 = vld [vmem:[%s10100_s26 + $0x18] sm:$0xff]  ;;  %v5266_v32 = vld [vmem:[%s10100_s26 + $0x10] sm:$0xff] }
0x1eb4   :  { %5102 = vadd.xlane.f32.xlu2 %v5101_v62  ;;  %5093 = vadd.xlane.f32.xlu1 %v5092_v25  ;;  %v5264_v62 = vld [vmem:[%s10100_s26] sm:$0xff] }
0x1eb5   :  { %v5065_v6 = vadd.f32 %v5057_v54, %v9637_v48  ;;  %5237 = vmatpush.msrb.mxu3 %v5207_v57  ;;  %v5179_v48 = vld [vmem:[%s10432_s11 + $0x18] sm:$0xff]  ;;  %v5265_v54 = vld [vmem:[%s10100_s26 + $0x8] sm:$0xff]  ;;  %v9795_v25 = vld [vmem:[%s10151_s5] sm:$0xf] }
0x1eb6   :  { %5196 = vmatpush.msrb.mxu0 %v5179_v48  ;;  %v5287_v57 = vld [vmem:[%s10100_s26 + $0xb8] sm:$0xff] }
0x1eb7   :  { %v5073_v28 = vmax.f32 %v5065_v6, 0.0  ;;  %v5124_v6 = vperm.slane %v9795_v25, 0 }
0x1eb9   :  { %v5082_v12 = vmul.f32 %v9652_v13, %v5073_v28  ;;  %v5178_v13 = vld [vmem:[%s10432_s11 + $0x10] sm:$0xff]  ;;  %v9801_v28 = vld [vmem:[%s10096_s22] sm:$0xff] }
0x1eba   :  { %5197 = vmatpush.msrb.mxu0 %v5178_v13  ;;  %v5210_v39 = vperm.slane %v9801_v28, 0  ;;  %v5211_v17 = vperm.slane %v9801_v28, 4 }
0x1ebb   :  { %v5104_v3 = vsel %vm4554_vm5, %v5082_v12, 0.0  ;;  %vm5135_vm5 = vcmask 130112  }
0x1ebc   :  { %5105 = vadd.xlane.f32.xlu1 %v5104_v3  ;;  %5198 = vmatpush.msrb.mxu0 %v5177_v10  ;;  %v5136_v23 = vsel %vm5135_vm5, %v5134_v38, %v5133_v0  ;;  %v5214_v35 = vperm.slane %v5210_v39, 0  ;;  %v5285_v10 = vld [vmem:[%s10100_s26 + $0xa8] sm:$0xff]  ;;  %v5419_v39 = vld [vmem:[%s10098_s24 + $0x18] sm:$0xff] }
0x1ebd   :  { %v5140_v51 = vsel %vm5139_vm9, %v5138_v56, %v5136_v23  ;;  %v5361_v23 = vld [vmem:[%s10097_s23 + $0x20] sm:$0xff] }
0x1ebe   :  { %5199 = vmatpush.msrb.mxu0 %v5176_v59  ;;  %v5284_v59 = vld [vmem:[%s10100_s26 + $0xa0] sm:$0xff] }
0x1ec0   :  { %5257 = vmatpush.msra.mxu0 %v5208_v49 }
0x1f17   :  { %v5097_v37 = vpop.xlane.xlu1 %5096 }
0x1f18   :  { %v5116_v47 = vadd.f32 %v5110_v16, %v5097_v37 }
0x1f1a   :  { %v5145_v19 = vperm.slane %v5116_v47, %v10433_v61 }
0x1f1f   :  { %v5100_v41 = vpop.xlane.xlu1 %5099 }
0x1f20   :  { %v5117_v7 = vadd.f32 %v5110_v16, %v5100_v41  ;;  %v5286_v41 = vld [vmem:[%s10100_s26 + $0xb0] sm:$0xff] }
0x1f22   :  { %v5146_v63 = vperm.slane %v5117_v7, %v8358_v40  ;;  %v5279_v40 = vld [vmem:[%s10100_s26 + $0x78] sm:$0xff]  ;;  %v5180_v7 = vperm.slane %v9795_v25, 1 }
0x1f24   :  { %v5147_v30 = vsel %vm5135_vm5, %v5146_v63, %v5145_v19  ;;  %vm10442_vm5 = vmmov %vm10440_vm14 }
0x1f27   :  { %v5094_v50 = vpop.xlane.xlu1 %5093  ;;  %v5103_v15 = vpop.xlane.xlu2 %5102 }
0x1f28   :  { %v5118_v34 = vadd.f32 %v5110_v16, %v5103_v15  ;;  %v5115_v31 = vadd.f32 %v5110_v16, %v5094_v50  ;;  %v5283_v50 = vld [vmem:[%s10100_s26 + $0x98] sm:$0xff]  ;;  %v5282_v15 = vld [vmem:[%s10100_s26 + $0x90] sm:$0xff] }
0x1f2a   :  { %v5148_v27 = vperm.slane %v5118_v34, %v5137_v58  ;;  %v5142_v33 = vperm.slane %v5115_v31, %v5141_v53  ;;  %v5215_v34 = vperm.slane %v5211_v17, 0  ;;  %v5289_v31 = vperm.slane %v9801_v28, 1 }
0x1f2c   :  { %v5149_v22 = vsel %vm5139_vm9, %v5148_v27, %v5147_v30  ;;  %v5144_v4 = vsel %vm5143_vm0, %v5142_v33, %v5140_v51  ;;  %v5359_v30 = vld [vmem:[%s10097_s23 + $0x10] sm:$0xff]  ;;  %v5364_v51 = vld [vmem:[%s10097_s23 + $0x38] sm:$0xff]  ;;  %vm10443_vm9 = vmmov %vm10442_vm5 }
0x1f2f   :  { %v5106_v42 = vpop.xlane.xlu1 %5105 }
0x1f30   :  { %v5119_v2 = vadd.f32 %v5110_v16, %v5106_v42  ;;  %v5281_v16 = vld [vmem:[%s10100_s26 + $0x88] sm:$0xff] }
0x1f32   :  { %v5150_v46 = vperm.slane %v5119_v2, %v5141_v53  ;;  %v5363_v2 = vld [vmem:[%s10097_s23 + $0x30] sm:$0xff] }
0x1f34   :  { %v5151_v20 = vsel %vm5143_vm0, %v5150_v46, %v5149_v22  ;;  %v5357_v46 = vld [vmem:[%s10097_s23] sm:$0xff]  ;;  %v5362_v22 = vld [vmem:[%s10097_s23 + $0x28] sm:$0xff]  ;;  %vm10444_vm0 = vmmov %vm10441_vm13 }
0x1f35   :  { %v5152_v45 = vsel %vm10434_vm11, %v5151_v20, %v5144_v4  ;;  %v5360_v4 = vld [vmem:[%s10097_s23 + $0x18] sm:$0xff]  ;;  %v5358_v20 = vld [vmem:[%s10097_s23 + $0x8] sm:$0xff]  ;;  %vm10445_vm11 = vmmov %vm10442_vm5 }
0x1f36   :  { %6173 = vmatmul.msk.f32.vlgmr.msra.gmra.mxu3 %vm3407_vm15, %v5152_v45  ;;  %v5430_v45 = vld [vmem:[%s10098_s24 + $0x70] sm:$0xff] }
0x1f37   :  { %5294 = vmatpush.msra.mxu3 %v5279_v40  ;;  %v5431_v40 = vld [vmem:[%s10098_s24 + $0x78] sm:$0xff] }
0x1f38   :  { %5445 = vmatpush.msrb.mxu1 %v5431_v40 }
0x1f39   :  { %5295 = vmatpush.msra.mxu3 %v5278_v1  ;;  %v5429_v1 = vld [vmem:[%s10098_s24 + $0x68] sm:$0xff] }
0x1f3a   :  { %5446 = vmatpush.msrb.mxu1 %v5430_v45 }
0x1f3b   :  { %5296 = vmatpush.msra.mxu3 %v5277_v60  ;;  %v5428_v60 = vld [vmem:[%s10098_s24 + $0x60] sm:$0xff] }
0x1f3c   :  { %5447 = vmatpush.msrb.mxu1 %v5429_v1 }
0x1f3d   :  { %5297 = vmatpush.msra.mxu3 %v5276_v21  ;;  %v5440_v21 = vld [vmem:[%s10098_s24 + $0xc0] sm:$0xff] }
0x1f3e   :  { %6175 = vmatmul.msk.f32.vlgmr.msrb.gmra.mxu3 %vm10435_vm7, %v5219_v9  ;;  %5448 = vmatpush.msrb.mxu1 %v5428_v60 }
0x1f3f   :  { %5298 = vmatpush.msra.mxu3 %v5275_v26  ;;  %v5439_v26 = vld [vmem:[%s10098_s24 + $0xb8] sm:$0xff] }
0x1f41   :  { %5299 = vmatpush.msra.mxu3 %v5274_v44  ;;  %v5334_v44 = vld [vmem:[%s10437_s4] sm:$0xf] }
0x1f43   :  { %5300 = vmatpush.msra.mxu3 %v5273_v5  ;;  %v5426_v5 = vld [vmem:[%s10098_s24 + $0x50] sm:$0xff] }
0x1f45   :  { %5301 = vmatpush.msra.mxu3 %v5272_v24 }
0x1f47   :  { %5302 = vmatpush.msra.mxu3 %v5271_v8  ;;  %v5335_v8 = vld [vmem:[%s10437_s4 + $0x4] sm:$0xf] }
0x1f49   :  { %5303 = vmatpush.msra.mxu3 %v5270_v11 }
0x1f4b   :  { %5304 = vmatpush.msra.mxu3 %v5269_v43  ;;  %v5425_v43 = vld [vmem:[%s10098_s24 + $0x48] sm:$0xff] }
0x1f4d   :  { %5305 = vmatpush.msra.mxu3 %v5268_v52 }
0x1f4f   :  { %5306 = vmatpush.msra.mxu3 %v5267_v55  ;;  %v5424_v55 = vld [vmem:[%s10098_s24 + $0x40] sm:$0xff] }
0x1f51   :  { %5307 = vmatpush.msra.mxu3 %v5266_v32  ;;  %v5423_v32 = vld [vmem:[%s10098_s24 + $0x38] sm:$0xff] }
0x1f53   :  { %5308 = vmatpush.msra.mxu3 %v5265_v54  ;;  %v5422_v54 = vld [vmem:[%s10098_s24 + $0x30] sm:$0xff] }
0x1f55   :  { %5309 = vmatpush.msra.mxu3 %v5264_v62  ;;  %v5421_v62 = vld [vmem:[%s10098_s24 + $0x28] sm:$0xff] }
0x1f57   :  { %5472 = vmatpush.msrb.mxu3 %v5440_v21 }
0x1f59   :  { %5473 = vmatpush.msrb.mxu3 %v5439_v26 }
0x1fb9   :  { %v5172_v12 = vpop.f32.mrf.mxu3 }
0x1fba   :  { %v5173_v3 = vadd.f32 %v5172_v12, %v5124_v6  ;;  %v5420_v6 = vld [vmem:[%s10098_s24 + $0x20] sm:$0xff] }
0x1fbc   :  { %v5175_v18 = vmax.f32 %v5173_v3, 0.0 }
0x1fbe   :  { %6174 = vmatmul.msk.f32.vlgmr.msrb.gmra.mxu0 %vm3407_vm15, %v5175_v18  ;;  %v5418_v18 = vld [vmem:[%s10098_s24 + $0x10] sm:$0xff] }
0x1fbf   :  { %5321 = vmatpush.msrb.mxu0 %v5288_v36  ;;  %v5438_v36 = vld [vmem:[%s10098_s24 + $0xb0] sm:$0xff] }
0x1fc0   :  { %5474 = vmatpush.msrb.mxu3 %v5438_v36 }
0x1fc1   :  { %v5239_v37 = vpop.f32.mrf.mxu3  ;;  %5322 = vmatpush.msrb.mxu0 %v5287_v57  ;;  %v5437_v57 = vld [vmem:[%s10098_s24 + $0xa8] sm:$0xff] }
0x1fc2   :  { %v5240_v48 = vadd.f32 %v5239_v37, %v5214_v35  ;;  %v5417_v35 = vld [vmem:[%s10098_s24 + $0x8] sm:$0xff]  ;;  %v5416_v37 = vld [vmem:[%s10098_s24] sm:$0xff]  ;;  %5475 = vmatpush.msrb.mxu3 %v5437_v57  ;;  %v144_v57 = vld [vmem:[%s10090_s16 + $0x34] sm:$0xf] }
0x1fc3   :  { %5323 = vmatpush.msrb.mxu0 %v5286_v41  ;;  %v5434_v41 = vld [vmem:[%s10098_s24 + $0x90] sm:$0xff] }
0x1fc4   :  { %v5262_v13 = vmax.f32 %v5240_v48, 0.0  ;;  %v5436_v48 = vld [vmem:[%s10098_s24 + $0xa0] sm:$0xff] }
0x1fc5   :  { %5324 = vmatpush.msrb.mxu0 %v5285_v10  ;;  %5476 = vmatpush.msrb.mxu3 %v5436_v48  ;;  %v5433_v10 = vld [vmem:[%s10098_s24 + $0x88] sm:$0xff] }
0x1fc6   :  { %6176 = vmatmul.msk.f32.vlgmr.msra.gmra.mxu0 %vm10436_vm8, %v5219_v9  ;;  %5310 = vmatmul.f32.vlgmr.msra.gmra.mxu3 %v5262_v13  ;;  %v5427_v9 = vld [vmem:[%s10098_s24 + $0x58] sm:$0xff] }
0x1fc7   :  { %5325 = vmatpush.msrb.mxu0 %v5284_v59  ;;  %5449 = vmatpush.msrb.mxu1 %v5427_v9  ;;  %v5435_v13 = vld [vmem:[%s10098_s24 + $0x98] sm:$0xff]  ;;  %v5432_v59 = vld [vmem:[%s10098_s24 + $0x80] sm:$0xff]  ;;  %s6598_s24 = smov 16  }
0x1fc8   :  { %5477 = vmatpush.msrb.mxu3 %v5435_v13 }
0x1fc9   :  { %5326 = vmatpush.msrb.mxu0 %v5283_v50  ;;  %5450 = vmatpush.msrb.mxu1 %v5426_v5  ;;  %v5365_v50 = vperm.slane %v9801_v28, 2  ;;  %v142_v5 = vld [vmem:[%s10090_s16 + $0x2c] sm:$0xf] }
0x1fca   :  { %5478 = vmatpush.msrb.mxu3 %v5434_v41 }
0x1fcb   :  { %5327 = vmatpush.msrb.mxu0 %v5282_v15  ;;  %5451 = vmatpush.msrb.mxu1 %v5425_v43  ;;  %v5369_v15 = vperm.slane %v5365_v50, 2 }
0x1fcc   :  { %5479 = vmatpush.msrb.mxu3 %v5433_v10 }
0x1fcd   :  { %5328 = vmatpush.msrb.mxu0 %v5281_v16  ;;  %5452 = vmatpush.msrb.mxu1 %v5424_v55 }
0x1fce   :  { %5480 = vmatpush.msrb.mxu3 %v5432_v59 }
0x1fcf   :  { %5329 = vmatpush.msrb.mxu0 %v5280_v29  ;;  %5453 = vmatpush.msrb.mxu1 %v5423_v32 }
0x1fd1   :  { %5386 = vmatpush.msra.mxu0 %v5363_v2  ;;  %5454 = vmatpush.msrb.mxu1 %v5422_v54 }
0x1fd3   :  { %5387 = vmatpush.msra.mxu0 %v5361_v23  ;;  %5455 = vmatpush.msrb.mxu1 %v5421_v62 }
0x1fd5   :  { %5388 = vmatpush.msra.mxu0 %v5359_v30  ;;  %5456 = vmatpush.msrb.mxu1 %v5420_v6 }
0x1fd7   :  { %5389 = vmatpush.msra.mxu0 %v5357_v46  ;;  %5457 = vmatpush.msrb.mxu1 %v5419_v39 }
0x1fd9   :  { %5458 = vmatpush.msrb.mxu1 %v5418_v18 }
0x1fdb   :  { %5459 = vmatpush.msrb.mxu1 %v5417_v35  ;;  %v143_v35 = vld [vmem:[%s10090_s16 + $0x30] sm:$0xf] }
0x1fdd   :  { %5460 = vmatpush.msrb.mxu1 %v5416_v37 }
0x203b   :  { %v5201_v61 = vpop.f32.mrf.mxu0 }
0x203c   :  { %v5202_v58 = vadd.f32 %v5201_v61, %v5180_v7  ;;  %v5366_v7 = vperm.slane %v9801_v28, 6 }
0x203e   :  { %5205 = vst.msk [vmem:[#allocation2] sm:$0x3] %vm5204_vm3, %v5202_v58  ;;  %v5370_v58 = vperm.slane %v5366_v7, 2 }
0x203f   :  { %6014 = dma.vmem_to_hbm [thread:$0]  %s6010_s10, 32, %s6012_s3, [#allocation3]  }
0x2043   :  { %v5259_v14 = vpop.f32.mrf.mxu0 }
0x2044   :  { %v5260_v47 = vadd.f32 %v5259_v14, %v5215_v34 }
0x2046   :  { %v5263_v53 = vmax.f32 %v5260_v47, 0.0  ;;  %v5441_v47 = vperm.slane %v9801_v28, 3 }
0x2048   :  { %6177 = vmatmul.msk.f32.vlgmr.msrb.gmra.mxu0 %vm5290_vm2, %v5263_v53 }
0x2049   :  { %v5311_v38 = vpop.f32.mrf.mxu3  ;;  %5406 = vmatpush.msrb.mxu0 %v5364_v51 }
0x204a   :  { %v5312_v63 = vadd.f32 %v5311_v38, %v5289_v31 }
0x204b   :  { %5407 = vmatpush.msrb.mxu0 %v5362_v22 }
0x204d   :  { %5408 = vmatpush.msrb.mxu0 %v5360_v4 }
0x204f   :  { %5409 = vmatpush.msrb.mxu0 %v5358_v20 }
0x20c5   :  { %v5331_v56 = vpop.f32.mrf.mxu0 }
0x20c6   :  { %v5332_v27 = vadd.f32 %v5331_v56, %v5312_v63  ;;  %v139_v56 = vld [vmem:[%s10090_s16 + $0x20] sm:$0xf] }
0x20c8   :  { %v5336_v42 = vmul.f32 0.5, %v5332_v27 }
0x20ca   :  { %v5337_v0 = vmul.f32 1.442695, %v5336_v42 }
0x20cc   :  { %6552 = vpow2.f32 %v5337_v0 }
0x20d2   :  { %v6553_v19 = vpop.eup %6552 }
0x20d3   :  { %5341 = vrot.lane.b32.xlu0 %v6553_v19, %s6596_s8  ;;  %v5340_v33 = vrot.slane %v6553_v19, 4 }
0x20d5   :  { %5343 = vrot.lane.b32.xlu1 %v5340_v33, %s6596_s8 }
0x2145   :  { %v5342_v24 = vpop.permute.xlu0 %5341 }
0x2146   :  { %v5347_v11 = vmul.f32 %v5342_v24, %v5334_v44  ;;  %v141_v44 = vld [vmem:[%s10090_s16 + $0x28] sm:$0xf] }
0x2147   :  { %v5344_v52 = vpop.permute.xlu1 %5343 }
0x2148   :  { %5351 = vst [vmem:[#allocation1] ss:$2 sm:$0xff] %v5347_v11  ;;  %v5348_v49 = vmul.f32 %v5344_v52, %v5335_v8  ;;  %v9976_v8 = vld [vmem:[%s10087_s13] sm:$0xff] }
0x2149   :  { %v5641_v11 = vperm.slane %v9976_v8, 4  ;;  %v5716_v48 = vperm.slane %v9976_v8, 5 }
0x214a   :  { %5353 = vst [vmem:[#allocation1 + $0x1] ss:$2 sm:$0xff] %v5348_v49 }
0x2151   :  { %v5354_v12 = vld.sshfl [vmem:[#allocation1] sm:$0xff pattern:$0x75316420] }
0x2152   :  { %v5356_v3 = vadd.f32 %v5354_v12, %v5332_v27  ;;  %v140_v27 = vld [vmem:[%s10090_s16 + $0x24] sm:$0xf] }
0x2154   :  { %6178 = vmatmul.msk.f32.vlgmr.msra.gmra.mxu0 %vm3407_vm15, %v5356_v3 }
0x215c   :  { %6179 = vmatmul.msk.f32.vlgmr.msrb.gmra.mxu0 %vm3407_vm15, %v5356_v3  ;;  %vm10438_vm15 = vcmask 1043456  }
0x215d   :  { %6185 = vmatpush.msk.msra.mxu2 %vm10438_vm15, %v139_v56  ;;  %vm10439_vm10 = vmmov %vm10438_vm15  ;;  %v149_v56 = vld [vmem:[%s10089_s15 + $0x4] sm:$0xf] }
0x215e   :  { %6182 = vmatpush.msk.msra.mxu0 %vm10439_vm10, %v140_v27  ;;  %vm10446_vm7 = vmmov %vm10439_vm10 }
0x215f   :  { %vm10447_vm8 = vmmov %vm10446_vm7 }
0x2160   :  { %6191 = vmatpush.msk.msrb.mxu0 %vm10446_vm7, %v141_v44  ;;  %6188 = vmatpush.msk.msra.mxu3 %vm10447_vm8, %v142_v5  ;;  %vm10449_vm15 = vmmov %vm10444_vm0 }
0x21d1   :  { %v5391_v16 = vpop.f32.mrf.mxu0 }
0x21d2   :  { %v5392_v29 = vadd.f32 %v5391_v16, %v5369_v15 }
0x21d4   :  { %v5414_v61 = vmax.f32 %v5392_v29, 0.0 }
0x21d6   :  { %5461 = vmatmul.f32.vlgmr.msrb.gmra.mxu1 %v5414_v61 }
0x21d9   :  { %v5411_v17 = vpop.f32.mrf.mxu0 }
0x21da   :  { %v5412_v34 = vadd.f32 %v5411_v17, %v5370_v58 }
0x21dc   :  { %v5415_v14 = vmax.f32 %v5412_v34, 0.0 }
0x21de   :  { %6180 = vmatmul.msk.f32.vlgmr.msrb.gmra.mxu3 %vm5290_vm2, %v5415_v14  ;;  %vm10448_vm2 = vmmov %vm10442_vm5 }
0x21df   :  { %vm10450_vm10 = vmmov %vm10448_vm2 }
0x2253   :  { %v5462_v53 = vpop.f32.mrf.mxu1 }
0x2254   :  { %v5463_v31 = vadd.f32 %v5462_v53, %v5441_v47 }
0x2261   :  { %v5482_v38 = vpop.f32.mrf.mxu3 }
0x2262   :  { %v5483_v63 = vadd.f32 %v5482_v38, %v5463_v31  ;;  %v146_v38 = vld [vmem:[%s10090_s16 + $0x3c] sm:$0xf] }
0x2263   :  { %6200 = vmatpush.msk.msrb.mxu3 %vm10447_vm8, %v146_v38 }
0x2264   :  { %v6181_v42 = vmul.f32 -1.442695, %v5483_v63  ;;  %v145_v63 = vld [vmem:[%s10090_s16 + $0x38] sm:$0xf] }
0x2266   :  { %6554 = vpow2.f32 %v6181_v42  ;;  %v5795_v42 = vperm.slane %v9976_v8, 6 }
0x226c   :  { %v6555_v0 = vpop.eup %6554 }
0x226d   :  { %v5488_v28 = vadd.f32 1.0, %v6555_v0 }
0x226f   :  { %6556 = vrcp.f32 %v5488_v28  ;;  %v5500_v23 = vand.u32 2147483648, %v5488_v28  ;;  %v5498_v46 = vand.u32 2147483647, %v5488_v28  ;;  %vm5494_vm6 = vweird.f32 %v5488_v28 }
0x2271   :  { %v5501_v22 = vor.u32 1.1754944e-38, %v5500_v23  ;;  %vm5499_vm12 = vcmp.eq.f32.partialorder %v5498_v46, 8.507059e+37 }
0x2275   :  { %v6557_v19 = vpop.eup %6556 }
0x2276   :  { %v5490_v33 = vmul.f32 %v6557_v19, %v5488_v28  ;;  %vm5495_vm1 = vweird.f32 %v6557_v19 }
0x2277   :  { %vm5496_vm4 = vmor %vm5494_vm6, %vm5495_vm1 }
0x2278   :  { %v5491_v2 = vsub.f32 1.0, %v5490_v33  ;;  %vm10451_vm1 = vmmov %vm10448_vm2 }
0x2279   :  { %vm10452_vm6 = vmmov %vm10444_vm0 }
0x227a   :  { %v5492_v30 = vmul.f32 %v6557_v19, %v5491_v2 }
0x227c   :  { %v5493_v51 = vadd.f32 %v6557_v19, %v5492_v30 }
0x227e   :  { %v5497_v4 = vsel %vm5496_vm4, %v6557_v19, %v5493_v51  ;;  %vm10453_vm4 = vmmov %vm10451_vm1 }
0x227f   :  { %v5502_v20 = vsel %vm5499_vm12, %v5501_v22, %v5497_v4  ;;  %vm10454_vm12 = vmmov %vm10446_vm7 }
0x2280   :  { %5507 = vxpose.xlu0.b32.start.end [1/1] (short) (narrow) %v5502_v20, 8  ;;  %v5505_v40 = vrot.slane %v5502_v20, 4  ;;  %6197 = vmatpush.msk.msrb.mxu2 %vm10454_vm12, %v143_v35 }
0x2282   :  { %5539 = vxpose.xlu2.b32.start.end [1/1] (short) (narrow) %v5505_v40, 8 }
0x231b   :  { %v5555_v60 = vpop.trf.xlu2 }
0x231c   :  { %v5574_v26 = vrot.slane %v5555_v60, 7 }
0x231e   :  { %v5578_v9 = vsel %vm10444_vm0, 0.0, %v5574_v26  ;;  %vm10459_vm0 = vmmov %vm10451_vm1 }
0x2324   :  { %v5523_v45 = vpop.trf.xlu0 }
0x2325   :  { %v5573_v1 = vrot.slane %v5523_v45, 7  ;;  %6183 = vmatmul.msk.f32.vlgmr.msra.gmra.mxu0 %vm10440_vm14, %v5523_v45  ;;  %vm10455_vm14 = vmmov %vm10446_vm7 }
0x2326   :  { %6194 = vmatpush.msk.msra.mxu1 %vm10455_vm14, %v144_v57  ;;  %vm10461_vm7 = vmmov %vm10459_vm0 }
0x2327   :  { %v5577_v21 = vsel %vm10441_vm13, 0.0, %v5573_v1  ;;  %vm10456_vm13 = vmmov %vm10451_vm1 }
0x2328   :  { %6186 = vmatmul.msk.f32.vlgmr.msra.gmra.mxu2 %vm10442_vm5, %v5577_v21  ;;  %vm10457_vm5 = vcmask 1041408   ;;  %vm10469_vm14 = vmmov %vm10459_vm0 }
0x232d   :  { %6184 = vmatmul.msk.f32.gmra.mxu0 %vm10443_vm9, %v5555_v60  ;;  %vm10458_vm9 = vmmov %vm10451_vm1 }
0x2330   :  { %6187 = vmatmul.msk.f32.gmra.mxu2 %vm10445_vm11, %v5578_v9  ;;  %vm10460_vm11 = vmmov %vm10457_vm5 }
0x23a2   :  { %v5603_v24 = vpop.f32.mrf.mxu0 }
0x23aa   :  { %v5606_v54 = vpop.f32.mrf.mxu0 }
0x23ab   :  { %v5635_v43 = vpop.f32.mrf.mxu2 }
0x23ac   :  { %v5636_v52 = vadd.f32 %v5635_v43, %v5603_v24 }
0x23ae   :  { %v5642_v49 = vadd.f32 %v5641_v11, %v5636_v52 }
0x23b0   :  { %v5644_v55 = vmax.f32 %v5642_v49, 0.0 }
0x23b2   :  { %v5648_v32 = vrot.slane %v5644_v55, 7  ;;  %6189 = vmatmul.msk.f32.vlgmr.msra.gmra.mxu3 %vm10448_vm2, %v5644_v55  ;;  %vm10462_vm2 = vmmov %vm10447_vm8 }
0x23b3   :  { %v5638_v62 = vpop.f32.mrf.mxu2  ;;  %6203 = vmatpush.msk.msra.mxu0 %vm10462_vm2, %v145_v63 }
0x23b4   :  { %v5652_v6 = vsel %vm10449_vm15, 0.0, %v5648_v32  ;;  %v5639_v12 = vadd.f32 %v5638_v62, %v5606_v54  ;;  %vm10463_vm15 = vmmov %vm10462_vm2 }
0x23b5   :  { %6192 = vmatmul.msk.f32.vlgmr.msrb.gmra.mxu0 %vm10450_vm10, %v5652_v6  ;;  %6206 = vmatpush.msk.msrb.mxu1 %vm10463_vm15, %v149_v56  ;;  %vm10464_vm10 = vmmov %vm10459_vm0  ;;  %vm10476_vm15 = vcmask 1042434  }
0x23b6   :  { %v5643_v3 = vadd.f32 %v5641_v11, %v5639_v12 }
0x23b8   :  { %v5645_v39 = vmax.f32 %v5643_v3, 0.0 }
0x23ba   :  { %v5649_v18 = vrot.slane %v5645_v39, 7  ;;  %6190 = vmatmul.msk.f32.gmra.mxu3 %vm10451_vm1, %v5645_v39  ;;  %vm10465_vm1 = vmmov %vm10457_vm5 }
0x23bb   :  { %vm10468_vm12 = vmmov %vm10465_vm1 }
0x23bc   :  { %v5653_v36 = vsel %vm10452_vm6, 0.0, %v5649_v18  ;;  %vm10466_vm6 = vmmov %vm10459_vm0  ;;  %v5913_v18 = vperm.slane %v9795_v25, 2 }
0x23bd   :  { %6193 = vmatmul.msk.f32.gmra.mxu0 %vm10453_vm4, %v5653_v36  ;;  %vm10467_vm4 = vmmov %vm10459_vm0 }
0x2432   :  { %v5710_v37 = vpop.f32.mrf.mxu0 }
0x2435   :  { %v5678_v13 = vpop.f32.mrf.mxu3 }
0x2436   :  { %v5711_v41 = vadd.f32 %v5710_v37, %v5678_v13 }
0x2438   :  { %v5717_v10 = vadd.f32 %v5716_v48, %v5711_v41 }
0x243a   :  { %v5719_v59 = vmax.f32 %v5717_v10, 0.0  ;;  %v5713_v15 = vpop.f32.mrf.mxu0 }
0x243c   :  { %v5721_v50 = vadd.f32 %v5719_v59, %v5523_v45  ;;  %v5912_v45 = vld [vmem:[%s10470_s21] sm:$0xf] }
0x243d   :  { %v5681_v16 = vpop.f32.mrf.mxu3 }
0x243e   :  { %v5723_v29 = vmax.f32 %v5721_v50, 0.0  ;;  %v5714_v7 = vadd.f32 %v5713_v15, %v5681_v16 }
0x2440   :  { %v5727_v61 = vrot.slane %v5723_v29, 6  ;;  %v5718_v58 = vadd.f32 %v5716_v48, %v5714_v7  ;;  %6195 = vmatmul.msk.f32.vlgmr.msra.gmra.mxu1 %vm10456_vm13, %v5723_v29  ;;  %vm10471_vm13 = vmmov %vm10462_vm2  ;;  %vm10475_vm2 = vcmask 1044484  }
0x2441   :  { %6209 = vmatpush.msk.msra.mxu2 %vm10471_vm13, %v5912_v45  ;;  %vm5974_vm13 = vcmask 520579  }
0x2442   :  { %v5720_v17 = vmax.f32 %v5718_v58, 0.0  ;;  %v5731_v34 = vsel %vm10457_vm5, 0.0, %v5727_v61  ;;  %vm10472_vm5 = vmmov %vm10459_vm0 }
0x2443   :  { %6198 = vmatmul.msk.f32.vlgmr.msrb.gmra.mxu2 %vm10458_vm9, %v5731_v34  ;;  %vm10473_vm9 = vmmov %vm10459_vm0 }
0x2444   :  { %v5722_v14 = vadd.f32 %v5720_v17, %v5555_v60  ;;  %v5870_v60 = vperm.slane %v9976_v8, 7  ;;  %v6564_v8 = vld [vmem:[%s10088_s14] sm:$0x3]  ;;  %s6597_s14 = smov 48  }
0x2445   :  { %v5879_v62 = vperm.slane %v6564_v8, 1 }
0x2446   :  { %v5724_v47 = vmax.f32 %v5722_v14, 0.0 }
0x2448   :  { %6196 = vmatmul.msk.f32.gmra.mxu1 %vm10459_vm0, %v5724_v47  ;;  %v5728_v53 = vrot.slane %v5724_v47, 6 }
0x244a   :  { %v5732_v31 = vsel %vm10460_vm11, 0.0, %v5728_v53  ;;  %vm10474_vm11 = vmmov %vm10459_vm0 }
0x244b   :  { %6199 = vmatmul.msk.f32.gmra.mxu2 %vm10461_vm7, %v5732_v31 }
0x24bd   :  { %v5757_v27 = vpop.f32.mrf.mxu1 }
0x24c5   :  { %v5760_v23 = vpop.f32.mrf.mxu1 }
0x24c6   :  { %v5789_v0 = vpop.f32.mrf.mxu2 }
0x24c7   :  { %v5790_v28 = vadd.f32 %v5789_v0, %v5757_v27 }
0x24c9   :  { %v5796_v19 = vadd.f32 %v5795_v42, %v5790_v28 }
0x24cb   :  { %v5798_v33 = vmax.f32 %v5796_v19, 0.0 }
0x24cd   :  { %v5802_v2 = vrot.slane %v5798_v33, 6  ;;  %6201 = vmatmul.msk.f32.vlgmr.msrb.gmra.mxu3 %vm10464_vm10, %v5798_v33  ;;  %vm10477_vm10 = vcmask 1043459  }
0x24ce   :  { %v5792_v30 = vpop.f32.mrf.mxu2 }
0x24cf   :  { %v5806_v46 = vsel %vm10465_vm1, 0.0, %v5802_v2  ;;  %v5793_v51 = vadd.f32 %v5792_v30, %v5760_v23  ;;  %vm10478_vm1 = vcmask 1045509  }
0x24d0   :  { %6204 = vmatmul.msk.f32.vlgmr.msra.gmra.mxu0 %vm10466_vm6, %v5806_v46  ;;  %vm10479_vm6 = vcmask 1046534  }
0x24d1   :  { %v5797_v22 = vadd.f32 %v5795_v42, %v5793_v51 }
0x24d3   :  { %v5799_v4 = vmax.f32 %v5797_v22, 0.0 }
0x24d5   :  { %v5803_v20 = vrot.slane %v5799_v4, 6  ;;  %6202 = vmatmul.msk.f32.gmra.mxu3 %vm10467_vm4, %v5799_v4  ;;  %vm10480_vm4 = vcmask 1041409  }
0x24d7   :  { %v5807_v40 = vsel %vm10468_vm12, 0.0, %v5803_v20  ;;  %vm10481_vm12 = vcmask 1047559  }
0x24d8   :  { %6205 = vmatmul.msk.f32.gmra.mxu0 %vm10469_vm14, %v5807_v40  ;;  %vm5962_vm14 = vcmask 256129  }
0x254d   :  { %v5864_v1 = vpop.f32.mrf.mxu0 }
0x2550   :  { %v5832_v21 = vpop.f32.mrf.mxu3 }
0x2551   :  { %v5865_v26 = vadd.f32 %v5864_v1, %v5832_v21 }
0x2553   :  { %v5871_v9 = vadd.f32 %v5870_v60, %v5865_v26 }
0x2555   :  { %v5873_v44 = vmax.f32 %v5871_v9, 0.0  ;;  %v5867_v24 = vpop.f32.mrf.mxu0 }
0x2557   :  { %v5875_v5 = vadd.f32 %v5873_v44, %v5723_v29 }
0x2558   :  { %v5835_v11 = vpop.f32.mrf.mxu3 }
0x2559   :  { %v5877_v43 = vmax.f32 %v5875_v5, 0.0  ;;  %v5868_v52 = vadd.f32 %v5867_v24, %v5835_v11 }
0x255b   :  { %v5872_v49 = vadd.f32 %v5870_v60, %v5868_v52  ;;  %6207 = vmatmul.msk.f32.vlgmr.msrb.gmra.mxu1 %vm10472_vm5, %v5877_v43  ;;  %vm5980_vm5 = vcmask 652804  }
0x255d   :  { %v5874_v55 = vmax.f32 %v5872_v49, 0.0 }
0x255f   :  { %v5876_v32 = vadd.f32 %v5874_v55, %v5724_v47 }
0x2561   :  { %v5878_v54 = vmax.f32 %v5876_v32, 0.0 }
0x2563   :  { %6208 = vmatmul.msk.f32.gmra.mxu1 %vm10473_vm9, %v5878_v54  ;;  %vm5986_vm9 = vcmask 785029  }
0x25d8   :  { %v5906_v6 = vpop.f32.mrf.mxu1 }
0x25d9   :  { %v5907_v12 = vadd.f32 %v5906_v6, %v5879_v62 }
0x25db   :  { %6210 = vmatmul.msk.f32.vlgmr.msra.gmra.mxu2 %vm10459_vm0, %v5907_v12  ;;  %vm5992_vm0 = vcmask 917254  }
0x25e0   :  { %v5909_v3 = vpop.f32.mrf.mxu1 }
0x25e1   :  { %v5910_v39 = vadd.f32 %v5909_v3, %v5879_v62 }
0x25e3   :  { %6211 = vmatmul.msk.f32.gmra.mxu2 %vm10474_vm11, %v5910_v39  ;;  %vm6000_vm11 = vcmask 1048455  }
0x265e   :  { %v5940_v36 = vpop.f32.mrf.mxu2 }
0x265f   :  { %v5941_v35 = vadd.f32 %v5940_v36, %v5913_v18 }
0x2661   :  { %vm5946_vm7 = vcmp.gt.f32.partialorder %v5941_v35, 0.0  ;;  %v5948_v57 = vmul.f32 0.01, %v5941_v35 }
0x2663   :  { %v5950_v37 = vsel %vm5946_vm7, %v5941_v35, %v5948_v57  ;;  %vm6002_vm7 = vcmask 1041280  }
0x2664   :  { %5994 = vrot.lane.b32.xlu2 %v5950_v37, %s6591_s29 }
0x2666   :  { %v5943_v48 = vpop.f32.mrf.mxu2 }
0x2667   :  { %v5944_v13 = vadd.f32 %v5943_v48, %v5913_v18 }
0x2669   :  { %vm5947_vm8 = vcmp.gt.f32.partialorder %v5944_v13, 0.0  ;;  %v5949_v41 = vmul.f32 0.01, %v5944_v13 }
0x266b   :  { %v5951_v10 = vsel %vm5947_vm8, %v5944_v13, %v5949_v41 }
0x266c   :  { %v5954_v59 = vrot.slane %v5951_v10, 7 }
0x266e   :  { %v5970_v50 = vsel %vm10475_vm2, %v5954_v59, %v5950_v37  ;;  %v5958_v15 = vsel %vm10476_vm15, %v5954_v59, %v5950_v37  ;;  %v5964_v25 = vsel %vm10477_vm10, %v5954_v59, %v5950_v37  ;;  %v5976_v16 = vsel %vm10478_vm1, %v5954_v59, %v5950_v37 }
0x266f   :  { %5971 = vrot.lane.b32.xlu0 %v5970_v50, %s6597_s14  ;;  %5959 = vrot.lane.b32.xlu1 %v5958_v15, %s6598_s24  ;;  %v5982_v29 = vsel %vm10479_vm6, %v5954_v59, %v5950_v37  ;;  %v5955_v7 = vsel %vm10480_vm4, %v5954_v59, %v5950_v37  ;;  %v5988_v61 = vsel %vm10481_vm12, %v5954_v59, %v5950_v37 }
0x2670   :  { %5957 = vst.msk [vmem:[%s10102_s28] sm:$0x3] %vm5204_vm3, %v5955_v7  ;;  %vm5968_vm3 = vcmask 388354  }
0x2677   :  { %5965 = vrot.lane.b32.xlu1 %v5964_v25, %s6599_s18 }
0x267f   :  { %5977 = vrot.lane.b32.xlu1 %v5976_v16, %s6595_s20 }
0x2687   :  { %5983 = vrot.lane.b32.xlu1 %v5982_v29, %s6600_s1 }
0x268f   :  { %5989 = vrot.lane.b32.xlu1 %v5988_v61, %s6596_s8 }
0x2697   :  { %5996 = vrot.lane.b32.xlu1 %v5954_v59, %s6591_s29 }
0x26be   :  { %v5995_v31 = vpop.permute.xlu2 %5994 }
0x26e1   :  { %v5960_v58 = vpop.permute.xlu1 %5959  ;;  %v5972_v34 = vpop.permute.xlu0 %5971 }
0x26e2   :  { %5963 = vst.msk [vmem:[%s10102_s28 - $0x1] sm:$0x6] %vm5962_vm14, %v5960_v58 }
0x26e9   :  { %v5966_v17 = vpop.permute.xlu1 %5965 }
0x26ea   :  { %5969 = vst.msk [vmem:[%s10102_s28 - $0x2] sm:$0xc] %vm5968_vm3, %v5966_v17 }
0x26eb   :  { %5975 = vst.msk [vmem:[%s10102_s28 - $0x3] sm:$0x18] %vm5974_vm13, %v5972_v34 }
0x26f1   :  { %v5978_v14 = vpop.permute.xlu1 %5977 }
0x26f2   :  { %5981 = vst.msk [vmem:[%s10102_s28 - $0x4] sm:$0x30] %vm5980_vm5, %v5978_v14 }
0x26f9   :  { %v5984_v47 = vpop.permute.xlu1 %5983 }
0x26fa   :  { %5987 = vst.msk [vmem:[%s10102_s28 - $0x5] sm:$0x60] %vm5986_vm9, %v5984_v47 }
0x2701   :  { %v5990_v53 = vpop.permute.xlu1 %5989 }
0x2702   :  { %5993 = vst.msk [vmem:[%s10102_s28 - $0x6] sm:$0xc0] %vm5992_vm0, %v5990_v53 }
0x2703   :  { %6001 = vst.msk [vmem:[%s10102_s28 - $0x7] sm:$0x80] %vm6000_vm11, %v5995_v31 }
0x2709   :  { %v5997_v38 = vpop.permute.xlu1 %5996 }
0x270a   :  { %6003 = vst.msk [vmem:[%s10102_s28 + $0x1] sm:$0x1] %vm6002_vm7, %v5997_v38 }
0x270b   :  { %6589 = dma.done.wait [#allocation3], 32  }
0x270c   :  { %6590 = vsyncadd [#allocation3], 4294967264 }
0x270d   :  { %6023 = vsyncpa [#allocation3], 1 }

</bundles_post_ra>
